<compile_context>
chip_gen: v6e
topology: v6e:2x2x1
jax: 0.10.0
libtpu: 0.0.40
codegen_flags: <defaults>
</compile_context>

<pallas_src>
import functools

import jax
import jax.numpy as jnp
from jax.experimental import pallas as pl
from jax.experimental.pallas import tpu as pltpu

N_ACTIONS = 9  # gym 'EnduroDeterministic-v4' action space size


# ----------------------------------------------------------------------------
# Tiling helper
# ----------------------------------------------------------------------------
def _pick_tile_m(M, cap=512):
    """Largest multiple-of-8 tile <= cap that divides M (full M if it is small).

    Falls back to `cap` (Pallas masks the ragged edge block) if no aligned
    divisor exists.
    """
    if M <= cap:
        return M
    t = (cap // 8) * 8
    while t >= 8:
        if M % t == 0:
            return t
        t -= 8
    return cap


# ----------------------------------------------------------------------------
# Pallas kernels
# ----------------------------------------------------------------------------
def _matmul_bias_act_kernel(x_ref, w_ref, b_ref, o_ref, *, relu):
    acc = jnp.dot(x_ref[...], w_ref[...], preferred_element_type=jnp.float32)
    acc = acc + b_ref[...]                      # b is (1, N), broadcasts over M
    if relu:
        acc = jnp.maximum(acc, 0.0)
    o_ref[...] = acc.astype(o_ref.dtype)


def matmul_bias_act(x, w, b, *, relu, out_dtype=jnp.float32, tile_cap=512):
    """out = [relu](x @ w + b), tiled over M; weights/bias stay VMEM-resident."""
    M, K = x.shape
    N = w.shape[1]
    tm = _pick_tile_m(M, tile_cap)
    grid = (pl.cdiv(M, tm),)
    return pl.pallas_call(
        functools.partial(_matmul_bias_act_kernel, relu=relu),
        out_shape=jax.ShapeDtypeStruct((M, N), out_dtype),
        grid=grid,
        in_specs=[
            pl.BlockSpec((tm, K), lambda i: (i, 0)),
            pl.BlockSpec((K, N), lambda i: (0, 0)),   # resident weight block
            pl.BlockSpec((1, N), lambda i: (0, 0)),   # resident bias block
        ],
        out_specs=pl.BlockSpec((tm, N), lambda i: (i, 0)),
        compiler_params=pltpu.CompilerParams(
            dimension_semantics=("parallel",),
        ),
    )(x, w, b.reshape(1, N))


def _fused_fc_dueling_kernel(x_ref, w4_ref, b4_ref, w5a_ref, b5a_ref,
                             w5v_ref, b5v_ref, o_ref):
    # Hidden layer: single 3136 x 1024 matmul = [lin4_adv | lin4_val] fused.
    h = jnp.dot(x_ref[...], w4_ref[...], preferred_element_type=jnp.float32)
    h = jnp.maximum(h + b4_ref[...], 0.0)           # f32 epilogue
    h = h.astype(w5a_ref.dtype)                     # bf16 for the MXU
    n_h = w5a_ref.shape[0]                          # 512 (split at lane-aligned 512)
    adv = jnp.dot(h[:, :n_h], w5a_ref[...],
                  preferred_element_type=jnp.float32) + b5a_ref[...]
    val = jnp.dot(h[:, n_h:], w5v_ref[...],
                  preferred_element_type=jnp.float32) + b5v_ref[...]
    # val.expand_as(adv) + adv - adv.mean(1).unsqueeze(1).expand_as(adv)
    o_ref[...] = (val + adv - jnp.mean(adv, axis=1, keepdims=True)).astype(o_ref.dtype)


def fused_fc_dueling(x, w4, b4, w5a, b5a, w5v, b5v):
    """Both 3136->512 linears + both heads + dueling combine in ONE pallas_call."""
    B, K = x.shape
    H2 = w4.shape[1]            # 1024 (= 512 adv || 512 val)
    A = w5a.shape[1]            # N_ACTIONS
    tb = _pick_tile_m(B, 256)
    grid = (pl.cdiv(B, tb),)
    return pl.pallas_call(
        _fused_fc_dueling_kernel,
        out_shape=jax.ShapeDtypeStruct((B, A), jnp.float32),
        grid=grid,
        in_specs=[
            pl.BlockSpec((tb, K), lambda i: (i, 0)),
            pl.BlockSpec((K, H2), lambda i: (0, 0)),      # resident 6.4 MB bf16
            pl.BlockSpec((1, H2), lambda i: (0, 0)),
            pl.BlockSpec((H2 // 2, A), lambda i: (0, 0)),
            pl.BlockSpec((1, A), lambda i: (0, 0)),
            pl.BlockSpec((H2 // 2, 1), lambda i: (0, 0)),
            pl.BlockSpec((1, 1), lambda i: (0, 0)),
        ],
        out_specs=pl.BlockSpec((tb, A), lambda i: (i, 0)),
        compiler_params=pltpu.CompilerParams(
            dimension_semantics=("parallel",),
            vmem_limit_bytes=48 * 1024 * 1024,   # headroom even on v7x (64 MiB VMEM)
        ),
    )(x, w4, b4.reshape(1, H2), w5a, b5a.reshape(1, A), w5v, b5v.reshape(1, 1))


# ----------------------------------------------------------------------------
# Conv glue: im2col in plain JAX, matmul hot-path in Pallas
# ----------------------------------------------------------------------------
def _im2col(x_nhwc, k, stride):
    B, H, W, C = x_nhwc.shape
    Ho = (H - k) // stride + 1
    Wo = (W - k) // stride + 1
    cols = []
    for i in range(k):
        for j in range(k):
            cols.append(x_nhwc[:, i:i + stride * Ho:stride,
                                  j:j + stride * Wo:stride, :])
    p = jnp.stack(cols, axis=3)              # [B, Ho, Wo, k*k, C] (kh, kw, Cin)
    return p.reshape(B * Ho * Wo, k * k * C), Ho, Wo


def conv2d_relu(x_nhwc, w_mat, b, *, k, stride):
    """w_mat is the pre-transposed [(kh,kw,Cin), Cout] bf16 matmul weight."""
    B = x_nhwc.shape[0]
    cols, Ho, Wo = _im2col(x_nhwc, k, stride)
    out = matmul_bias_act(cols, w_mat, b, relu=True, out_dtype=jnp.bfloat16)
    return out.reshape(B, Ho, Wo, -1)


# ----------------------------------------------------------------------------
# Parameter init (deterministic, mimics torch xavier_uniform_ / default inits)
# ----------------------------------------------------------------------------
def _xavier_conv(key, cout, cin, k):
    fan_in, fan_out = cin * k * k, cout * k * k
    limit = (6.0 / (fan_in + fan_out)) ** 0.5
    return jax.random.uniform(key, (cout, cin, k, k), jnp.float32, -limit, limit)


def _uniform_bias(key, n, fan_in):
    bound = 1.0 / (fan_in ** 0.5)
    return jax.random.uniform(key, (n,), jnp.float32, -bound, bound)


def _linear(key, fan_in, fan_out):
    bound = 1.0 / (fan_in ** 0.5)
    kw, kb = jax.random.split(key)
    w = jax.random.uniform(kw, (fan_in, fan_out), jnp.float32, -bound, bound)
    b = jax.random.uniform(kb, (fan_out,), jnp.float32, -bound, bound)
    return w, b


def init_params(key):
    """Torch-layout parameters (conv OIHW, linear [in, out], NCHW flatten order)."""
    ks = jax.random.split(key, 10)
    p = {}
    p["w1"] = _xavier_conv(ks[0], 32, 4, 8)
    p["b1"] = _uniform_bias(ks[1], 32, 4 * 8 * 8)
    p["w2"] = _xavier_conv(ks[2], 64, 32, 4)
    p["b2"] = _uniform_bias(ks[3], 64, 32 * 4 * 4)
    p["w3"] = _xavier_conv(ks[4], 64, 64, 3)
    p["b3"] = _uniform_bias(ks[5], 64, 64 * 3 * 3)
    p["w4a"], p["b4a"] = _linear(ks[6], 3136, 512)
    p["w5a"], p["b5a"] = _linear(ks[7], 512, N_ACTIONS)
    p["w4v"], p["b4v"] = _linear(ks[8], 3136, 512)
    p["w5v"], p["b5v"] = _linear(ks[9], 512, 1)
    return p


def prepare_params(p):
    """One-time weight repacking: torch layout -> kernel layout (bf16 operands)."""
    def conv_mat(w):  # (Cout, Cin, kh, kw) -> [(kh, kw, Cin), Cout]
        cout, cin, kh, kw = w.shape
        return (jnp.transpose(w, (2, 3, 1, 0))
                .reshape(kh * kw * cin, cout).astype(jnp.bfloat16))

    def nhwc_rows(w):
        # Linear rows are indexed by the torch NCHW flatten (c*49 + h*7 + w).
        # Permute them to the NHWC flatten ((h*7 + w)*64 + c) so the transpose
        # before x.view(B, -1) disappears from the runtime forward pass.
        n = w.shape[1]
        return jnp.transpose(w.reshape(64, 7, 7, n), (1, 2, 0, 3)).reshape(3136, n)

    w4 = jnp.concatenate([nhwc_rows(p["w4a"]), nhwc_rows(p["w4v"])],
                         axis=1).astype(jnp.bfloat16)           # (3136, 1024)
    b4 = jnp.concatenate([p["b4a"], p["b4v"]])                  # (1024,) f32
    return {
        "w1m": conv_mat(p["w1"]), "b1": p["b1"],
        "w2m": conv_mat(p["w2"]), "b2": p["b2"],
        "w3m": conv_mat(p["w3"]), "b3": p["b3"],
        "w4": w4, "b4": b4,
        "w5a": p["w5a"].astype(jnp.bfloat16), "b5a": p["b5a"],
        "w5v": p["w5v"].astype(jnp.bfloat16), "b5v": p["b5v"],
    }


# ----------------------------------------------------------------------------
# Forward pass (matches Cov_net.forward; .cuda() is a no-op here)
# ----------------------------------------------------------------------------
def cov_net_forward(prep, x_nchw):
    x = jnp.transpose(x_nchw, (0, 2, 3, 1)).astype(jnp.bfloat16)   # NCHW -> NHWC
    x = conv2d_relu(x, prep["w1m"], prep["b1"], k=8, stride=4)     # [B,20,20,32]
    x = conv2d_relu(x, prep["w2m"], prep["b2"], k=4, stride=2)     # [B, 9, 9,64]
    x = conv2d_relu(x, prep["w3m"], prep["b3"], k=3, stride=1)     # [B, 7, 7,64]
    B = x.shape[0]
    x = x.reshape(B, 3136)     # NHWC flatten; w4 rows were pre-permuted to match
    return fused_fc_dueling(x, prep["w4"], prep["b4"],
                            prep["w5a"], prep["b5a"],
                            prep["w5v"], prep["b5v"])


if __name__ == "__main__":
    key = jax.random.PRNGKey(0)
    k_params, k_x = jax.random.split(key)
    params = init_params(k_params)
    prep = prepare_params(params)           # one-time weight repack (not per step)
    # Atari-style stacked-frame input; 84x84 is required by the 3136 flatten.
    x = jax.random.uniform(k_x, (2, 4, 84, 84), jnp.float32)
    q = jax.jit(cov_net_forward)(prep, x)
    q = jax.block_until_ready(q)
    assert q.shape == (2, N_ACTIONS) and q.dtype == jnp.float32
    print("KERNEL_OK")
</pallas_src>

<mosaic_0001>
module attributes {stable_mosaic.version = 11 : i64} {
  func.func @_matmul_bias_act_kernel(%arg0: i32, %arg1: memref<400x256xbf16, #tpu.memory_space<vmem>>, %arg2: memref<256x32xbf16, #tpu.memory_space<vmem>>, %arg3: memref<1x32xf32, #tpu.memory_space<vmem>>, %arg4: memref<400x32xbf16, #tpu.memory_space<vmem>>) attributes {dimension_semantics = [#tpu.dimension_semantics<parallel>], iteration_bounds = array<i64: 2>, scalar_prefetch = 0 : i64, scratch_operands = 0 : i64, tpu.core_type = #tpu.core_type<tc>, window_params = [{transform_indices = @transform_0, window_bounds = array<i64: 400, 256>}, {pipeline_mode = #tpu.pipeline_mode<synchronous>, transform_indices = @transform_1, window_bounds = array<i64: 256, 32>}, {pipeline_mode = #tpu.pipeline_mode<synchronous>, transform_indices = @transform_2, window_bounds = array<i64: 1, 32>}, {transform_indices = @transform_3, window_bounds = array<i64: 400, 32>}]} {
    %c0 = arith.constant 0 : index
    %c0_0 = arith.constant 0 : index
    %0 = vector.load %arg1[%c0, %c0_0] : memref<400x256xbf16, #tpu.memory_space<vmem>>, vector<400x256xbf16>
    %c0_1 = arith.constant 0 : index
    %c0_2 = arith.constant 0 : index
    %1 = vector.load %arg2[%c0_1, %c0_2] : memref<256x32xbf16, #tpu.memory_space<vmem>>, vector<256x32xbf16>
    %cst = arith.constant dense<0.000000e+00> : vector<400x32xf32>
    %2 = tpu.matmul %0, %1, %cst {dimension_numbers = #tpu.dot_dimension_numbers<[1], [0], [0], [1], [0, 0, 1, 1], [], []>} : vector<400x256xbf16>, vector<256x32xbf16>, vector<400x32xf32> -> vector<400x32xf32>
    %c0_3 = arith.constant 0 : index
    %c0_4 = arith.constant 0 : index
    %3 = vector.load %arg3[%c0_3, %c0_4] : memref<1x32xf32, #tpu.memory_space<vmem>>, vector<1x32xf32>
    %4 = vector.broadcast %3 : vector<1x32xf32> to vector<400x32xf32>
    %5 = arith.addf %2, %4 : vector<400x32xf32>
    %cst_5 = arith.constant 0.000000e+00 : f32
    %6 = vector.broadcast %cst_5 : f32 to vector<400x32xf32>
    %7 = arith.maximumf %5, %6 : vector<400x32xf32>
    %8 = arith.truncf %7 : vector<400x32xf32> to vector<400x32xbf16>
    %c0_6 = arith.constant 0 : index
    %c0_7 = arith.constant 0 : index
    %9 = vector.load %arg4[%c0_6, %c0_7] : memref<400x32xbf16, #tpu.memory_space<vmem>>, vector<400x32xbf16>
    tpu.vector_store %arg4[%c0_6, %c0_7], %8 {strides = array<i32>} : memref<400x32xbf16, #tpu.memory_space<vmem>>, vector<400x32xbf16>,
    return
  }
  func.func @transform_0(%arg0: i32) -> (i32, i32) {
    %c0_i32 = arith.constant 0 : i32
    %c0_i32_0 = arith.constant 0 : i32
    return %arg0, %c0_i32 : i32, i32
  }
  func.func @transform_1(%arg0: i32) -> (i32, i32) {
    %c0_i32 = arith.constant 0 : i32
    %c0_i32_0 = arith.constant 0 : i32
    %c0_i32_1 = arith.constant 0 : i32
    return %c0_i32, %c0_i32_0 : i32, i32
  }
  func.func @transform_2(%arg0: i32) -> (i32, i32) {
    %c0_i32 = arith.constant 0 : i32
    %c0_i32_0 = arith.constant 0 : i32
    %c0_i32_1 = arith.constant 0 : i32
    return %c0_i32, %c0_i32_0 : i32, i32
  }
  func.func @transform_3(%arg0: i32) -> (i32, i32) {
    %c0_i32 = arith.constant 0 : i32
    %c0_i32_0 = arith.constant 0 : i32
    return %arg0, %c0_i32 : i32, i32
  }
}

module attributes {stable_mosaic.version = 11 : i64} {
  func.func @_matmul_bias_act_kernel(%arg0: i32, %arg1: memref<162x512xbf16, #tpu.memory_space<vmem>>, %arg2: memref<512x64xbf16, #tpu.memory_space<vmem>>, %arg3: memref<1x64xf32, #tpu.memory_space<vmem>>, %arg4: memref<162x64xbf16, #tpu.memory_space<vmem>>) attributes {dimension_semantics = [#tpu.dimension_semantics<parallel>], iteration_bounds = array<i64: 1>, scalar_prefetch = 0 : i64, scratch_operands = 0 : i64, tpu.core_type = #tpu.core_type<tc>, window_params = [{transform_indices = @transform_0, window_bounds = array<i64: 162, 512>}, {pipeline_mode = #tpu.pipeline_mode<synchronous>, transform_indices = @transform_1, window_bounds = array<i64: 512, 64>}, {pipeline_mode = #tpu.pipeline_mode<synchronous>, transform_indices = @transform_2, window_bounds = array<i64: 1, 64>}, {transform_indices = @transform_3, window_bounds = array<i64: 162, 64>}]} {
    %c0 = arith.constant 0 : index
    %c0_0 = arith.constant 0 : index
    %0 = vector.load %arg1[%c0, %c0_0] : memref<162x512xbf16, #tpu.memory_space<vmem>>, vector<162x512xbf16>
    %c0_1 = arith.constant 0 : index
    %c0_2 = arith.constant 0 : index
    %1 = vector.load %arg2[%c0_1, %c0_2] : memref<512x64xbf16, #tpu.memory_space<vmem>>, vector<512x64xbf16>
    %cst = arith.constant dense<0.000000e+00> : vector<162x64xf32>
    %2 = tpu.matmul %0, %1, %cst {dimension_numbers = #tpu.dot_dimension_numbers<[1], [0], [0], [1], [0, 0, 1, 1], [], []>} : vector<162x512xbf16>, vector<512x64xbf16>, vector<162x64xf32> -> vector<162x64xf32>
    %c0_3 = arith.constant 0 : index
    %c0_4 = arith.constant 0 : index
    %3 = vector.load %arg3[%c0_3, %c0_4] : memref<1x64xf32, #tpu.memory_space<vmem>>, vector<1x64xf32>
    %4 = vector.broadcast %3 : vector<1x64xf32> to vector<162x64xf32>
    %5 = arith.addf %2, %4 : vector<162x64xf32>
    %cst_5 = arith.constant 0.000000e+00 : f32
    %6 = vector.broadcast %cst_5 : f32 to vector<162x64xf32>
    %7 = arith.maximumf %5, %6 : vector<162x64xf32>
    %8 = arith.truncf %7 : vector<162x64xf32> to vector<162x64xbf16>
    %c0_6 = arith.constant 0 : index
    %c0_7 = arith.constant 0 : index
    %9 = vector.load %arg4[%c0_6, %c0_7] : memref<162x64xbf16, #tpu.memory_space<vmem>>, vector<162x64xbf16>
    tpu.vector_store %arg4[%c0_6, %c0_7], %8 {strides = array<i32>} : memref<162x64xbf16, #tpu.memory_space<vmem>>, vector<162x64xbf16>,
    return
  }
  func.func @transform_0(%arg0: i32) -> (i32, i32) {
    %c0_i32 = arith.constant 0 : i32
    %c0_i32_0 = arith.constant 0 : i32
    return %arg0, %c0_i32 : i32, i32
  }
  func.func @transform_1(%arg0: i32) -> (i32, i32) {
    %c0_i32 = arith.constant 0 : i32
    %c0_i32_0 = arith.constant 0 : i32
    %c0_i32_1 = arith.constant 0 : i32
    return %c0_i32, %c0_i32_0 : i32, i32
  }
  func.func @transform_2(%arg0: i32) -> (i32, i32) {
    %c0_i32 = arith.constant 0 : i32
    %c0_i32_0 = arith.constant 0 : i32
    %c0_i32_1 = arith.constant 0 : i32
    return %c0_i32, %c0_i32_0 : i32, i32
  }
  func.func @transform_3(%arg0: i32) -> (i32, i32) {
    %c0_i32 = arith.constant 0 : i32
    %c0_i32_0 = arith.constant 0 : i32
    return %arg0, %c0_i32 : i32, i32
  }
}

module attributes {stable_mosaic.version = 11 : i64} {
  func.func @_matmul_bias_act_kernel(%arg0: i32, %arg1: memref<98x576xbf16, #tpu.memory_space<vmem>>, %arg2: memref<576x64xbf16, #tpu.memory_space<vmem>>, %arg3: memref<1x64xf32, #tpu.memory_space<vmem>>, %arg4: memref<98x64xbf16, #tpu.memory_space<vmem>>) attributes {dimension_semantics = [#tpu.dimension_semantics<parallel>], iteration_bounds = array<i64: 1>, scalar_prefetch = 0 : i64, scratch_operands = 0 : i64, tpu.core_type = #tpu.core_type<tc>, window_params = [{transform_indices = @transform_0, window_bounds = array<i64: 98, 576>}, {pipeline_mode = #tpu.pipeline_mode<synchronous>, transform_indices = @transform_1, window_bounds = array<i64: 576, 64>}, {pipeline_mode = #tpu.pipeline_mode<synchronous>, transform_indices = @transform_2, window_bounds = array<i64: 1, 64>}, {transform_indices = @transform_3, window_bounds = array<i64: 98, 64>}]} {
    %c0 = arith.constant 0 : index
    %c0_0 = arith.constant 0 : index
    %0 = vector.load %arg1[%c0, %c0_0] : memref<98x576xbf16, #tpu.memory_space<vmem>>, vector<98x576xbf16>
    %c0_1 = arith.constant 0 : index
    %c0_2 = arith.constant 0 : index
    %1 = vector.load %arg2[%c0_1, %c0_2] : memref<576x64xbf16, #tpu.memory_space<vmem>>, vector<576x64xbf16>
    %cst = arith.constant dense<0.000000e+00> : vector<98x64xf32>
    %2 = tpu.matmul %0, %1, %cst {dimension_numbers = #tpu.dot_dimension_numbers<[1], [0], [0], [1], [0, 0, 1, 1], [], []>} : vector<98x576xbf16>, vector<576x64xbf16>, vector<98x64xf32> -> vector<98x64xf32>
    %c0_3 = arith.constant 0 : index
    %c0_4 = arith.constant 0 : index
    %3 = vector.load %arg3[%c0_3, %c0_4] : memref<1x64xf32, #tpu.memory_space<vmem>>, vector<1x64xf32>
    %4 = vector.broadcast %3 : vector<1x64xf32> to vector<98x64xf32>
    %5 = arith.addf %2, %4 : vector<98x64xf32>
    %cst_5 = arith.constant 0.000000e+00 : f32
    %6 = vector.broadcast %cst_5 : f32 to vector<98x64xf32>
    %7 = arith.maximumf %5, %6 : vector<98x64xf32>
    %8 = arith.truncf %7 : vector<98x64xf32> to vector<98x64xbf16>
    %c0_6 = arith.constant 0 : index
    %c0_7 = arith.constant 0 : index
    %9 = vector.load %arg4[%c0_6, %c0_7] : memref<98x64xbf16, #tpu.memory_space<vmem>>, vector<98x64xbf16>
    tpu.vector_store %arg4[%c0_6, %c0_7], %8 {strides = array<i32>} : memref<98x64xbf16, #tpu.memory_space<vmem>>, vector<98x64xbf16>,
    return
  }
  func.func @transform_0(%arg0: i32) -> (i32, i32) {
    %c0_i32 = arith.constant 0 : i32
    %c0_i32_0 = arith.constant 0 : i32
    return %arg0, %c0_i32 : i32, i32
  }
  func.func @transform_1(%arg0: i32) -> (i32, i32) {
    %c0_i32 = arith.constant 0 : i32
    %c0_i32_0 = arith.constant 0 : i32
    %c0_i32_1 = arith.constant 0 : i32
    return %c0_i32, %c0_i32_0 : i32, i32
  }
  func.func @transform_2(%arg0: i32) -> (i32, i32) {
    %c0_i32 = arith.constant 0 : i32
    %c0_i32_0 = arith.constant 0 : i32
    %c0_i32_1 = arith.constant 0 : i32
    return %c0_i32, %c0_i32_0 : i32, i32
  }
  func.func @transform_3(%arg0: i32) -> (i32, i32) {
    %c0_i32 = arith.constant 0 : i32
    %c0_i32_0 = arith.constant 0 : i32
    return %arg0, %c0_i32 : i32, i32
  }
}

module attributes {stable_mosaic.version = 11 : i64} {
  func.func @_fused_fc_dueling_kernel(%arg0: i32, %arg1: memref<2x3136xbf16, #tpu.memory_space<vmem>>, %arg2: memref<3136x1024xbf16, #tpu.memory_space<vmem>>, %arg3: memref<1x1024xf32, #tpu.memory_space<vmem>>, %arg4: memref<512x9xbf16, #tpu.memory_space<vmem>>, %arg5: memref<1x9xf32, #tpu.memory_space<vmem>>, %arg6: memref<512x1xbf16, #tpu.memory_space<vmem>>, %arg7: memref<1x1xf32, #tpu.memory_space<vmem>>, %arg8: memref<2x9xf32, #tpu.memory_space<vmem>>) attributes {dimension_semantics = [#tpu.dimension_semantics<parallel>], iteration_bounds = array<i64: 1>, scalar_prefetch = 0 : i64, scratch_operands = 0 : i64, tpu.core_type = #tpu.core_type<tc>, window_params = [{transform_indices = @transform_0, window_bounds = array<i64: 2, 3136>}, {pipeline_mode = #tpu.pipeline_mode<synchronous>, transform_indices = @transform_1, window_bounds = array<i64: 3136, 1024>}, {pipeline_mode = #tpu.pipeline_mode<synchronous>, transform_indices = @transform_2, window_bounds = array<i64: 1, 1024>}, {pipeline_mode = #tpu.pipeline_mode<synchronous>, transform_indices = @transform_3, window_bounds = array<i64: 512, 9>}, {pipeline_mode = #tpu.pipeline_mode<synchronous>, transform_indices = @transform_4, window_bounds = array<i64: 1, 9>}, {pipeline_mode = #tpu.pipeline_mode<synchronous>, transform_indices = @transform_5, window_bounds = array<i64: 512, 1>}, {pipeline_mode = #tpu.pipeline_mode<synchronous>, transform_indices = @transform_6, window_bounds = array<i64: 1, 1>}, {transform_indices = @transform_7, window_bounds = array<i64: 2, 9>}]} {
    %c0 = arith.constant 0 : index
    %c0_0 = arith.constant 0 : index
    %0 = vector.load %arg1[%c0, %c0_0] : memref<2x3136xbf16, #tpu.memory_space<vmem>>, vector<2x3136xbf16>
    %c0_1 = arith.constant 0 : index
    %c0_2 = arith.constant 0 : index
    %1 = vector.load %arg2[%c0_1, %c0_2] : memref<3136x1024xbf16, #tpu.memory_space<vmem>>, vector<3136x1024xbf16>
    %cst = arith.constant dense<0.000000e+00> : vector<2x1024xf32>
    %2 = tpu.matmul %0, %1, %cst {dimension_numbers = #tpu.dot_dimension_numbers<[1], [0], [0], [1], [0, 0, 1, 1], [], []>} : vector<2x3136xbf16>, vector<3136x1024xbf16>, vector<2x1024xf32> -> vector<2x1024xf32>
    %c0_3 = arith.constant 0 : index
    %c0_4 = arith.constant 0 : index
    %3 = vector.load %arg3[%c0_3, %c0_4] : memref<1x1024xf32, #tpu.memory_space<vmem>>, vector<1x1024xf32>
    %4 = vector.broadcast %3 : vector<1x1024xf32> to vector<2x1024xf32>
    %5 = arith.addf %2, %4 : vector<2x1024xf32>
    %cst_5 = arith.constant 0.000000e+00 : f32
    %6 = vector.broadcast %cst_5 : f32 to vector<2x1024xf32>
    %7 = arith.maximumf %5, %6 : vector<2x1024xf32>
    %8 = arith.truncf %7 : vector<2x1024xf32> to vector<2x1024xbf16>
    %9 = vector.extract_strided_slice %8 {offsets = [0, 0], sizes = [2, 512], strides = [1, 1]} : vector<2x1024xbf16> to vector<2x512xbf16>
    %c0_6 = arith.constant 0 : index
    %c0_7 = arith.constant 0 : index
    %10 = vector.load %arg4[%c0_6, %c0_7] : memref<512x9xbf16, #tpu.memory_space<vmem>>, vector<512x9xbf16>
    %cst_8 = arith.constant dense<0.000000e+00> : vector<2x9xf32>
    %11 = tpu.matmul %9, %10, %cst_8 {dimension_numbers = #tpu.dot_dimension_numbers<[1], [0], [0], [1], [0, 0, 1, 1], [], []>} : vector<2x512xbf16>, vector<512x9xbf16>, vector<2x9xf32> -> vector<2x9xf32>
    %c0_9 = arith.constant 0 : index
    %c0_10 = arith.constant 0 : index
    %12 = vector.load %arg5[%c0_9, %c0_10] : memref<1x9xf32, #tpu.memory_space<vmem>>, vector<1x9xf32>
    %13 = vector.broadcast %12 : vector<1x9xf32> to vector<2x9xf32>
    %14 = arith.addf %11, %13 : vector<2x9xf32>
    %15 = vector.extract_strided_slice %8 {offsets = [0, 512], sizes = [2, 512], strides = [1, 1]} : vector<2x1024xbf16> to vector<2x512xbf16>
    %c0_11 = arith.constant 0 : index
    %c0_12 = arith.constant 0 : index
    %16 = vector.load %arg6[%c0_11, %c0_12] : memref<512x1xbf16, #tpu.memory_space<vmem>>, vector<512x1xbf16>
    %cst_13 = arith.constant dense<0.000000e+00> : vector<2x1xf32>
    %17 = tpu.matmul %15, %16, %cst_13 {dimension_numbers = #tpu.dot_dimension_numbers<[1], [0], [0], [1], [0, 0, 1, 1], [], []>} : vector<2x512xbf16>, vector<512x1xbf16>, vector<2x1xf32> -> vector<2x1xf32>
    %c0_14 = arith.constant 0 : index
    %c0_15 = arith.constant 0 : index
    %18 = vector.load %arg7[%c0_14, %c0_15] : memref<1x1xf32, #tpu.memory_space<vmem>>, vector<1x1xf32>
    %19 = vector.broadcast %18 : vector<1x1xf32> to vector<2x1xf32>
    %20 = arith.addf %17, %19 : vector<2x1xf32>
    %21 = vector.broadcast %20 : vector<2x1xf32> to vector<2x9xf32>
    %22 = arith.addf %21, %14 : vector<2x9xf32>
    %cst_16 = arith.constant dense<0.000000e+00> : vector<2xf32>
    %23 = vector.multi_reduction <add>, %14, %cst_16 [1] : vector<2x9xf32> to vector<2xf32>
    %24 = vector.shape_cast %23 : vector<2xf32> to vector<2x1xf32>
    %cst_17 = arith.constant 9.000000e+00 : f32
    %25 = vector.broadcast %cst_17 : f32 to vector<2x1xf32>
    %26 = arith.divf %24, %25 : vector<2x1xf32>
    %27 = vector.broadcast %26 : vector<2x1xf32> to vector<2x9xf32>
    %28 = arith.subf %22, %27 : vector<2x9xf32>
    %c0_18 = arith.constant 0 : index
    %c0_19 = arith.constant 0 : index
    %29 = vector.load %arg8[%c0_18, %c0_19] : memref<2x9xf32, #tpu.memory_space<vmem>>, vector<2x9xf32>
    tpu.vector_store %arg8[%c0_18, %c0_19], %28 {strides = array<i32>} : memref<2x9xf32, #tpu.memory_space<vmem>>, vector<2x9xf32>,
    return
  }
  func.func @transform_0(%arg0: i32) -> (i32, i32) {
    %c0_i32 = arith.constant 0 : i32
    %c0_i32_0 = arith.constant 0 : i32
    return %arg0, %c0_i32 : i32, i32
  }
  func.func @transform_1(%arg0: i32) -> (i32, i32) {
    %c0_i32 = arith.constant 0 : i32
    %c0_i32_0 = arith.constant 0 : i32
    %c0_i32_1 = arith.constant 0 : i32
    return %c0_i32, %c0_i32_0 : i32, i32
  }
  func.func @transform_2(%arg0: i32) -> (i32, i32) {
    %c0_i32 = arith.constant 0 : i32
    %c0_i32_0 = arith.constant 0 : i32
    %c0_i32_1 = arith.constant 0 : i32
    return %c0_i32, %c0_i32_0 : i32, i32
  }
  func.func @transform_3(%arg0: i32) -> (i32, i32) {
    %c0_i32 = arith.constant 0 : i32
    %c0_i32_0 = arith.constant 0 : i32
    %c0_i32_1 = arith.constant 0 : i32
    return %c0_i32, %c0_i32_0 : i32, i32
  }
  func.func @transform_4(%arg0: i32) -> (i32, i32) {
    %c0_i32 = arith.constant 0 : i32
    %c0_i32_0 = arith.constant 0 : i32
    %c0_i32_1 = arith.constant 0 : i32
    return %c0_i32, %c0_i32_0 : i32, i32
  }
  func.func @transform_5(%arg0: i32) -> (i32, i32) {
    %c0_i32 = arith.constant 0 : i32
    %c0_i32_0 = arith.constant 0 : i32
    %c0_i32_1 = arith.constant 0 : i32
    return %c0_i32, %c0_i32_0 : i32, i32
  }
  func.func @transform_6(%arg0: i32) -> (i32, i32) {
    %c0_i32 = arith.constant 0 : i32
    %c0_i32_0 = arith.constant 0 : i32
    %c0_i32_1 = arith.constant 0 : i32
    return %c0_i32, %c0_i32_0 : i32, i32
  }
  func.func @transform_7(%arg0: i32) -> (i32, i32) {
    %c0_i32 = arith.constant 0 : i32
    %c0_i32_0 = arith.constant 0 : i32
    return %arg0, %c0_i32 : i32, i32
  }
}

</mosaic_0001>

<bundles_post_ra>
// kernel: cov_net_forward.4
= control target key start
LH: loop header
LB: loop body
LE: loop exit
PB: predicated region body
PF: predicated region fallthrough
CT: control target
= control target key end

     0   :  { %s1542_s12 = smov 0   ;;  %s1852_s0 = inlined_call_operand.vmem [shape: bf16[800,256], index: 0, kind: input, shape index: {}]   ;;  %s1853_s1 = inlined_call_operand.vmem [shape: bf16[256,32], index: 1, kind: input, shape index: {}]   ;;  %s1854_s2 = inlined_call_operand.vmem [shape: f32[1,32], index: 2, kind: input, shape index: {}]   ;;  %s1855_s3 = inlined_call_operand.vmem [shape: bf16[800,32], index: 3, kind: output, shape index: {}]  }
   0x1 LB: > { %s1203_s13 = sadd.s32 4294967295, %s1519_s12   ;;  %p1207_p0 = scmp.ge.s32.totalorder %s1519_s12, 1  ;;  %s1519_s12 = sphi %s1542_s12, %s13_s12  }
   0x2   : > { %p139_p1 = scmp.lt.s32.totalorder %s1519_s12, 3 }
   0x4   : > { %p140_p2 = pnand %p1207_p0, %p139_p1 }
   0x5   : > { %s164_s16 = smul.u32 (!%p140_p2), 50, %s1203_s13 }
   0x6   : > { %143 = sbr.rel (%p140_p2) target bundleno = 376 (0x178), region = 32 }
   0x7   : > { %p165_p3 = scmp.lt.s32.totalorder (!%p140_p2), %s164_s16, 99 }
   0xb   : > { %v1422_v0 = vld [vmem:[%s1853_s1 + $0x38] sm:$0xff]   ;;  %v1521_v1 = vmov 0   ;;  %v1423_v2 = vld [vmem:[%s1853_s1 + $0x30] sm:$0xff]   ;;  %v1424_v3 = vld [vmem:[%s1853_s1 + $0x28] sm:$0xff]   ;;  %s1857_s16 = smov (!%p165_p3, %s164_s16), 99  ;;  %vm1096_vm0 = vcmask 257024  }
   0xc   : > { %613 = vmatprep.subr.bf16.mxu0 %v1521_v1  ;;  %1381 = vmatprep.subr.bf16.mxu1 %v1521_v1  ;;  %v1425_v4 = vld [vmem:[%s1853_s1 + $0x20] sm:$0xff]   ;;  %s1330_s23 = sshll.u32 %s1857_s16, 3  ;;  %v1426_v5 = vld [vmem:[%s1853_s1 + $0x18] sm:$0xff]   ;;  %v1427_v7 = vld [vmem:[%s1853_s1 + $0x10] sm:$0xff]   ;;  %s1210_s29 = sshll.u32 %s1857_s16, 2 }
   0xd   : > { %614 = vmatpush1.bf16.msra.mxu0 %v1422_v0  ;;  %1397 = vmatpush1.bf16.msra.mxu1 %v1422_v0  ;;  %s1579_s28 = scalar_lea.vmem %s1852_s0, %s1330_s23  ;;  %v1428_v9 = vld [vmem:[%s1853_s1 + $0x8] sm:$0xff]   ;;  %v1429_v10 = vld [vmem:[%s1853_s1] sm:$0xff]   ;;  %v1430_v11 = vld [vmem:[%s1853_s1 + $0x78] sm:$0xff]  }
   0xe   : > { %615 = vmatprep.subr.bf16.mxu0 %v1521_v1  ;;  %1382 = vmatprep.subr.bf16.mxu1 %v1521_v1  ;;  %v1440_v6 = vld [vmem:[%s1579_s28 + $0x4] ss:$8 sps:$4 sm:$0xff]   ;;  %v1443_v8 = vld [vmem:[%s1579_s28 + $0xd4] ss:$8 sps:$4 sm:$0xff]   ;;  %v1438_v19 = vld [vmem:[%s1579_s28] ss:$8 sps:$4 sm:$0xff]  }
   0xf   : > { %645 = vmatprep.mubr.bf16.mxu0 %v1440_v6  ;;  %749 = vmatprep.mubr.bf16.mxu1 %v1443_v8  ;;  %v1431_v12 = vld [vmem:[%s1853_s1 + $0x70] sm:$0xff]   ;;  %v1432_v13 = vld [vmem:[%s1853_s1 + $0x68] sm:$0xff]   ;;  %v1433_v14 = vld [vmem:[%s1853_s1 + $0x60] sm:$0xff]  }
  0x10   : > { %v1434_v15 = vld [vmem:[%s1853_s1 + $0x58] sm:$0xff]   ;;  %v1435_v16 = vld [vmem:[%s1853_s1 + $0x50] sm:$0xff]   ;;  %v1436_v17 = vld [vmem:[%s1853_s1 + $0x48] sm:$0xff]  }
  0x11   : > { %616 = vmatpush1.bf16.msra.mxu0 %v1423_v2  ;;  %1398 = vmatpush1.bf16.msra.mxu1 %v1423_v2  ;;  %v1437_v18 = vld [vmem:[%s1853_s1 + $0x40] sm:$0xff]   ;;  %v1441_v20 = vld [vmem:[%s1579_s28 + $0xd0] ss:$8 sps:$4 sm:$0xff]   ;;  %v1444_v21 = vld [vmem:[%s1579_s28 + $0x14] ss:$8 sps:$4 sm:$0xff]  }
  0x12   : > { %617 = vmatprep.subr.bf16.mxu0 %v1521_v1  ;;  %1383 = vmatprep.subr.bf16.mxu1 %v1521_v1  ;;  %v1447_v22 = vld [vmem:[%s1579_s28 + $0xe4] ss:$8 sps:$4 sm:$0xff]   ;;  %v1446_v23 = vld [vmem:[%s1579_s28 + $0x10] ss:$8 sps:$4 sm:$0xff]   ;;  %v1449_v24 = vld [vmem:[%s1579_s28 + $0xe0] ss:$8 sps:$4 sm:$0xff]  }
  0x13   : > { %v1450_v25 = vld [vmem:[%s1579_s28 + $0x24] ss:$8 sps:$4 sm:$0xff]   ;;  %v1453_v26 = vld [vmem:[%s1579_s28 + $0xf4] ss:$8 sps:$4 sm:$0xff]   ;;  %v1452_v27 = vld [vmem:[%s1579_s28 + $0x20] ss:$8 sps:$4 sm:$0xff]  }
  0x14   : > { %v1455_v28 = vld [vmem:[%s1579_s28 + $0xf0] ss:$8 sps:$4 sm:$0xff]   ;;  %v1456_v29 = vld [vmem:[%s1579_s28 + $0x34] ss:$8 sps:$4 sm:$0xff]   ;;  %v1459_v30 = vld [vmem:[%s1579_s28 + $0x104] ss:$8 sps:$4 sm:$0xff]  }
  0x15   : > { %618 = vmatpush1.bf16.msra.mxu0 %v1424_v3  ;;  %1399 = vmatpush1.bf16.msra.mxu1 %v1424_v3  ;;  %v1458_v31 = vld [vmem:[%s1579_s28 + $0x30] ss:$8 sps:$4 sm:$0xff]   ;;  %v1461_v32 = vld [vmem:[%s1579_s28 + $0x100] ss:$8 sps:$4 sm:$0xff]   ;;  %v1462_v33 = vld [vmem:[%s1579_s28 + $0x44] ss:$8 sps:$4 sm:$0xff]  }
  0x16   : > { %619 = vmatprep.subr.bf16.mxu0 %v1521_v1  ;;  %1384 = vmatprep.subr.bf16.mxu1 %v1521_v1  ;;  %v1465_v34 = vld [vmem:[%s1579_s28 + $0x114] ss:$8 sps:$4 sm:$0xff]   ;;  %v1464_v35 = vld [vmem:[%s1579_s28 + $0x40] ss:$8 sps:$4 sm:$0xff]   ;;  %v1467_v36 = vld [vmem:[%s1579_s28 + $0x110] ss:$8 sps:$4 sm:$0xff]  }
  0x17   : > { %v1468_v37 = vld [vmem:[%s1579_s28 + $0x54] ss:$8 sps:$4 sm:$0xff]   ;;  %v1471_v38 = vld [vmem:[%s1579_s28 + $0x124] ss:$8 sps:$4 sm:$0xff]   ;;  %v1470_v39 = vld [vmem:[%s1579_s28 + $0x50] ss:$8 sps:$4 sm:$0xff]  }
  0x18   : > { %v1473_v40 = vld [vmem:[%s1579_s28 + $0x120] ss:$8 sps:$4 sm:$0xff]   ;;  %v1474_v41 = vld [vmem:[%s1579_s28 + $0x64] ss:$8 sps:$4 sm:$0xff]   ;;  %v1477_v42 = vld [vmem:[%s1579_s28 + $0x134] ss:$8 sps:$4 sm:$0xff]  }
  0x19   : > { %620 = vmatpush1.bf16.msra.mxu0 %v1425_v4  ;;  %1400 = vmatpush1.bf16.msra.mxu1 %v1425_v4  ;;  %v1476_v43 = vld [vmem:[%s1579_s28 + $0x60] ss:$8 sps:$4 sm:$0xff]   ;;  %v1479_v44 = vld [vmem:[%s1579_s28 + $0x130] ss:$8 sps:$4 sm:$0xff]   ;;  %v1480_v45 = vld [vmem:[%s1579_s28 + $0x74] ss:$8 sps:$4 sm:$0xff]  }
  0x1a   : > { %621 = vmatprep.subr.bf16.mxu0 %v1521_v1  ;;  %1385 = vmatprep.subr.bf16.mxu1 %v1521_v1  ;;  %v1483_v46 = vld [vmem:[%s1579_s28 + $0x144] ss:$8 sps:$4 sm:$0xff]   ;;  %v1482_v47 = vld [vmem:[%s1579_s28 + $0x70] ss:$8 sps:$4 sm:$0xff]   ;;  %v1485_v48 = vld [vmem:[%s1579_s28 + $0x140] ss:$8 sps:$4 sm:$0xff]  }
  0x1b   : > { %v1486_v49 = vld [vmem:[%s1579_s28 + $0x84] ss:$8 sps:$4 sm:$0xff]   ;;  %v1489_v50 = vld [vmem:[%s1579_s28 + $0x154] ss:$8 sps:$4 sm:$0xff]   ;;  %v1488_v51 = vld [vmem:[%s1579_s28 + $0x80] ss:$8 sps:$4 sm:$0xff]  }
  0x1c   : > { %v1491_v52 = vld [vmem:[%s1579_s28 + $0x150] ss:$8 sps:$4 sm:$0xff]   ;;  %v1492_v53 = vld [vmem:[%s1579_s28 + $0x94] ss:$8 sps:$4 sm:$0xff]   ;;  %v1495_v54 = vld [vmem:[%s1579_s28 + $0x164] ss:$8 sps:$4 sm:$0xff]  }
  0x1d   : > { %622 = vmatpush1.bf16.msra.mxu0 %v1426_v5  ;;  %1401 = vmatpush1.bf16.msra.mxu1 %v1426_v5  ;;  %v1494_v55 = vld [vmem:[%s1579_s28 + $0x90] ss:$8 sps:$4 sm:$0xff]   ;;  %v1497_v56 = vld [vmem:[%s1579_s28 + $0x160] ss:$8 sps:$4 sm:$0xff]   ;;  %v1498_v57 = vld [vmem:[%s1579_s28 + $0xa4] ss:$8 sps:$4 sm:$0xff]  }
  0x1e   : > { %623 = vmatprep.subr.bf16.mxu0 %v1521_v1  ;;  %1386 = vmatprep.subr.bf16.mxu1 %v1521_v1  ;;  %v1501_v58 = vld [vmem:[%s1579_s28 + $0x174] ss:$8 sps:$4 sm:$0xff]   ;;  %v1500_v59 = vld [vmem:[%s1579_s28 + $0xa0] ss:$8 sps:$4 sm:$0xff]   ;;  %v1503_v60 = vld [vmem:[%s1579_s28 + $0x170] ss:$8 sps:$4 sm:$0xff]  }
  0x1f   : > { %v1504_v61 = vld [vmem:[%s1579_s28 + $0xb4] ss:$8 sps:$4 sm:$0xff]   ;;  %v1507_v62 = vld [vmem:[%s1579_s28 + $0x184] ss:$8 sps:$4 sm:$0xff]   ;;  %v1506_v63 = vld [vmem:[%s1579_s28 + $0xb0] ss:$8 sps:$4 sm:$0xff]  }
  0x20   : > { %v1509_v0 = vld [vmem:[%s1579_s28 + $0x180] ss:$8 sps:$4 sm:$0xff]  }
  0x21   : > { %624 = vmatpush1.bf16.msra.mxu0 %v1427_v7  ;;  %1402 = vmatpush1.bf16.msra.mxu1 %v1427_v7  ;;  %v1512_v2 = vld [vmem:[%s1579_s28 + $0xc0] ss:$8 sps:$4 sm:$0xff]  }
  0x22   : > { %625 = vmatprep.subr.bf16.mxu0 %v1521_v1  ;;  %1387 = vmatprep.subr.bf16.mxu1 %v1521_v1  ;;  %v1691_v3 = vld [vmem:[%s1854_s2] ss:$0 sm:$0xff] }
  0x25   : > { %626 = vmatpush1.bf16.msra.mxu0 %v1428_v9  ;;  %1403 = vmatpush1.bf16.msra.mxu1 %v1428_v9 }
  0x26   : > { %627 = vmatprep.subr.bf16.mxu0 %v1521_v1  ;;  %1388 = vmatprep.subr.bf16.mxu1 %v1521_v1 }
  0x29   : > { %628 = vmatpush1.bf16.msra.mxu0 %v1429_v10  ;;  %1404 = vmatpush1.bf16.msra.mxu1 %v1429_v10 }
  0x2a   : > { %629 = vmatprep.subr.bf16.mxu0 %v1521_v1  ;;  %1389 = vmatprep.subr.bf16.mxu1 %v1521_v1 }
  0x2d   : > { %630 = vmatpush2.bf16.msra.mxu0 %v1430_v11  ;;  %1405 = vmatpush2.bf16.msra.mxu1 %v1430_v11 }
  0x2e   : > { %631 = vmatprep.subr.bf16.mxu0 %v1521_v1  ;;  %1390 = vmatprep.subr.bf16.mxu1 %v1521_v1 }
  0x31   : > { %632 = vmatpush2.bf16.msra.mxu0 %v1431_v12  ;;  %1406 = vmatpush2.bf16.msra.mxu1 %v1431_v12 }
  0x32   : > { %633 = vmatprep.subr.bf16.mxu0 %v1521_v1  ;;  %1391 = vmatprep.subr.bf16.mxu1 %v1521_v1 }
  0x35   : > { %634 = vmatpush2.bf16.msra.mxu0 %v1432_v13  ;;  %1407 = vmatpush2.bf16.msra.mxu1 %v1432_v13 }
  0x36   : > { %635 = vmatprep.subr.bf16.mxu0 %v1521_v1  ;;  %1392 = vmatprep.subr.bf16.mxu1 %v1521_v1 }
  0x39   : > { %636 = vmatpush2.bf16.msra.mxu0 %v1433_v14  ;;  %1408 = vmatpush2.bf16.msra.mxu1 %v1433_v14 }
  0x3a   : > { %637 = vmatprep.subr.bf16.mxu0 %v1521_v1  ;;  %1393 = vmatprep.subr.bf16.mxu1 %v1521_v1 }
  0x3d   : > { %638 = vmatpush2.bf16.msra.mxu0 %v1434_v15  ;;  %1409 = vmatpush2.bf16.msra.mxu1 %v1434_v15 }
  0x3e   : > { %639 = vmatprep.subr.bf16.mxu0 %v1521_v1  ;;  %1394 = vmatprep.subr.bf16.mxu1 %v1521_v1 }
  0x41   : > { %640 = vmatpush2.bf16.msra.mxu0 %v1435_v16  ;;  %1410 = vmatpush2.bf16.msra.mxu1 %v1435_v16 }
  0x42   : > { %641 = vmatprep.subr.bf16.mxu0 %v1521_v1  ;;  %1395 = vmatprep.subr.bf16.mxu1 %v1521_v1 }
  0x45   : > { %642 = vmatpush2.bf16.msra.mxu0 %v1436_v17  ;;  %1411 = vmatpush2.bf16.msra.mxu1 %v1436_v17 }
  0x46   : > { %643 = vmatprep.subr.bf16.mxu0 %v1521_v1  ;;  %1396 = vmatprep.subr.bf16.mxu1 %v1521_v1  ;;  %v1510_v1 = vld [vmem:[%s1579_s28 + $0xc4] ss:$8 sps:$4 sm:$0xff]   ;;  %s1699_s28 = scalar_lea.vmem %s1855_s3, %s1210_s29 }
  0x49   : > { %644 = vmatpush2.bf16.msra.mxu0 %v1437_v18  ;;  %1412 = vmatpush2.bf16.msra.mxu1 %v1437_v18 }
  0x4c   : > { %646 = vmatmul.mubr.bf16.vlgmr.msra.gmra.mxu0 %v1438_v19  ;;  %750 = vmatmul.mubr.bf16.vlgmr.msra.gmra.mxu1 %v1441_v20 }
  0x4d   : > { %653 = vmatprep.mubr.bf16.mxu0 %v1444_v21  ;;  %757 = vmatprep.mubr.bf16.mxu1 %v1447_v22 }
  0x54   : > { %654 = vmatmul.mubr.bf16.gmra.mxu0 %v1446_v23  ;;  %758 = vmatmul.mubr.bf16.gmra.mxu1 %v1449_v24 }
  0x55   : > { %661 = vmatprep.mubr.bf16.mxu0 %v1450_v25  ;;  %765 = vmatprep.mubr.bf16.mxu1 %v1453_v26 }
  0x5c   : > { %662 = vmatmul.mubr.bf16.gmra.mxu0 %v1452_v27  ;;  %766 = vmatmul.mubr.bf16.gmra.mxu1 %v1455_v28 }
  0x5d   : > { %669 = vmatprep.mubr.bf16.mxu0 %v1456_v29  ;;  %773 = vmatprep.mubr.bf16.mxu1 %v1459_v30 }
  0x64   : > { %670 = vmatmul.mubr.bf16.gmra.mxu0 %v1458_v31  ;;  %774 = vmatmul.mubr.bf16.gmra.mxu1 %v1461_v32 }
  0x65   : > { %677 = vmatprep.mubr.bf16.mxu0 %v1462_v33  ;;  %781 = vmatprep.mubr.bf16.mxu1 %v1465_v34 }
  0x6c   : > { %678 = vmatmul.mubr.bf16.gmra.mxu0 %v1464_v35  ;;  %782 = vmatmul.mubr.bf16.gmra.mxu1 %v1467_v36 }
  0x6d   : > { %685 = vmatprep.mubr.bf16.mxu0 %v1468_v37  ;;  %789 = vmatprep.mubr.bf16.mxu1 %v1471_v38 }
  0x74   : > { %686 = vmatmul.mubr.bf16.gmra.mxu0 %v1470_v39  ;;  %790 = vmatmul.mubr.bf16.gmra.mxu1 %v1473_v40 }
  0x75   : > { %693 = vmatprep.mubr.bf16.mxu0 %v1474_v41  ;;  %797 = vmatprep.mubr.bf16.mxu1 %v1477_v42 }
  0x7c   : > { %694 = vmatmul.mubr.bf16.gmra.mxu0 %v1476_v43  ;;  %798 = vmatmul.mubr.bf16.gmra.mxu1 %v1479_v44 }
  0x7d   : > { %701 = vmatprep.mubr.bf16.mxu0 %v1480_v45  ;;  %805 = vmatprep.mubr.bf16.mxu1 %v1483_v46 }
  0x84   : > { %702 = vmatmul.mubr.bf16.gmra.mxu0 %v1482_v47  ;;  %806 = vmatmul.mubr.bf16.gmra.mxu1 %v1485_v48 }
  0x85   : > { %709 = vmatprep.mubr.bf16.mxu0 %v1486_v49  ;;  %813 = vmatprep.mubr.bf16.mxu1 %v1489_v50 }
  0x8c   : > { %710 = vmatmul.mubr.bf16.gmra.mxu0 %v1488_v51  ;;  %814 = vmatmul.mubr.bf16.gmra.mxu1 %v1491_v52 }
  0x8d   : > { %717 = vmatprep.mubr.bf16.mxu0 %v1492_v53  ;;  %821 = vmatprep.mubr.bf16.mxu1 %v1495_v54 }
  0x94   : > { %718 = vmatmul.mubr.bf16.gmra.mxu0 %v1494_v55  ;;  %822 = vmatmul.mubr.bf16.gmra.mxu1 %v1497_v56 }
  0x95   : > { %725 = vmatprep.mubr.bf16.mxu0 %v1498_v57  ;;  %829 = vmatprep.mubr.bf16.mxu1 %v1501_v58 }
  0x9c   : > { %726 = vmatmul.mubr.bf16.gmra.mxu0 %v1500_v59  ;;  %830 = vmatmul.mubr.bf16.gmra.mxu1 %v1503_v60 }
  0x9d   : > { %733 = vmatprep.mubr.bf16.mxu0 %v1504_v61  ;;  %837 = vmatprep.mubr.bf16.mxu1 %v1507_v62 }
  0xa4   : > { %734 = vmatmul.mubr.bf16.gmra.mxu0 %v1506_v63  ;;  %838 = vmatmul.mubr.bf16.gmra.mxu1 %v1509_v0 }
  0xa5   : > { %741 = vmatprep.mubr.bf16.mxu0 %v1510_v1 }
  0xac   : > { %742 = vmatmul.mubr.bf16.gmra.mxu0 %v1512_v2 }
 0x10c   : > { %v647_v4 = vpop.f32.mrf.mxu0  ;;  %v751_v5 = vpop.f32.mrf.mxu1 }
 0x10d   : > { %v648_v6 = vadd.f32 %v1691_v3, %v647_v4  ;;  %v752_v7 = vadd.f32 %v1691_v3, %v751_v5 }
 0x10e   : > { %v649_v8 = vpop.f32.mrf.mxu0  ;;  %v753_v9 = vpop.f32.mrf.mxu1 }
 0x10f   : > { %v846_v10 = vmax.f32 %v648_v6, 0.0  ;;  %v872_v11 = vmax.f32 %v752_v7, 0.0 }
 0x110   : > { %v650_v12 = vpop.f32.mrf.mxu0  ;;  %v754_v13 = vpop.f32.mrf.mxu1 }
 0x111   : > { %v1331_v14 = vpack.c.bf16 %v846_v10, %v846_v10  ;;  %v1357_v15 = vpack.c.bf16 %v872_v11, %v872_v11  ;;  %v651_v16 = vadd.f32 %v1691_v3, %v650_v12  ;;  %v755_v17 = vadd.f32 %v1691_v3, %v754_v13 }
 0x112   : > { %v652_v18 = vpop.f32.mrf.mxu0  ;;  %v756_v19 = vpop.f32.mrf.mxu1 }
 0x113   : > { %1097 = vst.msk [vmem:[%s1699_s28] sm:$0xf] %vm1096_vm0, %v1331_v14  ;;  %1123 = vst.msk [vmem:[%s1699_s28 + $0x68] sm:$0xf] %vm1096_vm0, %v1357_v15  ;;  %v847_v20 = vmax.f32 %v651_v16, 0.0  ;;  %v873_v21 = vmax.f32 %v755_v17, 0.0 }
 0x114   : > { %v655_v22 = vpop.f32.mrf.mxu0  ;;  %v759_v23 = vpop.f32.mrf.mxu1 }
 0x115   : > { %v1332_v24 = vpack.c.bf16 %v847_v20, %v847_v20  ;;  %v1358_v25 = vpack.c.bf16 %v873_v21, %v873_v21  ;;  %v656_v26 = vadd.f32 %v1691_v3, %v655_v22  ;;  %v760_v27 = vadd.f32 %v1691_v3, %v759_v23 }
 0x116   : > { %v657_v28 = vpop.f32.mrf.mxu0  ;;  %v761_v29 = vpop.f32.mrf.mxu1 }
 0x117   : > { %1098 = vst.msk [vmem:[%s1699_s28 + $0x4] sm:$0xf] %vm1096_vm0, %v1332_v24  ;;  %1124 = vst.msk [vmem:[%s1699_s28 + $0x6c] sm:$0xf] %vm1096_vm0, %v1358_v25  ;;  %v848_v30 = vmax.f32 %v656_v26, 0.0  ;;  %v874_v31 = vmax.f32 %v760_v27, 0.0 }
 0x118   : > { %v658_v32 = vpop.f32.mrf.mxu0  ;;  %v762_v33 = vpop.f32.mrf.mxu1 }
 0x119   : > { %v1333_v34 = vpack.c.bf16 %v848_v30, %v848_v30  ;;  %v1359_v35 = vpack.c.bf16 %v874_v31, %v874_v31  ;;  %v659_v36 = vadd.f32 %v1691_v3, %v658_v32  ;;  %v763_v37 = vadd.f32 %v1691_v3, %v762_v33 }
 0x11a   : > { %v660_v38 = vpop.f32.mrf.mxu0  ;;  %v764_v39 = vpop.f32.mrf.mxu1 }
 0x11b   : > { %1099 = vst.msk [vmem:[%s1699_s28 + $0x8] sm:$0xf] %vm1096_vm0, %v1333_v34  ;;  %1125 = vst.msk [vmem:[%s1699_s28 + $0x70] sm:$0xf] %vm1096_vm0, %v1359_v35  ;;  %v849_v40 = vmax.f32 %v659_v36, 0.0  ;;  %v875_v41 = vmax.f32 %v763_v37, 0.0 }
 0x11c   : > { %v663_v42 = vpop.f32.mrf.mxu0  ;;  %v767_v43 = vpop.f32.mrf.mxu1 }
 0x11d   : > { %v1334_v44 = vpack.c.bf16 %v849_v40, %v849_v40  ;;  %v1360_v45 = vpack.c.bf16 %v875_v41, %v875_v41  ;;  %v664_v46 = vadd.f32 %v1691_v3, %v663_v42  ;;  %v768_v47 = vadd.f32 %v1691_v3, %v767_v43 }
 0x11e   : > { %v665_v48 = vpop.f32.mrf.mxu0  ;;  %v769_v49 = vpop.f32.mrf.mxu1 }
 0x11f   : > { %1100 = vst.msk [vmem:[%s1699_s28 + $0xc] sm:$0xf] %vm1096_vm0, %v1334_v44  ;;  %1126 = vst.msk [vmem:[%s1699_s28 + $0x74] sm:$0xf] %vm1096_vm0, %v1360_v45  ;;  %v850_v50 = vmax.f32 %v664_v46, 0.0  ;;  %v876_v51 = vmax.f32 %v768_v47, 0.0 }
 0x120   : > { %v666_v52 = vpop.f32.mrf.mxu0  ;;  %v770_v53 = vpop.f32.mrf.mxu1 }
 0x121   : > { %v1335_v54 = vpack.c.bf16 %v850_v50, %v850_v50  ;;  %v1361_v55 = vpack.c.bf16 %v876_v51, %v876_v51  ;;  %v667_v56 = vadd.f32 %v1691_v3, %v666_v52  ;;  %v771_v57 = vadd.f32 %v1691_v3, %v770_v53 }
 0x122   : > { %v668_v58 = vpop.f32.mrf.mxu0  ;;  %v772_v59 = vpop.f32.mrf.mxu1 }
 0x123   : > { %1101 = vst.msk [vmem:[%s1699_s28 + $0x10] sm:$0xf] %vm1096_vm0, %v1335_v54  ;;  %1127 = vst.msk [vmem:[%s1699_s28 + $0x78] sm:$0xf] %vm1096_vm0, %v1361_v55  ;;  %v851_v60 = vmax.f32 %v667_v56, 0.0  ;;  %v877_v61 = vmax.f32 %v771_v57, 0.0 }
 0x124   : > { %v671_v62 = vpop.f32.mrf.mxu0  ;;  %v775_v63 = vpop.f32.mrf.mxu1 }
 0x125   : > { %v1336_v0 = vpack.c.bf16 %v851_v60, %v851_v60  ;;  %v1362_v1 = vpack.c.bf16 %v877_v61, %v877_v61  ;;  %v672_v2 = vadd.f32 %v1691_v3, %v671_v62  ;;  %v776_v4 = vadd.f32 %v1691_v3, %v775_v63 }
 0x126   : > { %v673_v5 = vpop.f32.mrf.mxu0  ;;  %v777_v6 = vpop.f32.mrf.mxu1 }
 0x127   : > { %1102 = vst.msk [vmem:[%s1699_s28 + $0x14] sm:$0xf] %vm1096_vm0, %v1336_v0  ;;  %1128 = vst.msk [vmem:[%s1699_s28 + $0x7c] sm:$0xf] %vm1096_vm0, %v1362_v1  ;;  %v852_v7 = vmax.f32 %v672_v2, 0.0  ;;  %v878_v8 = vmax.f32 %v776_v4, 0.0 }
 0x128   : > { %v674_v9 = vpop.f32.mrf.mxu0  ;;  %v778_v10 = vpop.f32.mrf.mxu1 }
 0x129   : > { %v1337_v11 = vpack.c.bf16 %v852_v7, %v852_v7  ;;  %v1363_v12 = vpack.c.bf16 %v878_v8, %v878_v8  ;;  %v675_v13 = vadd.f32 %v1691_v3, %v674_v9  ;;  %v779_v14 = vadd.f32 %v1691_v3, %v778_v10 }
 0x12a   : > { %v676_v15 = vpop.f32.mrf.mxu0  ;;  %v780_v16 = vpop.f32.mrf.mxu1 }
 0x12b   : > { %1103 = vst.msk [vmem:[%s1699_s28 + $0x18] sm:$0xf] %vm1096_vm0, %v1337_v11  ;;  %1129 = vst.msk [vmem:[%s1699_s28 + $0x80] sm:$0xf] %vm1096_vm0, %v1363_v12  ;;  %v853_v17 = vmax.f32 %v675_v13, 0.0  ;;  %v879_v18 = vmax.f32 %v779_v14, 0.0 }
 0x12c   : > { %v679_v19 = vpop.f32.mrf.mxu0  ;;  %v783_v20 = vpop.f32.mrf.mxu1 }
 0x12d   : > { %v1338_v21 = vpack.c.bf16 %v853_v17, %v853_v17  ;;  %v1364_v22 = vpack.c.bf16 %v879_v18, %v879_v18  ;;  %v680_v23 = vadd.f32 %v1691_v3, %v679_v19  ;;  %v784_v24 = vadd.f32 %v1691_v3, %v783_v20 }
 0x12e   : > { %v681_v25 = vpop.f32.mrf.mxu0  ;;  %v785_v26 = vpop.f32.mrf.mxu1 }
 0x12f   : > { %1104 = vst.msk [vmem:[%s1699_s28 + $0x1c] sm:$0xf] %vm1096_vm0, %v1338_v21  ;;  %1130 = vst.msk [vmem:[%s1699_s28 + $0x84] sm:$0xf] %vm1096_vm0, %v1364_v22  ;;  %v854_v27 = vmax.f32 %v680_v23, 0.0  ;;  %v880_v28 = vmax.f32 %v784_v24, 0.0 }
 0x130   : > { %v682_v29 = vpop.f32.mrf.mxu0  ;;  %v786_v30 = vpop.f32.mrf.mxu1 }
 0x131   : > { %v1339_v31 = vpack.c.bf16 %v854_v27, %v854_v27  ;;  %v1365_v32 = vpack.c.bf16 %v880_v28, %v880_v28  ;;  %v683_v33 = vadd.f32 %v1691_v3, %v682_v29  ;;  %v787_v34 = vadd.f32 %v1691_v3, %v786_v30 }
 0x132   : > { %v684_v35 = vpop.f32.mrf.mxu0  ;;  %v788_v36 = vpop.f32.mrf.mxu1 }
 0x133   : > { %1105 = vst.msk [vmem:[%s1699_s28 + $0x20] sm:$0xf] %vm1096_vm0, %v1339_v31  ;;  %1131 = vst.msk [vmem:[%s1699_s28 + $0x88] sm:$0xf] %vm1096_vm0, %v1365_v32  ;;  %v855_v37 = vmax.f32 %v683_v33, 0.0  ;;  %v881_v38 = vmax.f32 %v787_v34, 0.0 }
 0x134   : > { %v687_v39 = vpop.f32.mrf.mxu0  ;;  %v791_v40 = vpop.f32.mrf.mxu1 }
 0x135   : > { %v1340_v41 = vpack.c.bf16 %v855_v37, %v855_v37  ;;  %v1366_v42 = vpack.c.bf16 %v881_v38, %v881_v38  ;;  %v688_v43 = vadd.f32 %v1691_v3, %v687_v39  ;;  %v792_v44 = vadd.f32 %v1691_v3, %v791_v40 }
 0x136   : > { %v689_v45 = vpop.f32.mrf.mxu0  ;;  %v793_v46 = vpop.f32.mrf.mxu1 }
 0x137   : > { %1106 = vst.msk [vmem:[%s1699_s28 + $0x24] sm:$0xf] %vm1096_vm0, %v1340_v41  ;;  %1132 = vst.msk [vmem:[%s1699_s28 + $0x8c] sm:$0xf] %vm1096_vm0, %v1366_v42  ;;  %v856_v47 = vmax.f32 %v688_v43, 0.0  ;;  %v882_v48 = vmax.f32 %v792_v44, 0.0 }
 0x138   : > { %v690_v49 = vpop.f32.mrf.mxu0  ;;  %v794_v50 = vpop.f32.mrf.mxu1 }
 0x139   : > { %v1341_v51 = vpack.c.bf16 %v856_v47, %v856_v47  ;;  %v1367_v52 = vpack.c.bf16 %v882_v48, %v882_v48  ;;  %v691_v53 = vadd.f32 %v1691_v3, %v690_v49  ;;  %v795_v54 = vadd.f32 %v1691_v3, %v794_v50 }
 0x13a   : > { %v692_v55 = vpop.f32.mrf.mxu0  ;;  %v796_v56 = vpop.f32.mrf.mxu1 }
 0x13b   : > { %1107 = vst.msk [vmem:[%s1699_s28 + $0x28] sm:$0xf] %vm1096_vm0, %v1341_v51  ;;  %1133 = vst.msk [vmem:[%s1699_s28 + $0x90] sm:$0xf] %vm1096_vm0, %v1367_v52  ;;  %v857_v57 = vmax.f32 %v691_v53, 0.0  ;;  %v883_v58 = vmax.f32 %v795_v54, 0.0 }
 0x13c   : > { %v695_v59 = vpop.f32.mrf.mxu0  ;;  %v799_v60 = vpop.f32.mrf.mxu1 }
 0x13d   : > { %v1342_v61 = vpack.c.bf16 %v857_v57, %v857_v57  ;;  %v1368_v62 = vpack.c.bf16 %v883_v58, %v883_v58  ;;  %v696_v63 = vadd.f32 %v1691_v3, %v695_v59  ;;  %v800_v0 = vadd.f32 %v1691_v3, %v799_v60 }
 0x13e   : > { %v697_v1 = vpop.f32.mrf.mxu0  ;;  %v801_v2 = vpop.f32.mrf.mxu1 }
 0x13f   : > { %1108 = vst.msk [vmem:[%s1699_s28 + $0x2c] sm:$0xf] %vm1096_vm0, %v1342_v61  ;;  %1134 = vst.msk [vmem:[%s1699_s28 + $0x94] sm:$0xf] %vm1096_vm0, %v1368_v62  ;;  %v858_v4 = vmax.f32 %v696_v63, 0.0  ;;  %v884_v5 = vmax.f32 %v800_v0, 0.0 }
 0x140   : > { %v698_v6 = vpop.f32.mrf.mxu0  ;;  %v802_v7 = vpop.f32.mrf.mxu1 }
 0x141   : > { %v1343_v8 = vpack.c.bf16 %v858_v4, %v858_v4  ;;  %v1369_v9 = vpack.c.bf16 %v884_v5, %v884_v5  ;;  %v699_v10 = vadd.f32 %v1691_v3, %v698_v6  ;;  %v803_v11 = vadd.f32 %v1691_v3, %v802_v7 }
 0x142   : > { %v700_v12 = vpop.f32.mrf.mxu0  ;;  %v804_v13 = vpop.f32.mrf.mxu1 }
 0x143   : > { %1109 = vst.msk [vmem:[%s1699_s28 + $0x30] sm:$0xf] %vm1096_vm0, %v1343_v8  ;;  %1135 = vst.msk [vmem:[%s1699_s28 + $0x98] sm:$0xf] %vm1096_vm0, %v1369_v9  ;;  %v859_v14 = vmax.f32 %v699_v10, 0.0  ;;  %v885_v15 = vmax.f32 %v803_v11, 0.0 }
 0x144   : > { %v703_v16 = vpop.f32.mrf.mxu0  ;;  %v807_v17 = vpop.f32.mrf.mxu1 }
 0x145   : > { %v1344_v18 = vpack.c.bf16 %v859_v14, %v859_v14  ;;  %v1370_v19 = vpack.c.bf16 %v885_v15, %v885_v15  ;;  %v704_v20 = vadd.f32 %v1691_v3, %v703_v16  ;;  %v808_v21 = vadd.f32 %v1691_v3, %v807_v17 }
 0x146   : > { %v705_v22 = vpop.f32.mrf.mxu0  ;;  %v809_v23 = vpop.f32.mrf.mxu1 }
 0x147   : > { %1110 = vst.msk [vmem:[%s1699_s28 + $0x34] sm:$0xf] %vm1096_vm0, %v1344_v18  ;;  %1136 = vst.msk [vmem:[%s1699_s28 + $0x9c] sm:$0xf] %vm1096_vm0, %v1370_v19  ;;  %v860_v24 = vmax.f32 %v704_v20, 0.0  ;;  %v886_v25 = vmax.f32 %v808_v21, 0.0 }
 0x148   : > { %v706_v26 = vpop.f32.mrf.mxu0  ;;  %v810_v27 = vpop.f32.mrf.mxu1 }
 0x149   : > { %v1345_v28 = vpack.c.bf16 %v860_v24, %v860_v24  ;;  %v1371_v29 = vpack.c.bf16 %v886_v25, %v886_v25  ;;  %v707_v30 = vadd.f32 %v1691_v3, %v706_v26  ;;  %v811_v31 = vadd.f32 %v1691_v3, %v810_v27 }
 0x14a   : > { %v708_v32 = vpop.f32.mrf.mxu0  ;;  %v812_v33 = vpop.f32.mrf.mxu1 }
 0x14b   : > { %1111 = vst.msk [vmem:[%s1699_s28 + $0x38] sm:$0xf] %vm1096_vm0, %v1345_v28  ;;  %1137 = vst.msk [vmem:[%s1699_s28 + $0xa0] sm:$0xf] %vm1096_vm0, %v1371_v29  ;;  %v861_v34 = vmax.f32 %v707_v30, 0.0  ;;  %v887_v35 = vmax.f32 %v811_v31, 0.0 }
 0x14c   : > { %v711_v36 = vpop.f32.mrf.mxu0  ;;  %v815_v37 = vpop.f32.mrf.mxu1 }
 0x14d   : > { %v1346_v38 = vpack.c.bf16 %v861_v34, %v861_v34  ;;  %v1372_v39 = vpack.c.bf16 %v887_v35, %v887_v35  ;;  %v712_v40 = vadd.f32 %v1691_v3, %v711_v36  ;;  %v816_v41 = vadd.f32 %v1691_v3, %v815_v37 }
 0x14e   : > { %v713_v42 = vpop.f32.mrf.mxu0  ;;  %v817_v43 = vpop.f32.mrf.mxu1 }
 0x14f   : > { %1112 = vst.msk [vmem:[%s1699_s28 + $0x3c] sm:$0xf] %vm1096_vm0, %v1346_v38  ;;  %1138 = vst.msk [vmem:[%s1699_s28 + $0xa4] sm:$0xf] %vm1096_vm0, %v1372_v39  ;;  %v862_v44 = vmax.f32 %v712_v40, 0.0  ;;  %v888_v45 = vmax.f32 %v816_v41, 0.0 }
 0x150   : > { %v714_v46 = vpop.f32.mrf.mxu0  ;;  %v818_v47 = vpop.f32.mrf.mxu1 }
 0x151   : > { %v1347_v48 = vpack.c.bf16 %v862_v44, %v862_v44  ;;  %v1373_v49 = vpack.c.bf16 %v888_v45, %v888_v45  ;;  %v715_v50 = vadd.f32 %v1691_v3, %v714_v46  ;;  %v819_v51 = vadd.f32 %v1691_v3, %v818_v47 }
 0x152   : > { %v716_v52 = vpop.f32.mrf.mxu0  ;;  %v820_v53 = vpop.f32.mrf.mxu1 }
 0x153   : > { %1113 = vst.msk [vmem:[%s1699_s28 + $0x40] sm:$0xf] %vm1096_vm0, %v1347_v48  ;;  %1139 = vst.msk [vmem:[%s1699_s28 + $0xa8] sm:$0xf] %vm1096_vm0, %v1373_v49  ;;  %v863_v54 = vmax.f32 %v715_v50, 0.0  ;;  %v889_v55 = vmax.f32 %v819_v51, 0.0 }
 0x154   : > { %v719_v56 = vpop.f32.mrf.mxu0  ;;  %v823_v57 = vpop.f32.mrf.mxu1 }
 0x155   : > { %v1348_v58 = vpack.c.bf16 %v863_v54, %v863_v54  ;;  %v1374_v59 = vpack.c.bf16 %v889_v55, %v889_v55  ;;  %v720_v60 = vadd.f32 %v1691_v3, %v719_v56  ;;  %v824_v61 = vadd.f32 %v1691_v3, %v823_v57 }
 0x156   : > { %v721_v62 = vpop.f32.mrf.mxu0  ;;  %v825_v63 = vpop.f32.mrf.mxu1 }
 0x157   : > { %1114 = vst.msk [vmem:[%s1699_s28 + $0x44] sm:$0xf] %vm1096_vm0, %v1348_v58  ;;  %1140 = vst.msk [vmem:[%s1699_s28 + $0xac] sm:$0xf] %vm1096_vm0, %v1374_v59  ;;  %v864_v0 = vmax.f32 %v720_v60, 0.0  ;;  %v890_v1 = vmax.f32 %v824_v61, 0.0 }
 0x158   : > { %v722_v2 = vpop.f32.mrf.mxu0  ;;  %v826_v4 = vpop.f32.mrf.mxu1 }
 0x159   : > { %v1349_v5 = vpack.c.bf16 %v864_v0, %v864_v0  ;;  %v1375_v6 = vpack.c.bf16 %v890_v1, %v890_v1  ;;  %v723_v7 = vadd.f32 %v1691_v3, %v722_v2  ;;  %v827_v8 = vadd.f32 %v1691_v3, %v826_v4 }
 0x15a   : > { %v724_v9 = vpop.f32.mrf.mxu0  ;;  %v828_v10 = vpop.f32.mrf.mxu1 }
 0x15b   : > { %1115 = vst.msk [vmem:[%s1699_s28 + $0x48] sm:$0xf] %vm1096_vm0, %v1349_v5  ;;  %1141 = vst.msk [vmem:[%s1699_s28 + $0xb0] sm:$0xf] %vm1096_vm0, %v1375_v6  ;;  %v865_v11 = vmax.f32 %v723_v7, 0.0  ;;  %v891_v12 = vmax.f32 %v827_v8, 0.0 }
 0x15c   : > { %v727_v13 = vpop.f32.mrf.mxu0  ;;  %v831_v14 = vpop.f32.mrf.mxu1 }
 0x15d   : > { %v1350_v15 = vpack.c.bf16 %v865_v11, %v865_v11  ;;  %v1376_v16 = vpack.c.bf16 %v891_v12, %v891_v12  ;;  %v728_v17 = vadd.f32 %v1691_v3, %v727_v13  ;;  %v832_v18 = vadd.f32 %v1691_v3, %v831_v14 }
 0x15e   : > { %v729_v19 = vpop.f32.mrf.mxu0  ;;  %v833_v20 = vpop.f32.mrf.mxu1 }
 0x15f   : > { %1116 = vst.msk [vmem:[%s1699_s28 + $0x4c] sm:$0xf] %vm1096_vm0, %v1350_v15  ;;  %1142 = vst.msk [vmem:[%s1699_s28 + $0xb4] sm:$0xf] %vm1096_vm0, %v1376_v16  ;;  %v866_v21 = vmax.f32 %v728_v17, 0.0  ;;  %v892_v22 = vmax.f32 %v832_v18, 0.0 }
 0x160   : > { %v730_v23 = vpop.f32.mrf.mxu0  ;;  %v834_v24 = vpop.f32.mrf.mxu1 }
 0x161   : > { %v1351_v25 = vpack.c.bf16 %v866_v21, %v866_v21  ;;  %v1377_v26 = vpack.c.bf16 %v892_v22, %v892_v22  ;;  %v731_v27 = vadd.f32 %v1691_v3, %v730_v23  ;;  %v835_v28 = vadd.f32 %v1691_v3, %v834_v24 }
 0x162   : > { %v732_v29 = vpop.f32.mrf.mxu0  ;;  %v836_v30 = vpop.f32.mrf.mxu1 }
 0x163   : > { %1117 = vst.msk [vmem:[%s1699_s28 + $0x50] sm:$0xf] %vm1096_vm0, %v1351_v25  ;;  %1143 = vst.msk [vmem:[%s1699_s28 + $0xb8] sm:$0xf] %vm1096_vm0, %v1377_v26  ;;  %v867_v31 = vmax.f32 %v731_v27, 0.0  ;;  %v893_v32 = vmax.f32 %v835_v28, 0.0 }
 0x164   : > { %v735_v33 = vpop.f32.mrf.mxu0  ;;  %v839_v34 = vpop.f32.mrf.mxu1 }
 0x165   : > { %v1352_v35 = vpack.c.bf16 %v867_v31, %v867_v31  ;;  %v1378_v36 = vpack.c.bf16 %v893_v32, %v893_v32  ;;  %v736_v37 = vadd.f32 %v1691_v3, %v735_v33  ;;  %v840_v38 = vadd.f32 %v1691_v3, %v839_v34 }
 0x166   : > { %v737_v39 = vpop.f32.mrf.mxu0  ;;  %v841_v40 = vpop.f32.mrf.mxu1 }
 0x167   : > { %1118 = vst.msk [vmem:[%s1699_s28 + $0x54] sm:$0xf] %vm1096_vm0, %v1352_v35  ;;  %1144 = vst.msk [vmem:[%s1699_s28 + $0xbc] sm:$0xf] %vm1096_vm0, %v1378_v36  ;;  %v868_v41 = vmax.f32 %v736_v37, 0.0  ;;  %v894_v42 = vmax.f32 %v840_v38, 0.0 }
 0x168   : > { %v738_v43 = vpop.f32.mrf.mxu0  ;;  %v842_v44 = vpop.f32.mrf.mxu1 }
 0x169   : > { %v1353_v45 = vpack.c.bf16 %v868_v41, %v868_v41  ;;  %v1379_v46 = vpack.c.bf16 %v894_v42, %v894_v42  ;;  %v739_v47 = vadd.f32 %v1691_v3, %v738_v43  ;;  %v843_v48 = vadd.f32 %v1691_v3, %v842_v44 }
 0x16a   : > { %v740_v49 = vpop.f32.mrf.mxu0  ;;  %v844_v50 = vpop.f32.mrf.mxu1 }
 0x16b   : > { %1119 = vst.msk [vmem:[%s1699_s28 + $0x58] sm:$0xf] %vm1096_vm0, %v1353_v45  ;;  %1145 = vst.msk [vmem:[%s1699_s28 + $0xc0] sm:$0xf] %vm1096_vm0, %v1379_v46  ;;  %v869_v51 = vmax.f32 %v739_v47, 0.0  ;;  %v895_v52 = vmax.f32 %v843_v48, 0.0 }
 0x16c   : > { %v743_v53 = vpop.f32.mrf.mxu0 }
 0x16d   : > { %v1354_v54 = vpack.c.bf16 %v869_v51, %v869_v51  ;;  %v1380_v55 = vpack.c.bf16 %v895_v52, %v895_v52  ;;  %v744_v56 = vadd.f32 %v1691_v3, %v743_v53 }
 0x16e   : > { %v745_v57 = vpop.f32.mrf.mxu0 }
 0x16f   : > { %1120 = vst.msk [vmem:[%s1699_s28 + $0x5c] sm:$0xf] %vm1096_vm0, %v1354_v54  ;;  %1146 = vst.msk [vmem:[%s1699_s28 + $0xc4] sm:$0xf] %vm1096_vm0, %v1380_v55  ;;  %v870_v58 = vmax.f32 %v744_v56, 0.0 }
 0x170   : > { %v746_v59 = vpop.f32.mrf.mxu0 }
 0x171   : > { %v1355_v60 = vpack.c.bf16 %v870_v58, %v870_v58  ;;  %v747_v61 = vadd.f32 %v1691_v3, %v746_v59 }
 0x172   : > { %v748_v62 = vpop.f32.mrf.mxu0 }
 0x173   : > { %1121 = vst.msk [vmem:[%s1699_s28 + $0x60] sm:$0xf] %vm1096_vm0, %v1355_v60  ;;  %v871_v63 = vmax.f32 %v747_v61, 0.0 }
 0x175   : > { %v1356_v0 = vpack.c.bf16 %v871_v63, %v871_v63 }
 0x177   : > { %1122 = vst.msk [vmem:[%s1699_s28 + $0x64] sm:$0xf] %vm1096_vm0, %v1356_v0 }
 0x178 PF: > { %s13_s12 = sadd.s32 1, %s1519_s12  }
 0x179   : > { %p10_p4 = scmp.ge.s32.totalorder %s13_s12, 4  }
 0x17b   :  { %12 = sbr.rel (!%p10_p4) target bundleno = 1 (0x1), region = 62 }

// kernel: cov_net_forward.5
= control target key start
LH: loop header
LB: loop body
LE: loop exit
PB: predicated region body
PF: predicated region fallthrough
CT: control target
= control target key end

     0   :  { %vm880_vm0 = vcmask 519168   ;;  %vm901_vm1 = vcmask 516096   ;;  %s1637_s1 = inlined_call_operand.vmem [shape: bf16[512,64], index: 1, kind: input, shape index: {}]   ;;  %s1638_s0 = inlined_call_operand.vmem [shape: bf16[162,512], index: 0, kind: input, shape index: {}]   ;;  %s1639_s2 = inlined_call_operand.vmem [shape: f32[1,64], index: 2, kind: input, shape index: {}]   ;;  %s1640_s3 = inlined_call_operand.vmem [shape: bf16[162,64], index: 3, kind: output, shape index: {}]  }
   0x1   :  { %v1190_v0 = vld [vmem:[%s1637_s1 + $0x78] sm:$0xff]   ;;  %v1194_v4 = vld [vmem:[%s1637_s1 + $0x70] sm:$0xff]   ;;  %v1198_v8 = vld [vmem:[%s1637_s1 + $0x68] sm:$0xff]  }
   0x2   :  { %v1191_v1 = vld [vmem:[%s1637_s1 + $0xf8] sm:$0xff]   ;;  %1026 = vmatprep.subr.bf16.mxu0 %v1190_v0  ;;  %v1195_v5 = vld [vmem:[%s1637_s1 + $0xf0] sm:$0xff]   ;;  %v1199_v9 = vld [vmem:[%s1637_s1 + $0xe8] sm:$0xff]  }
   0x3   :  { %v1192_v2 = vld [vmem:[%s1637_s1 + $0x38] sm:$0xff]   ;;  %1108 = vmatprep.subr.bf16.mxu1 %v1191_v1  ;;  %v1196_v6 = vld [vmem:[%s1637_s1 + $0x30] sm:$0xff]   ;;  %v1200_v10 = vld [vmem:[%s1637_s1 + $0x28] sm:$0xff]  }
   0x4   :  { %v1193_v3 = vld [vmem:[%s1637_s1 + $0xb8] sm:$0xff]   ;;  %1027 = vmatpush3.bf16.msra.mxu0 %v1192_v2  ;;  %v1197_v7 = vld [vmem:[%s1637_s1 + $0xb0] sm:$0xff]   ;;  %v1201_v11 = vld [vmem:[%s1637_s1 + $0xa8] sm:$0xff]  }
   0x5   :  { %1109 = vmatpush3.bf16.msra.mxu1 %v1193_v3  ;;  %1028 = vmatprep.subr.bf16.mxu0 %v1194_v4  ;;  %v1202_v12 = vld [vmem:[%s1637_s1 + $0x60] sm:$0xff]   ;;  %v1206_v16 = vld [vmem:[%s1637_s1 + $0x58] sm:$0xff]   ;;  %v1210_v20 = vld [vmem:[%s1637_s1 + $0x50] sm:$0xff]  }
   0x6   :  { %1110 = vmatprep.subr.bf16.mxu1 %v1195_v5  ;;  %v1203_v13 = vld [vmem:[%s1637_s1 + $0xe0] sm:$0xff]   ;;  %v1207_v17 = vld [vmem:[%s1637_s1 + $0xd8] sm:$0xff]   ;;  %v1211_v21 = vld [vmem:[%s1637_s1 + $0xd0] sm:$0xff]  }
   0x7   :  { %v1204_v14 = vld [vmem:[%s1637_s1 + $0x20] sm:$0xff]   ;;  %v1208_v18 = vld [vmem:[%s1637_s1 + $0x18] sm:$0xff]   ;;  %v1212_v22 = vld [vmem:[%s1637_s1 + $0x10] sm:$0xff]  }
   0x8   :  { %1029 = vmatpush3.bf16.msra.mxu0 %v1196_v6  ;;  %v1205_v15 = vld [vmem:[%s1637_s1 + $0xa0] sm:$0xff]   ;;  %v1209_v19 = vld [vmem:[%s1637_s1 + $0x98] sm:$0xff]   ;;  %v1213_v23 = vld [vmem:[%s1637_s1 + $0x90] sm:$0xff]  }
   0x9   :  { %1111 = vmatpush3.bf16.msra.mxu1 %v1197_v7  ;;  %1030 = vmatprep.subr.bf16.mxu0 %v1198_v8  ;;  %v1214_v24 = vld [vmem:[%s1637_s1 + $0x48] sm:$0xff]   ;;  %v1218_v28 = vld [vmem:[%s1637_s1 + $0x40] sm:$0xff]  }
   0xa   :  { %1112 = vmatprep.subr.bf16.mxu1 %v1199_v9  ;;  %v1215_v25 = vld [vmem:[%s1637_s1 + $0xc8] sm:$0xff]   ;;  %v1219_v29 = vld [vmem:[%s1637_s1 + $0xc0] sm:$0xff]  }
   0xb   :  { %v1216_v26 = vld [vmem:[%s1637_s1 + $0x8] sm:$0xff]   ;;  %v1220_v30 = vld [vmem:[%s1637_s1] sm:$0xff]  }
   0xc   :  { %1031 = vmatpush3.bf16.msra.mxu0 %v1200_v10  ;;  %v1217_v27 = vld [vmem:[%s1637_s1 + $0x88] sm:$0xff]   ;;  %v1221_v31 = vld [vmem:[%s1637_s1 + $0x80] sm:$0xff]  }
   0xd   :  { %1113 = vmatpush3.bf16.msra.mxu1 %v1201_v11  ;;  %1032 = vmatprep.subr.bf16.mxu0 %v1202_v12  ;;  %v1222_v32 = vld [vmem:[%s1638_s0] ss:$16 sps:$4 sm:$0xff]   ;;  %v1224_v33 = vld [vmem:[%s1638_s0 + $0x4] ss:$16 sps:$4 sm:$0xff]   ;;  %v1225_v34 = vld [vmem:[%s1638_s0 + $0x8] ss:$16 sps:$4 sm:$0xff]  }
   0xe   :  { %1114 = vmatprep.subr.bf16.mxu1 %v1203_v13  ;;  %v1227_v35 = vld [vmem:[%s1638_s0 + $0xc] ss:$16 sps:$4 sm:$0xff]   ;;  %566 = vmatprep.mubr.bf16.mxu0 %v1224_v33  ;;  %v1228_v36 = vld [vmem:[%s1638_s0 + $0x24] ss:$16 sps:$4 sm:$0xff]   ;;  %v1232_v38 = vld [vmem:[%s1638_s0 + $0x20] ss:$16 sps:$4 sm:$0xff]  }
   0xf   :  { %686 = vmatprep.mubr.bf16.mxu1 %v1227_v35  ;;  %v1230_v37 = vld [vmem:[%s1638_s0 + $0x2c] ss:$16 sps:$4 sm:$0xff]   ;;  %v1233_v39 = vld [vmem:[%s1638_s0 + $0x28] ss:$16 sps:$4 sm:$0xff]   ;;  %v1234_v40 = vld [vmem:[%s1638_s0 + $0x44] ss:$16 sps:$4 sm:$0xff]  }
  0x10   :  { %1033 = vmatpush3.bf16.msra.mxu0 %v1204_v14  ;;  %v1236_v41 = vld [vmem:[%s1638_s0 + $0x4c] ss:$16 sps:$4 sm:$0xff]   ;;  %v1238_v42 = vld [vmem:[%s1638_s0 + $0x40] ss:$16 sps:$4 sm:$0xff]   ;;  %v1239_v43 = vld [vmem:[%s1638_s0 + $0x48] ss:$16 sps:$4 sm:$0xff]  }
  0x11   :  { %1115 = vmatpush3.bf16.msra.mxu1 %v1205_v15  ;;  %1034 = vmatprep.subr.bf16.mxu0 %v1206_v16  ;;  %v1240_v44 = vld [vmem:[%s1638_s0 + $0x64] ss:$16 sps:$4 sm:$0xff]   ;;  %v1242_v45 = vld [vmem:[%s1638_s0 + $0x6c] ss:$16 sps:$4 sm:$0xff]   ;;  %v1244_v46 = vld [vmem:[%s1638_s0 + $0x60] ss:$16 sps:$4 sm:$0xff]  }
  0x12   :  { %1116 = vmatprep.subr.bf16.mxu1 %v1207_v17  ;;  %v1245_v47 = vld [vmem:[%s1638_s0 + $0x68] ss:$16 sps:$4 sm:$0xff]   ;;  %v1246_v48 = vld [vmem:[%s1638_s0 + $0x84] ss:$16 sps:$4 sm:$0xff]   ;;  %v1248_v49 = vld [vmem:[%s1638_s0 + $0x8c] ss:$16 sps:$4 sm:$0xff]  }
  0x13   :  { %v1250_v50 = vld [vmem:[%s1638_s0 + $0x80] ss:$16 sps:$4 sm:$0xff]   ;;  %v1251_v51 = vld [vmem:[%s1638_s0 + $0x88] ss:$16 sps:$4 sm:$0xff]   ;;  %v1252_v52 = vld [vmem:[%s1638_s0 + $0xa4] ss:$16 sps:$4 sm:$0xff]  }
  0x14   :  { %1035 = vmatpush3.bf16.msra.mxu0 %v1208_v18  ;;  %v1254_v53 = vld [vmem:[%s1638_s0 + $0xac] ss:$16 sps:$4 sm:$0xff]   ;;  %v1256_v54 = vld [vmem:[%s1638_s0 + $0xa0] ss:$16 sps:$4 sm:$0xff]   ;;  %v1257_v55 = vld [vmem:[%s1638_s0 + $0xa8] ss:$16 sps:$4 sm:$0xff]  }
  0x15   :  { %1117 = vmatpush3.bf16.msra.mxu1 %v1209_v19  ;;  %1036 = vmatprep.subr.bf16.mxu0 %v1210_v20  ;;  %v1258_v56 = vld [vmem:[%s1638_s0 + $0xc4] ss:$16 sps:$4 sm:$0xff]   ;;  %v1260_v57 = vld [vmem:[%s1638_s0 + $0xcc] ss:$16 sps:$4 sm:$0xff]   ;;  %v1262_v58 = vld [vmem:[%s1638_s0 + $0xc0] ss:$16 sps:$4 sm:$0xff]  }
  0x16   :  { %1118 = vmatprep.subr.bf16.mxu1 %v1211_v21  ;;  %v1263_v59 = vld [vmem:[%s1638_s0 + $0xc8] ss:$16 sps:$4 sm:$0xff]   ;;  %v1264_v60 = vld [vmem:[%s1638_s0 + $0xe4] ss:$16 sps:$4 sm:$0xff]   ;;  %v1266_v61 = vld [vmem:[%s1638_s0 + $0xec] ss:$16 sps:$4 sm:$0xff]  }
  0x17   :  { %v1268_v62 = vld [vmem:[%s1638_s0 + $0xe0] ss:$16 sps:$4 sm:$0xff]   ;;  %v1269_v63 = vld [vmem:[%s1638_s0 + $0xe8] ss:$16 sps:$4 sm:$0xff]   ;;  %v1270_v0 = vld [vmem:[%s1638_s0 + $0x104] ss:$16 sps:$4 sm:$0xff]  }
  0x18   :  { %1037 = vmatpush3.bf16.msra.mxu0 %v1212_v22  ;;  %v1272_v1 = vld [vmem:[%s1638_s0 + $0x10c] ss:$16 sps:$4 sm:$0xff]   ;;  %v1274_v2 = vld [vmem:[%s1638_s0 + $0x100] ss:$16 sps:$4 sm:$0xff]   ;;  %v1275_v3 = vld [vmem:[%s1638_s0 + $0x108] ss:$16 sps:$4 sm:$0xff]  }
  0x19   :  { %1119 = vmatpush3.bf16.msra.mxu1 %v1213_v23  ;;  %1038 = vmatprep.subr.bf16.mxu0 %v1214_v24  ;;  %v1276_v4 = vld [vmem:[%s1638_s0 + $0x124] ss:$16 sps:$4 sm:$0xff]   ;;  %v1278_v5 = vld [vmem:[%s1638_s0 + $0x12c] ss:$16 sps:$4 sm:$0xff]   ;;  %v1280_v8 = vld [vmem:[%s1638_s0 + $0x120] ss:$16 sps:$4 sm:$0xff]  }
  0x1a   :  { %1120 = vmatprep.subr.bf16.mxu1 %v1215_v25  ;;  %v55_v6 = vld [vmem:[%s1638_s0 + $0x140] sm:$0x11]  ;;  %v56_v7 = vld [vmem:[%s1638_s0 + $0x148] sm:$0x11] }
  0x1b   :  { %v1281_v9 = vld [vmem:[%s1638_s0 + $0x128] ss:$16 sps:$4 sm:$0xff]   ;;  %v949_v10 = vcombine.high %v55_v6, %v55_v6  ;;  %v951_v11 = vcombine.high %v56_v7, %v56_v7  ;;  %v948_v12 = vcombine.low %v55_v6, %v55_v6  ;;  %v950_v13 = vcombine.low %v56_v7, %v56_v7  ;;  %v1531_v16 = vld [vmem:[%s1639_s2] ss:$0 sm:$0xff] }
  0x1c   :  { %1039 = vmatpush3.bf16.msra.mxu0 %v1216_v26 }
  0x1d   :  { %1121 = vmatpush3.bf16.msra.mxu1 %v1217_v27  ;;  %1040 = vmatprep.subr.bf16.mxu0 %v1218_v28 }
  0x1e   :  { %1122 = vmatprep.subr.bf16.mxu1 %v1219_v29 }
  0x20   :  { %1041 = vmatpush3.bf16.msra.mxu0 %v1220_v30 }
  0x21   :  { %1123 = vmatpush3.bf16.msra.mxu1 %v1221_v31 }
  0x23   :  { %567 = vmatmul.mubr.bf16.vlgmr.msra.gmra.mxu0 %v1222_v32 }
  0x24   :  { %687 = vmatmul.mubr.bf16.vlgmr.msra.gmra.mxu1 %v1225_v34  ;;  %574 = vmatprep.mubr.bf16.mxu0 %v1228_v36 }
  0x25   :  { %694 = vmatprep.mubr.bf16.mxu1 %v1230_v37 }
  0x2b   :  { %575 = vmatmul.mubr.bf16.gmra.mxu0 %v1232_v38 }
  0x2c   :  { %695 = vmatmul.mubr.bf16.gmra.mxu1 %v1233_v39  ;;  %582 = vmatprep.mubr.bf16.mxu0 %v1234_v40 }
  0x2d   :  { %702 = vmatprep.mubr.bf16.mxu1 %v1236_v41 }
  0x33   :  { %583 = vmatmul.mubr.bf16.gmra.mxu0 %v1238_v42 }
  0x34   :  { %703 = vmatmul.mubr.bf16.gmra.mxu1 %v1239_v43  ;;  %590 = vmatprep.mubr.bf16.mxu0 %v1240_v44 }
  0x35   :  { %710 = vmatprep.mubr.bf16.mxu1 %v1242_v45 }
  0x3b   :  { %591 = vmatmul.mubr.bf16.gmra.mxu0 %v1244_v46 }
  0x3c   :  { %711 = vmatmul.mubr.bf16.gmra.mxu1 %v1245_v47  ;;  %598 = vmatprep.mubr.bf16.mxu0 %v1246_v48 }
  0x3d   :  { %718 = vmatprep.mubr.bf16.mxu1 %v1248_v49 }
  0x43   :  { %599 = vmatmul.mubr.bf16.gmra.mxu0 %v1250_v50 }
  0x44   :  { %719 = vmatmul.mubr.bf16.gmra.mxu1 %v1251_v51  ;;  %606 = vmatprep.mubr.bf16.mxu0 %v1252_v52 }
  0x45   :  { %726 = vmatprep.mubr.bf16.mxu1 %v1254_v53 }
  0x4b   :  { %607 = vmatmul.mubr.bf16.gmra.mxu0 %v1256_v54 }
  0x4c   :  { %727 = vmatmul.mubr.bf16.gmra.mxu1 %v1257_v55  ;;  %614 = vmatprep.mubr.bf16.mxu0 %v1258_v56 }
  0x4d   :  { %734 = vmatprep.mubr.bf16.mxu1 %v1260_v57 }
  0x53   :  { %615 = vmatmul.mubr.bf16.gmra.mxu0 %v1262_v58 }
  0x54   :  { %735 = vmatmul.mubr.bf16.gmra.mxu1 %v1263_v59  ;;  %622 = vmatprep.mubr.bf16.mxu0 %v1264_v60 }
  0x55   :  { %742 = vmatprep.mubr.bf16.mxu1 %v1266_v61 }
  0x5b   :  { %623 = vmatmul.mubr.bf16.gmra.mxu0 %v1268_v62 }
  0x5c   :  { %743 = vmatmul.mubr.bf16.gmra.mxu1 %v1269_v63  ;;  %630 = vmatprep.mubr.bf16.mxu0 %v1270_v0 }
  0x5d   :  { %750 = vmatprep.mubr.bf16.mxu1 %v1272_v1 }
  0x63   :  { %631 = vmatmul.mubr.bf16.gmra.mxu0 %v1274_v2 }
  0x64   :  { %751 = vmatmul.mubr.bf16.gmra.mxu1 %v1275_v3  ;;  %638 = vmatprep.mubr.bf16.mxu0 %v1276_v4 }
  0x65   :  { %758 = vmatprep.mubr.bf16.mxu1 %v1278_v5 }
  0x6b   :  { %639 = vmatmul.mubr.bf16.gmra.mxu0 %v1280_v8 }
  0x6c   :  { %759 = vmatmul.mubr.bf16.gmra.mxu1 %v1281_v9  ;;  %646 = vmatprep.mubr.bf16.mxu0 %v949_v10 }
  0x6d   :  { %766 = vmatprep.mubr.bf16.mxu1 %v951_v11 }
  0x73   :  { %647 = vmatmul.mubr.bf16.gmra.mxu0 %v948_v12 }
  0x74   :  { %767 = vmatmul.mubr.bf16.gmra.mxu1 %v950_v13 }
  0xe3   :  { %v1042_v14 = vpop.f32.mrf.mxu0 }
  0xe4   :  { %v1124_v15 = vpop.f32.mrf.mxu1 }
  0xe5   :  { %v1043_v17 = vpop.f32.mrf.mxu0 }
  0xe6   :  { %v1044_v18 = vadd.f32 %v1043_v17, %v1042_v14  ;;  %v1125_v19 = vpop.f32.mrf.mxu1 }
  0xe7   :  { %v1045_v20 = vpop.f32.mrf.mxu0  ;;  %v1126_v22 = vadd.f32 %v1125_v19, %v1124_v15 }
  0xe8   :  { %v569_v21 = vadd.f32 %v1044_v18, %v1531_v16  ;;  %v1127_v23 = vpop.f32.mrf.mxu1 }
  0xe9   :  { %v1046_v24 = vpop.f32.mrf.mxu0 }
  0xea   :  { %v689_v25 = vadd.f32 %v1126_v22, %v569_v21  ;;  %v1047_v26 = vadd.f32 %v1046_v24, %v1045_v20  ;;  %v1128_v27 = vpop.f32.mrf.mxu1 }
  0xeb   :  { %v1048_v28 = vpop.f32.mrf.mxu0  ;;  %v1129_v31 = vadd.f32 %v1128_v27, %v1127_v23 }
  0xec   :  { %v774_v29 = vmax.f32 %v689_v25, 0.0  ;;  %v572_v30 = vadd.f32 %v1047_v26, %v1531_v16  ;;  %v1130_v32 = vpop.f32.mrf.mxu1 }
  0xed   :  { %v1049_v33 = vpop.f32.mrf.mxu0 }
  0xee   :  { %v1005_v34 = vpack.c.bf16 %v774_v29, %v774_v29  ;;  %v692_v35 = vadd.f32 %v1129_v31, %v572_v30  ;;  %v1050_v36 = vadd.f32 %v1049_v33, %v1048_v28  ;;  %v1131_v37 = vpop.f32.mrf.mxu1 }
  0xef   :  { %v1051_v38 = vpop.f32.mrf.mxu0  ;;  %v1132_v41 = vadd.f32 %v1131_v37, %v1130_v32 }
  0xf0   :  { %881 = vst.msk [vmem:[%s1640_s3] sm:$0xf] %vm880_vm0, %v1005_v34  ;;  %v775_v39 = vmax.f32 %v692_v35, 0.0  ;;  %v577_v40 = vadd.f32 %v1050_v36, %v1531_v16  ;;  %v1133_v42 = vpop.f32.mrf.mxu1 }
  0xf1   :  { %v1052_v43 = vpop.f32.mrf.mxu0 }
  0xf2   :  { %v1006_v44 = vpack.c.bf16 %v775_v39, %v775_v39  ;;  %v697_v45 = vadd.f32 %v1132_v41, %v577_v40  ;;  %v1053_v46 = vadd.f32 %v1052_v43, %v1051_v38  ;;  %v1134_v47 = vpop.f32.mrf.mxu1 }
  0xf3   :  { %v1054_v48 = vpop.f32.mrf.mxu0  ;;  %v1135_v51 = vadd.f32 %v1134_v47, %v1133_v42 }
  0xf4   :  { %882 = vst.msk [vmem:[%s1640_s3 + $0x4] sm:$0xf] %vm880_vm0, %v1006_v44  ;;  %v776_v49 = vmax.f32 %v697_v45, 0.0  ;;  %v580_v50 = vadd.f32 %v1053_v46, %v1531_v16  ;;  %v1136_v52 = vpop.f32.mrf.mxu1 }
  0xf5   :  { %v1055_v53 = vpop.f32.mrf.mxu0 }
  0xf6   :  { %v1007_v54 = vpack.c.bf16 %v776_v49, %v776_v49  ;;  %v700_v55 = vadd.f32 %v1135_v51, %v580_v50  ;;  %v1056_v56 = vadd.f32 %v1055_v53, %v1054_v48  ;;  %v1137_v57 = vpop.f32.mrf.mxu1 }
  0xf7   :  { %v1057_v58 = vpop.f32.mrf.mxu0  ;;  %v1138_v61 = vadd.f32 %v1137_v57, %v1136_v52 }
  0xf8   :  { %883 = vst.msk [vmem:[%s1640_s3 + $0x8] sm:$0xf] %vm880_vm0, %v1007_v54  ;;  %v777_v59 = vmax.f32 %v700_v55, 0.0  ;;  %v585_v60 = vadd.f32 %v1056_v56, %v1531_v16  ;;  %v1139_v62 = vpop.f32.mrf.mxu1 }
  0xf9   :  { %v1058_v63 = vpop.f32.mrf.mxu0 }
  0xfa   :  { %v1008_v0 = vpack.c.bf16 %v777_v59, %v777_v59  ;;  %v705_v1 = vadd.f32 %v1138_v61, %v585_v60  ;;  %v1059_v2 = vadd.f32 %v1058_v63, %v1057_v58  ;;  %v1140_v3 = vpop.f32.mrf.mxu1 }
  0xfb   :  { %v1060_v4 = vpop.f32.mrf.mxu0  ;;  %v1141_v7 = vadd.f32 %v1140_v3, %v1139_v62 }
  0xfc   :  { %884 = vst.msk [vmem:[%s1640_s3 + $0xc] sm:$0xf] %vm880_vm0, %v1008_v0  ;;  %v778_v5 = vmax.f32 %v705_v1, 0.0  ;;  %v588_v6 = vadd.f32 %v1059_v2, %v1531_v16  ;;  %v1142_v8 = vpop.f32.mrf.mxu1 }
  0xfd   :  { %v1061_v9 = vpop.f32.mrf.mxu0 }
  0xfe   :  { %v1009_v10 = vpack.c.bf16 %v778_v5, %v778_v5  ;;  %v708_v11 = vadd.f32 %v1141_v7, %v588_v6  ;;  %v1062_v12 = vadd.f32 %v1061_v9, %v1060_v4  ;;  %v1143_v13 = vpop.f32.mrf.mxu1 }
  0xff   :  { %v1063_v14 = vpop.f32.mrf.mxu0  ;;  %v1144_v18 = vadd.f32 %v1143_v13, %v1142_v8 }
 0x100   :  { %885 = vst.msk [vmem:[%s1640_s3 + $0x10] sm:$0xf] %vm880_vm0, %v1009_v10  ;;  %v779_v15 = vmax.f32 %v708_v11, 0.0  ;;  %v593_v17 = vadd.f32 %v1062_v12, %v1531_v16  ;;  %v1145_v19 = vpop.f32.mrf.mxu1 }
 0x101   :  { %v1064_v20 = vpop.f32.mrf.mxu0 }
 0x102   :  { %v1010_v21 = vpack.c.bf16 %v779_v15, %v779_v15  ;;  %v713_v22 = vadd.f32 %v1144_v18, %v593_v17  ;;  %v1065_v23 = vadd.f32 %v1064_v20, %v1063_v14  ;;  %v1146_v24 = vpop.f32.mrf.mxu1 }
 0x103   :  { %v1066_v25 = vpop.f32.mrf.mxu0  ;;  %v1147_v28 = vadd.f32 %v1146_v24, %v1145_v19 }
 0x104   :  { %886 = vst.msk [vmem:[%s1640_s3 + $0x14] sm:$0xf] %vm880_vm0, %v1010_v21  ;;  %v780_v26 = vmax.f32 %v713_v22, 0.0  ;;  %v596_v27 = vadd.f32 %v1065_v23, %v1531_v16  ;;  %v1148_v29 = vpop.f32.mrf.mxu1 }
 0x105   :  { %v1067_v30 = vpop.f32.mrf.mxu0 }
 0x106   :  { %v1011_v31 = vpack.c.bf16 %v780_v26, %v780_v26  ;;  %v716_v32 = vadd.f32 %v1147_v28, %v596_v27  ;;  %v1068_v33 = vadd.f32 %v1067_v30, %v1066_v25  ;;  %v1149_v34 = vpop.f32.mrf.mxu1 }
 0x107   :  { %v1069_v35 = vpop.f32.mrf.mxu0  ;;  %v1150_v38 = vadd.f32 %v1149_v34, %v1148_v29 }
 0x108   :  { %887 = vst.msk [vmem:[%s1640_s3 + $0x18] sm:$0xf] %vm880_vm0, %v1011_v31  ;;  %v781_v36 = vmax.f32 %v716_v32, 0.0  ;;  %v601_v37 = vadd.f32 %v1068_v33, %v1531_v16  ;;  %v1151_v39 = vpop.f32.mrf.mxu1 }
 0x109   :  { %v1070_v40 = vpop.f32.mrf.mxu0 }
 0x10a   :  { %v1012_v41 = vpack.c.bf16 %v781_v36, %v781_v36  ;;  %v721_v42 = vadd.f32 %v1150_v38, %v601_v37  ;;  %v1071_v43 = vadd.f32 %v1070_v40, %v1069_v35  ;;  %v1152_v44 = vpop.f32.mrf.mxu1 }
 0x10b   :  { %v1072_v45 = vpop.f32.mrf.mxu0  ;;  %v1153_v48 = vadd.f32 %v1152_v44, %v1151_v39 }
 0x10c   :  { %888 = vst.msk [vmem:[%s1640_s3 + $0x1c] sm:$0xf] %vm880_vm0, %v1012_v41  ;;  %v782_v46 = vmax.f32 %v721_v42, 0.0  ;;  %v604_v47 = vadd.f32 %v1071_v43, %v1531_v16  ;;  %v1154_v49 = vpop.f32.mrf.mxu1 }
 0x10d   :  { %v1073_v50 = vpop.f32.mrf.mxu0 }
 0x10e   :  { %v1013_v51 = vpack.c.bf16 %v782_v46, %v782_v46  ;;  %v724_v52 = vadd.f32 %v1153_v48, %v604_v47  ;;  %v1074_v53 = vadd.f32 %v1073_v50, %v1072_v45  ;;  %v1155_v54 = vpop.f32.mrf.mxu1 }
 0x10f   :  { %v1075_v55 = vpop.f32.mrf.mxu0  ;;  %v1156_v58 = vadd.f32 %v1155_v54, %v1154_v49 }
 0x110   :  { %889 = vst.msk [vmem:[%s1640_s3 + $0x20] sm:$0xf] %vm880_vm0, %v1013_v51  ;;  %v783_v56 = vmax.f32 %v724_v52, 0.0  ;;  %v609_v57 = vadd.f32 %v1074_v53, %v1531_v16  ;;  %v1157_v59 = vpop.f32.mrf.mxu1 }
 0x111   :  { %v1076_v60 = vpop.f32.mrf.mxu0 }
 0x112   :  { %v1014_v61 = vpack.c.bf16 %v783_v56, %v783_v56  ;;  %v729_v62 = vadd.f32 %v1156_v58, %v609_v57  ;;  %v1077_v63 = vadd.f32 %v1076_v60, %v1075_v55  ;;  %v1158_v0 = vpop.f32.mrf.mxu1 }
 0x113   :  { %v1078_v1 = vpop.f32.mrf.mxu0  ;;  %v1159_v4 = vadd.f32 %v1158_v0, %v1157_v59 }
 0x114   :  { %890 = vst.msk [vmem:[%s1640_s3 + $0x24] sm:$0xf] %vm880_vm0, %v1014_v61  ;;  %v784_v2 = vmax.f32 %v729_v62, 0.0  ;;  %v612_v3 = vadd.f32 %v1077_v63, %v1531_v16  ;;  %v1160_v5 = vpop.f32.mrf.mxu1 }
 0x115   :  { %v1079_v6 = vpop.f32.mrf.mxu0 }
 0x116   :  { %v1015_v7 = vpack.c.bf16 %v784_v2, %v784_v2  ;;  %v732_v8 = vadd.f32 %v1159_v4, %v612_v3  ;;  %v1080_v9 = vadd.f32 %v1079_v6, %v1078_v1  ;;  %v1161_v10 = vpop.f32.mrf.mxu1 }
 0x117   :  { %v1081_v11 = vpop.f32.mrf.mxu0  ;;  %v1162_v14 = vadd.f32 %v1161_v10, %v1160_v5 }
 0x118   :  { %891 = vst.msk [vmem:[%s1640_s3 + $0x28] sm:$0xf] %vm880_vm0, %v1015_v7  ;;  %v785_v12 = vmax.f32 %v732_v8, 0.0  ;;  %v617_v13 = vadd.f32 %v1080_v9, %v1531_v16  ;;  %v1163_v15 = vpop.f32.mrf.mxu1 }
 0x119   :  { %v1082_v17 = vpop.f32.mrf.mxu0 }
 0x11a   :  { %v1016_v18 = vpack.c.bf16 %v785_v12, %v785_v12  ;;  %v737_v19 = vadd.f32 %v1162_v14, %v617_v13  ;;  %v1083_v20 = vadd.f32 %v1082_v17, %v1081_v11  ;;  %v1164_v21 = vpop.f32.mrf.mxu1 }
 0x11b   :  { %v1084_v22 = vpop.f32.mrf.mxu0  ;;  %v1165_v25 = vadd.f32 %v1164_v21, %v1163_v15 }
 0x11c   :  { %892 = vst.msk [vmem:[%s1640_s3 + $0x2c] sm:$0xf] %vm880_vm0, %v1016_v18  ;;  %v786_v23 = vmax.f32 %v737_v19, 0.0  ;;  %v620_v24 = vadd.f32 %v1083_v20, %v1531_v16  ;;  %v1166_v26 = vpop.f32.mrf.mxu1 }
 0x11d   :  { %v1085_v27 = vpop.f32.mrf.mxu0 }
 0x11e   :  { %v1017_v28 = vpack.c.bf16 %v786_v23, %v786_v23  ;;  %v740_v29 = vadd.f32 %v1165_v25, %v620_v24  ;;  %v1086_v30 = vadd.f32 %v1085_v27, %v1084_v22  ;;  %v1167_v31 = vpop.f32.mrf.mxu1 }
 0x11f   :  { %v1087_v32 = vpop.f32.mrf.mxu0  ;;  %v1168_v35 = vadd.f32 %v1167_v31, %v1166_v26 }
 0x120   :  { %893 = vst.msk [vmem:[%s1640_s3 + $0x30] sm:$0xf] %vm880_vm0, %v1017_v28  ;;  %v787_v33 = vmax.f32 %v740_v29, 0.0  ;;  %v625_v34 = vadd.f32 %v1086_v30, %v1531_v16  ;;  %v1169_v36 = vpop.f32.mrf.mxu1 }
 0x121   :  { %v1088_v37 = vpop.f32.mrf.mxu0 }
 0x122   :  { %v1018_v38 = vpack.c.bf16 %v787_v33, %v787_v33  ;;  %v745_v39 = vadd.f32 %v1168_v35, %v625_v34  ;;  %v1089_v40 = vadd.f32 %v1088_v37, %v1087_v32  ;;  %v1170_v41 = vpop.f32.mrf.mxu1 }
 0x123   :  { %v1090_v42 = vpop.f32.mrf.mxu0  ;;  %v1171_v45 = vadd.f32 %v1170_v41, %v1169_v36 }
 0x124   :  { %894 = vst.msk [vmem:[%s1640_s3 + $0x34] sm:$0xf] %vm880_vm0, %v1018_v38  ;;  %v788_v43 = vmax.f32 %v745_v39, 0.0  ;;  %v628_v44 = vadd.f32 %v1089_v40, %v1531_v16  ;;  %v1172_v46 = vpop.f32.mrf.mxu1 }
 0x125   :  { %v1091_v47 = vpop.f32.mrf.mxu0 }
 0x126   :  { %v1019_v48 = vpack.c.bf16 %v788_v43, %v788_v43  ;;  %v748_v49 = vadd.f32 %v1171_v45, %v628_v44  ;;  %v1092_v50 = vadd.f32 %v1091_v47, %v1090_v42  ;;  %v1173_v51 = vpop.f32.mrf.mxu1 }
 0x127   :  { %v1093_v52 = vpop.f32.mrf.mxu0  ;;  %v1174_v55 = vadd.f32 %v1173_v51, %v1172_v46 }
 0x128   :  { %895 = vst.msk [vmem:[%s1640_s3 + $0x38] sm:$0xf] %vm880_vm0, %v1019_v48  ;;  %v789_v53 = vmax.f32 %v748_v49, 0.0  ;;  %v633_v54 = vadd.f32 %v1092_v50, %v1531_v16  ;;  %v1175_v56 = vpop.f32.mrf.mxu1 }
 0x129   :  { %v1094_v57 = vpop.f32.mrf.mxu0 }
 0x12a   :  { %v1020_v58 = vpack.c.bf16 %v789_v53, %v789_v53  ;;  %v753_v59 = vadd.f32 %v1174_v55, %v633_v54  ;;  %v1095_v60 = vadd.f32 %v1094_v57, %v1093_v52  ;;  %v1176_v61 = vpop.f32.mrf.mxu1 }
 0x12b   :  { %v1096_v62 = vpop.f32.mrf.mxu0  ;;  %v1177_v1 = vadd.f32 %v1176_v61, %v1175_v56 }
 0x12c   :  { %896 = vst.msk [vmem:[%s1640_s3 + $0x3c] sm:$0xf] %vm880_vm0, %v1020_v58  ;;  %v790_v63 = vmax.f32 %v753_v59, 0.0  ;;  %v636_v0 = vadd.f32 %v1095_v60, %v1531_v16  ;;  %v1178_v2 = vpop.f32.mrf.mxu1 }
 0x12d   :  { %v1097_v3 = vpop.f32.mrf.mxu0 }
 0x12e   :  { %v1021_v4 = vpack.c.bf16 %v790_v63, %v790_v63  ;;  %v756_v5 = vadd.f32 %v1177_v1, %v636_v0  ;;  %v1098_v6 = vadd.f32 %v1097_v3, %v1096_v62  ;;  %v1179_v7 = vpop.f32.mrf.mxu1 }
 0x12f   :  { %v1099_v8 = vpop.f32.mrf.mxu0  ;;  %v1180_v11 = vadd.f32 %v1179_v7, %v1178_v2 }
 0x130   :  { %897 = vst.msk [vmem:[%s1640_s3 + $0x40] sm:$0xf] %vm880_vm0, %v1021_v4  ;;  %v791_v9 = vmax.f32 %v756_v5, 0.0  ;;  %v641_v10 = vadd.f32 %v1098_v6, %v1531_v16  ;;  %v1181_v12 = vpop.f32.mrf.mxu1 }
 0x131   :  { %v1100_v13 = vpop.f32.mrf.mxu0 }
 0x132   :  { %v1022_v14 = vpack.c.bf16 %v791_v9, %v791_v9  ;;  %v761_v15 = vadd.f32 %v1180_v11, %v641_v10  ;;  %v1101_v17 = vadd.f32 %v1100_v13, %v1099_v8  ;;  %v1182_v18 = vpop.f32.mrf.mxu1 }
 0x133   :  { %v1102_v19 = vpop.f32.mrf.mxu0  ;;  %v1183_v22 = vadd.f32 %v1182_v18, %v1181_v12 }
 0x134   :  { %898 = vst.msk [vmem:[%s1640_s3 + $0x44] sm:$0xf] %vm880_vm0, %v1022_v14  ;;  %v792_v20 = vmax.f32 %v761_v15, 0.0  ;;  %v644_v21 = vadd.f32 %v1101_v17, %v1531_v16  ;;  %v1184_v23 = vpop.f32.mrf.mxu1 }
 0x135   :  { %v1103_v24 = vpop.f32.mrf.mxu0 }
 0x136   :  { %v1023_v25 = vpack.c.bf16 %v792_v20, %v792_v20  ;;  %v764_v26 = vadd.f32 %v1183_v22, %v644_v21  ;;  %v1104_v27 = vadd.f32 %v1103_v24, %v1102_v19  ;;  %v1185_v28 = vpop.f32.mrf.mxu1 }
 0x137   :  { %v1105_v29 = vpop.f32.mrf.mxu0  ;;  %v1186_v32 = vadd.f32 %v1185_v28, %v1184_v23 }
 0x138   :  { %899 = vst.msk [vmem:[%s1640_s3 + $0x48] sm:$0xf] %vm880_vm0, %v1023_v25  ;;  %v793_v30 = vmax.f32 %v764_v26, 0.0  ;;  %v649_v31 = vadd.f32 %v1104_v27, %v1531_v16  ;;  %v1187_v33 = vpop.f32.mrf.mxu1 }
 0x139   :  { %v1106_v34 = vpop.f32.mrf.mxu0 }
 0x13a   :  { %v1024_v35 = vpack.c.bf16 %v793_v30, %v793_v30  ;;  %v769_v36 = vadd.f32 %v1186_v32, %v649_v31  ;;  %v1188_v37 = vpop.f32.mrf.mxu1 }
 0x13c   :  { %900 = vst.msk [vmem:[%s1640_s3 + $0x4c] sm:$0xf] %vm880_vm0, %v1024_v35  ;;  %v794_v38 = vmax.f32 %v769_v36, 0.0 }
 0x13e   :  { %v1025_v39 = vpack.c.bf16 %v794_v38, %v794_v38 }
 0x140   :  { %902 = vst.msk [vmem:[%s1640_s3 + $0x50] sm:$0x1] %vm901_vm1, %v1025_v39 }

// kernel: cov_net_forward.6
= control target key start
LH: loop header
LB: loop body
LE: loop exit
PB: predicated region body
PF: predicated region fallthrough
CT: control target
= control target key end

     0   :  { %v1248_v34 = vmov 0.0   ;;  %vm1249_vm0 = vmmov 0   ;;  %vm516_vm1 = vcmask 523264   ;;  %vm868_vm2 = vcmask 519168   ;;  %s1647_s1 = inlined_call_operand.vmem [shape: bf16[576,64], index: 1, kind: input, shape index: {}]   ;;  %s1648_s0 = inlined_call_operand.vmem [shape: bf16[98,576], index: 0, kind: input, shape index: {}]   ;;  %s1649_s2 = inlined_call_operand.vmem [shape: f32[1,64], index: 2, kind: input, shape index: {}]   ;;  %s1650_s3 = inlined_call_operand.vmem [shape: bf16[98,64], index: 3, kind: output, shape index: {}]  }
   0x1   :  { %v1165_v0 = vld [vmem:[%s1647_s1 + $0x78] sm:$0xff]   ;;  %v1169_v4 = vld [vmem:[%s1647_s1 + $0x70] sm:$0xff]   ;;  %v1173_v8 = vld [vmem:[%s1647_s1 + $0x68] sm:$0xff]   ;;  %vm881_vm3 = vcmask 516096  }
   0x2   :  { %v1166_v1 = vld [vmem:[%s1647_s1 + $0xf8] sm:$0xff]   ;;  %992 = vmatprep.subr.bf16.mxu0 %v1165_v0  ;;  %v1170_v5 = vld [vmem:[%s1647_s1 + $0xf0] sm:$0xff]   ;;  %v1174_v9 = vld [vmem:[%s1647_s1 + $0xe8] sm:$0xff]  }
   0x3   :  { %v1167_v2 = vld [vmem:[%s1647_s1 + $0x38] sm:$0xff]   ;;  %1050 = vmatprep.subr.bf16.mxu1 %v1166_v1  ;;  %v1171_v6 = vld [vmem:[%s1647_s1 + $0x30] sm:$0xff]   ;;  %v1175_v10 = vld [vmem:[%s1647_s1 + $0x28] sm:$0xff]  }
   0x4   :  { %v1168_v3 = vld [vmem:[%s1647_s1 + $0xb8] sm:$0xff]   ;;  %993 = vmatpush3.bf16.msra.mxu0 %v1167_v2  ;;  %v1172_v7 = vld [vmem:[%s1647_s1 + $0xb0] sm:$0xff]   ;;  %v1176_v11 = vld [vmem:[%s1647_s1 + $0xa8] sm:$0xff]  }
   0x5   :  { %1051 = vmatpush3.bf16.msra.mxu1 %v1168_v3  ;;  %994 = vmatprep.subr.bf16.mxu0 %v1169_v4  ;;  %v1177_v12 = vld [vmem:[%s1647_s1 + $0x60] sm:$0xff]   ;;  %v1181_v16 = vld [vmem:[%s1647_s1 + $0x58] sm:$0xff]   ;;  %v1185_v20 = vld [vmem:[%s1647_s1 + $0x50] sm:$0xff]  }
   0x6   :  { %1052 = vmatprep.subr.bf16.mxu1 %v1170_v5  ;;  %v1178_v13 = vld [vmem:[%s1647_s1 + $0xe0] sm:$0xff]   ;;  %v1182_v17 = vld [vmem:[%s1647_s1 + $0xd8] sm:$0xff]   ;;  %v1186_v21 = vld [vmem:[%s1647_s1 + $0xd0] sm:$0xff]  }
   0x7   :  { %v1179_v14 = vld [vmem:[%s1647_s1 + $0x20] sm:$0xff]   ;;  %v1183_v18 = vld [vmem:[%s1647_s1 + $0x18] sm:$0xff]   ;;  %v1187_v22 = vld [vmem:[%s1647_s1 + $0x10] sm:$0xff]  }
   0x8   :  { %995 = vmatpush3.bf16.msra.mxu0 %v1171_v6  ;;  %v1180_v15 = vld [vmem:[%s1647_s1 + $0xa0] sm:$0xff]   ;;  %v1184_v19 = vld [vmem:[%s1647_s1 + $0x98] sm:$0xff]   ;;  %v1188_v23 = vld [vmem:[%s1647_s1 + $0x90] sm:$0xff]  }
   0x9   :  { %1053 = vmatpush3.bf16.msra.mxu1 %v1172_v7  ;;  %996 = vmatprep.subr.bf16.mxu0 %v1173_v8  ;;  %v1189_v24 = vld [vmem:[%s1647_s1 + $0x48] sm:$0xff]   ;;  %v1193_v28 = vld [vmem:[%s1647_s1 + $0x40] sm:$0xff]   ;;  %v1203_v37 = vld [vmem:[%s1647_s1 + $0x118] sm:$0xff]  }
   0xa   :  { %1054 = vmatprep.subr.bf16.mxu1 %v1174_v9  ;;  %v1190_v25 = vld [vmem:[%s1647_s1 + $0xc8] sm:$0xff]   ;;  %v1194_v29 = vld [vmem:[%s1647_s1 + $0xc0] sm:$0xff]   ;;  %v1214_v43 = vld [vmem:[%s1647_s1 + $0x110] sm:$0xff]  }
   0xb   :  { %v1191_v26 = vld [vmem:[%s1647_s1 + $0x8] sm:$0xff]   ;;  %v1195_v30 = vld [vmem:[%s1647_s1] sm:$0xff]   ;;  %v1212_v44 = vld [vmem:[%s1648_s0 + $0x5c] ss:$20 sps:$4 sm:$0xff]  }
   0xc   :  { %997 = vmatpush3.bf16.msra.mxu0 %v1175_v10  ;;  %v1192_v27 = vld [vmem:[%s1647_s1 + $0x88] sm:$0xff]   ;;  %v1196_v31 = vld [vmem:[%s1647_s1 + $0x80] sm:$0xff]   ;;  %v1217_v48 = vld [vmem:[%s1648_s0 + $0x7c] ss:$20 sps:$4 sm:$0xff]  }
   0xd   :  { %1055 = vmatpush3.bf16.msra.mxu1 %v1176_v11  ;;  %998 = vmatprep.subr.bf16.mxu0 %v1177_v12  ;;  %v1197_v32 = vld [vmem:[%s1648_s0] ss:$20 sps:$4 sm:$0xff]   ;;  %v1199_v33 = vld [vmem:[%s1648_s0 + $0x4] ss:$20 sps:$4 sm:$0xff]   ;;  %v1200_v35 = vld [vmem:[%s1648_s0 + $0x8] ss:$20 sps:$4 sm:$0xff]  }
   0xe   :  { %1056 = vmatprep.subr.bf16.mxu1 %v1178_v13  ;;  %v1202_v36 = vld [vmem:[%s1648_s0 + $0xc] ss:$20 sps:$4 sm:$0xff]   ;;  %570 = vmatprep.mubr.bf16.mxu0 %v1199_v33  ;;  %v1206_v39 = vld [vmem:[%s1648_s0 + $0x34] ss:$20 sps:$4 sm:$0xff]   ;;  %v1209_v41 = vld [vmem:[%s1648_s0 + $0x30] ss:$20 sps:$4 sm:$0xff]  }
   0xf   :  { %658 = vmatprep.mubr.bf16.mxu1 %v1202_v36  ;;  %v1204_v38 = vld [vmem:[%s1648_s0 + $0x2c] ss:$20 sps:$4 sm:$0xff]   ;;  %v1208_v40 = vld [vmem:[%s1648_s0 + $0x28] ss:$20 sps:$4 sm:$0xff]   ;;  %v1215_v46 = vld [vmem:[%s1648_s0 + $0x50] ss:$20 sps:$4 sm:$0xff]  }
  0x10   :  { %999 = vmatpush3.bf16.msra.mxu0 %v1179_v14  ;;  %v1210_v42 = vld [vmem:[%s1648_s0 + $0x54] ss:$20 sps:$4 sm:$0xff]   ;;  %v1216_v47 = vld [vmem:[%s1648_s0 + $0x58] ss:$20 sps:$4 sm:$0xff]   ;;  %v1236_v50 = vld [vmem:[%s1647_s1 + $0x100] sm:$0xff]  }
  0x11   :  { %1057 = vmatpush3.bf16.msra.mxu1 %v1180_v15  ;;  %1000 = vmatprep.subr.bf16.mxu0 %v1181_v16  ;;  %v1223_v45 = vld [vmem:[%s1647_s1 + $0x108] sm:$0xff]   ;;  %v1219_v49 = vld [vmem:[%s1648_s0 + $0x84] ss:$20 sps:$4 sm:$0xff]   ;;  %v1222_v52 = vld [vmem:[%s1648_s0 + $0x80] ss:$20 sps:$4 sm:$0xff]  }
  0x12   :  { %1058 = vmatprep.subr.bf16.mxu1 %v1182_v17  ;;  %v1221_v51 = vld [vmem:[%s1648_s0 + $0x78] ss:$20 sps:$4 sm:$0xff]   ;;  %v1228_v55 = vld [vmem:[%s1648_s0 + $0xa0] ss:$20 sps:$4 sm:$0xff]   ;;  %v1229_v56 = vld [vmem:[%s1648_s0 + $0xa8] ss:$20 sps:$4 sm:$0xff]  }
  0x13   :  { %v1224_v53 = vld [vmem:[%s1648_s0 + $0xa4] ss:$20 sps:$4 sm:$0xff]   ;;  %v1226_v54 = vld [vmem:[%s1648_s0 + $0xac] ss:$20 sps:$4 sm:$0xff]   ;;  %v1232_v58 = vld [vmem:[%s1648_s0 + $0xd4] ss:$20 sps:$4 sm:$0xff]  }
  0x14   :  { %1001 = vmatpush3.bf16.msra.mxu0 %v1183_v18  ;;  %v1230_v57 = vld [vmem:[%s1648_s0 + $0xcc] ss:$20 sps:$4 sm:$0xff]   ;;  %v51_v59 = vld [vmem:[%s1648_s0 + $0xf0] sm:$0x11]  ;;  %v52_v60 = vld [vmem:[%s1648_s0 + $0xf8] sm:$0x11] }
  0x15   :  { %1059 = vmatpush3.bf16.msra.mxu1 %v1184_v19  ;;  %1002 = vmatprep.subr.bf16.mxu0 %v1185_v20  ;;  %v1234_v61 = vld [vmem:[%s1648_s0 + $0xc8] ss:$20 sps:$4 sm:$0xff]   ;;  %v1235_v62 = vld [vmem:[%s1648_s0 + $0xd0] ss:$20 sps:$4 sm:$0xff]   ;;  %v919_v63 = vcombine.high %v51_v59, %v51_v59  ;;  %v921_v0 = vcombine.high %v52_v60, %v52_v60  ;;  %v918_v1 = vcombine.low %v51_v59, %v51_v59  ;;  %v1243_v5 = vld [vmem:[%s1648_s0 + $0x38] ss:$20 sps:$4 sm:$0xff]  }
  0x16   :  { %1060 = vmatprep.subr.bf16.mxu1 %v1186_v21  ;;  %v920_v2 = vcombine.low %v52_v60, %v52_v60  ;;  %v1241_v3 = vld [vmem:[%s1648_s0 + $0x10] ss:$20 sps:$4 sm:$0xff]   ;;  %v1244_v6 = vld [vmem:[%s1648_s0 + $0xd8] ss:$20 sps:$4 sm:$0xff]   ;;  %v1245_v7 = vld [vmem:[%s1648_s0 + $0x60] ss:$20 sps:$4 sm:$0xff]  }
  0x17   :  { %v1242_v4 = vld [vmem:[%s1648_s0 + $0xb0] ss:$20 sps:$4 sm:$0xff]   ;;  %v1246_v8 = vld [vmem:[%s1648_s0 + $0x100] ss:$0 sps:$4 sm:$0x11]  }
  0x18   :  { %1003 = vmatpush3.bf16.msra.mxu0 %v1187_v22  ;;  %v1247_v9 = vld [vmem:[%s1648_s0 + $0x88] ss:$20 sps:$4 sm:$0xff]   ;;  %v1553_v59 = vld [vmem:[%s1649_s2] ss:$0 sm:$0xff] }
  0x19   :  { %1061 = vmatpush3.bf16.msra.mxu1 %v1188_v23  ;;  %1004 = vmatprep.subr.bf16.mxu0 %v1189_v24 }
  0x1a   :  { %1062 = vmatprep.subr.bf16.mxu1 %v1190_v25 }
  0x1c   :  { %1005 = vmatpush3.bf16.msra.mxu0 %v1191_v26 }
  0x1d   :  { %1063 = vmatpush3.bf16.msra.mxu1 %v1192_v27  ;;  %1006 = vmatprep.subr.bf16.mxu0 %v1193_v28 }
  0x1e   :  { %1064 = vmatprep.subr.bf16.mxu1 %v1194_v29 }
  0x20   :  { %1007 = vmatpush3.bf16.msra.mxu0 %v1195_v30 }
  0x21   :  { %1065 = vmatpush3.bf16.msra.mxu1 %v1196_v31  ;;  %1119 = vmatprep.subr.bf16.mxu0 %v1248_v34 }
  0x22   :  { %1155 = vmatprep.subr.bf16.mxu1 %v1248_v34 }
  0x23   :  { %571 = vmatmul.mubr.bf16.vlgmr.msra.gmra.mxu0 %v1197_v32 }
  0x24   :  { %659 = vmatmul.mubr.bf16.vlgmr.msra.gmra.mxu1 %v1200_v35  ;;  %1120 = vmatpush3.bf16.msra.mxu0 %v1203_v37 }
  0x25   :  { %578 = vmatprep.mubr.bf16.mxu0 %v1204_v38  ;;  %1159 = vmatpush3.bf16.msra.mxu1 %v1203_v37 }
  0x26   :  { %666 = vmatprep.mubr.bf16.mxu1 %v1206_v39  ;;  %1121 = vmatprep.subr.bf16.mxu0 %v1248_v34 }
  0x27   :  { %1156 = vmatprep.subr.bf16.mxu1 %v1248_v34 }
  0x28   :  { %1122 = vmatpush3.bf16.msra.mxu0 %v1214_v43 }
  0x29   :  { %1160 = vmatpush3.bf16.msra.mxu1 %v1214_v43  ;;  %1123 = vmatprep.subr.bf16.mxu0 %v1248_v34 }
  0x2a   :  { %1157 = vmatprep.subr.bf16.mxu1 %v1248_v34 }
  0x2b   :  { %579 = vmatmul.mubr.bf16.gmra.mxu0 %v1208_v40 }
  0x2c   :  { %667 = vmatmul.mubr.bf16.gmra.mxu1 %v1209_v41  ;;  %586 = vmatprep.mubr.bf16.mxu0 %v1210_v42 }
  0x2d   :  { %674 = vmatprep.mubr.bf16.mxu1 %v1212_v44  ;;  %1124 = vmatpush3.bf16.msra.mxu0 %v1223_v45 }
  0x2e   :  { %1161 = vmatpush3.bf16.msra.mxu1 %v1223_v45  ;;  %1125 = vmatprep.subr.bf16.mxu0 %v1248_v34 }
  0x2f   :  { %1158 = vmatprep.subr.bf16.mxu1 %v1248_v34 }
  0x31   :  { %1126 = vmatpush3.bf16.msra.mxu0 %v1236_v50 }
  0x32   :  { %1162 = vmatpush3.bf16.msra.mxu1 %v1236_v50 }
  0x33   :  { %587 = vmatmul.mubr.bf16.gmra.mxu0 %v1215_v46 }
  0x34   :  { %675 = vmatmul.mubr.bf16.gmra.mxu1 %v1216_v47  ;;  %594 = vmatprep.mubr.bf16.mxu0 %v1217_v48 }
  0x35   :  { %682 = vmatprep.mubr.bf16.mxu1 %v1219_v49 }
  0x3b   :  { %595 = vmatmul.mubr.bf16.gmra.mxu0 %v1221_v51 }
  0x3c   :  { %683 = vmatmul.mubr.bf16.gmra.mxu1 %v1222_v52  ;;  %602 = vmatprep.mubr.bf16.mxu0 %v1224_v53 }
  0x3d   :  { %690 = vmatprep.mubr.bf16.mxu1 %v1226_v54 }
  0x43   :  { %603 = vmatmul.mubr.bf16.gmra.mxu0 %v1228_v55 }
  0x44   :  { %691 = vmatmul.mubr.bf16.gmra.mxu1 %v1229_v56  ;;  %610 = vmatprep.mubr.bf16.mxu0 %v1230_v57 }
  0x45   :  { %698 = vmatprep.mubr.bf16.mxu1 %v1232_v58 }
  0x4b   :  { %611 = vmatmul.mubr.bf16.gmra.mxu0 %v1234_v61 }
  0x4c   :  { %699 = vmatmul.mubr.bf16.gmra.mxu1 %v1235_v62  ;;  %618 = vmatprep.mubr.bf16.mxu0 %v919_v63 }
  0x4d   :  { %706 = vmatprep.mubr.bf16.mxu1 %v921_v0 }
  0x53   :  { %619 = vmatmul.mubr.bf16.gmra.mxu0 %v918_v1 }
  0x54   :  { %707 = vmatmul.mubr.bf16.gmra.mxu1 %v920_v2  ;;  %1127 = vmatprep.mubr.msk.bf16.mxu0 %vm1249_vm0, %v1248_v34 }
  0x55   :  { %1143 = vmatprep.mubr.msk.bf16.mxu1 %vm1249_vm0, %v1248_v34 }
  0x5b   :  { %1128 = vmatmul.mubr.msk.bf16.vlgmr.msra.gmra.mxu0 %vm516_vm1, %v1241_v3 }
  0x5c   :  { %1144 = vmatmul.mubr.msk.bf16.vlgmr.msra.gmra.mxu1 %vm516_vm1, %v1242_v4  ;;  %1131 = vmatprep.mubr.msk.bf16.mxu0 %vm1249_vm0, %v1248_v34 }
  0x5d   :  { %1147 = vmatprep.mubr.msk.bf16.mxu1 %vm1249_vm0, %v1248_v34 }
  0x63   :  { %1132 = vmatmul.mubr.msk.bf16.gmra.mxu0 %vm516_vm1, %v1243_v5 }
  0x64   :  { %1148 = vmatmul.mubr.msk.bf16.gmra.mxu1 %vm516_vm1, %v1244_v6  ;;  %1135 = vmatprep.mubr.msk.bf16.mxu0 %vm1249_vm0, %v1248_v34 }
  0x65   :  { %1151 = vmatprep.mubr.msk.bf16.mxu1 %vm1249_vm0, %v1248_v34 }
  0x6b   :  { %1136 = vmatmul.mubr.msk.bf16.gmra.mxu0 %vm516_vm1, %v1245_v7 }
  0x6c   :  { %1152 = vmatmul.mubr.msk.bf16.gmra.mxu1 %vm516_vm1, %v1246_v8  ;;  %1139 = vmatprep.mubr.msk.bf16.mxu0 %vm1249_vm0, %v1248_v34 }
  0x73   :  { %1140 = vmatmul.mubr.msk.bf16.gmra.mxu0 %vm516_vm1, %v1247_v9 }
  0xe3   :  { %v1008_v10 = vpop.f32.mrf.mxu0 }
  0xe4   :  { %v1066_v11 = vpop.f32.mrf.mxu1 }
  0xe5   :  { %v1009_v12 = vpop.f32.mrf.mxu0 }
  0xe6   :  { %v1067_v13 = vpop.f32.mrf.mxu1  ;;  %v1010_v57 = vadd.f32 %v1009_v12, %v1008_v10 }
  0xe7   :  { %v1011_v14 = vpop.f32.mrf.mxu0  ;;  %v1068_v2 = vadd.f32 %v1067_v13, %v1066_v11 }
  0xe8   :  { %v1069_v15 = vpop.f32.mrf.mxu1  ;;  %v573_v1 = vadd.f32 %v1010_v57, %v1553_v59 }
  0xe9   :  { %v1012_v16 = vpop.f32.mrf.mxu0 }
  0xea   :  { %v1070_v17 = vpop.f32.mrf.mxu1  ;;  %v1013_v63 = vadd.f32 %v1012_v16, %v1011_v14  ;;  %v661_v14 = vadd.f32 %v1068_v2, %v573_v1 }
  0xeb   :  { %v1014_v18 = vpop.f32.mrf.mxu0  ;;  %v1071_v10 = vadd.f32 %v1070_v17, %v1069_v15 }
  0xec   :  { %v1506_v19 = vpop.f32.mrf.mxu1  ;;  %v576_v9 = vadd.f32 %v1013_v63, %v1553_v59 }
  0xed   :  { %v1015_v20 = vpop.f32.mrf.mxu0 }
  0xee   :  { %v1508_v21 = vpop.f32.mrf.mxu1  ;;  %v1016_v12 = vadd.f32 %v1015_v20, %v1014_v18  ;;  %v664_v15 = vadd.f32 %v1071_v10, %v576_v9 }
  0xef   :  { %v1510_v22 = vpop.f32.mrf.mxu0 }
  0xf0   :  { %v1512_v23 = vpop.f32.mrf.mxu1 }
  0xf1   :  { %v1514_v24 = vpop.f32.mrf.mxu0 }
  0xf2   :  { %v1516_v25 = vpop.f32.mrf.mxu1  ;;  %v1019_v17 = vadd.f32 %v1514_v24, %v1510_v22 }
  0xf3   :  { %v1518_v26 = vpop.f32.mrf.mxu0 }
  0xf4   :  { %v1520_v27 = vpop.f32.mrf.mxu1  ;;  %v584_v24 = vadd.f32 %v1019_v17, %v1553_v59 }
  0xf5   :  { %v1522_v28 = vpop.f32.mrf.mxu0 }
  0xf6   :  { %v1524_v29 = vpop.f32.mrf.mxu1 }
  0xf7   :  { %v1526_v30 = vpop.f32.mrf.mxu0 }
  0xf8   :  { %v1528_v31 = vpop.f32.mrf.mxu1 }
  0xf9   :  { %v1530_v32 = vpop.f32.mrf.mxu0 }
  0xfa   :  { %v1532_v33 = vpop.f32.mrf.mxu1 }
  0xfb   :  { %v1534_v34 = vpop.f32.mrf.mxu0 }
  0xfc   :  { %v1536_v35 = vpop.f32.mrf.mxu1 }
  0xfd   :  { %v1538_v36 = vpop.f32.mrf.mxu0 }
  0xfe   :  { %v1540_v37 = vpop.f32.mrf.mxu1 }
  0xff   :  { %v1542_v38 = vpop.f32.mrf.mxu0 }
 0x100   :  { %v1544_v39 = vpop.f32.mrf.mxu1 }
 0x101   :  { %1651 = vst [vmem:[#allocation2_spill] sm:$0xff] %v1544_v39  ;;  %v1546_v40 = vpop.f32.mrf.mxu0 }
 0x102   :  { %1652 = vst [vmem:[#allocation3_spill] sm:$0xff] %v1546_v40  ;;  %v1548_v41 = vpop.f32.mrf.mxu1 }
 0x103   :  { %1653 = vst [vmem:[#allocation4_spill] sm:$0xff] %v1548_v41  ;;  %v1032_v42 = vpop.f32.mrf.mxu0 }
 0x104   :  { %v1090_v43 = vpop.f32.mrf.mxu1 }
 0x105   :  { %v1033_v44 = vpop.f32.mrf.mxu0 }
 0x106   :  { %v1091_v45 = vpop.f32.mrf.mxu1  ;;  %v1034_v60 = vadd.f32 %v1033_v44, %v1032_v42 }
 0x107   :  { %v1035_v46 = vpop.f32.mrf.mxu0  ;;  %v1092_v5 = vadd.f32 %v1091_v45, %v1090_v43  ;;  %v581_v43 = vadd.f32 %v1016_v12, %v1553_v59  ;;  %v1074_v45 = vadd.f32 %v1508_v21, %v1506_v19  ;;  %v1077_v19 = vadd.f32 %v1516_v25, %v1512_v23 }
 0x108   :  { %v1093_v47 = vpop.f32.mrf.mxu1  ;;  %v605_v4 = vadd.f32 %v1034_v60, %v1553_v59 }
 0x109   :  { %v1036_v48 = vpop.f32.mrf.mxu0  ;;  %v669_v22 = vadd.f32 %v1074_v45, %v581_v43 }
 0x10a   :  { %v1094_v49 = vpop.f32.mrf.mxu1  ;;  %v1037_v6 = vadd.f32 %v1036_v48, %v1035_v46  ;;  %v693_v13 = vadd.f32 %v1092_v5, %v605_v4 }
 0x10b   :  { %v1038_v50 = vpop.f32.mrf.mxu0  ;;  %v1095_v57 = vadd.f32 %v1094_v49, %v1093_v47 }
 0x10c   :  { %v1096_v51 = vpop.f32.mrf.mxu1  ;;  %v608_v16 = vadd.f32 %v1037_v6, %v1553_v59 }
 0x10d   :  { %v1039_v52 = vpop.f32.mrf.mxu0 }
 0x10e   :  { %v1097_v53 = vpop.f32.mrf.mxu1  ;;  %v1040_v44 = vadd.f32 %v1039_v52, %v1038_v50  ;;  %v696_v60 = vadd.f32 %v1095_v57, %v608_v16 }
 0x10f   :  { %v1041_v54 = vpop.f32.mrf.mxu0  ;;  %v1098_v20 = vadd.f32 %v1097_v53, %v1096_v51 }
 0x110   :  { %v1099_v55 = vpop.f32.mrf.mxu1  ;;  %v613_v18 = vadd.f32 %v1040_v44, %v1553_v59 }
 0x111   :  { %v1042_v56 = vpop.f32.mrf.mxu0 }
 0x112   :  { %v1100_v58 = vpop.f32.mrf.mxu1  ;;  %v1043_v49 = vadd.f32 %v1042_v56, %v1041_v54  ;;  %v701_v54 = vadd.f32 %v1098_v20, %v613_v18 }
 0x113   :  { %v1044_v61 = vpop.f32.mrf.mxu0  ;;  %v1101_v23 = vadd.f32 %v1100_v58, %v1099_v55  ;;  %v1080_v55 = vadd.f32 %v1524_v29, %v1520_v27 }
 0x114   :  { %v1555_v62 = vpop.f32.mrf.mxu1  ;;  %v616_v56 = vadd.f32 %v1043_v49, %v1553_v59 }
 0x115   :  { %v1045_v0 = vpop.f32.mrf.mxu0 }
 0x116   :  { %v1558_v3 = vpop.f32.mrf.mxu1  ;;  %v1046_v25 = vadd.f32 %v1045_v0, %v1044_v61  ;;  %v672_v0 = vadd.f32 %v1077_v19, %v584_v24  ;;  %v704_v29 = vadd.f32 %v1101_v23, %v616_v56  ;;  %v1655_v24 = vld [vmem:[#allocation2_spill] sm:$0xff] }
 0x117   :  { %v1047_v7 = vpop.f32.mrf.mxu0 }
 0x118   :  { %v1105_v8 = vpop.f32.mrf.mxu1  ;;  %v621_v44 = vadd.f32 %v1046_v25, %v1553_v59 }
 0x119   :  { %v1048_v42 = vpop.f32.mrf.mxu0  ;;  %v1025_v8 = vadd.f32 %v1530_v32, %v1526_v30  ;;  %v1104_v30 = vadd.f32 %v1558_v3, %v1555_v62  ;;  %v1028_v62 = vadd.f32 %v1538_v36, %v1534_v34 }
 0x11a   :  { %v1106_v41 = vpop.f32.mrf.mxu1 }
 0x11b   :  { %v748_v11 = vpop.f32.mrf.mxu0  ;;  %v709_v17 = vadd.f32 %v1104_v30, %v621_v44 }
 0x11c   :  { %v749_v39 = vadd.f32 %v748_v11, %v661_v14  ;;  %v780_v40 = vpop.f32.mrf.mxu1  ;;  %v592_v11 = vadd.f32 %v1025_v8, %v1553_v59 }
 0x11d   :  { %v781_v46 = vadd.f32 %v780_v40, %v693_v13  ;;  %v1129_v48 = vpop.f32.mrf.mxu0  ;;  %v1083_v13 = vadd.f32 %v1532_v33, %v1528_v31 }
 0x11e   :  { %v802_v41 = vmax.f32 %v749_v39, 0.0  ;;  %v1145_v47 = vpop.f32.mrf.mxu1  ;;  %v1022_v39 = vadd.f32 %v1522_v28, %v1518_v26 }
 0x11f   :  { %v810_v50 = vmax.f32 %v781_v46, 0.0  ;;  %v751_v52 = vpop.f32.mrf.mxu0  ;;  %v680_v49 = vadd.f32 %v1083_v13, %v592_v11 }
 0x120   :  { %v979_v63 = vpack.c.bf16 %v802_v41, %v802_v41  ;;  %v752_v1 = vadd.f32 %v751_v52, %v664_v15  ;;  %v783_v2 = vpop.f32.mrf.mxu1  ;;  %v589_v42 = vadd.f32 %v1022_v39, %v1553_v59  ;;  %v1086_v52 = vadd.f32 %v1540_v37, %v1536_v35  ;;  %v1656_v39 = vld [vmem:[#allocation4_spill] sm:$0xff] }
 0x121   :  { %v987_v21 = vpack.c.bf16 %v810_v50, %v810_v50  ;;  %v784_v40 = vadd.f32 %v783_v2, %v696_v60  ;;  %v1130_v4 = vpop.f32.mrf.mxu0  ;;  %v597_v50 = vadd.f32 %v1028_v62, %v1553_v59  ;;  %v1654_v60 = vld [vmem:[#allocation3_spill] sm:$0xff] }
 0x122   :  { %869 = vst.msk [vmem:[%s1650_s3] sm:$0xf] %vm868_vm2, %v979_v63  ;;  %v803_v51 = vmax.f32 %v752_v1, 0.0  ;;  %v1146_v53 = vpop.f32.mrf.mxu1  ;;  %v677_v15 = vadd.f32 %v1080_v55, %v589_v42  ;;  %v1031_v63 = vadd.f32 %v1654_v60, %v1542_v38 }
 0x123   :  { %877 = vst.msk [vmem:[%s1650_s3 + $0x20] sm:$0xf] %vm868_vm2, %v987_v21  ;;  %v811_v5 = vmax.f32 %v784_v40, 0.0  ;;  %v756_v6 = vpop.f32.mrf.mxu0 }
 0x124   :  { %v980_v26 = vpack.c.bf16 %v803_v51, %v803_v51  ;;  %v757_v28 = vadd.f32 %v756_v6, %v669_v22  ;;  %v788_v7 = vpop.f32.mrf.mxu1  ;;  %v600_v22 = vadd.f32 %v1031_v63, %v1553_v59  ;;  %v1089_v51 = vadd.f32 %v1656_v39, %v1655_v24 }
 0x125   :  { %v988_v9 = vpack.c.bf16 %v811_v5, %v811_v5  ;;  %v789_v10 = vadd.f32 %v788_v7, %v701_v54  ;;  %v1133_v12 = vpop.f32.mrf.mxu0  ;;  %v685_v54 = vadd.f32 %v1086_v52, %v597_v50 }
 0x126   :  { %870 = vst.msk [vmem:[%s1650_s3 + $0x4] sm:$0xf] %vm868_vm2, %v980_v26  ;;  %v804_v58 = vmax.f32 %v757_v28, 0.0  ;;  %v1149_v61 = vpop.f32.mrf.mxu1  ;;  %v688_v26 = vadd.f32 %v1089_v51, %v600_v22 }
 0x127   :  { %878 = vst.msk [vmem:[%s1650_s3 + $0x24] sm:$0xf] %vm868_vm2, %v988_v9  ;;  %v812_v32 = vmax.f32 %v789_v10, 0.0  ;;  %v759_v27 = vpop.f32.mrf.mxu0 }
 0x128   :  { %v981_v14 = vpack.c.bf16 %v804_v58, %v804_v58  ;;  %v760_v16 = vadd.f32 %v759_v27, %v672_v0  ;;  %v791_v57 = vpop.f32.mrf.mxu1 }
 0x129   :  { %v989_v43 = vpack.c.bf16 %v812_v32, %v812_v32  ;;  %v792_v45 = vadd.f32 %v791_v57, %v704_v29  ;;  %v1134_v46 = vpop.f32.mrf.mxu0 }
 0x12a   :  { %871 = vst.msk [vmem:[%s1650_s3 + $0x8] sm:$0xf] %vm868_vm2, %v981_v14  ;;  %v805_v3 = vmax.f32 %v760_v16, 0.0  ;;  %v1150_v48 = vpop.f32.mrf.mxu1 }
 0x12b   :  { %879 = vst.msk [vmem:[%s1650_s3 + $0x28] sm:$0xf] %vm868_vm2, %v989_v43  ;;  %v813_v31 = vmax.f32 %v792_v45, 0.0  ;;  %v764_v33 = vpop.f32.mrf.mxu0 }
 0x12c   :  { %v982_v18 = vpack.c.bf16 %v805_v3, %v805_v3  ;;  %v765_v20 = vadd.f32 %v764_v33, %v677_v15  ;;  %v796_v41 = vpop.f32.mrf.mxu1 }
 0x12d   :  { %v990_v34 = vpack.c.bf16 %v813_v31, %v813_v31  ;;  %v797_v36 = vadd.f32 %v796_v41, %v709_v17  ;;  %v1137_v47 = vpop.f32.mrf.mxu0 }
 0x12e   :  { %872 = vst.msk [vmem:[%s1650_s3 + $0xc] sm:$0xf] %vm868_vm2, %v982_v18  ;;  %v806_v1 = vmax.f32 %v765_v20, 0.0  ;;  %v1153_v2 = vpop.f32.mrf.mxu1 }
 0x12f   :  { %880 = vst.msk [vmem:[%s1650_s3 + $0x2c] sm:$0xf] %vm868_vm2, %v990_v34  ;;  %v814_v19 = vmax.f32 %v797_v36, 0.0  ;;  %v767_v21 = vpop.f32.mrf.mxu0 }
 0x130   :  { %v983_v40 = vpack.c.bf16 %v806_v1, %v806_v1  ;;  %v768_v35 = vadd.f32 %v767_v21, %v680_v49  ;;  %v799_v37 = vpop.f32.mrf.mxu1 }
 0x131   :  { %v991_v4 = vpack.c.bf16 %v814_v19, %v814_v19  ;;  %v1138_v38 = vpop.f32.mrf.mxu0 }
 0x132   :  { %873 = vst.msk [vmem:[%s1650_s3 + $0x10] sm:$0xf] %vm868_vm2, %v983_v40  ;;  %v807_v53 = vmax.f32 %v768_v35, 0.0  ;;  %v1154_v56 = vpop.f32.mrf.mxu1 }
 0x133   :  { %882 = vst.msk [vmem:[%s1650_s3 + $0x30] sm:$0x1] %vm881_vm3, %v991_v4  ;;  %v772_v23 = vpop.f32.mrf.mxu0 }
 0x134   :  { %v984_v25 = vpack.c.bf16 %v807_v53, %v807_v53  ;;  %v773_v5 = vadd.f32 %v772_v23, %v685_v54 }
 0x135   :  { %v1141_v6 = vpop.f32.mrf.mxu0 }
 0x136   :  { %874 = vst.msk [vmem:[%s1650_s3 + $0x14] sm:$0xf] %vm868_vm2, %v984_v25  ;;  %v808_v59 = vmax.f32 %v773_v5, 0.0 }
 0x137   :  { %v775_v28 = vpop.f32.mrf.mxu0 }
 0x138   :  { %v985_v7 = vpack.c.bf16 %v808_v59, %v808_v59  ;;  %v776_v8 = vadd.f32 %v775_v28, %v688_v26 }
 0x139   :  { %v1142_v9 = vpop.f32.mrf.mxu0 }
 0x13a   :  { %875 = vst.msk [vmem:[%s1650_s3 + $0x18] sm:$0xf] %vm868_vm2, %v985_v7  ;;  %v809_v10 = vmax.f32 %v776_v8, 0.0 }
 0x13c   :  { %v986_v12 = vpack.c.bf16 %v809_v10, %v809_v10 }
 0x13e   :  { %876 = vst.msk [vmem:[%s1650_s3 + $0x1c] sm:$0xf] %vm868_vm2, %v986_v12 }

// kernel: cov_net_forward.7
= control target key start
LH: loop header
LB: loop body
LE: loop exit
PB: predicated region body
PF: predicated region fallthrough
CT: control target
= control target key end

     0   :  { %s19722_s0 = inlined_call_operand.vmem [shape: bf16[2,3136], index: 0, kind: input, shape index: {}]   ;;  %s19723_s1 = inlined_call_operand.vmem [shape: bf16[3136,1024], index: 1, kind: input, shape index: {}]   ;;  %s19724_s2 = inlined_call_operand.vmem [shape: f32[1,1024], index: 2, kind: input, shape index: {}]   ;;  %s19725_s3 = inlined_call_operand.vmem [shape: bf16[512,9], index: 3, kind: input, shape index: {}]   ;;  %s19726_s4 = inlined_call_operand.vmem [shape: f32[1,9], index: 4, kind: input, shape index: {}]   ;;  %s19727_s5 = inlined_call_operand.vmem [shape: bf16[512,1], index: 5, kind: input, shape index: {}]   ;;  %s19728_s6 = inlined_call_operand.<no memory space> [shape: f32[1,1], index: 6, kind: input, shape index: {}]   ;;  %s19729_s7 = inlined_call_operand.hbm [shape: f32[2,9], index: 7, kind: output, shape index: {}]  }
   0x1   :  { %v12_v0 = vstv %s19728_s6 }
   0x2   :  { %13 = vst [vmem:[#allocation2] sm:$0x1] %v12_v0 }
   0x3   :  { %v90_v1 = vld [vmem:[%s19723_s1 + $0x1c0] sm:$0xff]  ;;  %v1604_v33 = vlaneseq  ;;  %v14362_v34 = vmov 1966171168  }
   0x4   :  { %v94_v2 = vld [vmem:[%s19723_s1 + $0x1e0] sm:$0xff]  ;;  %v1650_v35 = vunpack.c.l.s4 %v14362_v34 }
   0x5   :  { %v218_v3 = vld [vmem:[%s19723_s1 + $0x5c0] sm:$0xff]  ;;  %v12597_v4 = vcombine.high %v90_v1, %v94_v2  ;;  %v12596_v6 = vcombine.low %v90_v1, %v94_v2  ;;  %v14474_v44 = vshrl.u32 %v1604_v33, 7 }
   0x6   :  { %v222_v5 = vld [vmem:[%s19723_s1 + $0x5e0] sm:$0xff]  ;;  %v1651_v45 = vunpack.c.0.s8 %v1650_v35 }
   0x7   :  { %v82_v7 = vld [vmem:[%s19723_s1 + $0x180] sm:$0xff]  ;;  %v12725_v9 = vcombine.high %v218_v3, %v222_v5  ;;  %v12724_v10 = vcombine.low %v218_v3, %v222_v5  ;;  %9677 = vmatprep.subr.bf16.mxu0 %v12597_v4 }
   0x8   :  { %v86_v8 = vld [vmem:[%s19723_s1 + $0x1a0] sm:$0xff]  ;;  %9678 = vmatpush1.bf16.msra.mxu0 %v12596_v6  ;;  %v14489_v54 = vsub.s32 %v1651_v45, %v14474_v44 }
   0x9   :  { %v12589_v11 = vcombine.high %v82_v7, %v86_v8  ;;  %v210_v12 = vld [vmem:[%s19723_s1 + $0x580] sm:$0xff]  ;;  %9718 = vmatprep.subr.bf16.mxu1 %v12725_v9  ;;  %v12588_v19 = vcombine.low %v82_v7, %v86_v8 }
   0xa   :  { %v214_v13 = vld [vmem:[%s19723_s1 + $0x5a0] sm:$0xff]  ;;  %9719 = vmatpush1.bf16.msra.mxu1 %v12724_v10 }
   0xb   :  { %v74_v14 = vld [vmem:[%s19723_s1 + $0x140] sm:$0xff]  ;;  %v12717_v15 = vcombine.high %v210_v12, %v214_v13  ;;  %9679 = vmatprep.subr.bf16.mxu0 %v12589_v11  ;;  %v12716_v20 = vcombine.low %v210_v12, %v214_v13 }
   0xc   :  { %v78_v16 = vld [vmem:[%s19723_s1 + $0x160] sm:$0xff]  ;;  %9680 = vmatpush1.bf16.msra.mxu0 %v12588_v19 }
   0xd   :  { %v202_v17 = vld [vmem:[%s19723_s1 + $0x540] sm:$0xff]  ;;  %v12581_v21 = vcombine.high %v74_v14, %v78_v16  ;;  %9720 = vmatprep.subr.bf16.mxu1 %v12717_v15  ;;  %v12580_v27 = vcombine.low %v74_v14, %v78_v16 }
   0xe   :  { %v206_v18 = vld [vmem:[%s19723_s1 + $0x560] sm:$0xff]  ;;  %9721 = vmatpush1.bf16.msra.mxu1 %v12716_v20 }
   0xf   :  { %v12709_v22 = vcombine.high %v202_v17, %v206_v18  ;;  %v66_v23 = vld [vmem:[%s19723_s1 + $0x100] sm:$0xff]  ;;  %9681 = vmatprep.subr.bf16.mxu0 %v12581_v21  ;;  %v12708_v28 = vcombine.low %v202_v17, %v206_v18 }
  0x10   :  { %v70_v24 = vld [vmem:[%s19723_s1 + $0x120] sm:$0xff]  ;;  %9682 = vmatpush1.bf16.msra.mxu0 %v12580_v27 }
  0x11   :  { %v194_v25 = vld [vmem:[%s19723_s1 + $0x500] sm:$0xff]  ;;  %v12573_v29 = vcombine.high %v66_v23, %v70_v24  ;;  %9722 = vmatprep.subr.bf16.mxu1 %v12709_v22  ;;  %v12572_v38 = vcombine.low %v66_v23, %v70_v24 }
  0x12   :  { %v198_v26 = vld [vmem:[%s19723_s1 + $0x520] sm:$0xff]  ;;  %9723 = vmatpush1.bf16.msra.mxu1 %v12708_v28 }
  0x13   :  { %v12701_v30 = vcombine.high %v194_v25, %v198_v26  ;;  %v58_v31 = vld [vmem:[%s19723_s1 + $0xc0] sm:$0xff]  ;;  %9683 = vmatprep.subr.bf16.mxu0 %v12573_v29  ;;  %v12700_v39 = vcombine.low %v194_v25, %v198_v26 }
  0x14   :  { %v62_v32 = vld [vmem:[%s19723_s1 + $0xe0] sm:$0xff]  ;;  %9684 = vmatpush1.bf16.msra.mxu0 %v12572_v38 }
  0x15   :  { %v186_v36 = vld [vmem:[%s19723_s1 + $0x4c0] sm:$0xff]  ;;  %v12565_v40 = vcombine.high %v58_v31, %v62_v32  ;;  %9724 = vmatprep.subr.bf16.mxu1 %v12701_v30  ;;  %v12564_v48 = vcombine.low %v58_v31, %v62_v32 }
  0x16   :  { %v190_v37 = vld [vmem:[%s19723_s1 + $0x4e0] sm:$0xff]  ;;  %9725 = vmatpush1.bf16.msra.mxu1 %v12700_v39 }
  0x17   :  { %v12693_v41 = vcombine.high %v186_v36, %v190_v37  ;;  %v50_v42 = vld [vmem:[%s19723_s1 + $0x80] sm:$0xff]  ;;  %9685 = vmatprep.subr.bf16.mxu0 %v12565_v40  ;;  %v12692_v49 = vcombine.low %v186_v36, %v190_v37 }
  0x18   :  { %v54_v43 = vld [vmem:[%s19723_s1 + $0xa0] sm:$0xff]  ;;  %9686 = vmatpush1.bf16.msra.mxu0 %v12564_v48 }
  0x19   :  { %v178_v46 = vld [vmem:[%s19723_s1 + $0x480] sm:$0xff]  ;;  %v12557_v50 = vcombine.high %v50_v42, %v54_v43  ;;  %9726 = vmatprep.subr.bf16.mxu1 %v12693_v41  ;;  %v12556_v57 = vcombine.low %v50_v42, %v54_v43 }
  0x1a   :  { %v182_v47 = vld [vmem:[%s19723_s1 + $0x4a0] sm:$0xff]  ;;  %9727 = vmatpush1.bf16.msra.mxu1 %v12692_v49 }
  0x1b   :  { %v12685_v51 = vcombine.high %v178_v46, %v182_v47  ;;  %v42_v52 = vld [vmem:[%s19723_s1 + $0x40] sm:$0xff]  ;;  %9687 = vmatprep.subr.bf16.mxu0 %v12557_v50  ;;  %v12684_v58 = vcombine.low %v178_v46, %v182_v47 }
  0x1c   :  { %v46_v53 = vld [vmem:[%s19723_s1 + $0x60] sm:$0xff]  ;;  %9688 = vmatpush1.bf16.msra.mxu0 %v12556_v57 }
  0x1d   :  { %v170_v55 = vld [vmem:[%s19723_s1 + $0x440] sm:$0xff]  ;;  %v12549_v59 = vcombine.high %v42_v52, %v46_v53  ;;  %9728 = vmatprep.subr.bf16.mxu1 %v12685_v51  ;;  %v12548_v3 = vcombine.low %v42_v52, %v46_v53 }
  0x1e   :  { %v174_v56 = vld [vmem:[%s19723_s1 + $0x460] sm:$0xff]  ;;  %9729 = vmatpush1.bf16.msra.mxu1 %v12684_v58 }
  0x1f   :  { %v14500_v60 = vld [vmem:[%s19722_s0] sm:$0xff]  ;;  %v12677_v61 = vcombine.high %v170_v55, %v174_v56  ;;  %9689 = vmatprep.subr.bf16.mxu0 %v12549_v59  ;;  %v12676_v5 = vcombine.low %v170_v55, %v174_v56 }
  0x20   :  { %v34_v62 = vld [vmem:[%s19723_s1] sm:$0xff]  ;;  %v14510_v0 = vrot.slane %v14500_v60, %v14489_v54  ;;  %9690 = vmatpush1.bf16.msra.mxu0 %v12548_v3 }
  0x21   :  { %v38_v63 = vld [vmem:[%s19723_s1 + $0x20] sm:$0xff]  ;;  %9730 = vmatprep.subr.bf16.mxu1 %v12677_v61 }
  0x22   :  { %v162_v1 = vld [vmem:[%s19723_s1 + $0x400] sm:$0xff]  ;;  %v1663_v4 = vcombine.high %v14510_v0, %v14510_v0  ;;  %v12541_v6 = vcombine.high %v34_v62, %v38_v63  ;;  %v12540_v13 = vcombine.low %v34_v62, %v38_v63  ;;  %9731 = vmatpush1.bf16.msra.mxu1 %v12676_v5 }
  0x23   :  { %v166_v2 = vld [vmem:[%s19723_s1 + $0x420] sm:$0xff] }
  0x24   :  { %v12669_v7 = vcombine.high %v162_v1, %v166_v2  ;;  %v154_v8 = vld [vmem:[%s19723_s1 + $0x3c0] sm:$0xff]  ;;  %v14527_v10 = vrot.slane %v1663_v4, %v14489_v54  ;;  %9691 = vmatprep.subr.bf16.mxu0 %v12541_v6  ;;  %v12668_v15 = vcombine.low %v162_v1, %v166_v2  ;;  %v1648_v2 = vcombine.high %v14500_v60, %v14500_v60 }
  0x25   :  { %v158_v9 = vld [vmem:[%s19723_s1 + $0x3e0] sm:$0xff]  ;;  %9692 = vmatpush1.bf16.msra.mxu0 %v12540_v13 }
  0x26   :  { %v282_v11 = vld [vmem:[%s19723_s1 + $0x7c0] sm:$0xff]  ;;  %9709 = vmatprep.mubr.bf16.mxu0 %v14527_v10  ;;  %v14538_v14 = vcombine.high %v14527_v10, %v14527_v10  ;;  %v12661_v16 = vcombine.high %v154_v8, %v158_v9  ;;  %9732 = vmatprep.subr.bf16.mxu1 %v12669_v7  ;;  %v12660_v22 = vcombine.low %v154_v8, %v158_v9 }
  0x27   :  { %v286_v12 = vld [vmem:[%s19723_s1 + $0x7e0] sm:$0xff]  ;;  %9733 = vmatpush1.bf16.msra.mxu1 %v12668_v15 }
  0x28   :  { %v12789_v17 = vcombine.high %v282_v11, %v286_v12  ;;  %v146_v18 = vld [vmem:[%s19723_s1 + $0x380] sm:$0xff]  ;;  %9750 = vmatprep.mubr.bf16.mxu1 %v14538_v14  ;;  %9693 = vmatprep.subr.bf16.mxu0 %v12661_v16  ;;  %v12788_v23 = vcombine.low %v282_v11, %v286_v12  ;;  %v14628_v11 = vrot.slane %v1648_v2, %v14489_v54 }
  0x29   :  { %v150_v19 = vld [vmem:[%s19723_s1 + $0x3a0] sm:$0xff]  ;;  %9694 = vmatpush2.bf16.msra.mxu0 %v12660_v22 }
  0x2a   :  { %v274_v20 = vld [vmem:[%s19723_s1 + $0x780] sm:$0xff]  ;;  %v12653_v24 = vcombine.high %v146_v18, %v150_v19  ;;  %9734 = vmatprep.subr.bf16.mxu1 %v12789_v17  ;;  %v12652_v30 = vcombine.low %v146_v18, %v150_v19 }
  0x2b   :  { %v278_v21 = vld [vmem:[%s19723_s1 + $0x7a0] sm:$0xff]  ;;  %9735 = vmatpush2.bf16.msra.mxu1 %v12788_v23  ;;  %v14646_v23 = vrot.slane %v14510_v0, %v14489_v54 }
  0x2c   :  { %v12781_v25 = vcombine.high %v274_v20, %v278_v21  ;;  %v138_v26 = vld [vmem:[%s19723_s1 + $0x340] sm:$0xff]  ;;  %9695 = vmatprep.subr.bf16.mxu0 %v12653_v24  ;;  %v12780_v31 = vcombine.low %v274_v20, %v278_v21  ;;  %v1664_v21 = vcombine.high %v14628_v11, %v14628_v11 }
  0x2d   :  { %v142_v27 = vld [vmem:[%s19723_s1 + $0x360] sm:$0xff]  ;;  %9696 = vmatpush2.bf16.msra.mxu0 %v12652_v30 }
  0x2e   :  { %v266_v28 = vld [vmem:[%s19723_s1 + $0x740] sm:$0xff]  ;;  %v12645_v32 = vcombine.high %v138_v26, %v142_v27  ;;  %9736 = vmatprep.subr.bf16.mxu1 %v12781_v25  ;;  %v12644_v38 = vcombine.low %v138_v26, %v142_v27  ;;  %v14661_v30 = vrot.slane %v1664_v21, %v14489_v54 }
  0x2f   :  { %v270_v29 = vld [vmem:[%s19723_s1 + $0x760] sm:$0xff]  ;;  %9737 = vmatpush2.bf16.msra.mxu1 %v12780_v31  ;;  %v14665_v31 = vcombine.high %v14646_v23, %v14646_v23 }
  0x30   :  { %v12773_v33 = vcombine.high %v266_v28, %v270_v29  ;;  %v130_v34 = vld [vmem:[%s19723_s1 + $0x300] sm:$0xff]  ;;  %9697 = vmatprep.subr.bf16.mxu0 %v12645_v32  ;;  %v12772_v39 = vcombine.low %v266_v28, %v270_v29 }
  0x31   :  { %v134_v35 = vld [vmem:[%s19723_s1 + $0x320] sm:$0xff]  ;;  %9698 = vmatpush2.bf16.msra.mxu0 %v12644_v38 }
  0x32   :  { %v258_v36 = vld [vmem:[%s19723_s1 + $0x700] sm:$0xff]  ;;  %v12637_v40 = vcombine.high %v130_v34, %v134_v35  ;;  %9738 = vmatprep.subr.bf16.mxu1 %v12773_v33  ;;  %v12636_v47 = vcombine.low %v130_v34, %v134_v35 }
  0x33   :  { %v262_v37 = vld [vmem:[%s19723_s1 + $0x720] sm:$0xff]  ;;  %9739 = vmatpush2.bf16.msra.mxu1 %v12772_v39 }
  0x34   :  { %v12765_v41 = vcombine.high %v258_v36, %v262_v37  ;;  %v122_v42 = vld [vmem:[%s19723_s1 + $0x2c0] sm:$0xff]  ;;  %9699 = vmatprep.subr.bf16.mxu0 %v12637_v40  ;;  %v12764_v48 = vcombine.low %v258_v36, %v262_v37  ;;  %v14682_v40 = vcombine.high %v14661_v30, %v14661_v30 }
  0x35   :  { %v126_v43 = vld [vmem:[%s19723_s1 + $0x2e0] sm:$0xff]  ;;  %9700 = vmatpush2.bf16.msra.mxu0 %v12636_v47 }
  0x36   :  { %v250_v45 = vld [vmem:[%s19723_s1 + $0x6c0] sm:$0xff]  ;;  %v12629_v49 = vcombine.high %v122_v42, %v126_v43  ;;  %9740 = vmatprep.subr.bf16.mxu1 %v12765_v41  ;;  %v12628_v56 = vcombine.low %v122_v42, %v126_v43 }
  0x37   :  { %v254_v46 = vld [vmem:[%s19723_s1 + $0x6e0] sm:$0xff]  ;;  %9741 = vmatpush2.bf16.msra.mxu1 %v12764_v48 }
  0x38   :  { %v12757_v50 = vcombine.high %v250_v45, %v254_v46  ;;  %v114_v51 = vld [vmem:[%s19723_s1 + $0x280] sm:$0xff]  ;;  %9701 = vmatprep.subr.bf16.mxu0 %v12629_v49  ;;  %v12756_v57 = vcombine.low %v250_v45, %v254_v46 }
  0x39   :  { %v118_v52 = vld [vmem:[%s19723_s1 + $0x2a0] sm:$0xff]  ;;  %9702 = vmatpush2.bf16.msra.mxu0 %v12628_v56 }
  0x3a   :  { %v242_v53 = vld [vmem:[%s19723_s1 + $0x680] sm:$0xff]  ;;  %v12621_v58 = vcombine.high %v114_v51, %v118_v52  ;;  %9742 = vmatprep.subr.bf16.mxu1 %v12757_v50  ;;  %v12620_v3 = vcombine.low %v114_v51, %v118_v52 }
  0x3b   :  { %v246_v55 = vld [vmem:[%s19723_s1 + $0x6a0] sm:$0xff]  ;;  %9743 = vmatpush2.bf16.msra.mxu1 %v12756_v57 }
  0x3c   :  { %v12749_v59 = vcombine.high %v242_v53, %v246_v55  ;;  %v106_v61 = vld [vmem:[%s19723_s1 + $0x240] sm:$0xff]  ;;  %9703 = vmatprep.subr.bf16.mxu0 %v12621_v58  ;;  %v12748_v4 = vcombine.low %v242_v53, %v246_v55 }
  0x3d   :  { %v110_v62 = vld [vmem:[%s19723_s1 + $0x260] sm:$0xff]  ;;  %9704 = vmatpush2.bf16.msra.mxu0 %v12620_v3 }
  0x3e   :  { %v234_v63 = vld [vmem:[%s19723_s1 + $0x640] sm:$0xff]  ;;  %v12613_v5 = vcombine.high %v106_v61, %v110_v62  ;;  %9744 = vmatprep.subr.bf16.mxu1 %v12749_v59  ;;  %v12612_v12 = vcombine.low %v106_v61, %v110_v62 }
  0x3f   :  { %v238_v1 = vld [vmem:[%s19723_s1 + $0x660] sm:$0xff]  ;;  %9745 = vmatpush2.bf16.msra.mxu1 %v12748_v4 }
  0x40   :  { %v12741_v6 = vcombine.high %v234_v63, %v238_v1  ;;  %v98_v7 = vld [vmem:[%s19723_s1 + $0x200] sm:$0xff]  ;;  %9705 = vmatprep.subr.bf16.mxu0 %v12613_v5  ;;  %v12740_v13 = vcombine.low %v234_v63, %v238_v1 }
  0x41   :  { %v102_v8 = vld [vmem:[%s19723_s1 + $0x220] sm:$0xff]  ;;  %9706 = vmatpush2.bf16.msra.mxu0 %v12612_v12 }
  0x42   :  { %v226_v60 = vld [vmem:[%s19723_s1 + $0x600] sm:$0xff]  ;;  %v12605_v15 = vcombine.high %v98_v7, %v102_v8  ;;  %9746 = vmatprep.subr.bf16.mxu1 %v12741_v6  ;;  %v12604_v22 = vcombine.low %v98_v7, %v102_v8 }
  0x43   :  { %v230_v9 = vld [vmem:[%s19723_s1 + $0x620] sm:$0xff]  ;;  %9747 = vmatpush2.bf16.msra.mxu1 %v12740_v13 }
  0x44   :  { %v12733_v16 = vcombine.high %v226_v60, %v230_v9  ;;  %v346_v17 = vld [vmem:[%s19723_s1 + $0x9c0] sm:$0xff]  ;;  %9707 = vmatprep.subr.bf16.mxu0 %v12605_v15  ;;  %v12732_v24 = vcombine.low %v226_v60, %v230_v9 }
  0x45   :  { %v350_v18 = vld [vmem:[%s19723_s1 + $0x9e0] sm:$0xff]  ;;  %9708 = vmatpush2.bf16.msra.mxu0 %v12604_v22 }
  0x46   :  { %v474_v19 = vld [vmem:[%s19723_s1 + $0xdc0] sm:$0xff]  ;;  %v12853_v25 = vcombine.high %v346_v17, %v350_v18  ;;  %9748 = vmatprep.subr.bf16.mxu1 %v12733_v16  ;;  %v12852_v32 = vcombine.low %v346_v17, %v350_v18 }
  0x47   :  { %v478_v20 = vld [vmem:[%s19723_s1 + $0xde0] sm:$0xff]  ;;  %9749 = vmatpush2.bf16.msra.mxu1 %v12732_v24 }
  0x48   :  { %v12981_v26 = vcombine.high %v474_v19, %v478_v20  ;;  %v338_v27 = vld [vmem:[%s19723_s1 + $0x980] sm:$0xff]  ;;  %9759 = vmatprep.subr.bf16.mxu0 %v12853_v25  ;;  %v12980_v33 = vcombine.low %v474_v19, %v478_v20  ;;  %9710 = vmatmul.mubr.bf16.vlgmr.msra.gmra.mxu0 %v14646_v23 }
  0x49   :  { %v342_v28 = vld [vmem:[%s19723_s1 + $0x9a0] sm:$0xff]  ;;  %9760 = vmatpush1.bf16.msra.mxu0 %v12852_v32  ;;  %9791 = vmatprep.mubr.bf16.mxu0 %v14661_v30 }
  0x4a   :  { %v466_v29 = vld [vmem:[%s19723_s1 + $0xd80] sm:$0xff]  ;;  %v12845_v34 = vcombine.high %v338_v27, %v342_v28  ;;  %9800 = vmatprep.subr.bf16.mxu1 %v12981_v26  ;;  %9751 = vmatmul.mubr.bf16.vlgmr.msra.gmra.mxu1 %v14665_v31  ;;  %v12844_v41 = vcombine.low %v338_v27, %v342_v28 }
  0x4b   :  { %v470_v0 = vld [vmem:[%s19723_s1 + $0xda0] sm:$0xff]  ;;  %9801 = vmatpush1.bf16.msra.mxu1 %v12980_v33  ;;  %9832 = vmatprep.mubr.bf16.mxu1 %v14682_v40 }
  0x4c   :  { %v330_v35 = vld [vmem:[%s19723_s1 + $0x940] sm:$0xff]  ;;  %v12973_v38 = vcombine.high %v466_v29, %v470_v0  ;;  %9761 = vmatprep.subr.bf16.mxu0 %v12845_v34  ;;  %v12972_v42 = vcombine.low %v466_v29, %v470_v0 }
  0x4d   :  { %v334_v36 = vld [vmem:[%s19723_s1 + $0x960] sm:$0xff]  ;;  %9762 = vmatpush1.bf16.msra.mxu0 %v12844_v41 }
  0x4e   :  { %v458_v37 = vld [vmem:[%s19723_s1 + $0xd40] sm:$0xff]  ;;  %v12837_v43 = vcombine.high %v330_v35, %v334_v36  ;;  %9802 = vmatprep.subr.bf16.mxu1 %v12973_v38  ;;  %v12836_v50 = vcombine.low %v330_v35, %v334_v36 }
  0x4f   :  { %v462_v39 = vld [vmem:[%s19723_s1 + $0xd60] sm:$0xff]  ;;  %9803 = vmatpush1.bf16.msra.mxu1 %v12972_v42 }
  0x50   :  { %v322_v45 = vld [vmem:[%s19723_s1 + $0x900] sm:$0xff]  ;;  %v12965_v48 = vcombine.high %v458_v37, %v462_v39  ;;  %9763 = vmatprep.subr.bf16.mxu0 %v12837_v43  ;;  %v12964_v51 = vcombine.low %v458_v37, %v462_v39 }
  0x51   :  { %v326_v46 = vld [vmem:[%s19723_s1 + $0x920] sm:$0xff]  ;;  %9764 = vmatpush1.bf16.msra.mxu0 %v12836_v50 }
  0x52   :  { %v450_v47 = vld [vmem:[%s19723_s1 + $0xd00] sm:$0xff]  ;;  %v12829_v52 = vcombine.high %v322_v45, %v326_v46  ;;  %9804 = vmatprep.subr.bf16.mxu1 %v12965_v48  ;;  %v12828_v59 = vcombine.low %v322_v45, %v326_v46 }
  0x53   :  { %v454_v49 = vld [vmem:[%s19723_s1 + $0xd20] sm:$0xff]  ;;  %9805 = vmatpush1.bf16.msra.mxu1 %v12964_v51 }
  0x54   :  { %v314_v53 = vld [vmem:[%s19723_s1 + $0x8c0] sm:$0xff]  ;;  %v12957_v57 = vcombine.high %v450_v47, %v454_v49  ;;  %9765 = vmatprep.subr.bf16.mxu0 %v12829_v52  ;;  %v12956_v61 = vcombine.low %v450_v47, %v454_v49 }
  0x55   :  { %v318_v55 = vld [vmem:[%s19723_s1 + $0x8e0] sm:$0xff]  ;;  %9766 = vmatpush1.bf16.msra.mxu0 %v12828_v59 }
  0x56   :  { %v442_v56 = vld [vmem:[%s19723_s1 + $0xcc0] sm:$0xff]  ;;  %v12821_v62 = vcombine.high %v314_v53, %v318_v55  ;;  %9806 = vmatprep.subr.bf16.mxu1 %v12957_v57  ;;  %v12820_v5 = vcombine.low %v314_v53, %v318_v55 }
  0x57   :  { %v446_v58 = vld [vmem:[%s19723_s1 + $0xce0] sm:$0xff]  ;;  %9807 = vmatpush1.bf16.msra.mxu1 %v12956_v61 }
  0x58   :  { %v306_v63 = vld [vmem:[%s19723_s1 + $0x880] sm:$0xff]  ;;  %v12949_v3 = vcombine.high %v442_v56, %v446_v58  ;;  %9767 = vmatprep.subr.bf16.mxu0 %v12821_v62  ;;  %v12948_v6 = vcombine.low %v442_v56, %v446_v58 }
  0x59   :  { %v310_v1 = vld [vmem:[%s19723_s1 + $0x8a0] sm:$0xff]  ;;  %9768 = vmatpush1.bf16.msra.mxu0 %v12820_v5 }
  0x5a   :  { %v434_v2 = vld [vmem:[%s19723_s1 + $0xc80] sm:$0xff]  ;;  %v12813_v7 = vcombine.high %v306_v63, %v310_v1  ;;  %9808 = vmatprep.subr.bf16.mxu1 %v12949_v3  ;;  %v12812_v15 = vcombine.low %v306_v63, %v310_v1 }
  0x5b   :  { %v438_v4 = vld [vmem:[%s19723_s1 + $0xca0] sm:$0xff]  ;;  %9809 = vmatpush1.bf16.msra.mxu1 %v12948_v6 }
  0x5c   :  { %v298_v8 = vld [vmem:[%s19723_s1 + $0x840] sm:$0xff]  ;;  %v12941_v12 = vcombine.high %v434_v2, %v438_v4  ;;  %9769 = vmatprep.subr.bf16.mxu0 %v12813_v7  ;;  %v12940_v16 = vcombine.low %v434_v2, %v438_v4 }
  0x5d   :  { %v302_v60 = vld [vmem:[%s19723_s1 + $0x860] sm:$0xff]  ;;  %9770 = vmatpush1.bf16.msra.mxu0 %v12812_v15 }
  0x5e   :  { %v426_v9 = vld [vmem:[%s19723_s1 + $0xc40] sm:$0xff]  ;;  %v12805_v17 = vcombine.high %v298_v8, %v302_v60  ;;  %9810 = vmatprep.subr.bf16.mxu1 %v12941_v12  ;;  %v12804_v24 = vcombine.low %v298_v8, %v302_v60 }
  0x5f   :  { %v430_v13 = vld [vmem:[%s19723_s1 + $0xc60] sm:$0xff]  ;;  %9811 = vmatpush1.bf16.msra.mxu1 %v12940_v16 }
  0x60   :  { %v290_v18 = vld [vmem:[%s19723_s1 + $0x800] sm:$0xff]  ;;  %v12933_v21 = vcombine.high %v426_v9, %v430_v13  ;;  %9771 = vmatprep.subr.bf16.mxu0 %v12805_v17  ;;  %v12932_v25 = vcombine.low %v426_v9, %v430_v13 }
  0x61   :  { %v294_v19 = vld [vmem:[%s19723_s1 + $0x820] sm:$0xff]  ;;  %9772 = vmatpush1.bf16.msra.mxu0 %v12804_v24 }
  0x62   :  { %v418_v20 = vld [vmem:[%s19723_s1 + $0xc00] sm:$0xff]  ;;  %v12797_v26 = vcombine.high %v290_v18, %v294_v19  ;;  %9812 = vmatprep.subr.bf16.mxu1 %v12933_v21  ;;  %v12796_v33 = vcombine.low %v290_v18, %v294_v19 }
  0x63   :  { %v422_v22 = vld [vmem:[%s19723_s1 + $0xc20] sm:$0xff]  ;;  %9813 = vmatpush1.bf16.msra.mxu1 %v12932_v25  ;;  %v14834_v25 = vld [vmem:[%s19722_s0 + $0x8] sm:$0xff] }
  0x64   :  { %v410_v27 = vld [vmem:[%s19723_s1 + $0xbc0] sm:$0xff]  ;;  %v12925_v0 = vcombine.high %v418_v20, %v422_v22  ;;  %9773 = vmatprep.subr.bf16.mxu0 %v12797_v26  ;;  %v12924_v34 = vcombine.low %v418_v20, %v422_v22 }
  0x65   :  { %v414_v28 = vld [vmem:[%s19723_s1 + $0xbe0] sm:$0xff]  ;;  %9774 = vmatpush1.bf16.msra.mxu0 %v12796_v33 }
  0x66   :  { %v538_v29 = vld [vmem:[%s19723_s1 + $0xfc0] sm:$0xff]  ;;  %v12917_v35 = vcombine.high %v410_v27, %v414_v28  ;;  %9814 = vmatprep.subr.bf16.mxu1 %v12925_v0  ;;  %v12916_v42 = vcombine.low %v410_v27, %v414_v28 }
  0x67   :  { %v542_v32 = vld [vmem:[%s19723_s1 + $0xfe0] sm:$0xff]  ;;  %9815 = vmatpush1.bf16.msra.mxu1 %v12924_v34 }
  0x68   :  { %v402_v36 = vld [vmem:[%s19723_s1 + $0xb80] sm:$0xff]  ;;  %v13045_v39 = vcombine.high %v538_v29, %v542_v32  ;;  %9775 = vmatprep.subr.bf16.mxu0 %v12917_v35  ;;  %v13044_v43 = vcombine.low %v538_v29, %v542_v32  ;;  %v14850_v35 = vrot.slane %v14834_v25, %v14489_v54 }
  0x69   :  { %v406_v37 = vld [vmem:[%s19723_s1 + $0xba0] sm:$0xff]  ;;  %9776 = vmatpush2.bf16.msra.mxu0 %v12916_v42 }
  0x6a   :  { %v530_v38 = vld [vmem:[%s19723_s1 + $0xf80] sm:$0xff]  ;;  %v12909_v45 = vcombine.high %v402_v36, %v406_v37  ;;  %9816 = vmatprep.subr.bf16.mxu1 %v13045_v39  ;;  %v12908_v51 = vcombine.low %v402_v36, %v406_v37 }
  0x6b   :  { %v534_v41 = vld [vmem:[%s19723_s1 + $0xfa0] sm:$0xff]  ;;  %9817 = vmatpush2.bf16.msra.mxu1 %v13044_v43 }
  0x6c   :  { %v394_v46 = vld [vmem:[%s19723_s1 + $0xb40] sm:$0xff]  ;;  %v13037_v49 = vcombine.high %v530_v38, %v534_v41  ;;  %9777 = vmatprep.subr.bf16.mxu0 %v12909_v45  ;;  %v13036_v52 = vcombine.low %v530_v38, %v534_v41 }
  0x6d   :  { %v398_v47 = vld [vmem:[%s19723_s1 + $0xb60] sm:$0xff]  ;;  %9778 = vmatpush2.bf16.msra.mxu0 %v12908_v51 }
  0x6e   :  { %v522_v48 = vld [vmem:[%s19723_s1 + $0xf40] sm:$0xff]  ;;  %v12901_v53 = vcombine.high %v394_v46, %v398_v47  ;;  %9818 = vmatprep.subr.bf16.mxu1 %v13037_v49  ;;  %v12900_v61 = vcombine.low %v394_v46, %v398_v47  ;;  %v1712_v46 = vcombine.high %v14850_v35, %v14850_v35 }
  0x6f   :  { %v526_v50 = vld [vmem:[%s19723_s1 + $0xf60] sm:$0xff]  ;;  %9819 = vmatpush2.bf16.msra.mxu1 %v13036_v52 }
  0x70   :  { %v386_v55 = vld [vmem:[%s19723_s1 + $0xb00] sm:$0xff]  ;;  %v13029_v58 = vcombine.high %v522_v48, %v526_v50  ;;  %9779 = vmatprep.subr.bf16.mxu0 %v12901_v53  ;;  %v13028_v62 = vcombine.low %v522_v48, %v526_v50  ;;  %v14868_v48 = vrot.slane %v14628_v11, %v14489_v54 }
  0x71   :  { %v390_v56 = vld [vmem:[%s19723_s1 + $0xb20] sm:$0xff]  ;;  %9780 = vmatpush2.bf16.msra.mxu0 %v12900_v61 }
  0x72   :  { %v514_v57 = vld [vmem:[%s19723_s1 + $0xf00] sm:$0xff]  ;;  %v12893_v63 = vcombine.high %v386_v55, %v390_v56  ;;  %9820 = vmatprep.subr.bf16.mxu1 %v13029_v58  ;;  %v12892_v6 = vcombine.low %v386_v55, %v390_v56  ;;  %v14883_v56 = vrot.slane %v1712_v46, %v14489_v54 }
  0x73   :  { %v518_v59 = vld [vmem:[%s19723_s1 + $0xf20] sm:$0xff]  ;;  %9821 = vmatpush2.bf16.msra.mxu1 %v13028_v62 }
  0x74   :  { %v378_v1 = vld [vmem:[%s19723_s1 + $0xac0] sm:$0xff]  ;;  %v13021_v4 = vcombine.high %v514_v57, %v518_v59  ;;  %9781 = vmatprep.subr.bf16.mxu0 %v12893_v63  ;;  %v13020_v7 = vcombine.low %v514_v57, %v518_v59  ;;  %v14887_v57 = vcombine.high %v14868_v48, %v14868_v48 }
  0x75   :  { %v382_v2 = vld [vmem:[%s19723_s1 + $0xae0] sm:$0xff]  ;;  %9782 = vmatpush2.bf16.msra.mxu0 %v12892_v6 }
  0x76   :  { %v506_v3 = vld [vmem:[%s19723_s1 + $0xec0] sm:$0xff]  ;;  %v12885_v8 = vcombine.high %v378_v1, %v382_v2  ;;  %9822 = vmatprep.subr.bf16.mxu1 %v13021_v4  ;;  %v12884_v16 = vcombine.low %v378_v1, %v382_v2 }
  0x77   :  { %v510_v5 = vld [vmem:[%s19723_s1 + $0xee0] sm:$0xff]  ;;  %9823 = vmatpush2.bf16.msra.mxu1 %v13020_v7 }
  0x78   :  { %v370_v60 = vld [vmem:[%s19723_s1 + $0xa80] sm:$0xff]  ;;  %v13013_v13 = vcombine.high %v506_v3, %v510_v5  ;;  %9783 = vmatprep.subr.bf16.mxu0 %v12885_v8  ;;  %v13012_v18 = vcombine.low %v506_v3, %v510_v5 }
  0x79   :  { %v374_v9 = vld [vmem:[%s19723_s1 + $0xaa0] sm:$0xff]  ;;  %9784 = vmatpush2.bf16.msra.mxu0 %v12884_v16 }
  0x7a   :  { %v498_v12 = vld [vmem:[%s19723_s1 + $0xe80] sm:$0xff]  ;;  %v12877_v19 = vcombine.high %v370_v60, %v374_v9  ;;  %9824 = vmatprep.subr.bf16.mxu1 %v13013_v13  ;;  %v12876_v26 = vcombine.low %v370_v60, %v374_v9 }
  0x7b   :  { %v502_v15 = vld [vmem:[%s19723_s1 + $0xea0] sm:$0xff]  ;;  %9825 = vmatpush2.bf16.msra.mxu1 %v13012_v18 }
  0x7c   :  { %v362_v17 = vld [vmem:[%s19723_s1 + $0xa40] sm:$0xff]  ;;  %v13005_v24 = vcombine.high %v498_v12, %v502_v15  ;;  %9785 = vmatprep.subr.bf16.mxu0 %v12877_v19  ;;  %v13004_v27 = vcombine.low %v498_v12, %v502_v15 }
  0x7d   :  { %v366_v20 = vld [vmem:[%s19723_s1 + $0xa60] sm:$0xff]  ;;  %9786 = vmatpush2.bf16.msra.mxu0 %v12876_v26 }
  0x7e   :  { %v490_v21 = vld [vmem:[%s19723_s1 + $0xe40] sm:$0xff]  ;;  %v12869_v28 = vcombine.high %v362_v17, %v366_v20  ;;  %9826 = vmatprep.subr.bf16.mxu1 %v13005_v24  ;;  %v12868_v36 = vcombine.low %v362_v17, %v366_v20 }
  0x7f   :  { %v494_v22 = vld [vmem:[%s19723_s1 + $0xe60] sm:$0xff]  ;;  %9827 = vmatpush2.bf16.msra.mxu1 %v13004_v27 }
  0x80   :  { %v354_v29 = vld [vmem:[%s19723_s1 + $0xa00] sm:$0xff]  ;;  %v12997_v33 = vcombine.high %v490_v21, %v494_v22  ;;  %9787 = vmatprep.subr.bf16.mxu0 %v12869_v28  ;;  %v12996_v37 = vcombine.low %v490_v21, %v494_v22 }
  0x81   :  { %v358_v0 = vld [vmem:[%s19723_s1 + $0xa20] sm:$0xff]  ;;  %9788 = vmatpush2.bf16.msra.mxu0 %v12868_v36 }
  0x82   :  { %v482_v32 = vld [vmem:[%s19723_s1 + $0xe00] sm:$0xff]  ;;  %v12861_v38 = vcombine.high %v354_v29, %v358_v0  ;;  %9828 = vmatprep.subr.bf16.mxu1 %v12997_v33  ;;  %v12860_v47 = vcombine.low %v354_v29, %v358_v0 }
  0x83   :  { %v486_v34 = vld [vmem:[%s19723_s1 + $0xe20] sm:$0xff]  ;;  %9829 = vmatpush2.bf16.msra.mxu1 %v12996_v37 }
  0x84   :  { %v602_v39 = vld [vmem:[%s19723_s1 + $0x11c0] sm:$0xff]  ;;  %v12989_v43 = vcombine.high %v482_v32, %v486_v34  ;;  %9789 = vmatprep.subr.bf16.mxu0 %v12861_v38  ;;  %v12988_v49 = vcombine.low %v482_v32, %v486_v34 }
  0x85   :  { %v606_v41 = vld [vmem:[%s19723_s1 + $0x11e0] sm:$0xff]  ;;  %9790 = vmatpush2.bf16.msra.mxu0 %v12860_v47 }
  0x86   :  { %v730_v42 = vld [vmem:[%s19723_s1 + $0x15c0] sm:$0xff]  ;;  %v13109_v50 = vcombine.high %v602_v39, %v606_v41  ;;  %9830 = vmatprep.subr.bf16.mxu1 %v12989_v43  ;;  %v13108_v58 = vcombine.low %v602_v39, %v606_v41 }
  0x87   :  { %v734_v45 = vld [vmem:[%s19723_s1 + $0x15e0] sm:$0xff] }
  0x88   :  { %v594_v51 = vld [vmem:[%s19723_s1 + $0x1180] sm:$0xff]  ;;  %v13237_v55 = vcombine.high %v730_v42, %v734_v45 }
  0x89   :  { %v598_v52 = vld [vmem:[%s19723_s1 + $0x11a0] sm:$0xff] }
  0x8a   :  { %v722_v53 = vld [vmem:[%s19723_s1 + $0x1580] sm:$0xff] }
  0x8b   :  { %v726_v11 = vld [vmem:[%s19723_s1 + $0x15a0] sm:$0xff] }
  0x8c   :  { %14 = vsyncpa [#allocation4], 0  ;;  %9831 = vmatpush2.bf16.msra.mxu1 %v12988_v49  ;;  %9841 = vmatprep.subr.bf16.mxu0 %v13109_v50  ;;  %v13236_v59 = vcombine.low %v730_v42, %v734_v45  ;;  %v13101_v61 = vcombine.high %v594_v51, %v598_v52  ;;  %v13229_v62 = vcombine.high %v722_v53, %v726_v11  ;;  %v586_v63 = vld [vmem:[%s19723_s1 + $0x1140] sm:$0xff]  ;;  %vm9673_vm0 = vcmask 523264  }
  0x8d   :  { %9882 = vmatprep.subr.bf16.mxu1 %v13237_v55  ;;  %v590_v1 = vld [vmem:[%s19723_s1 + $0x1160] sm:$0xff]  ;;  %9792 = vmatmul.mubr.bf16.vlgmr.msra.gmra.mxu0 %v14868_v48  ;;  %v14904_v4 = vcombine.high %v14883_v56, %v14883_v56  ;;  %v13100_v5 = vcombine.low %v594_v51, %v598_v52  ;;  %v13228_v6 = vcombine.low %v722_v53, %v726_v11  ;;  %vm12517_vm1 = vcmask 66560  }
  0x8e   :  { %v714_v2 = vld [vmem:[%s19723_s1 + $0x1540] sm:$0xff]  ;;  %9842 = vmatpush1.bf16.msra.mxu0 %v13108_v58  ;;  %v13093_v7 = vcombine.high %v586_v63, %v590_v1  ;;  %9873 = vmatprep.mubr.bf16.mxu0 %v14883_v56  ;;  %v13092_v15 = vcombine.low %v586_v63, %v590_v1 }
  0x8f   :  { %v718_v3 = vld [vmem:[%s19723_s1 + $0x1560] sm:$0xff]  ;;  %9833 = vmatmul.mubr.bf16.vlgmr.msra.gmra.mxu1 %v14887_v57  ;;  %9843 = vmatprep.subr.bf16.mxu0 %v13101_v61 }
  0x90   :  { %9883 = vmatpush1.bf16.msra.mxu1 %v13236_v59  ;;  %v13221_v8 = vcombine.high %v714_v2, %v718_v3  ;;  %v578_v60 = vld [vmem:[%s19723_s1 + $0x1100] sm:$0xff]  ;;  %9914 = vmatprep.mubr.bf16.mxu1 %v14904_v4  ;;  %v13220_v16 = vcombine.low %v714_v2, %v718_v3 }
  0x91   :  { %9884 = vmatprep.subr.bf16.mxu1 %v13229_v62  ;;  %v582_v9 = vld [vmem:[%s19723_s1 + $0x1120] sm:$0xff] }
  0x92   :  { %v706_v12 = vld [vmem:[%s19723_s1 + $0x1500] sm:$0xff]  ;;  %9844 = vmatpush1.bf16.msra.mxu0 %v13100_v5  ;;  %v13085_v17 = vcombine.high %v578_v60, %v582_v9  ;;  %v13084_v24 = vcombine.low %v578_v60, %v582_v9 }
  0x93   :  { %v710_v13 = vld [vmem:[%s19723_s1 + $0x1520] sm:$0xff]  ;;  %9845 = vmatprep.subr.bf16.mxu0 %v13093_v7 }
  0x94   :  { %9885 = vmatpush1.bf16.msra.mxu1 %v13228_v6  ;;  %v13213_v18 = vcombine.high %v706_v12, %v710_v13  ;;  %v570_v19 = vld [vmem:[%s19723_s1 + $0x10c0] sm:$0xff]  ;;  %v13212_v26 = vcombine.low %v706_v12, %v710_v13 }
  0x95   :  { %9886 = vmatprep.subr.bf16.mxu1 %v13221_v8  ;;  %v574_v20 = vld [vmem:[%s19723_s1 + $0x10e0] sm:$0xff] }
  0x96   :  { %v698_v21 = vld [vmem:[%s19723_s1 + $0x14c0] sm:$0xff]  ;;  %9846 = vmatpush1.bf16.msra.mxu0 %v13092_v15  ;;  %v13077_v27 = vcombine.high %v570_v19, %v574_v20  ;;  %v13076_v34 = vcombine.low %v570_v19, %v574_v20 }
  0x97   :  { %v702_v22 = vld [vmem:[%s19723_s1 + $0x14e0] sm:$0xff]  ;;  %9847 = vmatprep.subr.bf16.mxu0 %v13085_v17 }
  0x98   :  { %9887 = vmatpush1.bf16.msra.mxu1 %v13220_v16  ;;  %v13205_v28 = vcombine.high %v698_v21, %v702_v22  ;;  %v562_v29 = vld [vmem:[%s19723_s1 + $0x1080] sm:$0xff]  ;;  %v13204_v36 = vcombine.low %v698_v21, %v702_v22 }
  0x99   :  { %9888 = vmatprep.subr.bf16.mxu1 %v13213_v18  ;;  %v566_v0 = vld [vmem:[%s19723_s1 + $0x10a0] sm:$0xff] }
  0x9a   :  { %v690_v32 = vld [vmem:[%s19723_s1 + $0x1480] sm:$0xff]  ;;  %9848 = vmatpush1.bf16.msra.mxu0 %v13084_v24  ;;  %v13069_v37 = vcombine.high %v562_v29, %v566_v0  ;;  %v13068_v45 = vcombine.low %v562_v29, %v566_v0 }
  0x9b   :  { %v694_v33 = vld [vmem:[%s19723_s1 + $0x14a0] sm:$0xff]  ;;  %9849 = vmatprep.subr.bf16.mxu0 %v13077_v27 }
  0x9c   :  { %9889 = vmatpush1.bf16.msra.mxu1 %v13212_v26  ;;  %v13197_v38 = vcombine.high %v690_v32, %v694_v33  ;;  %v554_v39 = vld [vmem:[%s19723_s1 + $0x1040] sm:$0xff]  ;;  %v13196_v46 = vcombine.low %v690_v32, %v694_v33 }
  0x9d   :  { %9890 = vmatprep.subr.bf16.mxu1 %v13205_v28  ;;  %v558_v41 = vld [vmem:[%s19723_s1 + $0x1060] sm:$0xff] }
  0x9e   :  { %v682_v42 = vld [vmem:[%s19723_s1 + $0x1440] sm:$0xff]  ;;  %9850 = vmatpush1.bf16.msra.mxu0 %v13076_v34  ;;  %v13061_v47 = vcombine.high %v554_v39, %v558_v41  ;;  %v13060_v55 = vcombine.low %v554_v39, %v558_v41 }
  0x9f   :  { %v686_v43 = vld [vmem:[%s19723_s1 + $0x1460] sm:$0xff]  ;;  %9851 = vmatprep.subr.bf16.mxu0 %v13069_v37 }
  0xa0   :  { %9891 = vmatpush1.bf16.msra.mxu1 %v13204_v36  ;;  %v13189_v49 = vcombine.high %v682_v42, %v686_v43  ;;  %v546_v50 = vld [vmem:[%s19723_s1 + $0x1000] sm:$0xff]  ;;  %v13188_v11 = vcombine.low %v682_v42, %v686_v43 }
  0xa1   :  { %9892 = vmatprep.subr.bf16.mxu1 %v13197_v38  ;;  %v550_v51 = vld [vmem:[%s19723_s1 + $0x1020] sm:$0xff] }
  0xa2   :  { %v674_v52 = vld [vmem:[%s19723_s1 + $0x1400] sm:$0xff]  ;;  %9852 = vmatpush1.bf16.msra.mxu0 %v13068_v45  ;;  %v13053_v58 = vcombine.high %v546_v50, %v550_v51  ;;  %v13052_v2 = vcombine.low %v546_v50, %v550_v51 }
  0xa3   :  { %v678_v53 = vld [vmem:[%s19723_s1 + $0x1420] sm:$0xff]  ;;  %9853 = vmatprep.subr.bf16.mxu0 %v13061_v47 }
  0xa4   :  { %9893 = vmatpush1.bf16.msra.mxu1 %v13196_v46  ;;  %v13181_v59 = vcombine.high %v674_v52, %v678_v53  ;;  %v666_v61 = vld [vmem:[%s19723_s1 + $0x13c0] sm:$0xff]  ;;  %v13180_v3 = vcombine.low %v674_v52, %v678_v53 }
  0xa5   :  { %9894 = vmatprep.subr.bf16.mxu1 %v13189_v49  ;;  %v670_v62 = vld [vmem:[%s19723_s1 + $0x13e0] sm:$0xff] }
  0xa6   :  { %v794_v63 = vld [vmem:[%s19723_s1 + $0x17c0] sm:$0xff]  ;;  %9854 = vmatpush1.bf16.msra.mxu0 %v13060_v55  ;;  %v13173_v5 = vcombine.high %v666_v61, %v670_v62  ;;  %v13172_v12 = vcombine.low %v666_v61, %v670_v62 }
  0xa7   :  { %v798_v1 = vld [vmem:[%s19723_s1 + $0x17e0] sm:$0xff]  ;;  %9855 = vmatprep.subr.bf16.mxu0 %v13053_v58 }
  0xa8   :  { %9895 = vmatpush1.bf16.msra.mxu1 %v13188_v11  ;;  %v13301_v6 = vcombine.high %v794_v63, %v798_v1  ;;  %v658_v7 = vld [vmem:[%s19723_s1 + $0x1380] sm:$0xff]  ;;  %v13300_v13 = vcombine.low %v794_v63, %v798_v1  ;;  %v1697_v63 = vcombine.high %v14834_v25, %v14834_v25 }
  0xa9   :  { %9896 = vmatprep.subr.bf16.mxu1 %v13181_v59  ;;  %v662_v8 = vld [vmem:[%s19723_s1 + $0x13a0] sm:$0xff] }
  0xaa   :  { %v786_v60 = vld [vmem:[%s19723_s1 + $0x1780] sm:$0xff]  ;;  %9856 = vmatpush1.bf16.msra.mxu0 %v13052_v2  ;;  %v13165_v15 = vcombine.high %v658_v7, %v662_v8  ;;  %v13164_v21 = vcombine.low %v658_v7, %v662_v8 }
  0xab   :  { %v790_v9 = vld [vmem:[%s19723_s1 + $0x17a0] sm:$0xff]  ;;  %9857 = vmatprep.subr.bf16.mxu0 %v13173_v5 }
  0xac   :  { %9897 = vmatpush1.bf16.msra.mxu1 %v13180_v3  ;;  %v13293_v16 = vcombine.high %v786_v60, %v790_v9  ;;  %v650_v17 = vld [vmem:[%s19723_s1 + $0x1340] sm:$0xff]  ;;  %v13292_v22 = vcombine.low %v786_v60, %v790_v9  ;;  %v15068_v60 = vrot.slane %v1697_v63, %v14489_v54 }
  0xad   :  { %9898 = vmatprep.subr.bf16.mxu1 %v13301_v6  ;;  %v654_v18 = vld [vmem:[%s19723_s1 + $0x1360] sm:$0xff] }
  0xae   :  { %v778_v19 = vld [vmem:[%s19723_s1 + $0x1740] sm:$0xff]  ;;  %9858 = vmatpush2.bf16.msra.mxu0 %v13172_v12  ;;  %v13157_v24 = vcombine.high %v650_v17, %v654_v18  ;;  %v13156_v32 = vcombine.low %v650_v17, %v654_v18 }
  0xaf   :  { %v782_v20 = vld [vmem:[%s19723_s1 + $0x1760] sm:$0xff]  ;;  %9859 = vmatprep.subr.bf16.mxu0 %v13165_v15 }
  0xb0   :  { %9899 = vmatpush2.bf16.msra.mxu1 %v13300_v13  ;;  %v13285_v26 = vcombine.high %v778_v19, %v782_v20  ;;  %v642_v27 = vld [vmem:[%s19723_s1 + $0x1300] sm:$0xff]  ;;  %v13284_v33 = vcombine.low %v778_v19, %v782_v20  ;;  %v1713_v20 = vcombine.high %v15068_v60, %v15068_v60 }
  0xb1   :  { %9900 = vmatprep.subr.bf16.mxu1 %v13293_v16  ;;  %v646_v28 = vld [vmem:[%s19723_s1 + $0x1320] sm:$0xff] }
  0xb2   :  { %v770_v29 = vld [vmem:[%s19723_s1 + $0x1700] sm:$0xff]  ;;  %9860 = vmatpush2.bf16.msra.mxu0 %v13164_v21  ;;  %v13149_v34 = vcombine.high %v642_v27, %v646_v28  ;;  %v13148_v42 = vcombine.low %v642_v27, %v646_v28 }
  0xb3   :  { %v774_v0 = vld [vmem:[%s19723_s1 + $0x1720] sm:$0xff]  ;;  %9861 = vmatprep.subr.bf16.mxu0 %v13157_v24 }
  0xb4   :  { %9901 = vmatpush2.bf16.msra.mxu1 %v13292_v22  ;;  %v13277_v36 = vcombine.high %v770_v29, %v774_v0  ;;  %v634_v37 = vld [vmem:[%s19723_s1 + $0x12c0] sm:$0xff]  ;;  %v13276_v43 = vcombine.low %v770_v29, %v774_v0  ;;  %v15086_v22 = vrot.slane %v14850_v35, %v14489_v54 }
  0xb5   :  { %9902 = vmatprep.subr.bf16.mxu1 %v13285_v26  ;;  %v638_v38 = vld [vmem:[%s19723_s1 + $0x12e0] sm:$0xff] }
  0xb6   :  { %v762_v39 = vld [vmem:[%s19723_s1 + $0x16c0] sm:$0xff]  ;;  %9862 = vmatpush2.bf16.msra.mxu0 %v13156_v32  ;;  %v13141_v45 = vcombine.high %v634_v37, %v638_v38  ;;  %v13140_v52 = vcombine.low %v634_v37, %v638_v38  ;;  %v15101_v32 = vrot.slane %v1713_v20, %v14489_v54 }
  0xb7   :  { %v766_v41 = vld [vmem:[%s19723_s1 + $0x16e0] sm:$0xff]  ;;  %9863 = vmatprep.subr.bf16.mxu0 %v13149_v34 }
  0xb8   :  { %9903 = vmatpush2.bf16.msra.mxu1 %v13284_v33  ;;  %v13269_v46 = vcombine.high %v762_v39, %v766_v41  ;;  %v626_v47 = vld [vmem:[%s19723_s1 + $0x1280] sm:$0xff]  ;;  %v13268_v53 = vcombine.low %v762_v39, %v766_v41  ;;  %v15105_v33 = vcombine.high %v15086_v22, %v15086_v22 }
  0xb9   :  { %9904 = vmatprep.subr.bf16.mxu1 %v13277_v36  ;;  %v630_v49 = vld [vmem:[%s19723_s1 + $0x12a0] sm:$0xff] }
  0xba   :  { %v754_v50 = vld [vmem:[%s19723_s1 + $0x1680] sm:$0xff]  ;;  %9864 = vmatpush2.bf16.msra.mxu0 %v13148_v42  ;;  %v13133_v55 = vcombine.high %v626_v47, %v630_v49  ;;  %v13132_v1 = vcombine.low %v626_v47, %v630_v49 }
  0xbb   :  { %v758_v51 = vld [vmem:[%s19723_s1 + $0x16a0] sm:$0xff]  ;;  %9865 = vmatprep.subr.bf16.mxu0 %v13141_v45  ;;  %v15122_v45 = vcombine.high %v15101_v32, %v15101_v32 }
  0xbc   :  { %9905 = vmatpush2.bf16.msra.mxu1 %v13276_v43  ;;  %v13261_v11 = vcombine.high %v754_v50, %v758_v51  ;;  %v618_v58 = vld [vmem:[%s19723_s1 + $0x1240] sm:$0xff]  ;;  %v13260_v2 = vcombine.low %v754_v50, %v758_v51 }
  0xbd   :  { %9906 = vmatprep.subr.bf16.mxu1 %v13269_v46  ;;  %v622_v59 = vld [vmem:[%s19723_s1 + $0x1260] sm:$0xff] }
  0xbe   :  { %v746_v61 = vld [vmem:[%s19723_s1 + $0x1640] sm:$0xff]  ;;  %9866 = vmatpush2.bf16.msra.mxu0 %v13140_v52  ;;  %v13125_v3 = vcombine.high %v618_v58, %v622_v59  ;;  %v13124_v9 = vcombine.low %v618_v58, %v622_v59 }
  0xbf   :  { %v750_v62 = vld [vmem:[%s19723_s1 + $0x1660] sm:$0xff]  ;;  %9867 = vmatprep.subr.bf16.mxu0 %v13133_v55 }
  0xc0   :  { %9907 = vmatpush2.bf16.msra.mxu1 %v13268_v53  ;;  %v13253_v5 = vcombine.high %v746_v61, %v750_v62  ;;  %v610_v6 = vld [vmem:[%s19723_s1 + $0x1200] sm:$0xff]  ;;  %v13252_v12 = vcombine.low %v746_v61, %v750_v62 }
  0xc1   :  { %9908 = vmatprep.subr.bf16.mxu1 %v13261_v11  ;;  %v614_v7 = vld [vmem:[%s19723_s1 + $0x1220] sm:$0xff] }
  0xc2   :  { %v738_v25 = vld [vmem:[%s19723_s1 + $0x1600] sm:$0xff]  ;;  %9868 = vmatpush2.bf16.msra.mxu0 %v13132_v1  ;;  %v13117_v13 = vcombine.high %v610_v6, %v614_v7  ;;  %v13116_v21 = vcombine.low %v610_v6, %v614_v7 }
  0xc3   :  { %v742_v8 = vld [vmem:[%s19723_s1 + $0x1620] sm:$0xff]  ;;  %9869 = vmatprep.subr.bf16.mxu0 %v13125_v3 }
  0xc4   :  { %9909 = vmatpush2.bf16.msra.mxu1 %v13260_v2  ;;  %v13245_v15 = vcombine.high %v738_v25, %v742_v8  ;;  %v858_v16 = vld [vmem:[%s19723_s1 + $0x19c0] sm:$0xff]  ;;  %v13244_v24 = vcombine.low %v738_v25, %v742_v8 }
  0xc5   :  { %9910 = vmatprep.subr.bf16.mxu1 %v13253_v5  ;;  %v862_v17 = vld [vmem:[%s19723_s1 + $0x19e0] sm:$0xff] }
  0xc6   :  { %v986_v18 = vld [vmem:[%s19723_s1 + $0x1dc0] sm:$0xff]  ;;  %9870 = vmatpush2.bf16.msra.mxu0 %v13124_v9  ;;  %v13365_v26 = vcombine.high %v858_v16, %v862_v17  ;;  %v13364_v34 = vcombine.low %v858_v16, %v862_v17 }
  0xc7   :  { %v990_v19 = vld [vmem:[%s19723_s1 + $0x1de0] sm:$0xff]  ;;  %9871 = vmatprep.subr.bf16.mxu0 %v13117_v13 }
  0xc8   :  { %9911 = vmatpush2.bf16.msra.mxu1 %v13252_v12  ;;  %v13493_v27 = vcombine.high %v986_v18, %v990_v19  ;;  %v850_v28 = vld [vmem:[%s19723_s1 + $0x1980] sm:$0xff]  ;;  %v13492_v36 = vcombine.low %v986_v18, %v990_v19 }
  0xc9   :  { %9912 = vmatprep.subr.bf16.mxu1 %v13245_v15  ;;  %v854_v29 = vld [vmem:[%s19723_s1 + $0x19a0] sm:$0xff] }
  0xca   :  { %v978_v0 = vld [vmem:[%s19723_s1 + $0x1d80] sm:$0xff]  ;;  %9872 = vmatpush2.bf16.msra.mxu0 %v13116_v21  ;;  %v13357_v37 = vcombine.high %v850_v28, %v854_v29  ;;  %v13356_v46 = vcombine.low %v850_v28, %v854_v29 }
  0xcb   :  { %v982_v35 = vld [vmem:[%s19723_s1 + $0x1da0] sm:$0xff]  ;;  %9923 = vmatprep.subr.bf16.mxu0 %v13365_v26 }
  0xcc   :  { %9913 = vmatpush2.bf16.msra.mxu1 %v13244_v24  ;;  %v13485_v38 = vcombine.high %v978_v0, %v982_v35  ;;  %v842_v39 = vld [vmem:[%s19723_s1 + $0x1940] sm:$0xff]  ;;  %v13484_v47 = vcombine.low %v978_v0, %v982_v35 }
  0xcd   :  { %9964 = vmatprep.subr.bf16.mxu1 %v13493_v27  ;;  %v846_v41 = vld [vmem:[%s19723_s1 + $0x1960] sm:$0xff]  ;;  %9874 = vmatmul.mubr.bf16.vlgmr.msra.gmra.mxu0 %v15086_v22 }
  0xce   :  { %v970_v42 = vld [vmem:[%s19723_s1 + $0x1d40] sm:$0xff]  ;;  %9924 = vmatpush1.bf16.msra.mxu0 %v13364_v34  ;;  %v13349_v49 = vcombine.high %v842_v39, %v846_v41  ;;  %9955 = vmatprep.mubr.bf16.mxu0 %v15101_v32  ;;  %v13348_v11 = vcombine.low %v842_v39, %v846_v41 }
  0xcf   :  { %v974_v43 = vld [vmem:[%s19723_s1 + $0x1d60] sm:$0xff]  ;;  %9915 = vmatmul.mubr.bf16.vlgmr.msra.gmra.mxu1 %v15105_v33  ;;  %9925 = vmatprep.subr.bf16.mxu0 %v13357_v37 }
  0xd0   :  { %9965 = vmatpush1.bf16.msra.mxu1 %v13492_v36  ;;  %v13477_v50 = vcombine.high %v970_v42, %v974_v43  ;;  %v834_v51 = vld [vmem:[%s19723_s1 + $0x1900] sm:$0xff]  ;;  %9996 = vmatprep.mubr.bf16.mxu1 %v15122_v45  ;;  %v13476_v58 = vcombine.low %v970_v42, %v974_v43 }
  0xd1   :  { %9966 = vmatprep.subr.bf16.mxu1 %v13485_v38  ;;  %v838_v52 = vld [vmem:[%s19723_s1 + $0x1920] sm:$0xff] }
  0xd2   :  { %v962_v53 = vld [vmem:[%s19723_s1 + $0x1d00] sm:$0xff]  ;;  %9926 = vmatpush1.bf16.msra.mxu0 %v13356_v46  ;;  %v13341_v59 = vcombine.high %v834_v51, %v838_v52  ;;  %v13340_v3 = vcombine.low %v834_v51, %v838_v52 }
  0xd3   :  { %v966_v55 = vld [vmem:[%s19723_s1 + $0x1d20] sm:$0xff]  ;;  %9927 = vmatprep.subr.bf16.mxu0 %v13349_v49 }
  0xd4   :  { %9967 = vmatpush1.bf16.msra.mxu1 %v13484_v47  ;;  %v13469_v61 = vcombine.high %v962_v53, %v966_v55  ;;  %v826_v62 = vld [vmem:[%s19723_s1 + $0x18c0] sm:$0xff]  ;;  %v13468_v5 = vcombine.low %v962_v53, %v966_v55 }
  0xd5   :  { %9968 = vmatprep.subr.bf16.mxu1 %v13477_v50  ;;  %v830_v63 = vld [vmem:[%s19723_s1 + $0x18e0] sm:$0xff] }
  0xd6   :  { %v954_v1 = vld [vmem:[%s19723_s1 + $0x1cc0] sm:$0xff]  ;;  %9928 = vmatpush1.bf16.msra.mxu0 %v13348_v11  ;;  %v13333_v6 = vcombine.high %v826_v62, %v830_v63  ;;  %v13332_v13 = vcombine.low %v826_v62, %v830_v63 }
  0xd7   :  { %v958_v2 = vld [vmem:[%s19723_s1 + $0x1ce0] sm:$0xff]  ;;  %9929 = vmatprep.subr.bf16.mxu0 %v13341_v59 }
  0xd8   :  { %9969 = vmatpush1.bf16.msra.mxu1 %v13476_v58  ;;  %v13461_v7 = vcombine.high %v954_v1, %v958_v2  ;;  %v818_v25 = vld [vmem:[%s19723_s1 + $0x1880] sm:$0xff]  ;;  %v13460_v15 = vcombine.low %v954_v1, %v958_v2 }
  0xd9   :  { %9970 = vmatprep.subr.bf16.mxu1 %v13469_v61  ;;  %v822_v8 = vld [vmem:[%s19723_s1 + $0x18a0] sm:$0xff] }
  0xda   :  { %v946_v9 = vld [vmem:[%s19723_s1 + $0x1c80] sm:$0xff]  ;;  %9930 = vmatpush1.bf16.msra.mxu0 %v13340_v3  ;;  %v13325_v16 = vcombine.high %v818_v25, %v822_v8  ;;  %v13324_v24 = vcombine.low %v818_v25, %v822_v8 }
  0xdb   :  { %v950_v12 = vld [vmem:[%s19723_s1 + $0x1ca0] sm:$0xff]  ;;  %9931 = vmatprep.subr.bf16.mxu0 %v13333_v6 }
  0xdc   :  { %9971 = vmatpush1.bf16.msra.mxu1 %v13468_v5  ;;  %v13453_v17 = vcombine.high %v946_v9, %v950_v12  ;;  %v810_v18 = vld [vmem:[%s19723_s1 + $0x1840] sm:$0xff]  ;;  %v13452_v26 = vcombine.low %v946_v9, %v950_v12 }
  0xdd   :  { %9972 = vmatprep.subr.bf16.mxu1 %v13461_v7  ;;  %v814_v19 = vld [vmem:[%s19723_s1 + $0x1860] sm:$0xff] }
  0xde   :  { %v938_v20 = vld [vmem:[%s19723_s1 + $0x1c40] sm:$0xff]  ;;  %9932 = vmatpush1.bf16.msra.mxu0 %v13332_v13  ;;  %v13317_v27 = vcombine.high %v810_v18, %v814_v19  ;;  %v13316_v36 = vcombine.low %v810_v18, %v814_v19 }
  0xdf   :  { %v942_v21 = vld [vmem:[%s19723_s1 + $0x1c60] sm:$0xff]  ;;  %9933 = vmatprep.subr.bf16.mxu0 %v13325_v16 }
  0xe0   :  { %9973 = vmatpush1.bf16.msra.mxu1 %v13460_v15  ;;  %v13445_v28 = vcombine.high %v938_v20, %v942_v21  ;;  %v802_v29 = vld [vmem:[%s19723_s1 + $0x1800] sm:$0xff]  ;;  %v13444_v37 = vcombine.low %v938_v20, %v942_v21 }
  0xe1   :  { %9974 = vmatprep.subr.bf16.mxu1 %v13453_v17  ;;  %v806_v0 = vld [vmem:[%s19723_s1 + $0x1820] sm:$0xff] }
  0xe2   :  { %v930_v35 = vld [vmem:[%s19723_s1 + $0x1c00] sm:$0xff]  ;;  %9934 = vmatpush1.bf16.msra.mxu0 %v13324_v24  ;;  %v13309_v38 = vcombine.high %v802_v29, %v806_v0  ;;  %v13308_v47 = vcombine.low %v802_v29, %v806_v0 }
  0xe3   :  { %v934_v34 = vld [vmem:[%s19723_s1 + $0x1c20] sm:$0xff]  ;;  %9935 = vmatprep.subr.bf16.mxu0 %v13317_v27 }
  0xe4   :  { %9975 = vmatpush1.bf16.msra.mxu1 %v13452_v26  ;;  %v13437_v39 = vcombine.high %v930_v35, %v934_v34  ;;  %v922_v41 = vld [vmem:[%s19723_s1 + $0x1bc0] sm:$0xff]  ;;  %v13436_v49 = vcombine.low %v930_v35, %v934_v34 }
  0xe5   :  { %9976 = vmatprep.subr.bf16.mxu1 %v13445_v28  ;;  %v926_v42 = vld [vmem:[%s19723_s1 + $0x1be0] sm:$0xff] }
  0xe6   :  { %v1050_v43 = vld [vmem:[%s19723_s1 + $0x1fc0] sm:$0xff]  ;;  %9936 = vmatpush1.bf16.msra.mxu0 %v13316_v36  ;;  %v13429_v50 = vcombine.high %v922_v41, %v926_v42  ;;  %v13428_v58 = vcombine.low %v922_v41, %v926_v42 }
  0xe7   :  { %v1054_v46 = vld [vmem:[%s19723_s1 + $0x1fe0] sm:$0xff]  ;;  %9937 = vmatprep.subr.bf16.mxu0 %v13309_v38 }
  0xe8   :  { %9977 = vmatpush1.bf16.msra.mxu1 %v13444_v37  ;;  %v13557_v51 = vcombine.high %v1050_v43, %v1054_v46  ;;  %v914_v52 = vld [vmem:[%s19723_s1 + $0x1b80] sm:$0xff]  ;;  %v13556_v59 = vcombine.low %v1050_v43, %v1054_v46 }
  0xe9   :  { %9978 = vmatprep.subr.bf16.mxu1 %v13437_v39  ;;  %v918_v53 = vld [vmem:[%s19723_s1 + $0x1ba0] sm:$0xff] }
  0xea   :  { %v1042_v55 = vld [vmem:[%s19723_s1 + $0x1f80] sm:$0xff]  ;;  %9938 = vmatpush1.bf16.msra.mxu0 %v13308_v47  ;;  %v13421_v61 = vcombine.high %v914_v52, %v918_v53  ;;  %v13420_v5 = vcombine.low %v914_v52, %v918_v53 }
  0xeb   :  { %v1046_v11 = vld [vmem:[%s19723_s1 + $0x1fa0] sm:$0xff]  ;;  %9939 = vmatprep.subr.bf16.mxu0 %v13429_v50  ;;  %v15274_v50 = vld [vmem:[%s19722_s0 + $0x10] sm:$0xff] }
  0xec   :  { %9979 = vmatpush1.bf16.msra.mxu1 %v13436_v49  ;;  %v13549_v62 = vcombine.high %v1042_v55, %v1046_v11  ;;  %v906_v63 = vld [vmem:[%s19723_s1 + $0x1b40] sm:$0xff]  ;;  %v13548_v6 = vcombine.low %v1042_v55, %v1046_v11 }
  0xed   :  { %9980 = vmatprep.subr.bf16.mxu1 %v13557_v51  ;;  %v910_v1 = vld [vmem:[%s19723_s1 + $0x1b60] sm:$0xff] }
  0xee   :  { %v1034_v2 = vld [vmem:[%s19723_s1 + $0x1f40] sm:$0xff]  ;;  %9940 = vmatpush2.bf16.msra.mxu0 %v13428_v58  ;;  %v13413_v7 = vcombine.high %v906_v63, %v910_v1  ;;  %v13412_v15 = vcombine.low %v906_v63, %v910_v1 }
  0xef   :  { %v1038_v3 = vld [vmem:[%s19723_s1 + $0x1f60] sm:$0xff]  ;;  %9941 = vmatprep.subr.bf16.mxu0 %v13421_v61  ;;  %v15290_v61 = vrot.slane %v15274_v50, %v14489_v54 }
  0xf0   :  { %9981 = vmatpush2.bf16.msra.mxu1 %v13556_v59  ;;  %v13541_v25 = vcombine.high %v1034_v2, %v1038_v3  ;;  %v898_v8 = vld [vmem:[%s19723_s1 + $0x1b00] sm:$0xff]  ;;  %v13540_v16 = vcombine.low %v1034_v2, %v1038_v3 }
  0xf1   :  { %9982 = vmatprep.subr.bf16.mxu1 %v13549_v62  ;;  %v902_v9 = vld [vmem:[%s19723_s1 + $0x1b20] sm:$0xff] }
  0xf2   :  { %v1026_v12 = vld [vmem:[%s19723_s1 + $0x1f00] sm:$0xff]  ;;  %9942 = vmatpush2.bf16.msra.mxu0 %v13420_v5  ;;  %v13405_v17 = vcombine.high %v898_v8, %v902_v9  ;;  %v13404_v26 = vcombine.low %v898_v8, %v902_v9  ;;  %v1606_v9 = vsub.s32 0, %v14474_v44 }
  0xf3   :  { %v1030_v13 = vld [vmem:[%s19723_s1 + $0x1f20] sm:$0xff]  ;;  %9943 = vmatprep.subr.bf16.mxu0 %v13413_v7 }
  0xf4   :  { %9983 = vmatpush2.bf16.msra.mxu1 %v13548_v6  ;;  %v13533_v18 = vcombine.high %v1026_v12, %v1030_v13  ;;  %v890_v19 = vld [vmem:[%s19723_s1 + $0x1ac0] sm:$0xff]  ;;  %v13532_v27 = vcombine.low %v1026_v12, %v1030_v13  ;;  %v15309_v12 = vrot.slane %v15068_v60, %v14489_v54 }
  0xf5   :  { %9984 = vmatprep.subr.bf16.mxu1 %v13541_v25  ;;  %v894_v20 = vld [vmem:[%s19723_s1 + $0x1ae0] sm:$0xff]  ;;  %v1761_v25 = vcombine.high %v15290_v61, %v15290_v61 }
  0xf6   :  { %v1018_v21 = vld [vmem:[%s19723_s1 + $0x1ec0] sm:$0xff]  ;;  %9944 = vmatpush2.bf16.msra.mxu0 %v13412_v15  ;;  %v13397_v28 = vcombine.high %v890_v19, %v894_v20  ;;  %v13396_v37 = vcombine.low %v890_v19, %v894_v20 }
  0xf7   :  { %v1022_v24 = vld [vmem:[%s19723_s1 + $0x1ee0] sm:$0xff]  ;;  %9945 = vmatprep.subr.bf16.mxu0 %v13405_v17 }
  0xf8   :  { %9985 = vmatpush2.bf16.msra.mxu1 %v13540_v16  ;;  %v13525_v29 = vcombine.high %v1018_v21, %v1022_v24  ;;  %v882_v0 = vld [vmem:[%s19723_s1 + $0x1a80] sm:$0xff]  ;;  %v13524_v38 = vcombine.low %v1018_v21, %v1022_v24  ;;  %v15328_v24 = vrot.slane %v1761_v25, %v14489_v54 }
  0xf9   :  { %9986 = vmatprep.subr.bf16.mxu1 %v13533_v18  ;;  %v886_v35 = vld [vmem:[%s19723_s1 + $0x1aa0] sm:$0xff]  ;;  %v1610_v18 = vsub.s32 1, %v14474_v44 }
  0xfa   :  { %v1010_v34 = vld [vmem:[%s19723_s1 + $0x1e80] sm:$0xff]  ;;  %9946 = vmatpush2.bf16.msra.mxu0 %v13404_v26  ;;  %v13389_v39 = vcombine.high %v882_v0, %v886_v35  ;;  %v13388_v49 = vcombine.low %v882_v0, %v886_v35 }
  0xfb   :  { %v1014_v36 = vld [vmem:[%s19723_s1 + $0x1ea0] sm:$0xff]  ;;  %9947 = vmatprep.subr.bf16.mxu0 %v13397_v28 }
  0xfc   :  { %9987 = vmatpush2.bf16.msra.mxu1 %v13532_v27  ;;  %v13517_v41 = vcombine.high %v1010_v34, %v1014_v36  ;;  %v874_v42 = vld [vmem:[%s19723_s1 + $0x1a40] sm:$0xff]  ;;  %v13516_v51 = vcombine.low %v1010_v34, %v1014_v36  ;;  %v15332_v27 = vcombine.high %v15309_v12, %v15309_v12 }
  0xfd   :  { %9988 = vmatprep.subr.bf16.mxu1 %v13525_v29  ;;  %v878_v43 = vld [vmem:[%s19723_s1 + $0x1a60] sm:$0xff] }
  0xfe   :  { %v1002_v46 = vld [vmem:[%s19723_s1 + $0x1e40] sm:$0xff]  ;;  %9948 = vmatpush2.bf16.msra.mxu0 %v13396_v37  ;;  %v13381_v52 = vcombine.high %v874_v42, %v878_v43  ;;  %v13380_v62 = vcombine.low %v874_v42, %v878_v43  ;;  %v15349_v42 = vcombine.high %v15328_v24, %v15328_v24 }
  0xff   :  { %v1006_v47 = vld [vmem:[%s19723_s1 + $0x1e60] sm:$0xff]  ;;  %9949 = vmatprep.subr.bf16.mxu0 %v13389_v39 }
 0x100   :  { %9989 = vmatpush2.bf16.msra.mxu1 %v13524_v38  ;;  %v13509_v53 = vcombine.high %v1002_v46, %v1006_v47  ;;  %v866_v55 = vld [vmem:[%s19723_s1 + $0x1a00] sm:$0xff]  ;;  %v13508_v63 = vcombine.low %v1002_v46, %v1006_v47 }
 0x101   :  { %9990 = vmatprep.subr.bf16.mxu1 %v13517_v41  ;;  %v870_v11 = vld [vmem:[%s19723_s1 + $0x1a20] sm:$0xff] }
 0x102   :  { %v994_v58 = vld [vmem:[%s19723_s1 + $0x1e00] sm:$0xff]  ;;  %9950 = vmatpush2.bf16.msra.mxu0 %v13388_v49  ;;  %v13373_v1 = vcombine.high %v866_v55, %v870_v11  ;;  %v13372_v8 = vcombine.low %v866_v55, %v870_v11 }
 0x103   :  { %v998_v59 = vld [vmem:[%s19723_s1 + $0x1e20] sm:$0xff]  ;;  %9951 = vmatprep.subr.bf16.mxu0 %v13381_v52 }
 0x104   :  { %9991 = vmatpush2.bf16.msra.mxu1 %v13516_v51  ;;  %v13501_v2 = vcombine.high %v994_v58, %v998_v59  ;;  %v1114_v3 = vld [vmem:[%s19723_s1 + $0x21c0] sm:$0xff]  ;;  %v13500_v13 = vcombine.low %v994_v58, %v998_v59 }
 0x105   :  { %9992 = vmatprep.subr.bf16.mxu1 %v13509_v53  ;;  %v1118_v5 = vld [vmem:[%s19723_s1 + $0x21e0] sm:$0xff] }
 0x106   :  { %v1242_v6 = vld [vmem:[%s19723_s1 + $0x25c0] sm:$0xff]  ;;  %9952 = vmatpush2.bf16.msra.mxu0 %v13380_v62  ;;  %v13621_v16 = vcombine.high %v1114_v3, %v1118_v5  ;;  %v13620_v28 = vcombine.low %v1114_v3, %v1118_v5 }
 0x107   :  { %v1246_v7 = vld [vmem:[%s19723_s1 + $0x25e0] sm:$0xff]  ;;  %9953 = vmatprep.subr.bf16.mxu0 %v13373_v1 }
 0x108   :  { %9993 = vmatpush2.bf16.msra.mxu1 %v13508_v63  ;;  %v1602_v15 = vld [vmem:[%s19724_s2] sm:$0xff]  ;;  %v13749_v17 = vcombine.high %v1242_v6, %v1246_v7  ;;  %v13748_v29 = vcombine.low %v1242_v6, %v1246_v7  ;;  %v9711_v38 = vpop.f32.mrf.mxu0 }
 0x109   :  { %9994 = vmatprep.subr.bf16.mxu1 %v13501_v2  ;;  %v1106_v19 = vld [vmem:[%s19723_s1 + $0x2180] sm:$0xff]  ;;  %v1607_v26 = vrot.slane %v1602_v15, %v1606_v9  ;;  %v1611_v35 = vrot.slane %v1602_v15, %v1610_v18 }
 0x10a   :  { %v1110_v60 = vld [vmem:[%s19723_s1 + $0x21a0] sm:$0xff]  ;;  %9954 = vmatpush2.bf16.msra.mxu0 %v13372_v8  ;;  %v9752_v46 = vpop.f32.mrf.mxu1  ;;  %v9713_v49 = vpop.f32.mrf.mxu0 }
 0x10b   :  { %v1234_v20 = vld [vmem:[%s19723_s1 + $0x2580] sm:$0xff]  ;;  %10005 = vmatprep.subr.bf16.mxu0 %v13621_v16  ;;  %v13613_v0 = vcombine.high %v1106_v19, %v1110_v60  ;;  %v9712_v43 = vadd.f32 %v9711_v38, %v1607_v26  ;;  %v13612_v47 = vcombine.low %v1106_v19, %v1110_v60  ;;  %v9714_v55 = vadd.f32 %v9713_v49, %v1611_v35 }
 0x10c   :  { %v1238_v21 = vld [vmem:[%s19723_s1 + $0x25a0] sm:$0xff]  ;;  %9995 = vmatpush2.bf16.msra.mxu1 %v13500_v13  ;;  %v9754_v11 = vpop.f32.mrf.mxu1  ;;  %v9715_v63 = vpop.f32.mrf.mxu0 }
 0x10d   :  { %10046 = vmatprep.subr.bf16.mxu1 %v13749_v17  ;;  %v13741_v34 = vcombine.high %v1234_v20, %v1238_v21  ;;  %v1098_v36 = vld [vmem:[%s19723_s1 + $0x2140] sm:$0xff]  ;;  %9956 = vmatmul.mubr.bf16.vlgmr.msra.gmra.mxu0 %v15309_v12  ;;  %v13740_v51 = vcombine.low %v1234_v20, %v1238_v21  ;;  %v15352_v53 = vadd.f32 %v9752_v46, %v9712_v43 }
 0x10e   :  { %v1102_v37 = vld [vmem:[%s19723_s1 + $0x2160] sm:$0xff]  ;;  %10006 = vmatpush1.bf16.msra.mxu0 %v13620_v28  ;;  %10037 = vmatprep.mubr.bf16.mxu0 %v15328_v24  ;;  %v15368_v3 = vadd.f32 %v9754_v11, %v9714_v55  ;;  %v9756_v5 = vpop.f32.mrf.mxu1  ;;  %v9716_v7 = vpop.f32.mrf.mxu0 }
 0x10f   :  { %v1226_v39 = vld [vmem:[%s19723_s1 + $0x2540] sm:$0xff]  ;;  %9997 = vmatmul.mubr.bf16.vlgmr.msra.gmra.mxu1 %v15332_v27  ;;  %10007 = vmatprep.subr.bf16.mxu0 %v13613_v0  ;;  %v13605_v52 = vcombine.high %v1098_v36, %v1102_v37  ;;  %v13604_v6 = vcombine.low %v1098_v36, %v1102_v37 }
 0x110   :  { %v1230_v41 = vld [vmem:[%s19723_s1 + $0x2560] sm:$0xff]  ;;  %10047 = vmatpush1.bf16.msra.mxu1 %v13748_v29  ;;  %10078 = vmatprep.mubr.bf16.mxu1 %v15349_v42  ;;  %v9757_v9 = vpop.f32.mrf.mxu1 }
 0x111   :  { %10048 = vmatprep.subr.bf16.mxu1 %v13741_v34  ;;  %v13733_v58 = vcombine.high %v1226_v39, %v1230_v41  ;;  %v1090_v59 = vld [vmem:[%s19723_s1 + $0x2100] sm:$0xff]  ;;  %v13732_v25 = vcombine.low %v1226_v39, %v1230_v41  ;;  %v14363_v41 = vmov 0  }
 0x112   :  { %v1094_v62 = vld [vmem:[%s19723_s1 + $0x2120] sm:$0xff]  ;;  %10008 = vmatpush1.bf16.msra.mxu0 %v13612_v47  ;;  %14269 = vset.pattern.permute.xlu0 %v14363_v41 }
 0x113   :  { %v1218_v1 = vld [vmem:[%s19723_s1 + $0x2500] sm:$0xff]  ;;  %10009 = vmatprep.subr.bf16.mxu0 %v13605_v52  ;;  %v13597_v8 = vcombine.high %v1090_v59, %v1094_v62  ;;  %v13596_v19 = vcombine.low %v1090_v59, %v1094_v62 }
 0x114   :  { %v1222_v2 = vld [vmem:[%s19723_s1 + $0x2520] sm:$0xff]  ;;  %10049 = vmatpush1.bf16.msra.mxu1 %v13740_v51 }
 0x115   :  { %10050 = vmatprep.subr.bf16.mxu1 %v13733_v58  ;;  %v13725_v13 = vcombine.high %v1218_v1, %v1222_v2  ;;  %v1082_v15 = vld [vmem:[%s19723_s1 + $0x20c0] sm:$0xff]  ;;  %v13724_v60 = vcombine.low %v1218_v1, %v1222_v2 }
 0x116   :  { %v1086_v16 = vld [vmem:[%s19723_s1 + $0x20e0] sm:$0xff]  ;;  %10010 = vmatpush1.bf16.msra.mxu0 %v13604_v6 }
 0x117   :  { %v1210_v17 = vld [vmem:[%s19723_s1 + $0x24c0] sm:$0xff]  ;;  %10011 = vmatprep.subr.bf16.mxu0 %v13597_v8  ;;  %v13589_v20 = vcombine.high %v1082_v15, %v1086_v16  ;;  %v13588_v35 = vcombine.low %v1082_v15, %v1086_v16 }
 0x118   :  { %v1214_v18 = vld [vmem:[%s19723_s1 + $0x24e0] sm:$0xff]  ;;  %10051 = vmatpush1.bf16.msra.mxu1 %v13732_v25 }
 0x119   :  { %10052 = vmatprep.subr.bf16.mxu1 %v13725_v13  ;;  %v13717_v21 = vcombine.high %v1210_v17, %v1214_v18  ;;  %v1074_v26 = vld [vmem:[%s19723_s1 + $0x2080] sm:$0xff]  ;;  %v13716_v34 = vcombine.low %v1210_v17, %v1214_v18 }
 0x11a   :  { %v1078_v28 = vld [vmem:[%s19723_s1 + $0x20a0] sm:$0xff]  ;;  %10012 = vmatpush1.bf16.msra.mxu0 %v13596_v19 }
 0x11b   :  { %v1202_v29 = vld [vmem:[%s19723_s1 + $0x2480] sm:$0xff]  ;;  %10013 = vmatprep.subr.bf16.mxu0 %v13589_v20  ;;  %v13581_v36 = vcombine.high %v1074_v26, %v1078_v28  ;;  %v13580_v47 = vcombine.low %v1074_v26, %v1078_v28 }
 0x11c   :  { %v1206_v0 = vld [vmem:[%s19723_s1 + $0x24a0] sm:$0xff]  ;;  %10053 = vmatpush1.bf16.msra.mxu1 %v13724_v60 }
 0x11d   :  { %10054 = vmatprep.subr.bf16.mxu1 %v13717_v21  ;;  %v13709_v37 = vcombine.high %v1202_v29, %v1206_v0  ;;  %v1066_v38 = vld [vmem:[%s19723_s1 + $0x2040] sm:$0xff]  ;;  %v13708_v49 = vcombine.low %v1202_v29, %v1206_v0 }
 0x11e   :  { %v1070_v39 = vld [vmem:[%s19723_s1 + $0x2060] sm:$0xff]  ;;  %10014 = vmatpush1.bf16.msra.mxu0 %v13588_v35 }
 0x11f   :  { %v1194_v43 = vld [vmem:[%s19723_s1 + $0x2440] sm:$0xff]  ;;  %10015 = vmatprep.subr.bf16.mxu0 %v13581_v36  ;;  %v13573_v51 = vcombine.high %v1066_v38, %v1070_v39  ;;  %v13572_v62 = vcombine.low %v1066_v38, %v1070_v39 }
 0x120   :  { %v1198_v46 = vld [vmem:[%s19723_s1 + $0x2460] sm:$0xff]  ;;  %10055 = vmatpush1.bf16.msra.mxu1 %v13716_v34 }
 0x121   :  { %10056 = vmatprep.subr.bf16.mxu1 %v13709_v37  ;;  %v13701_v52 = vcombine.high %v1194_v43, %v1198_v46  ;;  %v1058_v55 = vld [vmem:[%s19723_s1 + $0x2000] sm:$0xff]  ;;  %v13700_v63 = vcombine.low %v1194_v43, %v1198_v46 }
 0x122   :  { %v1062_v11 = vld [vmem:[%s19723_s1 + $0x2020] sm:$0xff]  ;;  %10016 = vmatpush1.bf16.msra.mxu0 %v13580_v47 }
 0x123   :  { %v1186_v58 = vld [vmem:[%s19723_s1 + $0x2400] sm:$0xff]  ;;  %10017 = vmatprep.subr.bf16.mxu0 %v13573_v51  ;;  %v13565_v1 = vcombine.high %v1058_v55, %v1062_v11  ;;  %v13564_v8 = vcombine.low %v1058_v55, %v1062_v11 }
 0x124   :  { %v1190_v59 = vld [vmem:[%s19723_s1 + $0x2420] sm:$0xff]  ;;  %10057 = vmatpush1.bf16.msra.mxu1 %v13708_v49 }
 0x125   :  { %10058 = vmatprep.subr.bf16.mxu1 %v13701_v52  ;;  %v13693_v2 = vcombine.high %v1186_v58, %v1190_v59  ;;  %v1178_v5 = vld [vmem:[%s19723_s1 + $0x23c0] sm:$0xff]  ;;  %v13692_v9 = vcombine.low %v1186_v58, %v1190_v59 }
 0x126   :  { %v1182_v6 = vld [vmem:[%s19723_s1 + $0x23e0] sm:$0xff]  ;;  %10018 = vmatpush1.bf16.msra.mxu0 %v13572_v62 }
 0x127   :  { %v1306_v7 = vld [vmem:[%s19723_s1 + $0x27c0] sm:$0xff]  ;;  %10019 = vmatprep.subr.bf16.mxu0 %v13565_v1  ;;  %v13685_v13 = vcombine.high %v1178_v5, %v1182_v6  ;;  %v13684_v60 = vcombine.low %v1178_v5, %v1182_v6 }
 0x128   :  { %v1310_v25 = vld [vmem:[%s19723_s1 + $0x27e0] sm:$0xff]  ;;  %10059 = vmatpush1.bf16.msra.mxu1 %v13700_v63 }
 0x129   :  { %10060 = vmatprep.subr.bf16.mxu1 %v13693_v2  ;;  %v13813_v15 = vcombine.high %v1306_v7, %v1310_v25  ;;  %v1170_v16 = vld [vmem:[%s19723_s1 + $0x2380] sm:$0xff]  ;;  %v13812_v20 = vcombine.low %v1306_v7, %v1310_v25 }
 0x12a   :  { %v1174_v17 = vld [vmem:[%s19723_s1 + $0x23a0] sm:$0xff]  ;;  %10020 = vmatpush1.bf16.msra.mxu0 %v13564_v8 }
 0x12b   :  { %v1298_v18 = vld [vmem:[%s19723_s1 + $0x2780] sm:$0xff]  ;;  %10021 = vmatprep.subr.bf16.mxu0 %v13685_v13  ;;  %v13677_v21 = vcombine.high %v1170_v16, %v1174_v17  ;;  %v13676_v34 = vcombine.low %v1170_v16, %v1174_v17 }
 0x12c   :  { %v1302_v19 = vld [vmem:[%s19723_s1 + $0x27a0] sm:$0xff]  ;;  %10061 = vmatpush1.bf16.msra.mxu1 %v13692_v9 }
 0x12d   :  { %10062 = vmatprep.subr.bf16.mxu1 %v13813_v15  ;;  %v13805_v26 = vcombine.high %v1298_v18, %v1302_v19  ;;  %v1162_v28 = vld [vmem:[%s19723_s1 + $0x2340] sm:$0xff]  ;;  %v13804_v36 = vcombine.low %v1298_v18, %v1302_v19 }
 0x12e   :  { %v1166_v29 = vld [vmem:[%s19723_s1 + $0x2360] sm:$0xff]  ;;  %10022 = vmatpush2.bf16.msra.mxu0 %v13684_v60 }
 0x12f   :  { %v1290_v0 = vld [vmem:[%s19723_s1 + $0x2740] sm:$0xff]  ;;  %10023 = vmatprep.subr.bf16.mxu0 %v13677_v21  ;;  %v13669_v37 = vcombine.high %v1162_v28, %v1166_v29  ;;  %v13668_v49 = vcombine.low %v1162_v28, %v1166_v29 }
 0x130   :  { %v1294_v35 = vld [vmem:[%s19723_s1 + $0x2760] sm:$0xff]  ;;  %10063 = vmatpush2.bf16.msra.mxu1 %v13812_v20  ;;  %v1746_v20 = vcombine.high %v15274_v50, %v15274_v50 }
 0x131   :  { %10064 = vmatprep.subr.bf16.mxu1 %v13805_v26  ;;  %v13797_v38 = vcombine.high %v1290_v0, %v1294_v35  ;;  %v1154_v39 = vld [vmem:[%s19723_s1 + $0x2300] sm:$0xff]  ;;  %v13796_v51 = vcombine.low %v1290_v0, %v1294_v35 }
 0x132   :  { %v1158_v43 = vld [vmem:[%s19723_s1 + $0x2320] sm:$0xff]  ;;  %10024 = vmatpush2.bf16.msra.mxu0 %v13676_v34 }
 0x133   :  { %v1282_v46 = vld [vmem:[%s19723_s1 + $0x2700] sm:$0xff]  ;;  %10025 = vmatprep.subr.bf16.mxu0 %v13669_v37  ;;  %v13661_v52 = vcombine.high %v1154_v39, %v1158_v43  ;;  %v13660_v63 = vcombine.low %v1154_v39, %v1158_v43 }
 0x134   :  { %v1286_v47 = vld [vmem:[%s19723_s1 + $0x2720] sm:$0xff]  ;;  %10065 = vmatpush2.bf16.msra.mxu1 %v13804_v36  ;;  %v15518_v36 = vrot.slane %v1746_v20, %v14489_v54 }
 0x135   :  { %10066 = vmatprep.subr.bf16.mxu1 %v13797_v38  ;;  %v13789_v55 = vcombine.high %v1282_v46, %v1286_v47  ;;  %v1146_v11 = vld [vmem:[%s19723_s1 + $0x22c0] sm:$0xff]  ;;  %v13788_v1 = vcombine.low %v1282_v46, %v1286_v47 }
 0x136   :  { %v1150_v58 = vld [vmem:[%s19723_s1 + $0x22e0] sm:$0xff]  ;;  %10026 = vmatpush2.bf16.msra.mxu0 %v13668_v49 }
 0x137   :  { %v1274_v59 = vld [vmem:[%s19723_s1 + $0x26c0] sm:$0xff]  ;;  %10027 = vmatprep.subr.bf16.mxu0 %v13661_v52  ;;  %v13653_v2 = vcombine.high %v1146_v11, %v1150_v58  ;;  %v13652_v9 = vcombine.low %v1146_v11, %v1150_v58  ;;  %v1762_v52 = vcombine.high %v15518_v36, %v15518_v36  ;;  %v15536_v11 = vrot.slane %v15290_v61, %v14489_v54 }
 0x138   :  { %v1278_v62 = vld [vmem:[%s19723_s1 + $0x26e0] sm:$0xff]  ;;  %10067 = vmatpush2.bf16.msra.mxu1 %v13796_v51 }
 0x139   :  { %10068 = vmatprep.subr.bf16.mxu1 %v13789_v55  ;;  %v13781_v5 = vcombine.high %v1274_v59, %v1278_v62  ;;  %v1138_v6 = vld [vmem:[%s19723_s1 + $0x2280] sm:$0xff]  ;;  %v13780_v13 = vcombine.low %v1274_v59, %v1278_v62 }
 0x13a   :  { %v1142_v7 = vld [vmem:[%s19723_s1 + $0x22a0] sm:$0xff]  ;;  %10028 = vmatpush2.bf16.msra.mxu0 %v13660_v63 }
 0x13b   :  { %v1266_v25 = vld [vmem:[%s19723_s1 + $0x2680] sm:$0xff]  ;;  %10029 = vmatprep.subr.bf16.mxu0 %v13653_v2  ;;  %v13645_v15 = vcombine.high %v1138_v6, %v1142_v7  ;;  %v13644_v21 = vcombine.low %v1138_v6, %v1142_v7  ;;  %v15555_v6 = vcombine.high %v15536_v11, %v15536_v11 }
 0x13c   :  { %v1270_v8 = vld [vmem:[%s19723_s1 + $0x26a0] sm:$0xff]  ;;  %10069 = vmatpush2.bf16.msra.mxu1 %v13788_v1 }
 0x13d   :  { %10070 = vmatprep.subr.bf16.mxu1 %v13781_v5  ;;  %v13773_v16 = vcombine.high %v1266_v25, %v1270_v8  ;;  %v1130_v17 = vld [vmem:[%s19723_s1 + $0x2240] sm:$0xff]  ;;  %v13772_v26 = vcombine.low %v1266_v25, %v1270_v8  ;;  %v15551_v5 = vrot.slane %v1762_v52, %v14489_v54 }
 0x13e   :  { %v1134_v18 = vld [vmem:[%s19723_s1 + $0x2260] sm:$0xff]  ;;  %10030 = vmatpush2.bf16.msra.mxu0 %v13652_v9 }
 0x13f   :  { %v1258_v19 = vld [vmem:[%s19723_s1 + $0x2640] sm:$0xff]  ;;  %10031 = vmatprep.subr.bf16.mxu0 %v13645_v15  ;;  %v13637_v28 = vcombine.high %v1130_v17, %v1134_v18  ;;  %v13636_v37 = vcombine.low %v1130_v17, %v1134_v18 }
 0x140   :  { %v1262_v60 = vld [vmem:[%s19723_s1 + $0x2660] sm:$0xff]  ;;  %10071 = vmatpush2.bf16.msra.mxu1 %v13780_v13 }
 0x141   :  { %10072 = vmatprep.subr.bf16.mxu1 %v13773_v16  ;;  %v13765_v29 = vcombine.high %v1258_v19, %v1262_v60  ;;  %v1122_v0 = vld [vmem:[%s19723_s1 + $0x2200] sm:$0xff]  ;;  %v13764_v38 = vcombine.low %v1258_v19, %v1262_v60  ;;  %v15572_v19 = vcombine.high %v15551_v5, %v15551_v5 }
 0x142   :  { %v1126_v35 = vld [vmem:[%s19723_s1 + $0x2220] sm:$0xff]  ;;  %10032 = vmatpush2.bf16.msra.mxu0 %v13644_v21 }
 0x143   :  { %v1250_v50 = vld [vmem:[%s19723_s1 + $0x2600] sm:$0xff]  ;;  %10033 = vmatprep.subr.bf16.mxu0 %v13637_v28  ;;  %v13629_v39 = vcombine.high %v1122_v0, %v1126_v35  ;;  %v13628_v55 = vcombine.low %v1122_v0, %v1126_v35 }
 0x144   :  { %v1254_v34 = vld [vmem:[%s19723_s1 + $0x2620] sm:$0xff]  ;;  %10073 = vmatpush2.bf16.msra.mxu1 %v13772_v26 }
 0x145   :  { %10074 = vmatprep.subr.bf16.mxu1 %v13765_v29  ;;  %v13757_v43 = vcombine.high %v1250_v50, %v1254_v34  ;;  %v1370_v46 = vld [vmem:[%s19723_s1 + $0x29c0] sm:$0xff]  ;;  %v13756_v58 = vcombine.low %v1250_v50, %v1254_v34 }
 0x146   :  { %v1374_v47 = vld [vmem:[%s19723_s1 + $0x29e0] sm:$0xff]  ;;  %10034 = vmatpush2.bf16.msra.mxu0 %v13636_v37 }
 0x147   :  { %v1498_v49 = vld [vmem:[%s19723_s1 + $0x2dc0] sm:$0xff]  ;;  %10035 = vmatprep.subr.bf16.mxu0 %v13629_v39  ;;  %v13877_v59 = vcombine.high %v1370_v46, %v1374_v47  ;;  %v13876_v7 = vcombine.low %v1370_v46, %v1374_v47 }
 0x148   :  { %v1502_v51 = vld [vmem:[%s19723_s1 + $0x2de0] sm:$0xff]  ;;  %10075 = vmatpush2.bf16.msra.mxu1 %v13764_v38 }
 0x149   :  { %10076 = vmatprep.subr.bf16.mxu1 %v13757_v43  ;;  %v14005_v62 = vcombine.high %v1498_v49, %v1502_v51  ;;  %v1362_v63 = vld [vmem:[%s19723_s1 + $0x2980] sm:$0xff]  ;;  %v14004_v25 = vcombine.low %v1498_v49, %v1502_v51 }
 0x14a   :  { %v1366_v1 = vld [vmem:[%s19723_s1 + $0x29a0] sm:$0xff]  ;;  %10036 = vmatpush2.bf16.msra.mxu0 %v13628_v55 }
 0x14b   :  { %v1490_v2 = vld [vmem:[%s19723_s1 + $0x2d80] sm:$0xff]  ;;  %10087 = vmatprep.subr.bf16.mxu0 %v13877_v59  ;;  %v13869_v8 = vcombine.high %v1362_v63, %v1366_v1  ;;  %v13868_v21 = vcombine.low %v1362_v63, %v1366_v1 }
 0x14c   :  { %v1494_v61 = vld [vmem:[%s19723_s1 + $0x2da0] sm:$0xff]  ;;  %10077 = vmatpush2.bf16.msra.mxu1 %v13756_v58 }
 0x14d   :  { %10128 = vmatprep.subr.bf16.mxu1 %v14005_v62  ;;  %v13997_v9 = vcombine.high %v1490_v2, %v1494_v61  ;;  %v1354_v13 = vld [vmem:[%s19723_s1 + $0x2940] sm:$0xff]  ;;  %v9793_v16 = vpop.f32.mrf.mxu0  ;;  %10038 = vmatmul.mubr.bf16.vlgmr.msra.gmra.mxu0 %v15536_v11  ;;  %v13996_v28 = vcombine.low %v1490_v2, %v1494_v61 }
 0x14e   :  { %v1358_v15 = vld [vmem:[%s19723_s1 + $0x2960] sm:$0xff]  ;;  %v9794_v60 = vadd.f32 %v9793_v16, %v15352_v53  ;;  %10088 = vmatpush1.bf16.msra.mxu0 %v13876_v7  ;;  %10119 = vmatprep.mubr.bf16.mxu0 %v15551_v5 }
 0x14f   :  { %v1482_v17 = vld [vmem:[%s19723_s1 + $0x2d40] sm:$0xff]  ;;  %v9834_v20 = vpop.f32.mrf.mxu1  ;;  %10079 = vmatmul.mubr.bf16.vlgmr.msra.gmra.mxu1 %v15555_v6  ;;  %v9795_v26 = vpop.f32.mrf.mxu0  ;;  %10089 = vmatprep.subr.bf16.mxu0 %v13869_v8  ;;  %v13861_v29 = vcombine.high %v1354_v13, %v1358_v15  ;;  %v13860_v47 = vcombine.low %v1354_v13, %v1358_v15 }
 0x150   :  { %v1486_v18 = vld [vmem:[%s19723_s1 + $0x2d60] sm:$0xff]  ;;  %10129 = vmatpush1.bf16.msra.mxu1 %v14004_v25  ;;  %v15576_v0 = vadd.f32 %v9834_v20, %v9794_v60  ;;  %v9796_v35 = vadd.f32 %v9795_v26, %v15368_v3  ;;  %10160 = vmatprep.mubr.bf16.mxu1 %v15572_v19 }
 0x151   :  { %v9836_v50 = vpop.f32.mrf.mxu1  ;;  %10130 = vmatprep.subr.bf16.mxu1 %v13997_v9  ;;  %v13989_v34 = vcombine.high %v1482_v17, %v1486_v18  ;;  %v1346_v53 = vld [vmem:[%s19723_s1 + $0x2900] sm:$0xff]  ;;  %v9797_v38 = vpop.f32.mrf.mxu0  ;;  %v13988_v51 = vcombine.low %v1482_v17, %v1486_v18 }
 0x152   :  { %v1350_v37 = vld [vmem:[%s19723_s1 + $0x2920] sm:$0xff]  ;;  %v15593_v43 = vadd.f32 %v9836_v50, %v9796_v35  ;;  %10090 = vmatpush1.bf16.msra.mxu0 %v13868_v21 }
 0x153   :  { %v1474_v39 = vld [vmem:[%s19723_s1 + $0x2d00] sm:$0xff]  ;;  %v9838_v46 = vpop.f32.mrf.mxu1  ;;  %v9798_v49 = vpop.f32.mrf.mxu0  ;;  %10091 = vmatprep.subr.bf16.mxu0 %v13861_v29  ;;  %v13853_v52 = vcombine.high %v1346_v53, %v1350_v37  ;;  %v13852_v2 = vcombine.low %v1346_v53, %v1350_v37 }
 0x154   :  { %v1478_v3 = vld [vmem:[%s19723_s1 + $0x2d20] sm:$0xff]  ;;  %10131 = vmatpush1.bf16.msra.mxu1 %v13996_v28 }
 0x155   :  { %v9839_v55 = vpop.f32.mrf.mxu1  ;;  %10132 = vmatprep.subr.bf16.mxu1 %v13989_v34  ;;  %v13981_v58 = vcombine.high %v1474_v39, %v1478_v3  ;;  %v1338_v59 = vld [vmem:[%s19723_s1 + $0x28c0] sm:$0xff]  ;;  %v13980_v61 = vcombine.low %v1474_v39, %v1478_v3 }
 0x156   :  { %v1342_v62 = vld [vmem:[%s19723_s1 + $0x28e0] sm:$0xff]  ;;  %10092 = vmatpush1.bf16.msra.mxu0 %v13860_v47 }
 0x157   :  { %v1466_v63 = vld [vmem:[%s19723_s1 + $0x2cc0] sm:$0xff]  ;;  %10093 = vmatprep.subr.bf16.mxu0 %v13853_v52  ;;  %v13845_v7 = vcombine.high %v1338_v59, %v1342_v62  ;;  %v13844_v16 = vcombine.low %v1338_v59, %v1342_v62 }
 0x158   :  { %v1470_v1 = vld [vmem:[%s19723_s1 + $0x2ce0] sm:$0xff]  ;;  %10133 = vmatpush1.bf16.msra.mxu1 %v13988_v51 }
 0x159   :  { %10134 = vmatprep.subr.bf16.mxu1 %v13981_v58  ;;  %v13973_v25 = vcombine.high %v1466_v63, %v1470_v1  ;;  %v1330_v8 = vld [vmem:[%s19723_s1 + $0x2880] sm:$0xff]  ;;  %v13972_v17 = vcombine.low %v1466_v63, %v1470_v1 }
 0x15a   :  { %v1334_v9 = vld [vmem:[%s19723_s1 + $0x28a0] sm:$0xff]  ;;  %10094 = vmatpush1.bf16.msra.mxu0 %v13852_v2 }
 0x15b   :  { %v1458_v13 = vld [vmem:[%s19723_s1 + $0x2c80] sm:$0xff]  ;;  %10095 = vmatprep.subr.bf16.mxu0 %v13845_v7  ;;  %v13837_v18 = vcombine.high %v1330_v8, %v1334_v9  ;;  %v13836_v29 = vcombine.low %v1330_v8, %v1334_v9 }
 0x15c   :  { %v1462_v15 = vld [vmem:[%s19723_s1 + $0x2ca0] sm:$0xff]  ;;  %10135 = vmatpush1.bf16.msra.mxu1 %v13980_v61 }
 0x15d   :  { %10136 = vmatprep.subr.bf16.mxu1 %v13973_v25  ;;  %v13965_v60 = vcombine.high %v1458_v13, %v1462_v15  ;;  %v1322_v20 = vld [vmem:[%s19723_s1 + $0x2840] sm:$0xff]  ;;  %v13964_v35 = vcombine.low %v1458_v13, %v1462_v15 }
 0x15e   :  { %v1326_v21 = vld [vmem:[%s19723_s1 + $0x2860] sm:$0xff]  ;;  %10096 = vmatpush1.bf16.msra.mxu0 %v13844_v16 }
 0x15f   :  { %v1450_v26 = vld [vmem:[%s19723_s1 + $0x2c40] sm:$0xff]  ;;  %10097 = vmatprep.subr.bf16.mxu0 %v13837_v18  ;;  %v13829_v50 = vcombine.high %v1322_v20, %v1326_v21  ;;  %v13828_v3 = vcombine.low %v1322_v20, %v1326_v21 }
 0x160   :  { %v1454_v28 = vld [vmem:[%s19723_s1 + $0x2c60] sm:$0xff]  ;;  %10137 = vmatpush1.bf16.msra.mxu1 %v13972_v17 }
 0x161   :  { %10138 = vmatprep.subr.bf16.mxu1 %v13965_v60  ;;  %v13957_v34 = vcombine.high %v1450_v26, %v1454_v28  ;;  %v1314_v53 = vld [vmem:[%s19723_s1 + $0x2800] sm:$0xff]  ;;  %v13956_v46 = vcombine.low %v1450_v26, %v1454_v28 }
 0x162   :  { %v1318_v37 = vld [vmem:[%s19723_s1 + $0x2820] sm:$0xff]  ;;  %10098 = vmatpush1.bf16.msra.mxu0 %v13836_v29 }
 0x163   :  { %v1442_v38 = vld [vmem:[%s19723_s1 + $0x2c00] sm:$0xff]  ;;  %10099 = vmatprep.subr.bf16.mxu0 %v13829_v50  ;;  %v13821_v47 = vcombine.high %v1314_v53, %v1318_v37  ;;  %v13820_v59 = vcombine.low %v1314_v53, %v1318_v37 }
 0x164   :  { %v1446_v39 = vld [vmem:[%s19723_s1 + $0x2c20] sm:$0xff]  ;;  %10139 = vmatpush1.bf16.msra.mxu1 %v13964_v35 }
 0x165   :  { %10140 = vmatprep.subr.bf16.mxu1 %v13957_v34  ;;  %v13949_v49 = vcombine.high %v1442_v38, %v1446_v39  ;;  %v1434_v51 = vld [vmem:[%s19723_s1 + $0x2bc0] sm:$0xff]  ;;  %v13948_v62 = vcombine.low %v1442_v38, %v1446_v39 }
 0x166   :  { %v1438_v52 = vld [vmem:[%s19723_s1 + $0x2be0] sm:$0xff]  ;;  %10100 = vmatpush1.bf16.msra.mxu0 %v13828_v3 }
 0x167   :  { %v1562_v55 = vld [vmem:[%s19723_s1 + $0x2fc0] sm:$0xff]  ;;  %10101 = vmatprep.subr.bf16.mxu0 %v13821_v47  ;;  %v13941_v63 = vcombine.high %v1434_v51, %v1438_v52  ;;  %v13940_v8 = vcombine.low %v1434_v51, %v1438_v52 }
 0x168   :  { %v1566_v58 = vld [vmem:[%s19723_s1 + $0x2fe0] sm:$0xff]  ;;  %10141 = vmatpush1.bf16.msra.mxu1 %v13956_v46 }
 0x169   :  { %10142 = vmatprep.subr.bf16.mxu1 %v13949_v49  ;;  %v14069_v1 = vcombine.high %v1562_v55, %v1566_v58  ;;  %v1426_v2 = vld [vmem:[%s19723_s1 + $0x2b80] sm:$0xff]  ;;  %v14068_v9 = vcombine.low %v1562_v55, %v1566_v58 }
 0x16a   :  { %v1430_v61 = vld [vmem:[%s19723_s1 + $0x2ba0] sm:$0xff]  ;;  %10102 = vmatpush1.bf16.msra.mxu0 %v13820_v59 }
 0x16b   :  { %v1554_v7 = vld [vmem:[%s19723_s1 + $0x2f80] sm:$0xff]  ;;  %10103 = vmatprep.subr.bf16.mxu0 %v13941_v63  ;;  %v13933_v13 = vcombine.high %v1426_v2, %v1430_v61  ;;  %v13932_v20 = vcombine.low %v1426_v2, %v1430_v61 }
 0x16c   :  { %v1558_v25 = vld [vmem:[%s19723_s1 + $0x2fa0] sm:$0xff]  ;;  %10143 = vmatpush1.bf16.msra.mxu1 %v13948_v62 }
 0x16d   :  { %10144 = vmatprep.subr.bf16.mxu1 %v14069_v1  ;;  %v14061_v15 = vcombine.high %v1554_v7, %v1558_v25  ;;  %v1418_v16 = vld [vmem:[%s19723_s1 + $0x2b40] sm:$0xff]  ;;  %v14060_v21 = vcombine.low %v1554_v7, %v1558_v25 }
 0x16e   :  { %v1422_v17 = vld [vmem:[%s19723_s1 + $0x2b60] sm:$0xff]  ;;  %10104 = vmatpush2.bf16.msra.mxu0 %v13940_v8 }
 0x16f   :  { %v1546_v18 = vld [vmem:[%s19723_s1 + $0x2f40] sm:$0xff]  ;;  %10105 = vmatprep.subr.bf16.mxu0 %v13933_v13  ;;  %v13925_v26 = vcombine.high %v1418_v16, %v1422_v17  ;;  %v13924_v53 = vcombine.low %v1418_v16, %v1422_v17 }
 0x170   :  { %v1550_v60 = vld [vmem:[%s19723_s1 + $0x2f60] sm:$0xff]  ;;  %10145 = vmatpush2.bf16.msra.mxu1 %v14068_v9 }
 0x171   :  { %10146 = vmatprep.subr.bf16.mxu1 %v14061_v15  ;;  %v14053_v28 = vcombine.high %v1546_v18, %v1550_v60  ;;  %v1410_v29 = vld [vmem:[%s19723_s1 + $0x2b00] sm:$0xff]  ;;  %v14052_v37 = vcombine.low %v1546_v18, %v1550_v60 }
 0x172   :  { %v1414_v35 = vld [vmem:[%s19723_s1 + $0x2b20] sm:$0xff]  ;;  %10106 = vmatpush2.bf16.msra.mxu0 %v13932_v20 }
 0x173   :  { %v1538_v50 = vld [vmem:[%s19723_s1 + $0x2f00] sm:$0xff]  ;;  %10107 = vmatprep.subr.bf16.mxu0 %v13925_v26  ;;  %v13917_v38 = vcombine.high %v1410_v29, %v1414_v35  ;;  %v13916_v51 = vcombine.low %v1410_v29, %v1414_v35 }
 0x174   :  { %v1542_v34 = vld [vmem:[%s19723_s1 + $0x2f20] sm:$0xff]  ;;  %10147 = vmatpush2.bf16.msra.mxu1 %v14060_v21 }
 0x175   :  { %10148 = vmatprep.subr.bf16.mxu1 %v14053_v28  ;;  %v14045_v39 = vcombine.high %v1538_v50, %v1542_v34  ;;  %v1402_v3 = vld [vmem:[%s19723_s1 + $0x2ac0] sm:$0xff]  ;;  %v14044_v52 = vcombine.low %v1538_v50, %v1542_v34 }
 0x176   :  { %v1406_v46 = vld [vmem:[%s19723_s1 + $0x2ae0] sm:$0xff]  ;;  %10108 = vmatpush2.bf16.msra.mxu0 %v13924_v53 }
 0x177   :  { %v1530_v47 = vld [vmem:[%s19723_s1 + $0x2ec0] sm:$0xff]  ;;  %10109 = vmatprep.subr.bf16.mxu0 %v13917_v38  ;;  %v13909_v55 = vcombine.high %v1402_v3, %v1406_v46  ;;  %v13908_v2 = vcombine.low %v1402_v3, %v1406_v46  ;;  %v91_v38 = vld [vmem:[%s19723_s1 + $0x1c8] sm:$0xff]  ;;  %v15753_v46 = vrot.slane %v15518_v36, %v14489_v54 }
 0x178   :  { %v1534_v49 = vld [vmem:[%s19723_s1 + $0x2ee0] sm:$0xff]  ;;  %10149 = vmatpush2.bf16.msra.mxu1 %v14052_v37  ;;  %v87_v36 = vld [vmem:[%s19723_s1 + $0x1a8] sm:$0xff] }
 0x179   :  { %10150 = vmatprep.subr.bf16.mxu1 %v14045_v39  ;;  %v14037_v58 = vcombine.high %v1530_v47, %v1534_v49  ;;  %v1394_v59 = vld [vmem:[%s19723_s1 + $0x2a80] sm:$0xff]  ;;  %v14036_v61 = vcombine.low %v1530_v47, %v1534_v49  ;;  %v95_v39 = vld [vmem:[%s19723_s1 + $0x1e8] sm:$0xff] }
 0x17a   :  { %v1398_v62 = vld [vmem:[%s19723_s1 + $0x2aa0] sm:$0xff]  ;;  %10110 = vmatpush2.bf16.msra.mxu0 %v13916_v51  ;;  %v12599_v51 = vcombine.high %v91_v38, %v95_v39 }
 0x17b   :  { %v1522_v63 = vld [vmem:[%s19723_s1 + $0x2e80] sm:$0xff]  ;;  %10111 = vmatprep.subr.bf16.mxu0 %v13909_v55  ;;  %v13901_v7 = vcombine.high %v1394_v59, %v1398_v62  ;;  %v13900_v16 = vcombine.low %v1394_v59, %v1398_v62  ;;  %v15769_v59 = vcombine.high %v15753_v46, %v15753_v46 }
 0x17c   :  { %v1526_v1 = vld [vmem:[%s19723_s1 + $0x2ea0] sm:$0xff]  ;;  %10151 = vmatpush2.bf16.msra.mxu1 %v14044_v52 }
 0x17d   :  { %10152 = vmatprep.subr.bf16.mxu1 %v14037_v58  ;;  %v14029_v25 = vcombine.high %v1522_v63, %v1526_v1  ;;  %v1386_v8 = vld [vmem:[%s19723_s1 + $0x2a40] sm:$0xff]  ;;  %v14028_v17 = vcombine.low %v1522_v63, %v1526_v1  ;;  %v83_v58 = vld [vmem:[%s19723_s1 + $0x188] sm:$0xff]  ;;  %v12598_v63 = vcombine.low %v91_v38, %v95_v39 }
 0x17e   :  { %v1390_v9 = vld [vmem:[%s19723_s1 + $0x2a60] sm:$0xff]  ;;  %10112 = vmatpush2.bf16.msra.mxu0 %v13908_v2  ;;  %v12591_v2 = vcombine.high %v83_v58, %v87_v36 }
 0x17f   :  { %v1514_v13 = vld [vmem:[%s19723_s1 + $0x2e40] sm:$0xff]  ;;  %10113 = vmatprep.subr.bf16.mxu0 %v13901_v7  ;;  %v13893_v18 = vcombine.high %v1386_v8, %v1390_v9  ;;  %v13892_v29 = vcombine.low %v1386_v8, %v1390_v9  ;;  %v75_v8 = vld [vmem:[%s19723_s1 + $0x148] sm:$0xff] }
 0x180   :  { %v1518_v15 = vld [vmem:[%s19723_s1 + $0x2e60] sm:$0xff]  ;;  %10153 = vmatpush2.bf16.msra.mxu1 %v14036_v61  ;;  %v79_v9 = vld [vmem:[%s19723_s1 + $0x168] sm:$0xff] }
 0x181   :  { %10154 = vmatprep.subr.bf16.mxu1 %v14029_v25  ;;  %v14021_v60 = vcombine.high %v1514_v13, %v1518_v15  ;;  %v1378_v20 = vld [vmem:[%s19723_s1 + $0x2a00] sm:$0xff]  ;;  %v14020_v35 = vcombine.low %v1514_v13, %v1518_v15  ;;  %v12582_v39 = vcombine.low %v75_v8, %v79_v9 }
 0x182   :  { %v1382_v21 = vld [vmem:[%s19723_s1 + $0x2a20] sm:$0xff]  ;;  %10114 = vmatpush2.bf16.msra.mxu0 %v13900_v16 }
 0x183   :  { %v1506_v26 = vld [vmem:[%s19723_s1 + $0x2e00] sm:$0xff]  ;;  %10115 = vmatprep.subr.bf16.mxu0 %v13893_v18  ;;  %v13885_v50 = vcombine.high %v1378_v20, %v1382_v21  ;;  %v13884_v3 = vcombine.low %v1378_v20, %v1382_v21  ;;  %v12590_v18 = vcombine.low %v83_v58, %v87_v36  ;;  %v63_v58 = vld [vmem:[%s19723_s1 + $0xe8] sm:$0xff] }
 0x184   :  { %v1510_v28 = vld [vmem:[%s19723_s1 + $0x2e20] sm:$0xff]  ;;  %10155 = vmatpush2.bf16.msra.mxu1 %v14028_v17 }
 0x185   :  { %10156 = vmatprep.subr.bf16.mxu1 %v14021_v60  ;;  %v14013_v34 = vcombine.high %v1506_v26, %v1510_v28  ;;  %v1594_v53 = vld [vmem:[%s19723_s1 + $0x30c0] sm:$0xff]  ;;  %v14012_v47 = vcombine.low %v1506_v26, %v1510_v28  ;;  %v12583_v28 = vcombine.high %v75_v8, %v79_v9  ;;  %v51_v8 = vld [vmem:[%s19723_s1 + $0x88] sm:$0xff] }
 0x186   :  { %v1598_v37 = vld [vmem:[%s19723_s1 + $0x30e0] sm:$0xff]  ;;  %10116 = vmatpush2.bf16.msra.mxu0 %v13892_v29  ;;  %v55_v9 = vld [vmem:[%s19723_s1 + $0xa8] sm:$0xff] }
 0x187   :  { %10117 = vmatprep.subr.bf16.mxu0 %v13885_v50  ;;  %v14101_v49 = vcombine.high %v1594_v53, %v1598_v37  ;;  %v1586_v52 = vld [vmem:[%s19723_s1 + $0x3080] sm:$0xff]  ;;  %v14100_v62 = vcombine.low %v1594_v53, %v1598_v37  ;;  %v67_v50 = vld [vmem:[%s19723_s1 + $0x108] sm:$0xff] }
 0x188   :  { %10157 = vmatpush2.bf16.msra.mxu1 %v14020_v35  ;;  %v1590_v55 = vld [vmem:[%s19723_s1 + $0x30a0] sm:$0xff] }
 0x189   :  { %10158 = vmatprep.subr.bf16.mxu1 %v14013_v34  ;;  %v14093_v1 = vcombine.high %v1586_v52, %v1590_v55  ;;  %v1578_v61 = vld [vmem:[%s19723_s1 + $0x3040] sm:$0xff]  ;;  %v14092_v16 = vcombine.low %v1586_v52, %v1590_v55  ;;  %v223_v52 = vld [vmem:[%s19723_s1 + $0x5e8] sm:$0xff] }
 0x18a   :  { %10118 = vmatpush2.bf16.msra.mxu0 %v13884_v3  ;;  %v1582_v7 = vld [vmem:[%s19723_s1 + $0x3060] sm:$0xff]  ;;  %v59_v55 = vld [vmem:[%s19723_s1 + $0xc8] sm:$0xff] }
 0x18b   :  { %10177 = vmatprep.subr.bf16.mxu0 %v14101_v49  ;;  %v14085_v60 = vcombine.high %v1578_v61, %v1582_v7  ;;  %v1574_v29 = vld [vmem:[%s19723_s1 + $0x3020] sm:$0xff]  ;;  %v14084_v37 = vcombine.low %v1578_v61, %v1582_v7  ;;  %v211_v61 = vld [vmem:[%s19723_s1 + $0x588] sm:$0xff] }
 0x18c   :  { %10159 = vmatpush2.bf16.msra.mxu1 %v14012_v47  ;;  %v215_v7 = vld [vmem:[%s19723_s1 + $0x5a8] sm:$0xff] }
 0x18d   :  { %10210 = vmatprep.subr.bf16.mxu1 %v12599_v51  ;;  %v9875_v25 = vpop.f32.mrf.mxu0  ;;  %10120 = vmatmul.mubr.bf16.vlgmr.msra.gmra.mxu0 %v15753_v46  ;;  %v219_v51 = vld [vmem:[%s19723_s1 + $0x5c8] sm:$0xff] }
 0x18e   :  { %v9876_v13 = vadd.f32 %v9875_v25, %v15576_v0  ;;  %10178 = vmatpush1.bf16.msra.mxu0 %v14100_v62  ;;  %v1570_v0 = vld [vmem:[%s19723_s1 + $0x3000] sm:$0xff]  ;;  %10201 = vmatprep.mubr.bf16.mxu0 %v14363_v41  ;;  %v12539_v62 = vld.sshfl [vmem:[%s19722_s0 + $0x18] sm:$0x1 pattern:$0x75316420] }
 0x18f   :  { %v9916_v15 = vpop.f32.mrf.mxu1  ;;  %10161 = vmatmul.mubr.bf16.vlgmr.msra.gmra.mxu1 %v15769_v59  ;;  %v9877_v17 = vpop.f32.mrf.mxu0  ;;  %10179 = vmatprep.subr.bf16.mxu0 %v14093_v1  ;;  %v14077_v3 = vcombine.high %v1570_v0, %v1574_v29  ;;  %v14076_v36 = vcombine.low %v1570_v0, %v1574_v29  ;;  %v12727_v1 = vcombine.high %v219_v51, %v223_v52 }
 0x190   :  { %10211 = vmatpush1.bf16.msra.mxu1 %v12598_v63  ;;  %v15786_v20 = vadd.f32 %v9916_v15, %v9876_v13  ;;  %v9878_v21 = vadd.f32 %v9877_v17, %v15593_v43  ;;  %v71_v43 = vld [vmem:[%s19723_s1 + $0x128] sm:$0xff]  ;;  %10242 = vmatprep.mubr.bf16.mxu1 %v14527_v10  ;;  %v15827_v25 = vrot.slane %v12539_v62, %v14489_v54 }
 0x191   :  { %v9918_v26 = vpop.f32.mrf.mxu1  ;;  %10212 = vmatprep.subr.bf16.mxu1 %v12591_v2  ;;  %v9879_v35 = vpop.f32.mrf.mxu0  ;;  %v12575_v49 = vcombine.high %v67_v50, %v71_v43  ;;  %v12574_v63 = vcombine.low %v67_v50, %v71_v43  ;;  %v12567_v2 = vcombine.high %v59_v55, %v63_v58  ;;  %v12726_v13 = vcombine.low %v219_v51, %v223_v52  ;;  %v203_v54 = vld [vmem:[%s19723_s1 + $0x548] sm:$0xff] }
 0x192   :  { %v15803_v34 = vadd.f32 %v9918_v26, %v9878_v21  ;;  %10180 = vmatpush1.bf16.msra.mxu0 %v14092_v16  ;;  %v12566_v15 = vcombine.low %v59_v55, %v63_v58  ;;  %v12719_v16 = vcombine.high %v211_v61, %v215_v7  ;;  %v12559_v17 = vcombine.high %v51_v8, %v55_v9  ;;  %v47_v21 = vld [vmem:[%s19723_s1 + $0x68] sm:$0xff] }
 0x193   :  { %v9920_v53 = vpop.f32.mrf.mxu1  ;;  %v9880_v38 = vpop.f32.mrf.mxu0  ;;  %10181 = vmatprep.subr.bf16.mxu0 %v14085_v60  ;;  %v43_v60 = vld [vmem:[%s19723_s1 + $0x48] sm:$0xff]  ;;  %v12718_v26 = vcombine.low %v211_v61, %v215_v7 }
 0x194   :  { %10213 = vmatpush1.bf16.msra.mxu1 %v12590_v18  ;;  %v207_v18 = vld [vmem:[%s19723_s1 + $0x568] sm:$0xff]  ;;  %v12551_v29 = vcombine.high %v43_v60, %v47_v21  ;;  %v12550_v38 = vcombine.low %v43_v60, %v47_v21 }
 0x195   :  { %v9921_v47 = vpop.f32.mrf.mxu1  ;;  %10214 = vmatprep.subr.bf16.mxu1 %v12583_v28  ;;  %v12558_v28 = vcombine.low %v51_v8, %v55_v9  ;;  %v12711_v0 = vcombine.high %v203_v54, %v207_v18  ;;  %v195_v35 = vld [vmem:[%s19723_s1 + $0x508] sm:$0xff] }
 0x196   :  { %10182 = vmatpush1.bf16.msra.mxu0 %v14084_v37  ;;  %v199_v50 = vld [vmem:[%s19723_s1 + $0x528] sm:$0xff]  ;;  %v12710_v37 = vcombine.low %v203_v54, %v207_v18 }
 0x197   :  { %10183 = vmatprep.subr.bf16.mxu0 %v14077_v3  ;;  %v35_v43 = vld [vmem:[%s19723_s1 + $0x8] sm:$0xff]  ;;  %v12702_v55 = vcombine.low %v195_v35, %v199_v50 }
 0x198   :  { %10215 = vmatpush1.bf16.msra.mxu1 %v12582_v39  ;;  %v39_v53 = vld [vmem:[%s19723_s1 + $0x28] sm:$0xff]  ;;  %v12703_v39 = vcombine.high %v195_v35, %v199_v50 }
 0x199   :  { %10216 = vmatprep.subr.bf16.mxu1 %v12575_v49  ;;  %v12543_v3 = vcombine.high %v35_v43, %v39_v53  ;;  %v187_v47 = vld [vmem:[%s19723_s1 + $0x4c8] sm:$0xff]  ;;  %v12542_v58 = vcombine.low %v35_v43, %v39_v53 }
 0x19a   :  { %10184 = vmatpush1.bf16.msra.mxu0 %v14076_v36  ;;  %v191_v49 = vld [vmem:[%s19723_s1 + $0x4e8] sm:$0xff] }
 0x19b   :  { %10251 = vmatprep.subr.bf16.mxu0 %v12727_v1  ;;  %v155_v51 = vld [vmem:[%s19723_s1 + $0x3c8] sm:$0xff]  ;;  %v12695_v36 = vcombine.high %v187_v47, %v191_v49  ;;  %v12694_v7 = vcombine.low %v187_v47, %v191_v49 }
 0x19c   :  { %10217 = vmatpush1.bf16.msra.mxu1 %v12574_v63  ;;  %v159_v52 = vld [vmem:[%s19723_s1 + $0x3e8] sm:$0xff] }
 0x19d   :  { %10218 = vmatprep.subr.bf16.mxu1 %v12567_v2  ;;  %14108 = vmatmul.mubr.msk.bf16.vlgmr.msra.gmra.mxu0 %vm9673_vm0, %v15827_v25  ;;  %v12663_v62 = vcombine.high %v155_v51, %v159_v52  ;;  %v179_v63 = vld [vmem:[%s19723_s1 + $0x488] sm:$0xff]  ;;  %v12662_v8 = vcombine.low %v155_v51, %v159_v52 }
 0x19e   :  { %10252 = vmatpush1.bf16.msra.mxu0 %v12726_v13  ;;  %10283 = vmatprep.mubr.bf16.mxu0 %v14538_v14  ;;  %v183_v1 = vld [vmem:[%s19723_s1 + $0x4a8] sm:$0xff] }
 0x19f   :  { %10253 = vmatprep.subr.bf16.mxu0 %v12719_v16  ;;  %v147_v2 = vld [vmem:[%s19723_s1 + $0x388] sm:$0xff]  ;;  %v12687_v9 = vcombine.high %v179_v63, %v183_v1  ;;  %v12686_v18 = vcombine.low %v179_v63, %v183_v1 }
 0x1a0   :  { %10219 = vmatpush1.bf16.msra.mxu1 %v12566_v15  ;;  %v151_v61 = vld [vmem:[%s19723_s1 + $0x3a8] sm:$0xff] }
 0x1a1   :  { %10220 = vmatprep.subr.bf16.mxu1 %v12559_v17  ;;  %v12655_v13 = vcombine.high %v147_v2, %v151_v61  ;;  %v171_v15 = vld [vmem:[%s19723_s1 + $0x448] sm:$0xff]  ;;  %v12654_v60 = vcombine.low %v147_v2, %v151_v61 }
 0x1a2   :  { %10254 = vmatpush1.bf16.msra.mxu0 %v12718_v26  ;;  %v175_v16 = vld [vmem:[%s19723_s1 + $0x468] sm:$0xff] }
 0x1a3   :  { %10255 = vmatprep.subr.bf16.mxu0 %v12711_v0  ;;  %v139_v17 = vld [vmem:[%s19723_s1 + $0x348] sm:$0xff]  ;;  %v12679_v21 = vcombine.high %v171_v15, %v175_v16  ;;  %v12678_v50 = vcombine.low %v171_v15, %v175_v16 }
 0x1a4   :  { %10221 = vmatpush1.bf16.msra.mxu1 %v12558_v28  ;;  %v143_v54 = vld [vmem:[%s19723_s1 + $0x368] sm:$0xff] }
 0x1a5   :  { %10222 = vmatprep.subr.bf16.mxu1 %v12551_v29  ;;  %v12647_v26 = vcombine.high %v139_v17, %v143_v54  ;;  %v163_v28 = vld [vmem:[%s19723_s1 + $0x408] sm:$0xff]  ;;  %v12646_v43 = vcombine.low %v139_v17, %v143_v54 }
 0x1a6   :  { %10256 = vmatpush1.bf16.msra.mxu0 %v12710_v37  ;;  %v167_v0 = vld [vmem:[%s19723_s1 + $0x428] sm:$0xff] }
 0x1a7   :  { %10257 = vmatprep.subr.bf16.mxu0 %v12703_v39  ;;  %v131_v29 = vld [vmem:[%s19723_s1 + $0x308] sm:$0xff]  ;;  %v12671_v53 = vcombine.high %v163_v28, %v167_v0  ;;  %v12670_v49 = vcombine.low %v163_v28, %v167_v0 }
 0x1a8   :  { %10223 = vmatpush1.bf16.msra.mxu1 %v12550_v38  ;;  %v135_v35 = vld [vmem:[%s19723_s1 + $0x328] sm:$0xff] }
 0x1a9   :  { %10224 = vmatprep.subr.bf16.mxu1 %v12543_v3  ;;  %v12639_v37 = vcombine.high %v131_v29, %v135_v35  ;;  %v283_v38 = vld [vmem:[%s19723_s1 + $0x7c8] sm:$0xff]  ;;  %v12638_v51 = vcombine.low %v131_v29, %v135_v35 }
 0x1aa   :  { %10258 = vmatpush1.bf16.msra.mxu0 %v12702_v55  ;;  %v287_v39 = vld [vmem:[%s19723_s1 + $0x7e8] sm:$0xff] }
 0x1ab   :  { %10259 = vmatprep.subr.bf16.mxu0 %v12695_v36  ;;  %v123_v3 = vld [vmem:[%s19723_s1 + $0x2c8] sm:$0xff]  ;;  %v12791_v52 = vcombine.high %v283_v38, %v287_v39  ;;  %v12790_v1 = vcombine.low %v283_v38, %v287_v39 }
 0x1ac   :  { %10225 = vmatpush1.bf16.msra.mxu1 %v12542_v58  ;;  %v127_v47 = vld [vmem:[%s19723_s1 + $0x2e8] sm:$0xff] }
 0x1ad   :  { %10226 = vmatprep.subr.bf16.mxu1 %v12663_v62  ;;  %v12631_v55 = vcombine.high %v123_v3, %v127_v47  ;;  %v275_v58 = vld [vmem:[%s19723_s1 + $0x788] sm:$0xff]  ;;  %v12630_v2 = vcombine.low %v123_v3, %v127_v47 }
 0x1ae   :  { %10260 = vmatpush1.bf16.msra.mxu0 %v12694_v7  ;;  %v279_v36 = vld [vmem:[%s19723_s1 + $0x7a8] sm:$0xff] }
 0x1af   :  { %10261 = vmatprep.subr.bf16.mxu0 %v12687_v9  ;;  %v115_v62 = vld [vmem:[%s19723_s1 + $0x288] sm:$0xff]  ;;  %v12783_v61 = vcombine.high %v275_v58, %v279_v36  ;;  %v12782_v16 = vcombine.low %v275_v58, %v279_v36 }
 0x1b0   :  { %10227 = vmatpush2.bf16.msra.mxu1 %v12662_v8  ;;  %v119_v63 = vld [vmem:[%s19723_s1 + $0x2a8] sm:$0xff] }
 0x1b1   :  { %10228 = vmatprep.subr.bf16.mxu1 %v12655_v13  ;;  %v12623_v7 = vcombine.high %v115_v62, %v119_v63  ;;  %v267_v8 = vld [vmem:[%s19723_s1 + $0x748] sm:$0xff]  ;;  %v12622_v17 = vcombine.low %v115_v62, %v119_v63 }
 0x1b2   :  { %10262 = vmatpush1.bf16.msra.mxu0 %v12686_v18  ;;  %v271_v9 = vld [vmem:[%s19723_s1 + $0x768] sm:$0xff] }
 0x1b3   :  { %10263 = vmatprep.subr.bf16.mxu0 %v12679_v21  ;;  %v107_v13 = vld [vmem:[%s19723_s1 + $0x248] sm:$0xff]  ;;  %v12775_v54 = vcombine.high %v267_v8, %v271_v9  ;;  %v12774_v0 = vcombine.low %v267_v8, %v271_v9 }
 0x1b4   :  { %10229 = vmatpush2.bf16.msra.mxu1 %v12654_v60  ;;  %v111_v15 = vld [vmem:[%s19723_s1 + $0x268] sm:$0xff] }
 0x1b5   :  { %10230 = vmatprep.subr.bf16.mxu1 %v12647_v26  ;;  %v12615_v18 = vcombine.high %v107_v13, %v111_v15  ;;  %v259_v60 = vld [vmem:[%s19723_s1 + $0x708] sm:$0xff]  ;;  %v12614_v29 = vcombine.low %v107_v13, %v111_v15 }
 0x1b6   :  { %10264 = vmatpush1.bf16.msra.mxu0 %v12678_v50  ;;  %v263_v21 = vld [vmem:[%s19723_s1 + $0x728] sm:$0xff] }
 0x1b7   :  { %10265 = vmatprep.subr.bf16.mxu0 %v12671_v53  ;;  %v99_v26 = vld [vmem:[%s19723_s1 + $0x208] sm:$0xff]  ;;  %v12767_v35 = vcombine.high %v259_v60, %v263_v21  ;;  %v12766_v39 = vcombine.low %v259_v60, %v263_v21 }
 0x1b8   :  { %10231 = vmatpush2.bf16.msra.mxu1 %v12646_v43  ;;  %v103_v28 = vld [vmem:[%s19723_s1 + $0x228] sm:$0xff] }
 0x1b9   :  { %10232 = vmatprep.subr.bf16.mxu1 %v12639_v37  ;;  %v12607_v50 = vcombine.high %v99_v26, %v103_v28  ;;  %v251_v43 = vld [vmem:[%s19723_s1 + $0x6c8] sm:$0xff]  ;;  %v12606_v3 = vcombine.low %v99_v26, %v103_v28 }
 0x1ba   :  { %10266 = vmatpush1.bf16.msra.mxu0 %v12670_v49  ;;  %v255_v53 = vld [vmem:[%s19723_s1 + $0x6e8] sm:$0xff] }
 0x1bb   :  { %10267 = vmatprep.subr.bf16.mxu0 %v12791_v52  ;;  %v347_v37 = vld [vmem:[%s19723_s1 + $0x9c8] sm:$0xff]  ;;  %v12759_v47 = vcombine.high %v251_v43, %v255_v53  ;;  %v12758_v36 = vcombine.low %v251_v43, %v255_v53 }
 0x1bc   :  { %10233 = vmatpush2.bf16.msra.mxu1 %v12638_v51  ;;  %v351_v38 = vld [vmem:[%s19723_s1 + $0x9e8] sm:$0xff] }
 0x1bd   :  { %10234 = vmatprep.subr.bf16.mxu1 %v12631_v55  ;;  %v12855_v49 = vcombine.high %v347_v37, %v351_v38  ;;  %v243_v51 = vld [vmem:[%s19723_s1 + $0x688] sm:$0xff]  ;;  %v12854_v62 = vcombine.low %v347_v37, %v351_v38 }
 0x1be   :  { %10268 = vmatpush2.bf16.msra.mxu0 %v12790_v1  ;;  %v247_v52 = vld [vmem:[%s19723_s1 + $0x6a8] sm:$0xff] }
 0x1bf   :  { %10269 = vmatprep.subr.bf16.mxu0 %v12783_v61  ;;  %v339_v55 = vld [vmem:[%s19723_s1 + $0x988] sm:$0xff]  ;;  %v12751_v63 = vcombine.high %v243_v51, %v247_v52 }
 0x1c0   :  { %10235 = vmatpush2.bf16.msra.mxu1 %v12630_v2  ;;  %v343_v58 = vld [vmem:[%s19723_s1 + $0x9a8] sm:$0xff] }
 0x1c1   :  { %10236 = vmatprep.subr.bf16.mxu1 %v12623_v7  ;;  %v12847_v1 = vcombine.high %v339_v55, %v343_v58  ;;  %v235_v2 = vld [vmem:[%s19723_s1 + $0x648] sm:$0xff] }
 0x1c2   :  { %10270 = vmatpush2.bf16.msra.mxu0 %v12782_v16  ;;  %v239_v61 = vld [vmem:[%s19723_s1 + $0x668] sm:$0xff]  ;;  %v12750_v16 = vcombine.low %v243_v51, %v247_v52 }
 0x1c3   :  { %10271 = vmatprep.subr.bf16.mxu0 %v12775_v54  ;;  %v331_v8 = vld [vmem:[%s19723_s1 + $0x948] sm:$0xff]  ;;  %v12846_v54 = vcombine.low %v339_v55, %v343_v58  ;;  %v12742_v53 = vcombine.low %v235_v2, %v239_v61 }
 0x1c4   :  { %10237 = vmatpush2.bf16.msra.mxu1 %v12622_v17  ;;  %v335_v9 = vld [vmem:[%s19723_s1 + $0x968] sm:$0xff] }
 0x1c5   :  { %10238 = vmatprep.subr.bf16.mxu1 %v12615_v18  ;;  %v12743_v18 = vcombine.high %v235_v2, %v239_v61  ;;  %v12839_v28 = vcombine.high %v331_v8, %v335_v9  ;;  %v12838_v38 = vcombine.low %v331_v8, %v335_v9  ;;  %v479_v51 = vld [vmem:[%s19723_s1 + $0xde8] sm:$0xff] }
 0x1c6   :  { %10272 = vmatpush2.bf16.msra.mxu0 %v12774_v0  ;;  %v231_v0 = vld [vmem:[%s19723_s1 + $0x628] sm:$0xff] }
 0x1c7   :  { %10273 = vmatprep.subr.bf16.mxu0 %v12767_v35  ;;  %v323_v35 = vld [vmem:[%s19723_s1 + $0x908] sm:$0xff] }
 0x1c8   :  { %10239 = vmatpush2.bf16.msra.mxu1 %v12614_v29  ;;  %v315_v52 = vld [vmem:[%s19723_s1 + $0x8c8] sm:$0xff] }
 0x1c9   :  { %10240 = vmatprep.subr.bf16.mxu1 %v12607_v50  ;;  %v319_v55 = vld [vmem:[%s19723_s1 + $0x8e8] sm:$0xff] }
 0x1ca   :  { %10274 = vmatpush2.bf16.msra.mxu0 %v12766_v39  ;;  %v471_v2 = vld [vmem:[%s19723_s1 + $0xda8] sm:$0xff]  ;;  %v12822_v9 = vcombine.low %v315_v52, %v319_v55 }
 0x1cb   :  { %10275 = vmatprep.subr.bf16.mxu0 %v12759_v47  ;;  %v307_v61 = vld [vmem:[%s19723_s1 + $0x888] sm:$0xff] }
 0x1cc   :  { %10241 = vmatpush2.bf16.msra.mxu1 %v12606_v3 }
 0x1cd   :  { %10292 = vmatprep.subr.bf16.mxu1 %v12855_v49  ;;  %v9957_v7 = vpop.f32.mrf.mxu0  ;;  %v475_v49 = vld [vmem:[%s19723_s1 + $0xdc8] sm:$0xff] }
 0x1ce   :  { %v9958_v13 = vadd.f32 %v9957_v7, %v15786_v20  ;;  %10276 = vmatpush2.bf16.msra.mxu0 %v12758_v36  ;;  %v227_v20 = vld [vmem:[%s19723_s1 + $0x608] sm:$0xff]  ;;  %v12982_v8 = vcombine.low %v475_v49, %v479_v51 }
 0x1cf   :  { %v9998_v15 = vpop.f32.mrf.mxu1  ;;  %10243 = vmatmul.mubr.bf16.vlgmr.msra.gmra.mxu1 %v14646_v23  ;;  %v9959_v17 = vpop.f32.mrf.mxu0  ;;  %10277 = vmatprep.subr.bf16.mxu0 %v12751_v63  ;;  %v12735_v39 = vcombine.high %v227_v20, %v231_v0  ;;  %v12734_v58 = vcombine.low %v227_v20, %v231_v0  ;;  %v12823_v63 = vcombine.high %v315_v52, %v319_v55  ;;  %v311_v7 = vld [vmem:[%s19723_s1 + $0x8a8] sm:$0xff] }
 0x1d0   :  { %10293 = vmatpush1.bf16.msra.mxu1 %v12854_v62  ;;  %v15996_v60 = vadd.f32 %v9998_v15, %v9958_v13  ;;  %v9960_v21 = vadd.f32 %v9959_v17, %v15803_v34  ;;  %10324 = vmatprep.mubr.bf16.mxu1 %v14661_v30  ;;  %v327_v34 = vld [vmem:[%s19723_s1 + $0x928] sm:$0xff]  ;;  %v12983_v62 = vcombine.high %v475_v49, %v479_v51 }
 0x1d1   :  { %v10000_v26 = vpop.f32.mrf.mxu1  ;;  %10294 = vmatprep.subr.bf16.mxu1 %v12847_v1  ;;  %v9961_v29 = vpop.f32.mrf.mxu0  ;;  %v12831_v47 = vcombine.high %v323_v35, %v327_v34  ;;  %v12830_v36 = vcombine.low %v323_v35, %v327_v34  ;;  %v467_v1 = vld [vmem:[%s19723_s1 + $0xd88] sm:$0xff]  ;;  %v12815_v15 = vcombine.high %v307_v61, %v311_v7 }
 0x1d2   :  { %v16012_v50 = vadd.f32 %v10000_v26, %v9960_v21  ;;  %10278 = vmatpush2.bf16.msra.mxu0 %v12750_v16  ;;  %v12975_v13 = vcombine.high %v467_v1, %v471_v2  ;;  %v459_v16 = vld [vmem:[%s19723_s1 + $0xd48] sm:$0xff]  ;;  %v12974_v21 = vcombine.low %v467_v1, %v471_v2  ;;  %v12814_v26 = vcombine.low %v307_v61, %v311_v7 }
 0x1d3   :  { %v10002_v43 = vpop.f32.mrf.mxu1  ;;  %v9962_v37 = vpop.f32.mrf.mxu0  ;;  %10279 = vmatprep.subr.bf16.mxu0 %v12743_v18  ;;  %v463_v17 = vld [vmem:[%s19723_s1 + $0xd68] sm:$0xff] }
 0x1d4   :  { %10295 = vmatpush1.bf16.msra.mxu1 %v12846_v54  ;;  %v299_v54 = vld [vmem:[%s19723_s1 + $0x848] sm:$0xff]  ;;  %v12966_v43 = vcombine.low %v459_v16, %v463_v17 }
 0x1d5   :  { %v10003_v3 = vpop.f32.mrf.mxu1  ;;  %10296 = vmatprep.subr.bf16.mxu1 %v12839_v28  ;;  %v303_v18 = vld [vmem:[%s19723_s1 + $0x868] sm:$0xff]  ;;  %v12967_v28 = vcombine.high %v459_v16, %v463_v17 }
 0x1d6   :  { %10280 = vmatpush2.bf16.msra.mxu0 %v12742_v53  ;;  %v12807_v20 = vcombine.high %v299_v54, %v303_v18  ;;  %v451_v0 = vld [vmem:[%s19723_s1 + $0xd08] sm:$0xff]  ;;  %v12806_v53 = vcombine.low %v299_v54, %v303_v18 }
 0x1d7   :  { %10281 = vmatprep.subr.bf16.mxu0 %v12735_v39  ;;  %v455_v29 = vld [vmem:[%s19723_s1 + $0xd28] sm:$0xff] }
 0x1d8   :  { %10297 = vmatpush1.bf16.msra.mxu1 %v12838_v38  ;;  %v291_v35 = vld [vmem:[%s19723_s1 + $0x808] sm:$0xff]  ;;  %v12959_v37 = vcombine.high %v451_v0, %v455_v29  ;;  %v12958_v51 = vcombine.low %v451_v0, %v455_v29 }
 0x1d9   :  { %10298 = vmatprep.subr.bf16.mxu1 %v12831_v47  ;;  %v295_v34 = vld [vmem:[%s19723_s1 + $0x828] sm:$0xff] }
 0x1da   :  { %10282 = vmatpush2.bf16.msra.mxu0 %v12734_v58  ;;  %v12799_v38 = vcombine.high %v291_v35, %v295_v34  ;;  %v443_v39 = vld [vmem:[%s19723_s1 + $0xcc8] sm:$0xff]  ;;  %v12798_v52 = vcombine.low %v291_v35, %v295_v34 }
 0x1db   :  { %10333 = vmatprep.subr.bf16.mxu0 %v12983_v62  ;;  %v447_v3 = vld [vmem:[%s19723_s1 + $0xce8] sm:$0xff] }
 0x1dc   :  { %10299 = vmatpush1.bf16.msra.mxu1 %v12830_v36  ;;  %v411_v47 = vld [vmem:[%s19723_s1 + $0xbc8] sm:$0xff]  ;;  %v12951_v55 = vcombine.high %v443_v39, %v447_v3  ;;  %v12950_v2 = vcombine.low %v443_v39, %v447_v3 }
 0x1dd   :  { %10300 = vmatprep.subr.bf16.mxu1 %v12823_v63  ;;  %10284 = vmatmul.mubr.bf16.vlgmr.msra.gmra.mxu0 %v14665_v31  ;;  %v415_v49 = vld [vmem:[%s19723_s1 + $0xbe8] sm:$0xff] }
 0x1de   :  { %10334 = vmatpush1.bf16.msra.mxu0 %v12982_v8  ;;  %10365 = vmatprep.mubr.bf16.mxu0 %v14682_v40  ;;  %v12919_v58 = vcombine.high %v411_v47, %v415_v49  ;;  %v435_v36 = vld [vmem:[%s19723_s1 + $0xc88] sm:$0xff]  ;;  %v12918_v61 = vcombine.low %v411_v47, %v415_v49 }
 0x1df   :  { %10335 = vmatprep.subr.bf16.mxu0 %v12975_v13  ;;  %v439_v62 = vld [vmem:[%s19723_s1 + $0xca8] sm:$0xff] }
 0x1e0   :  { %10301 = vmatpush1.bf16.msra.mxu1 %v12822_v9  ;;  %v403_v63 = vld [vmem:[%s19723_s1 + $0xb88] sm:$0xff]  ;;  %v12943_v7 = vcombine.high %v435_v36, %v439_v62  ;;  %v12942_v17 = vcombine.low %v435_v36, %v439_v62 }
 0x1e1   :  { %10302 = vmatprep.subr.bf16.mxu1 %v12815_v15  ;;  %v407_v1 = vld [vmem:[%s19723_s1 + $0xba8] sm:$0xff] }
 0x1e2   :  { %10336 = vmatpush1.bf16.msra.mxu0 %v12974_v21  ;;  %v12911_v8 = vcombine.high %v403_v63, %v407_v1  ;;  %v427_v9 = vld [vmem:[%s19723_s1 + $0xc48] sm:$0xff]  ;;  %v12910_v54 = vcombine.low %v403_v63, %v407_v1 }
 0x1e3   :  { %10337 = vmatprep.subr.bf16.mxu0 %v12967_v28  ;;  %v431_v13 = vld [vmem:[%s19723_s1 + $0xc68] sm:$0xff] }
 0x1e4   :  { %10303 = vmatpush1.bf16.msra.mxu1 %v12814_v26  ;;  %v395_v15 = vld [vmem:[%s19723_s1 + $0xb48] sm:$0xff]  ;;  %v12935_v18 = vcombine.high %v427_v9, %v431_v13  ;;  %v12934_v29 = vcombine.low %v427_v9, %v431_v13 }
 0x1e5   :  { %10304 = vmatprep.subr.bf16.mxu1 %v12807_v20  ;;  %v399_v16 = vld [vmem:[%s19723_s1 + $0xb68] sm:$0xff] }
 0x1e6   :  { %10338 = vmatpush1.bf16.msra.mxu0 %v12966_v43  ;;  %v12903_v21 = vcombine.high %v395_v15, %v399_v16  ;;  %v419_v26 = vld [vmem:[%s19723_s1 + $0xc08] sm:$0xff]  ;;  %v12902_v35 = vcombine.low %v395_v15, %v399_v16 }
 0x1e7   :  { %10339 = vmatprep.subr.bf16.mxu0 %v12959_v37  ;;  %v423_v28 = vld [vmem:[%s19723_s1 + $0xc28] sm:$0xff] }
 0x1e8   :  { %10305 = vmatpush1.bf16.msra.mxu1 %v12806_v53  ;;  %v387_v20 = vld [vmem:[%s19723_s1 + $0xb08] sm:$0xff]  ;;  %v12927_v34 = vcombine.high %v419_v26, %v423_v28  ;;  %v12926_v3 = vcombine.low %v419_v26, %v423_v28 }
 0x1e9   :  { %10306 = vmatprep.subr.bf16.mxu1 %v12799_v38  ;;  %v391_v0 = vld [vmem:[%s19723_s1 + $0xb28] sm:$0xff] }
 0x1ea   :  { %10340 = vmatpush1.bf16.msra.mxu0 %v12958_v51  ;;  %v12895_v43 = vcombine.high %v387_v20, %v391_v0  ;;  %v539_v53 = vld [vmem:[%s19723_s1 + $0xfc8] sm:$0xff]  ;;  %v12894_v47 = vcombine.low %v387_v20, %v391_v0 }
 0x1eb   :  { %10341 = vmatprep.subr.bf16.mxu0 %v12951_v55  ;;  %v543_v37 = vld [vmem:[%s19723_s1 + $0xfe8] sm:$0xff] }
 0x1ec   :  { %10307 = vmatpush1.bf16.msra.mxu1 %v12798_v52  ;;  %v379_v38 = vld [vmem:[%s19723_s1 + $0xac8] sm:$0xff]  ;;  %v13047_v49 = vcombine.high %v539_v53, %v543_v37  ;;  %v13046_v62 = vcombine.low %v539_v53, %v543_v37 }
 0x1ed   :  { %10308 = vmatprep.subr.bf16.mxu1 %v12919_v58  ;;  %v383_v39 = vld [vmem:[%s19723_s1 + $0xae8] sm:$0xff] }
 0x1ee   :  { %10342 = vmatpush1.bf16.msra.mxu0 %v12950_v2  ;;  %v12887_v51 = vcombine.high %v379_v38, %v383_v39  ;;  %v531_v52 = vld [vmem:[%s19723_s1 + $0xf88] sm:$0xff]  ;;  %v12886_v63 = vcombine.low %v379_v38, %v383_v39 }
 0x1ef   :  { %10343 = vmatprep.subr.bf16.mxu0 %v12943_v7  ;;  %v535_v55 = vld [vmem:[%s19723_s1 + $0xfa8] sm:$0xff] }
 0x1f0   :  { %10309 = vmatpush2.bf16.msra.mxu1 %v12918_v61  ;;  %v371_v58 = vld [vmem:[%s19723_s1 + $0xa88] sm:$0xff]  ;;  %v13039_v1 = vcombine.high %v531_v52, %v535_v55  ;;  %v13038_v13 = vcombine.low %v531_v52, %v535_v55 }
 0x1f1   :  { %10310 = vmatprep.subr.bf16.mxu1 %v12911_v8  ;;  %v375_v36 = vld [vmem:[%s19723_s1 + $0xaa8] sm:$0xff] }
 0x1f2   :  { %10344 = vmatpush1.bf16.msra.mxu0 %v12942_v17  ;;  %v12879_v2 = vcombine.high %v371_v58, %v375_v36  ;;  %v523_v61 = vld [vmem:[%s19723_s1 + $0xf48] sm:$0xff]  ;;  %v12878_v15 = vcombine.low %v371_v58, %v375_v36 }
 0x1f3   :  { %10345 = vmatprep.subr.bf16.mxu0 %v12935_v18  ;;  %v527_v7 = vld [vmem:[%s19723_s1 + $0xf68] sm:$0xff] }
 0x1f4   :  { %10311 = vmatpush2.bf16.msra.mxu1 %v12910_v54  ;;  %v363_v8 = vld [vmem:[%s19723_s1 + $0xa48] sm:$0xff]  ;;  %v13031_v16 = vcombine.high %v523_v61, %v527_v7  ;;  %v13030_v28 = vcombine.low %v523_v61, %v527_v7 }
 0x1f5   :  { %10312 = vmatprep.subr.bf16.mxu1 %v12903_v21  ;;  %v367_v9 = vld [vmem:[%s19723_s1 + $0xa68] sm:$0xff] }
 0x1f6   :  { %10346 = vmatpush1.bf16.msra.mxu0 %v12934_v29  ;;  %v12871_v17 = vcombine.high %v363_v8, %v367_v9  ;;  %v515_v54 = vld [vmem:[%s19723_s1 + $0xf08] sm:$0xff]  ;;  %v12870_v20 = vcombine.low %v363_v8, %v367_v9 }
 0x1f7   :  { %10347 = vmatprep.subr.bf16.mxu0 %v12927_v34  ;;  %v519_v18 = vld [vmem:[%s19723_s1 + $0xf28] sm:$0xff] }
 0x1f8   :  { %10313 = vmatpush2.bf16.msra.mxu1 %v12902_v35  ;;  %v355_v21 = vld [vmem:[%s19723_s1 + $0xa08] sm:$0xff]  ;;  %v13023_v0 = vcombine.high %v515_v54, %v519_v18  ;;  %v13022_v37 = vcombine.low %v515_v54, %v519_v18 }
 0x1f9   :  { %10314 = vmatprep.subr.bf16.mxu1 %v12895_v43  ;;  %v359_v26 = vld [vmem:[%s19723_s1 + $0xa28] sm:$0xff] }
 0x1fa   :  { %10348 = vmatpush1.bf16.msra.mxu0 %v12926_v3  ;;  %v12863_v29 = vcombine.high %v355_v21, %v359_v26  ;;  %v507_v35 = vld [vmem:[%s19723_s1 + $0xec8] sm:$0xff]  ;;  %v12862_v38 = vcombine.low %v355_v21, %v359_v26 }
 0x1fb   :  { %10349 = vmatprep.subr.bf16.mxu0 %v13047_v49  ;;  %v511_v34 = vld [vmem:[%s19723_s1 + $0xee8] sm:$0xff] }
 0x1fc   :  { %10315 = vmatpush2.bf16.msra.mxu1 %v12894_v47  ;;  %v603_v43 = vld [vmem:[%s19723_s1 + $0x11c8] sm:$0xff]  ;;  %v13015_v39 = vcombine.high %v507_v35, %v511_v34  ;;  %v13014_v55 = vcombine.low %v507_v35, %v511_v34 }
 0x1fd   :  { %10316 = vmatprep.subr.bf16.mxu1 %v12887_v51  ;;  %v607_v53 = vld [vmem:[%s19723_s1 + $0x11e8] sm:$0xff] }
 0x1fe   :  { %10350 = vmatpush2.bf16.msra.mxu0 %v13046_v62  ;;  %v13111_v3 = vcombine.high %v603_v43, %v607_v53  ;;  %v499_v47 = vld [vmem:[%s19723_s1 + $0xe88] sm:$0xff]  ;;  %v13110_v58 = vcombine.low %v603_v43, %v607_v53 }
 0x1ff   :  { %10351 = vmatprep.subr.bf16.mxu0 %v13039_v1  ;;  %v503_v49 = vld [vmem:[%s19723_s1 + $0xea8] sm:$0xff] }
 0x200   :  { %10317 = vmatpush2.bf16.msra.mxu1 %v12886_v63  ;;  %v595_v51 = vld [vmem:[%s19723_s1 + $0x1188] sm:$0xff]  ;;  %v13007_v36 = vcombine.high %v499_v47, %v503_v49 }
 0x201   :  { %10318 = vmatprep.subr.bf16.mxu1 %v12879_v2  ;;  %v599_v52 = vld [vmem:[%s19723_s1 + $0x11a8] sm:$0xff] }
 0x202   :  { %10352 = vmatpush2.bf16.msra.mxu0 %v13038_v13  ;;  %v13103_v62 = vcombine.high %v595_v51, %v599_v52  ;;  %v491_v63 = vld [vmem:[%s19723_s1 + $0xe48] sm:$0xff]  ;;  %v13006_v13 = vcombine.low %v499_v47, %v503_v49 }
 0x203   :  { %10353 = vmatprep.subr.bf16.mxu0 %v13031_v16  ;;  %v495_v1 = vld [vmem:[%s19723_s1 + $0xe68] sm:$0xff]  ;;  %v13102_v16 = vcombine.low %v595_v51, %v599_v52 }
 0x204   :  { %10319 = vmatpush2.bf16.msra.mxu1 %v12878_v15  ;;  %v587_v61 = vld [vmem:[%s19723_s1 + $0x1148] sm:$0xff]  ;;  %v12998_v34 = vcombine.low %v491_v63, %v495_v1 }
 0x205   :  { %10320 = vmatprep.subr.bf16.mxu1 %v12871_v17  ;;  %v591_v7 = vld [vmem:[%s19723_s1 + $0x1168] sm:$0xff]  ;;  %v12999_v17 = vcombine.high %v491_v63, %v495_v1 }
 0x206   :  { %10354 = vmatpush2.bf16.msra.mxu0 %v13030_v28  ;;  %v13095_v26 = vcombine.high %v587_v61, %v591_v7  ;;  %v487_v28 = vld [vmem:[%s19723_s1 + $0xe28] sm:$0xff]  ;;  %v13094_v53 = vcombine.low %v587_v61, %v591_v7 }
 0x207   :  { %10355 = vmatprep.subr.bf16.mxu0 %v13023_v0  ;;  %v579_v0 = vld [vmem:[%s19723_s1 + $0x1108] sm:$0xff] }
 0x208   :  { %10321 = vmatpush2.bf16.msra.mxu1 %v12870_v20  ;;  %v735_v47 = vld [vmem:[%s19723_s1 + $0x15e8] sm:$0xff] }
 0x209   :  { %10322 = vmatprep.subr.bf16.mxu1 %v12863_v29  ;;  %v571_v49 = vld [vmem:[%s19723_s1 + $0x10c8] sm:$0xff] }
 0x20a   :  { %10356 = vmatpush2.bf16.msra.mxu0 %v13022_v37  ;;  %v575_v51 = vld [vmem:[%s19723_s1 + $0x10e8] sm:$0xff] }
 0x20b   :  { %10357 = vmatprep.subr.bf16.mxu0 %v13015_v39  ;;  %v727_v63 = vld [vmem:[%s19723_s1 + $0x15a8] sm:$0xff]  ;;  %v13078_v7 = vcombine.low %v571_v49, %v575_v51 }
 0x20c   :  { %10323 = vmatpush2.bf16.msra.mxu1 %v12862_v38  ;;  %v563_v1 = vld [vmem:[%s19723_s1 + $0x1088] sm:$0xff] }
 0x20d   :  { %10374 = vmatprep.subr.bf16.mxu1 %v13111_v3  ;;  %v10039_v2 = vpop.f32.mrf.mxu0  ;;  %v731_v3 = vld [vmem:[%s19723_s1 + $0x15c8] sm:$0xff] }
 0x20e   :  { %v10040_v8 = vadd.f32 %v10039_v2, %v15996_v60  ;;  %10358 = vmatpush2.bf16.msra.mxu0 %v13014_v55  ;;  %v483_v60 = vld [vmem:[%s19723_s1 + $0xe08] sm:$0xff]  ;;  %v13238_v61 = vcombine.low %v731_v3, %v735_v47 }
 0x20f   :  { %v10080_v9 = vpop.f32.mrf.mxu1  ;;  %10325 = vmatmul.mubr.bf16.vlgmr.msra.gmra.mxu1 %v14868_v48  ;;  %v10041_v15 = vpop.f32.mrf.mxu0  ;;  %10359 = vmatprep.subr.bf16.mxu0 %v13007_v36  ;;  %v12991_v37 = vcombine.high %v483_v60, %v487_v28  ;;  %v12990_v52 = vcombine.low %v483_v60, %v487_v28  ;;  %v13079_v36 = vcombine.high %v571_v49, %v575_v51  ;;  %v567_v2 = vld [vmem:[%s19723_s1 + $0x10a8] sm:$0xff] }
 0x210   :  { %10375 = vmatpush1.bf16.msra.mxu1 %v13110_v58  ;;  %v16198_v54 = vadd.f32 %v10080_v9, %v10040_v8  ;;  %v10042_v18 = vadd.f32 %v10041_v15, %v16012_v50  ;;  %10406 = vmatprep.mubr.bf16.mxu1 %v14883_v56  ;;  %v583_v50 = vld [vmem:[%s19723_s1 + $0x1128] sm:$0xff]  ;;  %v13239_v58 = vcombine.high %v731_v3, %v735_v47 }
 0x211   :  { %v10082_v21 = vpop.f32.mrf.mxu1  ;;  %10376 = vmatprep.subr.bf16.mxu1 %v13103_v62  ;;  %v10043_v20 = vpop.f32.mrf.mxu0  ;;  %v13087_v39 = vcombine.high %v579_v0, %v583_v50  ;;  %v13086_v55 = vcombine.low %v579_v0, %v583_v50  ;;  %v723_v62 = vld [vmem:[%s19723_s1 + $0x1588] sm:$0xff]  ;;  %v13071_v9 = vcombine.high %v563_v1, %v567_v2 }
 0x212   :  { %v16214_v29 = vadd.f32 %v10082_v21, %v10042_v18  ;;  %10360 = vmatpush2.bf16.msra.mxu0 %v13006_v13  ;;  %v13231_v8 = vcombine.high %v723_v62, %v727_v63  ;;  %v715_v13 = vld [vmem:[%s19723_s1 + $0x1548] sm:$0xff]  ;;  %v13230_v18 = vcombine.low %v723_v62, %v727_v63  ;;  %v13070_v21 = vcombine.low %v563_v1, %v567_v2 }
 0x213   :  { %v10084_v35 = vpop.f32.mrf.mxu1  ;;  %v10044_v43 = vpop.f32.mrf.mxu0  ;;  %10361 = vmatprep.subr.bf16.mxu0 %v12999_v17  ;;  %v719_v15 = vld [vmem:[%s19723_s1 + $0x1568] sm:$0xff] }
 0x214   :  { %10377 = vmatpush1.bf16.msra.mxu1 %v13102_v16  ;;  %v555_v16 = vld [vmem:[%s19723_s1 + $0x1048] sm:$0xff]  ;;  %v13222_v35 = vcombine.low %v715_v13, %v719_v15 }
 0x215   :  { %v10085_v38 = vpop.f32.mrf.mxu1  ;;  %10378 = vmatprep.subr.bf16.mxu1 %v13095_v26  ;;  %v559_v17 = vld [vmem:[%s19723_s1 + $0x1068] sm:$0xff]  ;;  %v13223_v26 = vcombine.high %v715_v13, %v719_v15 }
 0x216   :  { %10362 = vmatpush2.bf16.msra.mxu0 %v12998_v34  ;;  %v13063_v60 = vcombine.high %v555_v16, %v559_v17  ;;  %v707_v28 = vld [vmem:[%s19723_s1 + $0x1508] sm:$0xff]  ;;  %v13062_v34 = vcombine.low %v555_v16, %v559_v17 }
 0x217   :  { %10363 = vmatprep.subr.bf16.mxu0 %v12991_v37  ;;  %v711_v20 = vld [vmem:[%s19723_s1 + $0x1528] sm:$0xff] }
 0x218   :  { %10379 = vmatpush1.bf16.msra.mxu1 %v13094_v53  ;;  %v547_v0 = vld [vmem:[%s19723_s1 + $0x1008] sm:$0xff]  ;;  %v13215_v43 = vcombine.high %v707_v28, %v711_v20  ;;  %v13214_v47 = vcombine.low %v707_v28, %v711_v20 }
 0x219   :  { %10380 = vmatprep.subr.bf16.mxu1 %v13087_v39  ;;  %v551_v50 = vld [vmem:[%s19723_s1 + $0x1028] sm:$0xff] }
 0x21a   :  { %10364 = vmatpush2.bf16.msra.mxu0 %v12990_v52  ;;  %v13055_v53 = vcombine.high %v547_v0, %v551_v50  ;;  %v699_v37 = vld [vmem:[%s19723_s1 + $0x14c8] sm:$0xff]  ;;  %v13054_v49 = vcombine.low %v547_v0, %v551_v50 }
 0x21b   :  { %10415 = vmatprep.subr.bf16.mxu0 %v13239_v58  ;;  %v703_v38 = vld [vmem:[%s19723_s1 + $0x14e8] sm:$0xff] }
 0x21c   :  { %10381 = vmatpush1.bf16.msra.mxu1 %v13086_v55  ;;  %v667_v39 = vld [vmem:[%s19723_s1 + $0x13c8] sm:$0xff]  ;;  %v13207_v51 = vcombine.high %v699_v37, %v703_v38  ;;  %v13206_v63 = vcombine.low %v699_v37, %v703_v38 }
 0x21d   :  { %10382 = vmatprep.subr.bf16.mxu1 %v13079_v36  ;;  %10366 = vmatmul.mubr.bf16.vlgmr.msra.gmra.mxu0 %v14887_v57  ;;  %v671_v3 = vld [vmem:[%s19723_s1 + $0x13e8] sm:$0xff] }
 0x21e   :  { %10416 = vmatpush1.bf16.msra.mxu0 %v13238_v61  ;;  %10447 = vmatprep.mubr.bf16.mxu0 %v14904_v4  ;;  %v13175_v52 = vcombine.high %v667_v39, %v671_v3  ;;  %v691_v55 = vld [vmem:[%s19723_s1 + $0x1488] sm:$0xff]  ;;  %v13174_v1 = vcombine.low %v667_v39, %v671_v3 }
 0x21f   :  { %10417 = vmatprep.subr.bf16.mxu0 %v13231_v8  ;;  %v695_v58 = vld [vmem:[%s19723_s1 + $0x14a8] sm:$0xff] }
 0x220   :  { %10383 = vmatpush1.bf16.msra.mxu1 %v13078_v7  ;;  %v659_v36 = vld [vmem:[%s19723_s1 + $0x1388] sm:$0xff]  ;;  %v13199_v2 = vcombine.high %v691_v55, %v695_v58  ;;  %v13198_v15 = vcombine.low %v691_v55, %v695_v58 }
 0x221   :  { %10384 = vmatprep.subr.bf16.mxu1 %v13071_v9  ;;  %v663_v62 = vld [vmem:[%s19723_s1 + $0x13a8] sm:$0xff] }
 0x222   :  { %10418 = vmatpush1.bf16.msra.mxu0 %v13230_v18  ;;  %v13167_v61 = vcombine.high %v659_v36, %v663_v62  ;;  %v683_v7 = vld [vmem:[%s19723_s1 + $0x1448] sm:$0xff]  ;;  %v13166_v16 = vcombine.low %v659_v36, %v663_v62 }
 0x223   :  { %10419 = vmatprep.subr.bf16.mxu0 %v13223_v26  ;;  %v687_v8 = vld [vmem:[%s19723_s1 + $0x1468] sm:$0xff] }
 0x224   :  { %10385 = vmatpush1.bf16.msra.mxu1 %v13070_v21  ;;  %v651_v9 = vld [vmem:[%s19723_s1 + $0x1348] sm:$0xff]  ;;  %v13191_v17 = vcombine.high %v683_v7, %v687_v8  ;;  %v13190_v20 = vcombine.low %v683_v7, %v687_v8 }
 0x225   :  { %10386 = vmatprep.subr.bf16.mxu1 %v13063_v60  ;;  %v655_v13 = vld [vmem:[%s19723_s1 + $0x1368] sm:$0xff] }
 0x226   :  { %10420 = vmatpush1.bf16.msra.mxu0 %v13222_v35  ;;  %v13159_v18 = vcombine.high %v651_v9, %v655_v13  ;;  %v675_v21 = vld [vmem:[%s19723_s1 + $0x1408] sm:$0xff]  ;;  %v13158_v0 = vcombine.low %v651_v9, %v655_v13 }
 0x227   :  { %10421 = vmatprep.subr.bf16.mxu0 %v13215_v43  ;;  %v679_v26 = vld [vmem:[%s19723_s1 + $0x1428] sm:$0xff] }
 0x228   :  { %10387 = vmatpush1.bf16.msra.mxu1 %v13062_v34  ;;  %v643_v60 = vld [vmem:[%s19723_s1 + $0x1308] sm:$0xff]  ;;  %v13183_v50 = vcombine.high %v675_v21, %v679_v26  ;;  %v13182_v38 = vcombine.low %v675_v21, %v679_v26 }
 0x229   :  { %10388 = vmatprep.subr.bf16.mxu1 %v13055_v53  ;;  %v647_v28 = vld [vmem:[%s19723_s1 + $0x1328] sm:$0xff] }
 0x22a   :  { %10422 = vmatpush1.bf16.msra.mxu0 %v13214_v47  ;;  %v13151_v35 = vcombine.high %v643_v60, %v647_v28  ;;  %v795_v34 = vld [vmem:[%s19723_s1 + $0x17c8] sm:$0xff]  ;;  %v13150_v39 = vcombine.low %v643_v60, %v647_v28 }
 0x22b   :  { %10423 = vmatprep.subr.bf16.mxu0 %v13207_v51  ;;  %v799_v43 = vld [vmem:[%s19723_s1 + $0x17e8] sm:$0xff] }
 0x22c   :  { %10389 = vmatpush1.bf16.msra.mxu1 %v13054_v49  ;;  %v635_v53 = vld [vmem:[%s19723_s1 + $0x12c8] sm:$0xff]  ;;  %v13303_v3 = vcombine.high %v795_v34, %v799_v43  ;;  %v13302_v58 = vcombine.low %v795_v34, %v799_v43 }
 0x22d   :  { %10390 = vmatprep.subr.bf16.mxu1 %v13175_v52  ;;  %v639_v37 = vld [vmem:[%s19723_s1 + $0x12e8] sm:$0xff] }
 0x22e   :  { %10424 = vmatpush1.bf16.msra.mxu0 %v13206_v63  ;;  %v13143_v47 = vcombine.high %v635_v53, %v639_v37  ;;  %v787_v49 = vld [vmem:[%s19723_s1 + $0x1788] sm:$0xff]  ;;  %v13142_v36 = vcombine.low %v635_v53, %v639_v37 }
 0x22f   :  { %10425 = vmatprep.subr.bf16.mxu0 %v13199_v2  ;;  %v791_v51 = vld [vmem:[%s19723_s1 + $0x17a8] sm:$0xff] }
 0x230   :  { %10391 = vmatpush2.bf16.msra.mxu1 %v13174_v1  ;;  %v627_v52 = vld [vmem:[%s19723_s1 + $0x1288] sm:$0xff]  ;;  %v13295_v62 = vcombine.high %v787_v49, %v791_v51  ;;  %v13294_v8 = vcombine.low %v787_v49, %v791_v51 }
 0x231   :  { %10392 = vmatprep.subr.bf16.mxu1 %v13167_v61  ;;  %v631_v55 = vld [vmem:[%s19723_s1 + $0x12a8] sm:$0xff] }
 0x232   :  { %10426 = vmatpush1.bf16.msra.mxu0 %v13198_v15  ;;  %v13135_v63 = vcombine.high %v627_v52, %v631_v55  ;;  %v779_v1 = vld [vmem:[%s19723_s1 + $0x1748] sm:$0xff]  ;;  %v13134_v9 = vcombine.low %v627_v52, %v631_v55 }
 0x233   :  { %10427 = vmatprep.subr.bf16.mxu0 %v13191_v17  ;;  %v783_v2 = vld [vmem:[%s19723_s1 + $0x1768] sm:$0xff] }
 0x234   :  { %10393 = vmatpush2.bf16.msra.mxu1 %v13166_v16  ;;  %v619_v61 = vld [vmem:[%s19723_s1 + $0x1248] sm:$0xff]  ;;  %v13287_v13 = vcombine.high %v779_v1, %v783_v2  ;;  %v13286_v26 = vcombine.low %v779_v1, %v783_v2 }
 0x235   :  { %10394 = vmatprep.subr.bf16.mxu1 %v13159_v18  ;;  %v623_v7 = vld [vmem:[%s19723_s1 + $0x1268] sm:$0xff] }
 0x236   :  { %10428 = vmatpush1.bf16.msra.mxu0 %v13190_v20  ;;  %v13127_v15 = vcombine.high %v619_v61, %v623_v7  ;;  %v771_v16 = vld [vmem:[%s19723_s1 + $0x1708] sm:$0xff]  ;;  %v13126_v60 = vcombine.low %v619_v61, %v623_v7 }
 0x237   :  { %10429 = vmatprep.subr.bf16.mxu0 %v13183_v50  ;;  %v775_v17 = vld [vmem:[%s19723_s1 + $0x1728] sm:$0xff] }
 0x238   :  { %10395 = vmatpush2.bf16.msra.mxu1 %v13158_v0  ;;  %v611_v18 = vld [vmem:[%s19723_s1 + $0x1208] sm:$0xff]  ;;  %v13279_v28 = vcombine.high %v771_v16, %v775_v17  ;;  %v13278_v43 = vcombine.low %v771_v16, %v775_v17 }
 0x239   :  { %10396 = vmatprep.subr.bf16.mxu1 %v13151_v35  ;;  %v615_v21 = vld [vmem:[%s19723_s1 + $0x1228] sm:$0xff] }
 0x23a   :  { %10430 = vmatpush1.bf16.msra.mxu0 %v13182_v38  ;;  %v13119_v20 = vcombine.high %v611_v18, %v615_v21  ;;  %v763_v0 = vld [vmem:[%s19723_s1 + $0x16c8] sm:$0xff]  ;;  %v13118_v53 = vcombine.low %v611_v18, %v615_v21 }
 0x23b   :  { %10431 = vmatprep.subr.bf16.mxu0 %v13303_v3  ;;  %v767_v50 = vld [vmem:[%s19723_s1 + $0x16e8] sm:$0xff] }
 0x23c   :  { %10397 = vmatpush2.bf16.msra.mxu1 %v13150_v39  ;;  %v859_v35 = vld [vmem:[%s19723_s1 + $0x19c8] sm:$0xff]  ;;  %v13271_v37 = vcombine.high %v763_v0, %v767_v50  ;;  %v13270_v51 = vcombine.low %v763_v0, %v767_v50 }
 0x23d   :  { %10398 = vmatprep.subr.bf16.mxu1 %v13143_v47  ;;  %v863_v34 = vld [vmem:[%s19723_s1 + $0x19e8] sm:$0xff] }
 0x23e   :  { %10432 = vmatpush2.bf16.msra.mxu0 %v13302_v58  ;;  %v13367_v38 = vcombine.high %v859_v35, %v863_v34  ;;  %v755_v39 = vld [vmem:[%s19723_s1 + $0x1688] sm:$0xff]  ;;  %v13366_v52 = vcombine.low %v859_v35, %v863_v34 }
 0x23f   :  { %10433 = vmatprep.subr.bf16.mxu0 %v13295_v62  ;;  %v759_v3 = vld [vmem:[%s19723_s1 + $0x16a8] sm:$0xff] }
 0x240   :  { %10399 = vmatpush2.bf16.msra.mxu1 %v13142_v36  ;;  %v851_v47 = vld [vmem:[%s19723_s1 + $0x1988] sm:$0xff]  ;;  %v13263_v55 = vcombine.high %v755_v39, %v759_v3 }
 0x241   :  { %10400 = vmatprep.subr.bf16.mxu1 %v13135_v63  ;;  %v855_v49 = vld [vmem:[%s19723_s1 + $0x19a8] sm:$0xff] }
 0x242   :  { %10434 = vmatpush2.bf16.msra.mxu0 %v13294_v8  ;;  %v13359_v58 = vcombine.high %v851_v47, %v855_v49  ;;  %v747_v36 = vld [vmem:[%s19723_s1 + $0x1648] sm:$0xff]  ;;  %v13262_v8 = vcombine.low %v755_v39, %v759_v3 }
 0x243   :  { %10435 = vmatprep.subr.bf16.mxu0 %v13287_v13  ;;  %v751_v62 = vld [vmem:[%s19723_s1 + $0x1668] sm:$0xff]  ;;  %v13358_v13 = vcombine.low %v851_v47, %v855_v49 }
 0x244   :  { %10401 = vmatpush2.bf16.msra.mxu1 %v13134_v9  ;;  %v843_v1 = vld [vmem:[%s19723_s1 + $0x1948] sm:$0xff]  ;;  %v13254_v50 = vcombine.low %v747_v36, %v751_v62 }
 0x245   :  { %10402 = vmatprep.subr.bf16.mxu1 %v13127_v15  ;;  %v847_v2 = vld [vmem:[%s19723_s1 + $0x1968] sm:$0xff]  ;;  %v13255_v15 = vcombine.high %v747_v36, %v751_v62 }
 0x246   :  { %10436 = vmatpush2.bf16.msra.mxu0 %v13286_v26  ;;  %v13351_v21 = vcombine.high %v843_v1, %v847_v2  ;;  %v743_v26 = vld [vmem:[%s19723_s1 + $0x1628] sm:$0xff]  ;;  %v13350_v34 = vcombine.low %v843_v1, %v847_v2 }
 0x247   :  { %10437 = vmatprep.subr.bf16.mxu0 %v13279_v28  ;;  %v835_v28 = vld [vmem:[%s19723_s1 + $0x1908] sm:$0xff] }
 0x248   :  { %10403 = vmatpush2.bf16.msra.mxu1 %v13126_v60  ;;  %v991_v39 = vld [vmem:[%s19723_s1 + $0x1de8] sm:$0xff] }
 0x249   :  { %10404 = vmatprep.subr.bf16.mxu1 %v13119_v20  ;;  %v827_v3 = vld [vmem:[%s19723_s1 + $0x18c8] sm:$0xff] }
 0x24a   :  { %10438 = vmatpush2.bf16.msra.mxu0 %v13278_v43  ;;  %v831_v47 = vld [vmem:[%s19723_s1 + $0x18e8] sm:$0xff] }
 0x24b   :  { %10439 = vmatprep.subr.bf16.mxu0 %v13271_v37  ;;  %v983_v36 = vld [vmem:[%s19723_s1 + $0x1da8] sm:$0xff]  ;;  %v13334_v2 = vcombine.low %v827_v3, %v831_v47 }
 0x24c   :  { %10405 = vmatpush2.bf16.msra.mxu1 %v13118_v53  ;;  %v819_v62 = vld [vmem:[%s19723_s1 + $0x1888] sm:$0xff] }
 0x24d   :  { %10456 = vmatprep.subr.bf16.mxu1 %v13367_v38  ;;  %v10121_v63 = vpop.f32.mrf.mxu0  ;;  %v987_v38 = vld [vmem:[%s19723_s1 + $0x1dc8] sm:$0xff] }
 0x24e   :  { %v10122_v61 = vadd.f32 %v10121_v63, %v16198_v54  ;;  %10440 = vmatpush2.bf16.msra.mxu0 %v13270_v51  ;;  %v739_v54 = vld [vmem:[%s19723_s1 + $0x1608] sm:$0xff]  ;;  %v13494_v1 = vcombine.low %v987_v38, %v991_v39 }
 0x24f   :  { %v10162_v7 = vpop.f32.mrf.mxu1  ;;  %10407 = vmatmul.mubr.bf16.vlgmr.msra.gmra.mxu1 %v15086_v22  ;;  %v10123_v9 = vpop.f32.mrf.mxu0  ;;  %10441 = vmatprep.subr.bf16.mxu0 %v13263_v55  ;;  %v13247_v43 = vcombine.high %v739_v54, %v743_v26  ;;  %v13246_v49 = vcombine.low %v739_v54, %v743_v26  ;;  %v13335_v55 = vcombine.high %v827_v3, %v831_v47  ;;  %v823_v63 = vld [vmem:[%s19723_s1 + $0x18a8] sm:$0xff] }
 0x250   :  { %10457 = vmatpush1.bf16.msra.mxu1 %v13366_v52  ;;  %v10163_v16 = vadd.f32 %v10162_v7, %v10122_v61  ;;  %v10124_v17 = vadd.f32 %v10123_v9, %v16214_v29  ;;  %10488 = vmatprep.mubr.bf16.mxu1 %v15101_v32  ;;  %v839_v29 = vld [vmem:[%s19723_s1 + $0x1928] sm:$0xff]  ;;  %v13495_v52 = vcombine.high %v987_v38, %v991_v39 }
 0x251   :  { %v10164_v18 = vpop.f32.mrf.mxu1  ;;  %10458 = vmatprep.subr.bf16.mxu1 %v13359_v58  ;;  %v10125_v60 = vpop.f32.mrf.mxu0  ;;  %v13343_v37 = vcombine.high %v835_v28, %v839_v29  ;;  %v13342_v51 = vcombine.low %v835_v28, %v839_v29  ;;  %v979_v58 = vld [vmem:[%s19723_s1 + $0x1d88] sm:$0xff]  ;;  %v13327_v7 = vcombine.high %v819_v62, %v823_v63  ;;  %v13326_v26 = vcombine.low %v819_v62, %v823_v63 }
 0x252   :  { %v10165_v20 = vadd.f32 %v10164_v18, %v10124_v17  ;;  %10442 = vmatpush2.bf16.msra.mxu0 %v13262_v8  ;;  %v13487_v61 = vcombine.high %v979_v58, %v983_v36  ;;  %v971_v8 = vld [vmem:[%s19723_s1 + $0x1d48] sm:$0xff] }
 0x253   :  { %v10166_v0 = vpop.f32.mrf.mxu1  ;;  %v10126_v35 = vpop.f32.mrf.mxu0  ;;  %10443 = vmatprep.subr.bf16.mxu0 %v13255_v15  ;;  %v975_v9 = vld [vmem:[%s19723_s1 + $0x1d68] sm:$0xff] }
 0x254   :  { %10459 = vmatpush1.bf16.msra.mxu1 %v13358_v13  ;;  %v811_v15 = vld [vmem:[%s19723_s1 + $0x1848] sm:$0xff]  ;;  %v13479_v60 = vcombine.high %v971_v8, %v975_v9 }
 0x255   :  { %v10167_v53 = vpop.f32.mrf.mxu1  ;;  %10460 = vmatprep.subr.bf16.mxu1 %v13351_v21  ;;  %v815_v17 = vld [vmem:[%s19723_s1 + $0x1868] sm:$0xff]  ;;  %v13486_v21 = vcombine.low %v979_v58, %v983_v36 }
 0x256   :  { %10444 = vmatpush2.bf16.msra.mxu0 %v13254_v50  ;;  %v13319_v29 = vcombine.high %v811_v15, %v815_v17  ;;  %v963_v0 = vld [vmem:[%s19723_s1 + $0x1d08] sm:$0xff]  ;;  %v13318_v53 = vcombine.low %v811_v15, %v815_v17 }
 0x257   :  { %10445 = vmatprep.subr.bf16.mxu0 %v13247_v43  ;;  %v803_v35 = vld [vmem:[%s19723_s1 + $0x1808] sm:$0xff] }
 0x258   :  { %10461 = vmatpush1.bf16.msra.mxu1 %v13350_v34  ;;  %v13478_v34 = vcombine.low %v971_v8, %v975_v9  ;;  %v955_v39 = vld [vmem:[%s19723_s1 + $0x1cc8] sm:$0xff] }
 0x259   :  { %10462 = vmatprep.subr.bf16.mxu1 %v13343_v37  ;;  %v959_v3 = vld [vmem:[%s19723_s1 + $0x1ce8] sm:$0xff] }
 0x25a   :  { %10446 = vmatpush2.bf16.msra.mxu0 %v13246_v49  ;;  %v923_v47 = vld [vmem:[%s19723_s1 + $0x1bc8] sm:$0xff] }
 0x25b   :  { %10497 = vmatprep.subr.bf16.mxu0 %v13495_v52  ;;  %v927_v49 = vld [vmem:[%s19723_s1 + $0x1be8] sm:$0xff] }
 0x25c   :  { %10463 = vmatpush1.bf16.msra.mxu1 %v13342_v51  ;;  %v13431_v58 = vcombine.high %v923_v47, %v927_v49  ;;  %v947_v36 = vld [vmem:[%s19723_s1 + $0x1c88] sm:$0xff] }
 0x25d   :  { %10464 = vmatprep.subr.bf16.mxu1 %v13335_v55  ;;  %v10203_v13 = vpop.f32.mrf.mxu0  ;;  %10448 = vmatmul.mubr.bf16.vlgmr.msra.gmra.mxu0 %v15105_v33  ;;  %v13463_v55 = vcombine.high %v955_v39, %v959_v3  ;;  %v951_v62 = vld [vmem:[%s19723_s1 + $0x1ca8] sm:$0xff] }
 0x25e   :  { %v16451_v18 = vadd.f32 %v10203_v13, %v10163_v16  ;;  %10498 = vmatpush1.bf16.msra.mxu0 %v13494_v1  ;;  %10529 = vmatprep.mubr.bf16.mxu0 %v15122_v45  ;;  %v967_v16 = vld [vmem:[%s19723_s1 + $0x1d28] sm:$0xff] }
 0x25f   :  { %v10205_v54 = vpop.f32.mrf.mxu0  ;;  %10499 = vmatprep.subr.bf16.mxu0 %v13487_v61  ;;  %v13471_v37 = vcombine.high %v963_v0, %v967_v16  ;;  %v13470_v51 = vcombine.low %v963_v0, %v967_v16  ;;  %v915_v63 = vld [vmem:[%s19723_s1 + $0x1b88] sm:$0xff]  ;;  %v13430_v61 = vcombine.low %v923_v47, %v927_v49 }
 0x260   :  { %10465 = vmatpush1.bf16.msra.mxu1 %v13334_v2  ;;  %v16454_v28 = vadd.f32 %v10205_v54, %v10165_v20  ;;  %v807_v20 = vld [vmem:[%s19723_s1 + $0x1828] sm:$0xff]  ;;  %v13462_v2 = vcombine.low %v955_v39, %v959_v3 }
 0x261   :  { %10466 = vmatprep.subr.bf16.mxu1 %v13327_v7  ;;  %v10207_v50 = vpop.f32.mrf.mxu0  ;;  %v13311_v38 = vcombine.high %v803_v35, %v807_v20  ;;  %v13310_v52 = vcombine.low %v803_v35, %v807_v20  ;;  %v919_v1 = vld [vmem:[%s19723_s1 + $0x1ba8] sm:$0xff]  ;;  %v13455_v7 = vcombine.high %v947_v36, %v951_v62 }
 0x262   :  { %10500 = vmatpush1.bf16.msra.mxu0 %v13486_v21  ;;  %v13423_v8 = vcombine.high %v915_v63, %v919_v1  ;;  %v939_v9 = vld [vmem:[%s19723_s1 + $0x1c48] sm:$0xff]  ;;  %v13454_v21 = vcombine.low %v947_v36, %v951_v62  ;;  %v13422_v54 = vcombine.low %v915_v63, %v919_v1 }
 0x263   :  { %v10208_v43 = vpop.f32.mrf.mxu0  ;;  %10501 = vmatprep.subr.bf16.mxu0 %v13479_v60  ;;  %v943_v13 = vld [vmem:[%s19723_s1 + $0x1c68] sm:$0xff] }
 0x264   :  { %10467 = vmatpush1.bf16.msra.mxu1 %v13326_v26  ;;  %v907_v15 = vld [vmem:[%s19723_s1 + $0x1b48] sm:$0xff]  ;;  %v13447_v26 = vcombine.high %v939_v9, %v943_v13  ;;  %v13446_v35 = vcombine.low %v939_v9, %v943_v13 }
 0x265   :  { %10468 = vmatprep.subr.bf16.mxu1 %v13319_v29  ;;  %v911_v17 = vld [vmem:[%s19723_s1 + $0x1b68] sm:$0xff] }
 0x266   :  { %10502 = vmatpush1.bf16.msra.mxu0 %v13478_v34  ;;  %v13415_v60 = vcombine.high %v907_v15, %v911_v17  ;;  %v931_v29 = vld [vmem:[%s19723_s1 + $0x1c08] sm:$0xff]  ;;  %v13414_v20 = vcombine.low %v907_v15, %v911_v17 }
 0x267   :  { %10503 = vmatprep.subr.bf16.mxu0 %v13471_v37  ;;  %v935_v0 = vld [vmem:[%s19723_s1 + $0x1c28] sm:$0xff] }
 0x268   :  { %10469 = vmatpush1.bf16.msra.mxu1 %v13318_v53  ;;  %v899_v16 = vld [vmem:[%s19723_s1 + $0x1b08] sm:$0xff]  ;;  %v13439_v34 = vcombine.high %v931_v29, %v935_v0  ;;  %v13438_v3 = vcombine.low %v931_v29, %v935_v0 }
 0x269   :  { %10470 = vmatprep.subr.bf16.mxu1 %v13311_v38  ;;  %v903_v50 = vld [vmem:[%s19723_s1 + $0x1b28] sm:$0xff] }
 0x26a   :  { %10504 = vmatpush1.bf16.msra.mxu0 %v13470_v51  ;;  %v13407_v43 = vcombine.high %v899_v16, %v903_v50  ;;  %v1051_v53 = vld [vmem:[%s19723_s1 + $0x1fc8] sm:$0xff]  ;;  %v13406_v47 = vcombine.low %v899_v16, %v903_v50 }
 0x26b   :  { %10505 = vmatprep.subr.bf16.mxu0 %v13463_v55  ;;  %v1055_v37 = vld [vmem:[%s19723_s1 + $0x1fe8] sm:$0xff] }
 0x26c   :  { %10471 = vmatpush1.bf16.msra.mxu1 %v13310_v52  ;;  %v891_v38 = vld [vmem:[%s19723_s1 + $0x1ac8] sm:$0xff]  ;;  %v13559_v49 = vcombine.high %v1051_v53, %v1055_v37  ;;  %v13558_v62 = vcombine.low %v1051_v53, %v1055_v37 }
 0x26d   :  { %10472 = vmatprep.subr.bf16.mxu1 %v13431_v58  ;;  %v895_v39 = vld [vmem:[%s19723_s1 + $0x1ae8] sm:$0xff] }
 0x26e   :  { %10506 = vmatpush1.bf16.msra.mxu0 %v13462_v2  ;;  %v13399_v51 = vcombine.high %v891_v38, %v895_v39  ;;  %v1043_v52 = vld [vmem:[%s19723_s1 + $0x1f88] sm:$0xff]  ;;  %v13398_v63 = vcombine.low %v891_v38, %v895_v39 }
 0x26f   :  { %10507 = vmatprep.subr.bf16.mxu0 %v13455_v7  ;;  %v1047_v55 = vld [vmem:[%s19723_s1 + $0x1fa8] sm:$0xff] }
 0x270   :  { %10473 = vmatpush2.bf16.msra.mxu1 %v13430_v61  ;;  %v883_v58 = vld [vmem:[%s19723_s1 + $0x1a88] sm:$0xff]  ;;  %v13551_v1 = vcombine.high %v1043_v52, %v1047_v55  ;;  %v13550_v13 = vcombine.low %v1043_v52, %v1047_v55 }
 0x271   :  { %10474 = vmatprep.subr.bf16.mxu1 %v13423_v8  ;;  %v887_v36 = vld [vmem:[%s19723_s1 + $0x1aa8] sm:$0xff] }
 0x272   :  { %10508 = vmatpush1.bf16.msra.mxu0 %v13454_v21  ;;  %v13391_v2 = vcombine.high %v883_v58, %v887_v36  ;;  %v1035_v61 = vld [vmem:[%s19723_s1 + $0x1f48] sm:$0xff]  ;;  %v13390_v15 = vcombine.low %v883_v58, %v887_v36 }
 0x273   :  { %10509 = vmatprep.subr.bf16.mxu0 %v13447_v26  ;;  %v1039_v7 = vld [vmem:[%s19723_s1 + $0x1f68] sm:$0xff] }
 0x274   :  { %10475 = vmatpush2.bf16.msra.mxu1 %v13422_v54  ;;  %v875_v8 = vld [vmem:[%s19723_s1 + $0x1a48] sm:$0xff]  ;;  %v13543_v17 = vcombine.high %v1035_v61, %v1039_v7  ;;  %v13542_v0 = vcombine.low %v1035_v61, %v1039_v7 }
 0x275   :  { %10476 = vmatprep.subr.bf16.mxu1 %v13415_v60  ;;  %v879_v9 = vld [vmem:[%s19723_s1 + $0x1a68] sm:$0xff] }
 0x276   :  { %10510 = vmatpush1.bf16.msra.mxu0 %v13446_v35  ;;  %v13383_v21 = vcombine.high %v875_v8, %v879_v9  ;;  %v1027_v54 = vld [vmem:[%s19723_s1 + $0x1f08] sm:$0xff]  ;;  %v13382_v16 = vcombine.low %v875_v8, %v879_v9 }
 0x277   :  { %10511 = vmatprep.subr.bf16.mxu0 %v13439_v34  ;;  %v1031_v26 = vld [vmem:[%s19723_s1 + $0x1f28] sm:$0xff] }
 0x278   :  { %10477 = vmatpush2.bf16.msra.mxu1 %v13414_v20  ;;  %v867_v60 = vld [vmem:[%s19723_s1 + $0x1a08] sm:$0xff]  ;;  %v13535_v50 = vcombine.high %v1027_v54, %v1031_v26  ;;  %v13534_v37 = vcombine.low %v1027_v54, %v1031_v26 }
 0x279   :  { %10478 = vmatprep.subr.bf16.mxu1 %v13407_v43  ;;  %v871_v29 = vld [vmem:[%s19723_s1 + $0x1a28] sm:$0xff] }
 0x27a   :  { %10512 = vmatpush1.bf16.msra.mxu0 %v13438_v3  ;;  %v13375_v35 = vcombine.high %v867_v60, %v871_v29  ;;  %v1019_v20 = vld [vmem:[%s19723_s1 + $0x1ec8] sm:$0xff]  ;;  %v13374_v38 = vcombine.low %v867_v60, %v871_v29 }
 0x27b   :  { %10513 = vmatprep.subr.bf16.mxu0 %v13559_v49  ;;  %v1023_v34 = vld [vmem:[%s19723_s1 + $0x1ee8] sm:$0xff] }
 0x27c   :  { %10479 = vmatpush2.bf16.msra.mxu1 %v13406_v47  ;;  %v1115_v43 = vld [vmem:[%s19723_s1 + $0x21c8] sm:$0xff]  ;;  %v13527_v39 = vcombine.high %v1019_v20, %v1023_v34  ;;  %v13526_v55 = vcombine.low %v1019_v20, %v1023_v34 }
 0x27d   :  { %10480 = vmatprep.subr.bf16.mxu1 %v13399_v51  ;;  %v1119_v53 = vld [vmem:[%s19723_s1 + $0x21e8] sm:$0xff] }
 0x27e   :  { %10514 = vmatpush2.bf16.msra.mxu0 %v13558_v62  ;;  %v13623_v3 = vcombine.high %v1115_v43, %v1119_v53  ;;  %v1011_v47 = vld [vmem:[%s19723_s1 + $0x1e88] sm:$0xff]  ;;  %v13622_v58 = vcombine.low %v1115_v43, %v1119_v53 }
 0x27f   :  { %10515 = vmatprep.subr.bf16.mxu0 %v13551_v1  ;;  %v1015_v49 = vld [vmem:[%s19723_s1 + $0x1ea8] sm:$0xff] }
 0x280   :  { %10481 = vmatpush2.bf16.msra.mxu1 %v13398_v63  ;;  %v1107_v51 = vld [vmem:[%s19723_s1 + $0x2188] sm:$0xff]  ;;  %v13519_v36 = vcombine.high %v1011_v47, %v1015_v49  ;;  %v13518_v8 = vcombine.low %v1011_v47, %v1015_v49 }
 0x281   :  { %10482 = vmatprep.subr.bf16.mxu1 %v13391_v2  ;;  %v1111_v52 = vld [vmem:[%s19723_s1 + $0x21a8] sm:$0xff] }
 0x282   :  { %10516 = vmatpush2.bf16.msra.mxu0 %v13550_v13  ;;  %v13615_v62 = vcombine.high %v1107_v51, %v1111_v52  ;;  %v1003_v63 = vld [vmem:[%s19723_s1 + $0x1e48] sm:$0xff]  ;;  %v13614_v9 = vcombine.low %v1107_v51, %v1111_v52  ;;  %v14337_v51 = vld [vmem:[%s19724_s2] sm:$0xff] }
 0x283   :  { %10517 = vmatprep.subr.bf16.mxu0 %v13543_v17  ;;  %v1007_v1 = vld [vmem:[%s19723_s1 + $0x1e68] sm:$0xff] }
 0x284   :  { %10483 = vmatpush2.bf16.msra.mxu1 %v13390_v15  ;;  %v1099_v2 = vld [vmem:[%s19723_s1 + $0x2148] sm:$0xff]  ;;  %v13511_v13 = vcombine.high %v1003_v63, %v1007_v1 }
 0x285   :  { %10484 = vmatprep.subr.bf16.mxu1 %v13383_v21  ;;  %v1103_v61 = vld [vmem:[%s19723_s1 + $0x2168] sm:$0xff] }
 0x286   :  { %10518 = vmatpush2.bf16.msra.mxu0 %v13542_v0  ;;  %v13607_v17 = vcombine.high %v1099_v2, %v1103_v61  ;;  %v995_v21 = vld [vmem:[%s19723_s1 + $0x1e08] sm:$0xff]  ;;  %v13510_v0 = vcombine.low %v1003_v63, %v1007_v1 }
 0x287   :  { %10519 = vmatprep.subr.bf16.mxu0 %v13535_v50  ;;  %v999_v54 = vld [vmem:[%s19723_s1 + $0x1e28] sm:$0xff] }
 0x288   :  { %10485 = vmatpush2.bf16.msra.mxu1 %v13382_v16  ;;  %v1091_v26 = vld [vmem:[%s19723_s1 + $0x2108] sm:$0xff]  ;;  %v13606_v16 = vcombine.low %v1099_v2, %v1103_v61  ;;  %v13503_v50 = vcombine.high %v995_v21, %v999_v54 }
 0x289   :  { %10486 = vmatprep.subr.bf16.mxu1 %v13375_v35  ;;  %v1095_v60 = vld [vmem:[%s19723_s1 + $0x2128] sm:$0xff]  ;;  %v1614_v35 = vsub.s32 2, %v14474_v44 }
 0x28a   :  { %10520 = vmatpush2.bf16.msra.mxu0 %v13534_v37  ;;  %v13599_v34 = vcombine.high %v1091_v26, %v1095_v60  ;;  %v1243_v43 = vld [vmem:[%s19723_s1 + $0x25c8] sm:$0xff]  ;;  %v13598_v47 = vcombine.low %v1091_v26, %v1095_v60 }
 0x28b   :  { %10521 = vmatprep.subr.bf16.mxu0 %v13527_v39  ;;  %v1247_v53 = vld [vmem:[%s19723_s1 + $0x25e8] sm:$0xff]  ;;  %v1618_v39 = vsub.s32 3, %v14474_v44  ;;  %v1615_v52 = vrot.slane %v14337_v51, %v1614_v35 }
 0x28c   :  { %10487 = vmatpush2.bf16.msra.mxu1 %v13374_v38  ;;  %v1083_v37 = vld [vmem:[%s19723_s1 + $0x20c8] sm:$0xff]  ;;  %v13751_v49 = vcombine.high %v1243_v43, %v1247_v53  ;;  %v13750_v2 = vcombine.low %v1243_v43, %v1247_v53 }
 0x28d   :  { %10538 = vmatprep.subr.bf16.mxu1 %v13623_v3  ;;  %v1087_v38 = vld [vmem:[%s19723_s1 + $0x20e8] sm:$0xff]  ;;  %v13502_v3 = vcombine.low %v995_v21, %v999_v54  ;;  %v1619_v1 = vrot.slane %v14337_v51, %v1618_v39 }
 0x28e   :  { %10522 = vmatpush2.bf16.msra.mxu0 %v13526_v55  ;;  %v13591_v55 = vcombine.high %v1083_v37, %v1087_v38  ;;  %v1079_v63 = vld [vmem:[%s19723_s1 + $0x20a8] sm:$0xff]  ;;  %v13590_v61 = vcombine.low %v1083_v37, %v1087_v38 }
 0x28f   :  { %v10244_v7 = vpop.f32.mrf.mxu1  ;;  %10489 = vmatmul.mubr.bf16.vlgmr.msra.gmra.mxu1 %v15309_v12  ;;  %10523 = vmatprep.subr.bf16.mxu0 %v13519_v36  ;;  %v1239_v36 = vld [vmem:[%s19723_s1 + $0x25a8] sm:$0xff] }
 0x290   :  { %10539 = vmatpush1.bf16.msra.mxu1 %v13622_v58  ;;  %10570 = vmatprep.mubr.bf16.mxu1 %v15328_v24  ;;  %v1235_v58 = vld [vmem:[%s19723_s1 + $0x2588] sm:$0xff] }
 0x291   :  { %v10246_v15 = vpop.f32.mrf.mxu1  ;;  %10540 = vmatprep.subr.bf16.mxu1 %v13615_v62  ;;  %v1075_v62 = vld [vmem:[%s19723_s1 + $0x2088] sm:$0xff] }
 0x292   :  { %10524 = vmatpush2.bf16.msra.mxu0 %v13518_v8  ;;  %v13743_v8 = vcombine.high %v1235_v58, %v1239_v36  ;;  %v1231_v21 = vld [vmem:[%s19723_s1 + $0x2568] sm:$0xff]  ;;  %v10247_v60 = vadd.f32 %v10246_v15, %v1619_v1 }
 0x293   :  { %v10248_v29 = vpop.f32.mrf.mxu1  ;;  %10525 = vmatprep.subr.bf16.mxu0 %v13511_v13  ;;  %v13583_v13 = vcombine.high %v1075_v62, %v1079_v63  ;;  %v1067_v26 = vld [vmem:[%s19723_s1 + $0x2048] sm:$0xff] }
 0x294   :  { %10541 = vmatpush1.bf16.msra.mxu1 %v13614_v9  ;;  %v10245_v9 = vadd.f32 %v10244_v7, %v1615_v52  ;;  %v1071_v7 = vld [vmem:[%s19723_s1 + $0x2068] sm:$0xff] }
 0x295   :  { %v10249_v20 = vpop.f32.mrf.mxu1  ;;  %10542 = vmatprep.subr.bf16.mxu1 %v13607_v17  ;;  %v1227_v17 = vld [vmem:[%s19723_s1 + $0x2548] sm:$0xff] }
 0x296   :  { %10526 = vmatpush2.bf16.msra.mxu0 %v13510_v0  ;;  %v13742_v0 = vcombine.low %v1235_v58, %v1239_v36  ;;  %v13735_v35 = vcombine.high %v1227_v17, %v1231_v21  ;;  %v1219_v43 = vld [vmem:[%s19723_s1 + $0x2508] sm:$0xff]  ;;  %v13734_v39 = vcombine.low %v1227_v17, %v1231_v21 }
 0x297   :  { %10527 = vmatprep.subr.bf16.mxu0 %v13503_v50  ;;  %v13582_v50 = vcombine.low %v1075_v62, %v1079_v63  ;;  %v1223_v15 = vld [vmem:[%s19723_s1 + $0x2528] sm:$0xff] }
 0x298   :  { %10543 = vmatpush1.bf16.msra.mxu1 %v13606_v16  ;;  %v1059_v37 = vld [vmem:[%s19723_s1 + $0x2008] sm:$0xff]  ;;  %v13726_v62 = vcombine.low %v1219_v43, %v1223_v15 }
 0x299   :  { %10544 = vmatprep.subr.bf16.mxu1 %v13599_v34  ;;  %v13575_v34 = vcombine.high %v1067_v26, %v1071_v7  ;;  %v1063_v38 = vld [vmem:[%s19723_s1 + $0x2028] sm:$0xff] }
 0x29a   :  { %10528 = vmatpush2.bf16.msra.mxu0 %v13502_v3  ;;  %v13567_v51 = vcombine.high %v1059_v37, %v1063_v38  ;;  %v1211_v52 = vld [vmem:[%s19723_s1 + $0x24c8] sm:$0xff]  ;;  %v13566_v63 = vcombine.low %v1059_v37, %v1063_v38 }
 0x29b   :  { %10579 = vmatprep.subr.bf16.mxu0 %v13751_v49  ;;  %v13727_v49 = vcombine.high %v1219_v43, %v1223_v15  ;;  %v1179_v58 = vld [vmem:[%s19723_s1 + $0x23c8] sm:$0xff] }
 0x29c   :  { %10545 = vmatpush1.bf16.msra.mxu1 %v13598_v47  ;;  %v13574_v47 = vcombine.low %v1067_v26, %v1071_v7  ;;  %v1183_v36 = vld [vmem:[%s19723_s1 + $0x23e8] sm:$0xff] }
 0x29d   :  { %10546 = vmatprep.subr.bf16.mxu1 %v13591_v55  ;;  %v10285_v54 = vpop.f32.mrf.mxu0  ;;  %10530 = vmatmul.mubr.bf16.vlgmr.msra.gmra.mxu0 %v15332_v27  ;;  %v1215_v55 = vld [vmem:[%s19723_s1 + $0x24e8] sm:$0xff]  ;;  %v13686_v21 = vcombine.low %v1179_v58, %v1183_v36 }
 0x29e   :  { %v16656_v29 = vadd.f32 %v10285_v54, %v10245_v9  ;;  %10580 = vmatpush1.bf16.msra.mxu0 %v13750_v2  ;;  %10611 = vmatprep.mubr.bf16.mxu0 %v15349_v42  ;;  %v13719_v1 = vcombine.high %v1211_v52, %v1215_v55  ;;  %v13687_v2 = vcombine.high %v1179_v58, %v1183_v36  ;;  %v1171_v9 = vld [vmem:[%s19723_s1 + $0x2388] sm:$0xff] }
 0x29f   :  { %v10287_v16 = vpop.f32.mrf.mxu0  ;;  %10581 = vmatprep.subr.bf16.mxu0 %v13743_v8  ;;  %v1207_v8 = vld [vmem:[%s19723_s1 + $0x24a8] sm:$0xff]  ;;  %v13718_v17 = vcombine.low %v1211_v52, %v1215_v55 }
 0x2a0   :  { %10547 = vmatpush1.bf16.msra.mxu1 %v13590_v61  ;;  %v16659_v20 = vadd.f32 %v10287_v16, %v10247_v60  ;;  %v1203_v61 = vld [vmem:[%s19723_s1 + $0x2488] sm:$0xff] }
 0x2a1   :  { %10548 = vmatprep.subr.bf16.mxu1 %v13583_v13  ;;  %v10289_v53 = vpop.f32.mrf.mxu0  ;;  %v1175_v13 = vld [vmem:[%s19723_s1 + $0x23a8] sm:$0xff]  ;;  %v13711_v54 = vcombine.high %v1203_v61, %v1207_v8 }
 0x2a2   :  { %10582 = vmatpush1.bf16.msra.mxu0 %v13742_v0  ;;  %v13679_v26 = vcombine.high %v1171_v9, %v1175_v13  ;;  %v1195_v7 = vld [vmem:[%s19723_s1 + $0x2448] sm:$0xff] }
 0x2a3   :  { %v10290_v3 = vpop.f32.mrf.mxu0  ;;  %10583 = vmatprep.subr.bf16.mxu0 %v13735_v35  ;;  %v1199_v60 = vld [vmem:[%s19723_s1 + $0x2468] sm:$0xff]  ;;  %v13678_v35 = vcombine.low %v1171_v9, %v1175_v13 }
 0x2a4   :  { %10549 = vmatpush1.bf16.msra.mxu1 %v13582_v50  ;;  %v1163_v0 = vld [vmem:[%s19723_s1 + $0x2348] sm:$0xff]  ;;  %v13710_v50 = vcombine.low %v1203_v61, %v1207_v8 }
 0x2a5   :  { %10550 = vmatprep.subr.bf16.mxu1 %v13575_v34  ;;  %v1167_v16 = vld [vmem:[%s19723_s1 + $0x2368] sm:$0xff]  ;;  %v13703_v34 = vcombine.high %v1195_v7, %v1199_v60 }
 0x2a6   :  { %10584 = vmatpush1.bf16.msra.mxu0 %v13734_v39  ;;  %v13671_v43 = vcombine.high %v1163_v0, %v1167_v16  ;;  %v1187_v15 = vld [vmem:[%s19723_s1 + $0x2408] sm:$0xff]  ;;  %v13702_v39 = vcombine.low %v1195_v7, %v1199_v60  ;;  %v13670_v3 = vcombine.low %v1163_v0, %v1167_v16 }
 0x2a7   :  { %10585 = vmatprep.subr.bf16.mxu0 %v13727_v49  ;;  %v1191_v53 = vld [vmem:[%s19723_s1 + $0x2428] sm:$0xff] }
 0x2a8   :  { %10551 = vmatpush1.bf16.msra.mxu1 %v13574_v47  ;;  %v1155_v37 = vld [vmem:[%s19723_s1 + $0x2308] sm:$0xff]  ;;  %v13695_v47 = vcombine.high %v1187_v15, %v1191_v53  ;;  %v13694_v36 = vcombine.low %v1187_v15, %v1191_v53 }
 0x2a9   :  { %10552 = vmatprep.subr.bf16.mxu1 %v13567_v51  ;;  %v1159_v38 = vld [vmem:[%s19723_s1 + $0x2328] sm:$0xff] }
 0x2aa   :  { %10586 = vmatpush1.bf16.msra.mxu0 %v13726_v62  ;;  %v13663_v49 = vcombine.high %v1155_v37, %v1159_v38  ;;  %v1307_v51 = vld [vmem:[%s19723_s1 + $0x27c8] sm:$0xff]  ;;  %v13662_v62 = vcombine.low %v1155_v37, %v1159_v38 }
 0x2ab   :  { %10587 = vmatprep.subr.bf16.mxu0 %v13719_v1  ;;  %v1311_v52 = vld [vmem:[%s19723_s1 + $0x27e8] sm:$0xff] }
 0x2ac   :  { %10553 = vmatpush1.bf16.msra.mxu1 %v13566_v63  ;;  %v1147_v55 = vld [vmem:[%s19723_s1 + $0x22c8] sm:$0xff]  ;;  %v13815_v63 = vcombine.high %v1307_v51, %v1311_v52  ;;  %v13814_v13 = vcombine.low %v1307_v51, %v1311_v52 }
 0x2ad   :  { %10554 = vmatprep.subr.bf16.mxu1 %v13687_v2  ;;  %v1151_v58 = vld [vmem:[%s19723_s1 + $0x22e8] sm:$0xff] }
 0x2ae   :  { %10588 = vmatpush1.bf16.msra.mxu0 %v13718_v17  ;;  %v13655_v1 = vcombine.high %v1147_v55, %v1151_v58  ;;  %v1299_v2 = vld [vmem:[%s19723_s1 + $0x2788] sm:$0xff]  ;;  %v13654_v17 = vcombine.low %v1147_v55, %v1151_v58 }
 0x2af   :  { %10589 = vmatprep.subr.bf16.mxu0 %v13711_v54  ;;  %v1303_v61 = vld [vmem:[%s19723_s1 + $0x27a8] sm:$0xff] }
 0x2b0   :  { %10555 = vmatpush2.bf16.msra.mxu1 %v13686_v21  ;;  %v1139_v8 = vld [vmem:[%s19723_s1 + $0x2288] sm:$0xff]  ;;  %v13807_v21 = vcombine.high %v1299_v2, %v1303_v61  ;;  %v13806_v16 = vcombine.low %v1299_v2, %v1303_v61 }
 0x2b1   :  { %10556 = vmatprep.subr.bf16.mxu1 %v13679_v26  ;;  %v1143_v9 = vld [vmem:[%s19723_s1 + $0x22a8] sm:$0xff] }
 0x2b2   :  { %10590 = vmatpush1.bf16.msra.mxu0 %v13710_v50  ;;  %v13647_v54 = vcombine.high %v1139_v8, %v1143_v9  ;;  %v1291_v26 = vld [vmem:[%s19723_s1 + $0x2748] sm:$0xff]  ;;  %v13646_v50 = vcombine.low %v1139_v8, %v1143_v9 }
 0x2b3   :  { %10591 = vmatprep.subr.bf16.mxu0 %v13703_v34  ;;  %v1295_v7 = vld [vmem:[%s19723_s1 + $0x2768] sm:$0xff] }
 0x2b4   :  { %10557 = vmatpush2.bf16.msra.mxu1 %v13678_v35  ;;  %v1131_v60 = vld [vmem:[%s19723_s1 + $0x2248] sm:$0xff]  ;;  %v13799_v35 = vcombine.high %v1291_v26, %v1295_v7  ;;  %v13798_v38 = vcombine.low %v1291_v26, %v1295_v7 }
 0x2b5   :  { %10558 = vmatprep.subr.bf16.mxu1 %v13671_v43  ;;  %v1135_v0 = vld [vmem:[%s19723_s1 + $0x2268] sm:$0xff] }
 0x2b6   :  { %10592 = vmatpush1.bf16.msra.mxu0 %v13702_v39  ;;  %v13639_v34 = vcombine.high %v1131_v60, %v1135_v0  ;;  %v1283_v43 = vld [vmem:[%s19723_s1 + $0x2708] sm:$0xff]  ;;  %v13638_v39 = vcombine.low %v1131_v60, %v1135_v0 }
 0x2b7   :  { %10593 = vmatprep.subr.bf16.mxu0 %v13695_v47  ;;  %v1287_v15 = vld [vmem:[%s19723_s1 + $0x2728] sm:$0xff] }
 0x2b8   :  { %10559 = vmatpush2.bf16.msra.mxu1 %v13670_v3  ;;  %v1123_v53 = vld [vmem:[%s19723_s1 + $0x2208] sm:$0xff]  ;;  %v13791_v3 = vcombine.high %v1283_v43, %v1287_v15  ;;  %v13790_v58 = vcombine.low %v1283_v43, %v1287_v15 }
 0x2b9   :  { %10560 = vmatprep.subr.bf16.mxu1 %v13663_v49  ;;  %v1127_v37 = vld [vmem:[%s19723_s1 + $0x2228] sm:$0xff] }
 0x2ba   :  { %10594 = vmatpush1.bf16.msra.mxu0 %v13694_v36  ;;  %v13631_v47 = vcombine.high %v1123_v53, %v1127_v37  ;;  %v1275_v49 = vld [vmem:[%s19723_s1 + $0x26c8] sm:$0xff]  ;;  %v13630_v36 = vcombine.low %v1123_v53, %v1127_v37 }
 0x2bb   :  { %10595 = vmatprep.subr.bf16.mxu0 %v13815_v63  ;;  %v1279_v51 = vld [vmem:[%s19723_s1 + $0x26e8] sm:$0xff] }
 0x2bc   :  { %10561 = vmatpush2.bf16.msra.mxu1 %v13662_v62  ;;  %v1371_v52 = vld [vmem:[%s19723_s1 + $0x29c8] sm:$0xff]  ;;  %v13783_v62 = vcombine.high %v1275_v49, %v1279_v51  ;;  %v13782_v9 = vcombine.low %v1275_v49, %v1279_v51 }
 0x2bd   :  { %10562 = vmatprep.subr.bf16.mxu1 %v13655_v1  ;;  %v1375_v55 = vld [vmem:[%s19723_s1 + $0x29e8] sm:$0xff] }
 0x2be   :  { %10596 = vmatpush2.bf16.msra.mxu0 %v13814_v13  ;;  %v13879_v63 = vcombine.high %v1371_v52, %v1375_v55  ;;  %v1267_v1 = vld [vmem:[%s19723_s1 + $0x2688] sm:$0xff]  ;;  %v13878_v13 = vcombine.low %v1371_v52, %v1375_v55 }
 0x2bf   :  { %10597 = vmatprep.subr.bf16.mxu0 %v13807_v21  ;;  %v1271_v2 = vld [vmem:[%s19723_s1 + $0x26a8] sm:$0xff] }
 0x2c0   :  { %10563 = vmatpush2.bf16.msra.mxu1 %v13654_v17  ;;  %v1363_v61 = vld [vmem:[%s19723_s1 + $0x2988] sm:$0xff]  ;;  %v13775_v17 = vcombine.high %v1267_v1, %v1271_v2 }
 0x2c1   :  { %10564 = vmatprep.subr.bf16.mxu1 %v13647_v54  ;;  %v1367_v8 = vld [vmem:[%s19723_s1 + $0x29a8] sm:$0xff] }
 0x2c2   :  { %10598 = vmatpush2.bf16.msra.mxu0 %v13806_v16  ;;  %v13871_v21 = vcombine.high %v1363_v61, %v1367_v8  ;;  %v1259_v54 = vld [vmem:[%s19723_s1 + $0x2648] sm:$0xff]  ;;  %v13774_v16 = vcombine.low %v1267_v1, %v1271_v2 }
 0x2c3   :  { %10599 = vmatprep.subr.bf16.mxu0 %v13799_v35  ;;  %v1263_v26 = vld [vmem:[%s19723_s1 + $0x2668] sm:$0xff]  ;;  %v13870_v35 = vcombine.low %v1363_v61, %v1367_v8 }
 0x2c4   :  { %10565 = vmatpush2.bf16.msra.mxu1 %v13646_v50  ;;  %v1355_v7 = vld [vmem:[%s19723_s1 + $0x2948] sm:$0xff] }
 0x2c5   :  { %10566 = vmatprep.subr.bf16.mxu1 %v13639_v34  ;;  %v1359_v60 = vld [vmem:[%s19723_s1 + $0x2968] sm:$0xff]  ;;  %v13767_v34 = vcombine.high %v1259_v54, %v1263_v26 }
 0x2c6   :  { %10600 = vmatpush2.bf16.msra.mxu0 %v13798_v38  ;;  %v13863_v15 = vcombine.high %v1355_v7, %v1359_v60  ;;  %v1251_v53 = vld [vmem:[%s19723_s1 + $0x2608] sm:$0xff]  ;;  %v13862_v49 = vcombine.low %v1355_v7, %v1359_v60 }
 0x2c7   :  { %10601 = vmatprep.subr.bf16.mxu0 %v13791_v3  ;;  %v1255_v37 = vld [vmem:[%s19723_s1 + $0x2628] sm:$0xff] }
 0x2c8   :  { %10567 = vmatpush2.bf16.msra.mxu1 %v13638_v39  ;;  %v1351_v39 = vld [vmem:[%s19723_s1 + $0x2928] sm:$0xff]  ;;  %v13759_v51 = vcombine.high %v1251_v53, %v1255_v37 }
 0x2c9   :  { %10568 = vmatprep.subr.bf16.mxu1 %v13631_v47  ;;  %v13766_v47 = vcombine.low %v1259_v54, %v1263_v26  ;;  %v1491_v8 = vld [vmem:[%s19723_s1 + $0x2d88] sm:$0xff] }
 0x2ca   :  { %10602 = vmatpush2.bf16.msra.mxu0 %v13790_v58  ;;  %v1503_v58 = vld [vmem:[%s19723_s1 + $0x2de8] sm:$0xff] }
 0x2cb   :  { %10603 = vmatprep.subr.bf16.mxu0 %v13783_v62  ;;  %v1343_v62 = vld [vmem:[%s19723_s1 + $0x28e8] sm:$0xff] }
 0x2cc   :  { %10569 = vmatpush2.bf16.msra.mxu1 %v13630_v36  ;;  %v1339_v36 = vld [vmem:[%s19723_s1 + $0x28c8] sm:$0xff] }
 0x2cd   :  { %10620 = vmatprep.subr.bf16.mxu1 %v13879_v63  ;;  %v13758_v63 = vcombine.low %v1251_v53, %v1255_v37  ;;  %v13847_v61 = vcombine.high %v1339_v36, %v1343_v62  ;;  %v13846_v54 = vcombine.low %v1339_v36, %v1343_v62  ;;  %v1483_v60 = vld [vmem:[%s19723_s1 + $0x2d48] sm:$0xff] }
 0x2ce   :  { %10604 = vmatpush2.bf16.msra.mxu0 %v13782_v9  ;;  %v1495_v9 = vld [vmem:[%s19723_s1 + $0x2da8] sm:$0xff] }
 0x2cf   :  { %v10326_v0 = vpop.f32.mrf.mxu1  ;;  %10571 = vmatmul.mubr.bf16.vlgmr.msra.gmra.mxu1 %v15536_v11  ;;  %10605 = vmatprep.subr.bf16.mxu0 %v13775_v17  ;;  %v1335_v17 = vld [vmem:[%s19723_s1 + $0x28a8] sm:$0xff]  ;;  %v13999_v26 = vcombine.high %v1491_v8, %v1495_v9 }
 0x2d0   :  { %v10327_v50 = vadd.f32 %v10326_v0, %v16656_v29  ;;  %10621 = vmatpush1.bf16.msra.mxu1 %v13878_v13  ;;  %10652 = vmatprep.mubr.bf16.mxu1 %v15551_v5  ;;  %v1347_v29 = vld [vmem:[%s19723_s1 + $0x2908] sm:$0xff] }
 0x2d1   :  { %v10328_v43 = vpop.f32.mrf.mxu1  ;;  %10622 = vmatprep.subr.bf16.mxu1 %v13871_v21  ;;  %v13855_v55 = vcombine.high %v1347_v29, %v1351_v39  ;;  %v13854_v1 = vcombine.low %v1347_v29, %v1351_v39  ;;  %v1331_v13 = vld [vmem:[%s19723_s1 + $0x2888] sm:$0xff] }
 0x2d2   :  { %v10329_v38 = vadd.f32 %v10328_v43, %v16659_v20  ;;  %10606 = vmatpush2.bf16.msra.mxu0 %v13774_v16  ;;  %v1499_v20 = vld [vmem:[%s19723_s1 + $0x2dc8] sm:$0xff]  ;;  %v13839_v7 = vcombine.high %v1331_v13, %v1335_v17  ;;  %v13838_v37 = vcombine.low %v1331_v13, %v1335_v17 }
 0x2d3   :  { %v10330_v3 = vpop.f32.mrf.mxu1  ;;  %10607 = vmatprep.subr.bf16.mxu0 %v13767_v34  ;;  %v14007_v2 = vcombine.high %v1499_v20, %v1503_v58  ;;  %v14006_v21 = vcombine.low %v1499_v20, %v1503_v58  ;;  %v1487_v0 = vld [vmem:[%s19723_s1 + $0x2d68] sm:$0xff] }
 0x2d4   :  { %10623 = vmatpush1.bf16.msra.mxu1 %v13870_v35  ;;  %v1323_v35 = vld [vmem:[%s19723_s1 + $0x2848] sm:$0xff]  ;;  %v13991_v29 = vcombine.high %v1483_v60, %v1487_v0 }
 0x2d5   :  { %v10331_v52 = vpop.f32.mrf.mxu1  ;;  %10624 = vmatprep.subr.bf16.mxu1 %v13863_v15  ;;  %v1327_v34 = vld [vmem:[%s19723_s1 + $0x2868] sm:$0xff]  ;;  %v13998_v15 = vcombine.low %v1491_v8, %v1495_v9 }
 0x2d6   :  { %10608 = vmatpush2.bf16.msra.mxu0 %v13766_v47  ;;  %v13831_v3 = vcombine.high %v1323_v35, %v1327_v34  ;;  %v1475_v47 = vld [vmem:[%s19723_s1 + $0x2d08] sm:$0xff]  ;;  %v13990_v52 = vcombine.low %v1483_v60, %v1487_v0  ;;  %v13830_v20 = vcombine.low %v1323_v35, %v1327_v34 }
 0x2d7   :  { %10609 = vmatprep.subr.bf16.mxu0 %v13759_v51  ;;  %v1315_v51 = vld [vmem:[%s19723_s1 + $0x2808] sm:$0xff] }
 0x2d8   :  { %10625 = vmatpush1.bf16.msra.mxu1 %v13862_v49  ;;  %v1467_v62 = vld [vmem:[%s19723_s1 + $0x2cc8] sm:$0xff] }
 0x2d9   :  { %10626 = vmatprep.subr.bf16.mxu1 %v13855_v55  ;;  %v1459_v17 = vld [vmem:[%s19723_s1 + $0x2c88] sm:$0xff] }
 0x2da   :  { %10610 = vmatpush2.bf16.msra.mxu0 %v13758_v63  ;;  %v1471_v63 = vld [vmem:[%s19723_s1 + $0x2ce8] sm:$0xff] }
 0x2db   :  { %10661 = vmatprep.subr.bf16.mxu0 %v14007_v2  ;;  %v1439_v2 = vld [vmem:[%s19723_s1 + $0x2be8] sm:$0xff]  ;;  %v13975_v9 = vcombine.high %v1467_v62, %v1471_v63 }
 0x2dc   :  { %10627 = vmatpush1.bf16.msra.mxu1 %v13854_v1  ;;  %v1435_v1 = vld [vmem:[%s19723_s1 + $0x2bc8] sm:$0xff] }
 0x2dd   :  { %10628 = vmatprep.subr.bf16.mxu1 %v13847_v61  ;;  %v10367_v16 = vpop.f32.mrf.mxu0  ;;  %10612 = vmatmul.mubr.bf16.vlgmr.msra.gmra.mxu0 %v15555_v6  ;;  %v13943_v13 = vcombine.high %v1435_v1, %v1439_v2  ;;  %v13942_v60 = vcombine.low %v1435_v1, %v1439_v2  ;;  %v1451_v35 = vld [vmem:[%s19723_s1 + $0x2c48] sm:$0xff] }
 0x2de   :  { %v16858_v43 = vadd.f32 %v10367_v16, %v10327_v50  ;;  %10662 = vmatpush1.bf16.msra.mxu0 %v14006_v21  ;;  %10693 = vmatprep.mubr.bf16.mxu0 %v15572_v19  ;;  %v1479_v50 = vld [vmem:[%s19723_s1 + $0x2d28] sm:$0xff] }
 0x2df   :  { %v10369_v53 = vpop.f32.mrf.mxu0  ;;  %10663 = vmatprep.subr.bf16.mxu0 %v13999_v26  ;;  %v13983_v58 = vcombine.high %v1475_v47, %v1479_v50  ;;  %v13982_v61 = vcombine.low %v1475_v47, %v1479_v50  ;;  %v1463_v21 = vld [vmem:[%s19723_s1 + $0x2ca8] sm:$0xff] }
 0x2e0   :  { %10629 = vmatpush1.bf16.msra.mxu1 %v13846_v54  ;;  %v16861_v39 = vadd.f32 %v10369_v53, %v10329_v38  ;;  %v1319_v38 = vld [vmem:[%s19723_s1 + $0x2828] sm:$0xff]  ;;  %v13967_v0 = vcombine.high %v1459_v17, %v1463_v21 }
 0x2e1   :  { %10630 = vmatprep.subr.bf16.mxu1 %v13839_v7  ;;  %v10371_v49 = vpop.f32.mrf.mxu0  ;;  %v13823_v36 = vcombine.high %v1315_v51, %v1319_v38  ;;  %v13822_v8 = vcombine.low %v1315_v51, %v1319_v38  ;;  %v1427_v54 = vld [vmem:[%s19723_s1 + $0x2b88] sm:$0xff]  ;;  %v13974_v7 = vcombine.low %v1467_v62, %v1471_v63 }
 0x2e2   :  { %10664 = vmatpush1.bf16.msra.mxu0 %v13998_v15  ;;  %v1431_v26 = vld [vmem:[%s19723_s1 + $0x2ba8] sm:$0xff] }
 0x2e3   :  { %v10372_v55 = vpop.f32.mrf.mxu0  ;;  %10665 = vmatprep.subr.bf16.mxu0 %v13991_v29  ;;  %v13935_v16 = vcombine.high %v1427_v54, %v1431_v26  ;;  %v1455_v34 = vld [vmem:[%s19723_s1 + $0x2c68] sm:$0xff]  ;;  %v13934_v29 = vcombine.low %v1427_v54, %v1431_v26 }
 0x2e4   :  { %10631 = vmatpush1.bf16.msra.mxu1 %v13838_v37  ;;  %v1419_v15 = vld [vmem:[%s19723_s1 + $0x2b48] sm:$0xff]  ;;  %v13966_v37 = vcombine.low %v1459_v17, %v1463_v21 }
 0x2e5   :  { %10632 = vmatprep.subr.bf16.mxu1 %v13831_v3  ;;  %v1423_v53 = vld [vmem:[%s19723_s1 + $0x2b68] sm:$0xff]  ;;  %v13959_v3 = vcombine.high %v1451_v35, %v1455_v34 }
 0x2e6   :  { %10666 = vmatpush1.bf16.msra.mxu0 %v13990_v52  ;;  %v13927_v47 = vcombine.high %v1419_v15, %v1423_v53  ;;  %v1443_v50 = vld [vmem:[%s19723_s1 + $0x2c08] sm:$0xff]  ;;  %v13958_v52 = vcombine.low %v1451_v35, %v1455_v34  ;;  %v13926_v55 = vcombine.low %v1419_v15, %v1423_v53 }
 0x2e7   :  { %10667 = vmatprep.subr.bf16.mxu0 %v13983_v58  ;;  %v1447_v49 = vld [vmem:[%s19723_s1 + $0x2c28] sm:$0xff] }
 0x2e8   :  { %10633 = vmatpush1.bf16.msra.mxu1 %v13830_v20  ;;  %v1411_v51 = vld [vmem:[%s19723_s1 + $0x2b08] sm:$0xff]  ;;  %v13951_v20 = vcombine.high %v1443_v50, %v1447_v49  ;;  %v13950_v2 = vcombine.low %v1443_v50, %v1447_v49 }
 0x2e9   :  { %10634 = vmatprep.subr.bf16.mxu1 %v13823_v36  ;;  %v1415_v38 = vld [vmem:[%s19723_s1 + $0x2b28] sm:$0xff] }
 0x2ea   :  { %10668 = vmatpush1.bf16.msra.mxu0 %v13982_v61  ;;  %v13919_v58 = vcombine.high %v1411_v51, %v1415_v38  ;;  %v1563_v36 = vld [vmem:[%s19723_s1 + $0x2fc8] sm:$0xff]  ;;  %v13918_v61 = vcombine.low %v1411_v51, %v1415_v38 }
 0x2eb   :  { %10669 = vmatprep.subr.bf16.mxu0 %v13975_v9  ;;  %v1567_v62 = vld [vmem:[%s19723_s1 + $0x2fe8] sm:$0xff] }
 0x2ec   :  { %10635 = vmatpush1.bf16.msra.mxu1 %v13822_v8  ;;  %v1403_v63 = vld [vmem:[%s19723_s1 + $0x2ac8] sm:$0xff]  ;;  %v14071_v8 = vcombine.high %v1563_v36, %v1567_v62  ;;  %v14070_v26 = vcombine.low %v1563_v36, %v1567_v62 }
 0x2ed   :  { %10636 = vmatprep.subr.bf16.mxu1 %v13943_v13  ;;  %v1407_v1 = vld [vmem:[%s19723_s1 + $0x2ae8] sm:$0xff] }
 0x2ee   :  { %10670 = vmatpush1.bf16.msra.mxu0 %v13974_v7  ;;  %v13911_v9 = vcombine.high %v1403_v63, %v1407_v1  ;;  %v1555_v13 = vld [vmem:[%s19723_s1 + $0x2f88] sm:$0xff]  ;;  %v13910_v7 = vcombine.low %v1403_v63, %v1407_v1 }
 0x2ef   :  { %10671 = vmatprep.subr.bf16.mxu0 %v13967_v0  ;;  %v1559_v17 = vld [vmem:[%s19723_s1 + $0x2fa8] sm:$0xff] }
 0x2f0   :  { %10637 = vmatpush2.bf16.msra.mxu1 %v13942_v60  ;;  %v1395_v21 = vld [vmem:[%s19723_s1 + $0x2a88] sm:$0xff]  ;;  %v14063_v60 = vcombine.high %v1555_v13, %v1559_v17  ;;  %v14062_v53 = vcombine.low %v1555_v13, %v1559_v17 }
 0x2f1   :  { %10638 = vmatprep.subr.bf16.mxu1 %v13935_v16  ;;  %v1399_v54 = vld [vmem:[%s19723_s1 + $0x2aa8] sm:$0xff] }
 0x2f2   :  { %10672 = vmatpush1.bf16.msra.mxu0 %v13966_v37  ;;  %v13903_v0 = vcombine.high %v1395_v21, %v1399_v54  ;;  %v1547_v16 = vld [vmem:[%s19723_s1 + $0x2f48] sm:$0xff]  ;;  %v13902_v37 = vcombine.low %v1395_v21, %v1399_v54 }
 0x2f3   :  { %10673 = vmatprep.subr.bf16.mxu0 %v13959_v3  ;;  %v1551_v35 = vld [vmem:[%s19723_s1 + $0x2f68] sm:$0xff] }
 0x2f4   :  { %10639 = vmatpush2.bf16.msra.mxu1 %v13934_v29  ;;  %v1387_v34 = vld [vmem:[%s19723_s1 + $0x2a48] sm:$0xff]  ;;  %v14055_v29 = vcombine.high %v1547_v16, %v1551_v35  ;;  %v14054_v38 = vcombine.low %v1547_v16, %v1551_v35 }
 0x2f5   :  { %10640 = vmatprep.subr.bf16.mxu1 %v13927_v47  ;;  %v1391_v15 = vld [vmem:[%s19723_s1 + $0x2a68] sm:$0xff] }
 0x2f6   :  { %10674 = vmatpush1.bf16.msra.mxu0 %v13958_v52  ;;  %v13895_v3 = vcombine.high %v1387_v34, %v1391_v15  ;;  %v1539_v47 = vld [vmem:[%s19723_s1 + $0x2f08] sm:$0xff]  ;;  %v13894_v52 = vcombine.low %v1387_v34, %v1391_v15 }
 0x2f7   :  { %10675 = vmatprep.subr.bf16.mxu0 %v13951_v20  ;;  %v1543_v50 = vld [vmem:[%s19723_s1 + $0x2f28] sm:$0xff] }
 0x2f8   :  { %10641 = vmatpush2.bf16.msra.mxu1 %v13926_v55  ;;  %v1379_v49 = vld [vmem:[%s19723_s1 + $0x2a08] sm:$0xff]  ;;  %v14047_v55 = vcombine.high %v1539_v47, %v1543_v50  ;;  %v14046_v1 = vcombine.low %v1539_v47, %v1543_v50 }
 0x2f9   :  { %10642 = vmatprep.subr.bf16.mxu1 %v13919_v58  ;;  %v1383_v51 = vld [vmem:[%s19723_s1 + $0x2a28] sm:$0xff] }
 0x2fa   :  { %10676 = vmatpush1.bf16.msra.mxu0 %v13950_v2  ;;  %v13887_v20 = vcombine.high %v1379_v49, %v1383_v51  ;;  %v1531_v58 = vld [vmem:[%s19723_s1 + $0x2ec8] sm:$0xff]  ;;  %v13886_v2 = vcombine.low %v1379_v49, %v1383_v51 }
 0x2fb   :  { %10677 = vmatprep.subr.bf16.mxu0 %v14071_v8  ;;  %v1535_v36 = vld [vmem:[%s19723_s1 + $0x2ee8] sm:$0xff] }
 0x2fc   :  { %10643 = vmatpush2.bf16.msra.mxu1 %v13918_v61  ;;  %v1595_v62 = vld [vmem:[%s19723_s1 + $0x30c8] sm:$0xff]  ;;  %v14039_v61 = vcombine.high %v1531_v58, %v1535_v36  ;;  %v14038_v54 = vcombine.low %v1531_v58, %v1535_v36 }
 0x2fd   :  { %10644 = vmatprep.subr.bf16.mxu1 %v13911_v9  ;;  %v1599_v63 = vld [vmem:[%s19723_s1 + $0x30e8] sm:$0xff] }
 0x2fe   :  { %10678 = vmatpush2.bf16.msra.mxu0 %v14070_v26  ;;  %v14103_v8 = vcombine.high %v1595_v62, %v1599_v63  ;;  %v1523_v9 = vld [vmem:[%s19723_s1 + $0x2e88] sm:$0xff]  ;;  %v14102_v26 = vcombine.low %v1595_v62, %v1599_v63 }
 0x2ff   :  { %10679 = vmatprep.subr.bf16.mxu0 %v14063_v60  ;;  %v1527_v13 = vld [vmem:[%s19723_s1 + $0x2ea8] sm:$0xff] }
 0x300   :  { %10645 = vmatpush2.bf16.msra.mxu1 %v13910_v7  ;;  %v1587_v17 = vld [vmem:[%s19723_s1 + $0x3088] sm:$0xff]  ;;  %v14031_v7 = vcombine.high %v1523_v9, %v1527_v13 }
 0x301   :  { %10646 = vmatprep.subr.bf16.mxu1 %v13903_v0  ;;  %v1591_v21 = vld [vmem:[%s19723_s1 + $0x30a8] sm:$0xff] }
 0x302   :  { %10680 = vmatpush2.bf16.msra.mxu0 %v14062_v53  ;;  %v14095_v60 = vcombine.high %v1587_v17, %v1591_v21  ;;  %v1515_v0 = vld [vmem:[%s19723_s1 + $0x2e48] sm:$0xff]  ;;  %v14030_v53 = vcombine.low %v1523_v9, %v1527_v13 }
 0x303   :  { %10681 = vmatprep.subr.bf16.mxu0 %v14055_v29  ;;  %v1519_v16 = vld [vmem:[%s19723_s1 + $0x2e68] sm:$0xff]  ;;  %v14094_v29 = vcombine.low %v1587_v17, %v1591_v21  ;;  %v84_v21 = vld [vmem:[%s19723_s1 + $0x190] sm:$0xff] }
 0x304   :  { %10647 = vmatpush2.bf16.msra.mxu1 %v13902_v37  ;;  %v1579_v35 = vld [vmem:[%s19723_s1 + $0x3048] sm:$0xff] }
 0x305   :  { %10648 = vmatprep.subr.bf16.mxu1 %v13895_v3  ;;  %v1583_v34 = vld [vmem:[%s19723_s1 + $0x3068] sm:$0xff]  ;;  %v14023_v3 = vcombine.high %v1515_v0, %v1519_v16 }
 0x306   :  { %10682 = vmatpush2.bf16.msra.mxu0 %v14054_v38  ;;  %v14087_v50 = vcombine.high %v1579_v35, %v1583_v34  ;;  %v1507_v49 = vld [vmem:[%s19723_s1 + $0x2e08] sm:$0xff]  ;;  %v14086_v58 = vcombine.low %v1579_v35, %v1583_v34  ;;  %v76_v34 = vld [vmem:[%s19723_s1 + $0x150] sm:$0xff] }
 0x307   :  { %10683 = vmatprep.subr.bf16.mxu0 %v14047_v55  ;;  %v1511_v51 = vld [vmem:[%s19723_s1 + $0x2e28] sm:$0xff] }
 0x308   :  { %10649 = vmatpush2.bf16.msra.mxu1 %v13894_v52  ;;  %v1575_v52 = vld [vmem:[%s19723_s1 + $0x3028] sm:$0xff]  ;;  %v14015_v36 = vcombine.high %v1507_v49, %v1511_v51 }
 0x309   :  { %10650 = vmatprep.subr.bf16.mxu1 %v13887_v20  ;;  %v14022_v20 = vcombine.low %v1515_v0, %v1519_v16 }
 0x30a   :  { %10684 = vmatpush2.bf16.msra.mxu0 %v14046_v1  ;;  %v96_v1 = vld [vmem:[%s19723_s1 + $0x1f0] sm:$0xff] }
 0x30b   :  { %10685 = vmatprep.subr.bf16.mxu0 %v14039_v61  ;;  %v224_v61 = vld [vmem:[%s19723_s1 + $0x5f0] sm:$0xff] }
 0x30c   :  { %10651 = vmatpush2.bf16.msra.mxu1 %v13886_v2  ;;  %v220_v2 = vld [vmem:[%s19723_s1 + $0x5d0] sm:$0xff] }
 0x30d   :  { %10710 = vmatprep.subr.bf16.mxu1 %v14103_v8  ;;  %v14014_v8 = vcombine.low %v1507_v49, %v1511_v51  ;;  %v12729_v17 = vcombine.high %v220_v2, %v224_v61  ;;  %v12728_v0 = vcombine.low %v220_v2, %v224_v61  ;;  %v60_v61 = vld [vmem:[%s19723_s1 + $0xd0] sm:$0xff] }
 0x30e   :  { %10686 = vmatpush2.bf16.msra.mxu0 %v14038_v54  ;;  %v88_v54 = vld [vmem:[%s19723_s1 + $0x1b0] sm:$0xff] }
 0x30f   :  { %v10408_v15 = vpop.f32.mrf.mxu1  ;;  %10653 = vmatmul.mubr.bf16.vlgmr.msra.gmra.mxu1 %v15753_v46  ;;  %10687 = vmatprep.subr.bf16.mxu0 %v14031_v7  ;;  %v216_v7 = vld [vmem:[%s19723_s1 + $0x5b0] sm:$0xff]  ;;  %v12593_v16 = vcombine.high %v84_v21, %v88_v54 }
 0x310   :  { %v10409_v37 = vadd.f32 %v10408_v15, %v16858_v43  ;;  %10711 = vmatpush1.bf16.msra.mxu1 %v14102_v26  ;;  %10734 = vmatprep.mubr.bf16.mxu1 %v14363_v41  ;;  %v1571_v43 = vld [vmem:[%s19723_s1 + $0x3008] sm:$0xff]  ;;  %v212_v26 = vld [vmem:[%s19723_s1 + $0x590] sm:$0xff] }
 0x311   :  { %v10410_v47 = vpop.f32.mrf.mxu1  ;;  %10712 = vmatprep.subr.bf16.mxu1 %v14095_v60  ;;  %v14079_v63 = vcombine.high %v1571_v43, %v1575_v52  ;;  %v14078_v9 = vcombine.low %v1571_v43, %v1575_v52  ;;  %v12721_v35 = vcombine.high %v212_v26, %v216_v7  ;;  %v80_v15 = vld [vmem:[%s19723_s1 + $0x170] sm:$0xff]  ;;  %v12720_v51 = vcombine.low %v212_v26, %v216_v7 }
 0x312   :  { %v10411_v38 = vadd.f32 %v10410_v47, %v16861_v39  ;;  %10688 = vmatpush2.bf16.msra.mxu0 %v14030_v53  ;;  %v92_v39 = vld [vmem:[%s19723_s1 + $0x1d0] sm:$0xff]  ;;  %v12585_v43 = vcombine.high %v76_v34, %v80_v15 }
 0x313   :  { %v10412_v55 = vpop.f32.mrf.mxu1  ;;  %10689 = vmatprep.subr.bf16.mxu0 %v14023_v3  ;;  %v12601_v13 = vcombine.high %v92_v39, %v96_v1  ;;  %v12600_v60 = vcombine.low %v92_v39, %v96_v1  ;;  %v208_v3 = vld [vmem:[%s19723_s1 + $0x570] sm:$0xff] }
 0x314   :  { %10713 = vmatpush1.bf16.msra.mxu1 %v14094_v29  ;;  %v204_v29 = vld [vmem:[%s19723_s1 + $0x550] sm:$0xff] }
 0x315   :  { %v10413_v62 = vpop.f32.mrf.mxu1  ;;  %10714 = vmatprep.subr.bf16.mxu1 %v14087_v50  ;;  %v12592_v50 = vcombine.low %v84_v21, %v88_v54  ;;  %v12713_v55 = vcombine.high %v204_v29, %v208_v3  ;;  %v12712_v39 = vcombine.low %v204_v29, %v208_v3  ;;  %v52_v7 = vld [vmem:[%s19723_s1 + $0x90] sm:$0xff] }
 0x316   :  { %10690 = vmatpush2.bf16.msra.mxu0 %v14022_v20  ;;  %v68_v20 = vld [vmem:[%s19723_s1 + $0x110] sm:$0xff]  ;;  %v12584_v62 = vcombine.low %v76_v34, %v80_v15 }
 0x317   :  { %10691 = vmatprep.subr.bf16.mxu0 %v14015_v36  ;;  %v196_v36 = vld [vmem:[%s19723_s1 + $0x510] sm:$0xff] }
 0x318   :  { %10715 = vmatpush1.bf16.msra.mxu1 %v14086_v58  ;;  %v44_v29 = vld [vmem:[%s19723_s1 + $0x50] sm:$0xff] }
 0x319   :  { %10716 = vmatprep.subr.bf16.mxu1 %v14079_v63  ;;  %v48_v3 = vld [vmem:[%s19723_s1 + $0x70] sm:$0xff] }
 0x31a   :  { %10692 = vmatpush2.bf16.msra.mxu0 %v14014_v8  ;;  %v64_v8 = vld [vmem:[%s19723_s1 + $0xf0] sm:$0xff] }
 0x31b   :  { %10743 = vmatprep.subr.bf16.mxu0 %v12601_v13  ;;  %v192_v13 = vld [vmem:[%s19723_s1 + $0x4f0] sm:$0xff]  ;;  %v12569_v54 = vcombine.high %v60_v61, %v64_v8 }
 0x31c   :  { %10717 = vmatpush1.bf16.msra.mxu1 %v14078_v9  ;;  %v188_v9 = vld [vmem:[%s19723_s1 + $0x4d0] sm:$0xff] }
 0x31d   :  { %10784 = vmatprep.subr.bf16.mxu1 %v12729_v17  ;;  %v10449_v53 = vpop.f32.mrf.mxu0  ;;  %10694 = vmatmul.mubr.bf16.vlgmr.msra.gmra.mxu0 %v15769_v59  ;;  %v12697_v26 = vcombine.high %v188_v9, %v192_v13  ;;  %v12696_v34 = vcombine.low %v188_v9, %v192_v13  ;;  %v288_v9 = vld [vmem:[%s19723_s1 + $0x7f0] sm:$0xff] }
 0x31e   :  { %v17060_v47 = vadd.f32 %v10449_v53, %v10409_v37  ;;  %10744 = vmatpush1.bf16.msra.mxu0 %v12600_v60  ;;  %v72_v37 = vld [vmem:[%s19723_s1 + $0x130] sm:$0xff]  ;;  %10775 = vmatprep.mubr.bf16.mxu0 %v14527_v10 }
 0x31f   :  { %14109 = vmatmul.mubr.msk.bf16.vlgmr.msra.gmra.mxu1 %vm9673_vm0, %v15827_v25  ;;  %v10451_v49 = vpop.f32.mrf.mxu0  ;;  %10745 = vmatprep.subr.bf16.mxu0 %v12593_v16  ;;  %v12577_v1 = vcombine.high %v68_v20, %v72_v37  ;;  %v12576_v17 = vcombine.low %v68_v20, %v72_v37  ;;  %v56_v60 = vld [vmem:[%s19723_s1 + $0xb0] sm:$0xff] }
 0x320   :  { %10785 = vmatpush1.bf16.msra.mxu1 %v12728_v0  ;;  %v17064_v52 = vadd.f32 %v10451_v49, %v10411_v38  ;;  %v200_v38 = vld [vmem:[%s19723_s1 + $0x530] sm:$0xff]  ;;  %10816 = vmatprep.mubr.bf16.mxu1 %v14538_v14  ;;  %v12561_v15 = vcombine.high %v52_v7, %v56_v60 }
 0x321   :  { %10786 = vmatprep.subr.bf16.mxu1 %v12721_v35  ;;  %v10453_v58 = vpop.f32.mrf.mxu0  ;;  %v12705_v2 = vcombine.high %v196_v36, %v200_v38  ;;  %v12704_v21 = vcombine.low %v196_v36, %v200_v38  ;;  %v180_v0 = vld [vmem:[%s19723_s1 + $0x490] sm:$0xff]  ;;  %v12568_v35 = vcombine.low %v60_v61, %v64_v8 }
 0x322   :  { %10746 = vmatpush1.bf16.msra.mxu0 %v12592_v50  ;;  %v184_v16 = vld [vmem:[%s19723_s1 + $0x4b0] sm:$0xff] }
 0x323   :  { %v10454_v63 = vpop.f32.mrf.mxu0  ;;  %10747 = vmatprep.subr.bf16.mxu0 %v12585_v43  ;;  %v12689_v53 = vcombine.high %v180_v0, %v184_v16  ;;  %v172_v50 = vld [vmem:[%s19723_s1 + $0x450] sm:$0xff]  ;;  %v12688_v43 = vcombine.low %v180_v0, %v184_v16 }
 0x324   :  { %10787 = vmatpush1.bf16.msra.mxu1 %v12720_v51  ;;  %v176_v49 = vld [vmem:[%s19723_s1 + $0x470] sm:$0xff]  ;;  %v12560_v51 = vcombine.low %v52_v7, %v56_v60 }
 0x325   :  { %10788 = vmatprep.subr.bf16.mxu1 %v12713_v55  ;;  %v12553_v55 = vcombine.high %v44_v29, %v48_v3  ;;  %v12681_v20 = vcombine.high %v172_v50, %v176_v49  ;;  %v36_v37 = vld [vmem:[%s19723_s1 + $0x10] sm:$0xff]  ;;  %v12680_v63 = vcombine.low %v172_v50, %v176_v49 }
 0x326   :  { %10748 = vmatpush1.bf16.msra.mxu0 %v12584_v62  ;;  %v40_v58 = vld [vmem:[%s19723_s1 + $0x30] sm:$0xff]  ;;  %v12552_v62 = vcombine.low %v44_v29, %v48_v3 }
 0x327   :  { %10749 = vmatprep.subr.bf16.mxu0 %v12577_v1  ;;  %v164_v36 = vld [vmem:[%s19723_s1 + $0x410] sm:$0xff]  ;;  %v12544_v13 = vcombine.low %v36_v37, %v40_v58 }
 0x328   :  { %10789 = vmatpush1.bf16.msra.mxu1 %v12712_v39  ;;  %v168_v38 = vld [vmem:[%s19723_s1 + $0x430] sm:$0xff]  ;;  %v12545_v39 = vcombine.high %v36_v37, %v40_v58 }
 0x329   :  { %10790 = vmatprep.subr.bf16.mxu1 %v12705_v2  ;;  %v12673_v1 = vcombine.high %v164_v36, %v168_v38  ;;  %v156_v2 = vld [vmem:[%s19723_s1 + $0x3d0] sm:$0xff] }
 0x32a   :  { %10750 = vmatpush1.bf16.msra.mxu0 %v12576_v17  ;;  %v160_v61 = vld [vmem:[%s19723_s1 + $0x3f0] sm:$0xff]  ;;  %v12672_v17 = vcombine.low %v164_v36, %v168_v38 }
 0x32b   :  { %10751 = vmatprep.subr.bf16.mxu0 %v12569_v54  ;;  %v284_v8 = vld [vmem:[%s19723_s1 + $0x7d0] sm:$0xff]  ;;  %v12664_v16 = vcombine.low %v156_v2, %v160_v61 }
 0x32c   :  { %10791 = vmatpush1.bf16.msra.mxu1 %v12704_v21  ;;  %v12665_v21 = vcombine.high %v156_v2, %v160_v61  ;;  %v12793_v54 = vcombine.high %v284_v8, %v288_v9  ;;  %v152_v7 = vld [vmem:[%s19723_s1 + $0x3b0] sm:$0xff] }
 0x32d   :  { %10792 = vmatprep.subr.bf16.mxu1 %v12697_v26  ;;  %v148_v26 = vld [vmem:[%s19723_s1 + $0x390] sm:$0xff] }
 0x32e   :  { %10752 = vmatpush1.bf16.msra.mxu0 %v12568_v35  ;;  %v276_v60 = vld [vmem:[%s19723_s1 + $0x790] sm:$0xff]  ;;  %v12792_v35 = vcombine.low %v284_v8, %v288_v9  ;;  %v12656_v49 = vcombine.low %v148_v26, %v152_v7 }
 0x32f   :  { %10753 = vmatprep.subr.bf16.mxu0 %v12561_v15  ;;  %v280_v0 = vld [vmem:[%s19723_s1 + $0x7b0] sm:$0xff] }
 0x330   :  { %10793 = vmatpush1.bf16.msra.mxu1 %v12696_v34  ;;  %v12657_v34 = vcombine.high %v148_v26, %v152_v7  ;;  %v12785_v15 = vcombine.high %v276_v60, %v280_v0  ;;  %v144_v29 = vld [vmem:[%s19723_s1 + $0x370] sm:$0xff] }
 0x331   :  { %10794 = vmatprep.subr.bf16.mxu1 %v12689_v53  ;;  %v140_v53 = vld [vmem:[%s19723_s1 + $0x350] sm:$0xff] }
 0x332   :  { %10754 = vmatpush1.bf16.msra.mxu0 %v12560_v51  ;;  %v268_v3 = vld [vmem:[%s19723_s1 + $0x750] sm:$0xff]  ;;  %v12784_v51 = vcombine.low %v276_v60, %v280_v0  ;;  %v12648_v38 = vcombine.low %v140_v53, %v144_v29 }
 0x333   :  { %10755 = vmatprep.subr.bf16.mxu0 %v12553_v55  ;;  %v272_v50 = vld [vmem:[%s19723_s1 + $0x770] sm:$0xff] }
 0x334   :  { %10795 = vmatpush1.bf16.msra.mxu1 %v12688_v43  ;;  %v12649_v43 = vcombine.high %v140_v53, %v144_v29  ;;  %v12777_v55 = vcombine.high %v268_v3, %v272_v50  ;;  %v136_v37 = vld [vmem:[%s19723_s1 + $0x330] sm:$0xff] }
 0x335   :  { %10796 = vmatprep.subr.bf16.mxu1 %v12681_v20  ;;  %v132_v20 = vld [vmem:[%s19723_s1 + $0x310] sm:$0xff] }
 0x336   :  { %10756 = vmatpush1.bf16.msra.mxu0 %v12552_v62  ;;  %v260_v58 = vld [vmem:[%s19723_s1 + $0x710] sm:$0xff]  ;;  %v12776_v62 = vcombine.low %v268_v3, %v272_v50  ;;  %v12640_v9 = vcombine.low %v132_v20, %v136_v37 }
 0x337   :  { %10757 = vmatprep.subr.bf16.mxu0 %v12545_v39  ;;  %v264_v36 = vld [vmem:[%s19723_s1 + $0x730] sm:$0xff] }
 0x338   :  { %10797 = vmatpush1.bf16.msra.mxu1 %v12680_v63  ;;  %v12641_v63 = vcombine.high %v132_v20, %v136_v37  ;;  %v12769_v39 = vcombine.high %v260_v58, %v264_v36  ;;  %v128_v2 = vld [vmem:[%s19723_s1 + $0x2f0] sm:$0xff] }
 0x339   :  { %10798 = vmatprep.subr.bf16.mxu1 %v12673_v1  ;;  %v124_v1 = vld [vmem:[%s19723_s1 + $0x2d0] sm:$0xff] }
 0x33a   :  { %10758 = vmatpush1.bf16.msra.mxu0 %v12544_v13  ;;  %v252_v61 = vld [vmem:[%s19723_s1 + $0x6d0] sm:$0xff]  ;;  %v12768_v13 = vcombine.low %v260_v58, %v264_v36  ;;  %v12632_v0 = vcombine.low %v124_v1, %v128_v2 }
 0x33b   :  { %10759 = vmatprep.subr.bf16.mxu0 %v12665_v21  ;;  %v256_v8 = vld [vmem:[%s19723_s1 + $0x6f0] sm:$0xff] }
 0x33c   :  { %10799 = vmatpush1.bf16.msra.mxu1 %v12672_v17  ;;  %v12633_v17 = vcombine.high %v124_v1, %v128_v2  ;;  %v12761_v21 = vcombine.high %v252_v61, %v256_v8  ;;  %v120_v26 = vld [vmem:[%s19723_s1 + $0x2b0] sm:$0xff] }
 0x33d   :  { %10800 = vmatprep.subr.bf16.mxu1 %v12793_v54  ;;  %v116_v54 = vld [vmem:[%s19723_s1 + $0x290] sm:$0xff] }
 0x33e   :  { %10760 = vmatpush2.bf16.msra.mxu0 %v12664_v16  ;;  %v244_v7 = vld [vmem:[%s19723_s1 + $0x690] sm:$0xff]  ;;  %v12760_v16 = vcombine.low %v252_v61, %v256_v8 }
 0x33f   :  { %10761 = vmatprep.subr.bf16.mxu0 %v12657_v34  ;;  %v248_v60 = vld [vmem:[%s19723_s1 + $0x6b0] sm:$0xff] }
 0x340   :  { %10801 = vmatpush2.bf16.msra.mxu1 %v12792_v35  ;;  %v12625_v35 = vcombine.high %v116_v54, %v120_v26  ;;  %v12753_v34 = vcombine.high %v244_v7, %v248_v60  ;;  %v112_v53 = vld [vmem:[%s19723_s1 + $0x270] sm:$0xff] }
 0x341   :  { %10802 = vmatprep.subr.bf16.mxu1 %v12785_v15  ;;  %v108_v15 = vld [vmem:[%s19723_s1 + $0x250] sm:$0xff] }
 0x342   :  { %10762 = vmatpush2.bf16.msra.mxu0 %v12656_v49  ;;  %v236_v29 = vld [vmem:[%s19723_s1 + $0x650] sm:$0xff]  ;;  %v12624_v49 = vcombine.low %v116_v54, %v120_v26 }
 0x343   :  { %10763 = vmatprep.subr.bf16.mxu0 %v12649_v43  ;;  %v240_v3 = vld [vmem:[%s19723_s1 + $0x670] sm:$0xff]  ;;  %v12752_v43 = vcombine.low %v244_v7, %v248_v60 }
 0x344   :  { %10803 = vmatpush2.bf16.msra.mxu1 %v12784_v51  ;;  %v12745_v37 = vcombine.high %v236_v29, %v240_v3  ;;  %v100_v58 = vld [vmem:[%s19723_s1 + $0x210] sm:$0xff]  ;;  %v12744_v1 = vcombine.low %v236_v29, %v240_v3 }
 0x345   :  { %10804 = vmatprep.subr.bf16.mxu1 %v12777_v55  ;;  %v12617_v55 = vcombine.high %v108_v15, %v112_v53  ;;  %v104_v36 = vld [vmem:[%s19723_s1 + $0x230] sm:$0xff] }
 0x346   :  { %10764 = vmatpush2.bf16.msra.mxu0 %v12648_v38  ;;  %v12609_v2 = vcombine.high %v100_v58, %v104_v36  ;;  %v340_v60 = vld [vmem:[%s19723_s1 + $0x990] sm:$0xff] }
 0x347   :  { %10765 = vmatprep.subr.bf16.mxu0 %v12641_v63  ;;  %v332_v3 = vld [vmem:[%s19723_s1 + $0x950] sm:$0xff] }
 0x348   :  { %10805 = vmatpush2.bf16.msra.mxu1 %v12776_v62  ;;  %v232_v62 = vld [vmem:[%s19723_s1 + $0x630] sm:$0xff] }
 0x349   :  { %10806 = vmatprep.subr.bf16.mxu1 %v12769_v39  ;;  %v12616_v39 = vcombine.low %v108_v15, %v112_v53 }
 0x34a   :  { %10766 = vmatpush2.bf16.msra.mxu0 %v12640_v9  ;;  %v352_v9 = vld [vmem:[%s19723_s1 + $0x9f0] sm:$0xff] }
 0x34b   :  { %10767 = vmatprep.subr.bf16.mxu0 %v12633_v17  ;;  %v480_v17 = vld [vmem:[%s19723_s1 + $0xdf0] sm:$0xff] }
 0x34c   :  { %10807 = vmatpush2.bf16.msra.mxu1 %v12768_v13  ;;  %v476_v13 = vld [vmem:[%s19723_s1 + $0xdd0] sm:$0xff] }
 0x34d   :  { %10808 = vmatprep.subr.bf16.mxu1 %v12761_v21  ;;  %v12608_v21 = vcombine.low %v100_v58, %v104_v36  ;;  %v12985_v7 = vcombine.high %v476_v13, %v480_v17  ;;  %v12984_v15 = vcombine.low %v476_v13, %v480_v17  ;;  %v316_v17 = vld [vmem:[%s19723_s1 + $0x8d0] sm:$0xff] }
 0x34e   :  { %10768 = vmatpush2.bf16.msra.mxu0 %v12632_v0  ;;  %v344_v0 = vld [vmem:[%s19723_s1 + $0x9b0] sm:$0xff] }
 0x34f   :  { %v10490_v50 = vpop.f32.mrf.mxu1  ;;  %10769 = vmatprep.subr.bf16.mxu0 %v12625_v35  ;;  %v472_v35 = vld [vmem:[%s19723_s1 + $0xdb0] sm:$0xff]  ;;  %v12849_v53 = vcombine.high %v340_v60, %v344_v0 }
 0x350   :  { %v10491_v51 = vadd.f32 %v10490_v50, %v17060_v47  ;;  %10809 = vmatpush2.bf16.msra.mxu1 %v12760_v16  ;;  %v228_v47 = vld [vmem:[%s19723_s1 + $0x610] sm:$0xff] }
 0x351   :  { %v10492_v20 = vpop.f32.mrf.mxu1  ;;  %10810 = vmatprep.subr.bf16.mxu1 %v12753_v34  ;;  %v12737_v8 = vcombine.high %v228_v47, %v232_v62  ;;  %v12736_v54 = vcombine.low %v228_v47, %v232_v62  ;;  %v468_v16 = vld [vmem:[%s19723_s1 + $0xd90] sm:$0xff] }
 0x352   :  { %v10493_v38 = vadd.f32 %v10492_v20, %v17064_v52  ;;  %10770 = vmatpush2.bf16.msra.mxu0 %v12624_v49  ;;  %v348_v52 = vld [vmem:[%s19723_s1 + $0x9d0] sm:$0xff]  ;;  %v12977_v29 = vcombine.high %v468_v16, %v472_v35  ;;  %v12976_v36 = vcombine.low %v468_v16, %v472_v35 }
 0x353   :  { %v10494_v63 = vpop.f32.mrf.mxu1  ;;  %10771 = vmatprep.subr.bf16.mxu0 %v12617_v55  ;;  %v12857_v26 = vcombine.high %v348_v52, %v352_v9  ;;  %v12856_v34 = vcombine.low %v348_v52, %v352_v9  ;;  %v336_v50 = vld [vmem:[%s19723_s1 + $0x970] sm:$0xff] }
 0x354   :  { %10811 = vmatpush2.bf16.msra.mxu1 %v12752_v43  ;;  %v460_v43 = vld [vmem:[%s19723_s1 + $0xd50] sm:$0xff]  ;;  %v12841_v47 = vcombine.high %v332_v3, %v336_v50 }
 0x355   :  { %v10495_v61 = vpop.f32.mrf.mxu1  ;;  %10812 = vmatprep.subr.bf16.mxu1 %v12745_v37  ;;  %v464_v55 = vld [vmem:[%s19723_s1 + $0xd70] sm:$0xff]  ;;  %v12848_v37 = vcombine.low %v340_v60, %v344_v0 }
 0x356   :  { %10772 = vmatpush2.bf16.msra.mxu0 %v12616_v39  ;;  %v12969_v63 = vcombine.high %v460_v43, %v464_v55  ;;  %v324_v39 = vld [vmem:[%s19723_s1 + $0x910] sm:$0xff]  ;;  %v12840_v61 = vcombine.low %v332_v3, %v336_v50  ;;  %v12968_v52 = vcombine.low %v460_v43, %v464_v55 }
 0x357   :  { %10773 = vmatprep.subr.bf16.mxu0 %v12609_v2  ;;  %v452_v2 = vld [vmem:[%s19723_s1 + $0xd10] sm:$0xff] }
 0x358   :  { %10813 = vmatpush2.bf16.msra.mxu1 %v12744_v1  ;;  %v308_v35 = vld [vmem:[%s19723_s1 + $0x890] sm:$0xff] }
 0x359   :  { %10814 = vmatprep.subr.bf16.mxu1 %v12737_v8  ;;  %v300_v43 = vld [vmem:[%s19723_s1 + $0x850] sm:$0xff] }
 0x35a   :  { %10774 = vmatpush2.bf16.msra.mxu0 %v12608_v21  ;;  %v320_v21 = vld [vmem:[%s19723_s1 + $0x8f0] sm:$0xff] }
 0x35b   :  { %10825 = vmatprep.subr.bf16.mxu0 %v12857_v26  ;;  %v448_v26 = vld [vmem:[%s19723_s1 + $0xcf0] sm:$0xff]  ;;  %v12825_v0 = vcombine.high %v316_v17, %v320_v21 }
 0x35c   :  { %10815 = vmatpush2.bf16.msra.mxu1 %v12736_v54  ;;  %v444_v54 = vld [vmem:[%s19723_s1 + $0xcd0] sm:$0xff] }
 0x35d   :  { %10866 = vmatprep.subr.bf16.mxu1 %v12985_v7  ;;  %v10531_v49 = vpop.f32.mrf.mxu0  ;;  %10776 = vmatmul.mubr.bf16.vlgmr.msra.gmra.mxu0 %v14646_v23  ;;  %v12953_v16 = vcombine.high %v444_v54, %v448_v26  ;;  %v12952_v3 = vcombine.low %v444_v54, %v448_v26  ;;  %v304_v55 = vld [vmem:[%s19723_s1 + $0x870] sm:$0xff] }
 0x35e   :  { %v17263_v20 = vadd.f32 %v10531_v49, %v10491_v51  ;;  %10826 = vmatpush1.bf16.msra.mxu0 %v12856_v34  ;;  %v328_v51 = vld [vmem:[%s19723_s1 + $0x930] sm:$0xff]  ;;  %10857 = vmatprep.mubr.bf16.mxu0 %v14661_v30 }
 0x35f   :  { %10817 = vmatmul.mubr.bf16.vlgmr.msra.gmra.mxu1 %v14665_v31  ;;  %v10533_v58 = vpop.f32.mrf.mxu0  ;;  %10827 = vmatprep.subr.bf16.mxu0 %v12849_v53  ;;  %v12833_v9 = vcombine.high %v324_v39, %v328_v51  ;;  %v12832_v7 = vcombine.low %v324_v39, %v328_v51  ;;  %v312_v34 = vld [vmem:[%s19723_s1 + $0x8b0] sm:$0xff] }
 0x360   :  { %10867 = vmatpush1.bf16.msra.mxu1 %v12984_v15  ;;  %v17266_v62 = vadd.f32 %v10533_v58, %v10493_v38  ;;  %v456_v38 = vld [vmem:[%s19723_s1 + $0xd30] sm:$0xff]  ;;  %10898 = vmatprep.mubr.bf16.mxu1 %v14682_v40  ;;  %v12817_v50 = vcombine.high %v308_v35, %v312_v34 }
 0x361   :  { %10868 = vmatprep.subr.bf16.mxu1 %v12977_v29  ;;  %v10535_v1 = vpop.f32.mrf.mxu0  ;;  %v12961_v13 = vcombine.high %v452_v2, %v456_v38  ;;  %v12960_v60 = vcombine.low %v452_v2, %v456_v38  ;;  %v436_v15 = vld [vmem:[%s19723_s1 + $0xc90] sm:$0xff]  ;;  %v12824_v29 = vcombine.low %v316_v17, %v320_v21 }
 0x362   :  { %10828 = vmatpush1.bf16.msra.mxu0 %v12848_v37  ;;  %v440_v53 = vld [vmem:[%s19723_s1 + $0xcb0] sm:$0xff] }
 0x363   :  { %v10536_v8 = vpop.f32.mrf.mxu0  ;;  %10829 = vmatprep.subr.bf16.mxu0 %v12841_v47  ;;  %v12945_v49 = vcombine.high %v436_v15, %v440_v53  ;;  %v428_v37 = vld [vmem:[%s19723_s1 + $0xc50] sm:$0xff]  ;;  %v12944_v47 = vcombine.low %v436_v15, %v440_v53 }
 0x364   :  { %10869 = vmatpush1.bf16.msra.mxu1 %v12976_v36  ;;  %v432_v58 = vld [vmem:[%s19723_s1 + $0xc70] sm:$0xff]  ;;  %v12816_v36 = vcombine.low %v308_v35, %v312_v34 }
 0x365   :  { %10870 = vmatprep.subr.bf16.mxu1 %v12969_v63  ;;  %v12809_v63 = vcombine.high %v300_v43, %v304_v55  ;;  %v12937_v39 = vcombine.high %v428_v37, %v432_v58  ;;  %v292_v51 = vld [vmem:[%s19723_s1 + $0x810] sm:$0xff]  ;;  %v12936_v8 = vcombine.low %v428_v37, %v432_v58 }
 0x366   :  { %10830 = vmatpush1.bf16.msra.mxu0 %v12840_v61  ;;  %v296_v1 = vld [vmem:[%s19723_s1 + $0x830] sm:$0xff]  ;;  %v12808_v61 = vcombine.low %v300_v43, %v304_v55 }
 0x367   :  { %10831 = vmatprep.subr.bf16.mxu0 %v12833_v9  ;;  %v420_v2 = vld [vmem:[%s19723_s1 + $0xc10] sm:$0xff]  ;;  %v12800_v26 = vcombine.low %v292_v51, %v296_v1 }
 0x368   :  { %10871 = vmatpush1.bf16.msra.mxu1 %v12968_v52  ;;  %v424_v38 = vld [vmem:[%s19723_s1 + $0xc30] sm:$0xff]  ;;  %v12801_v52 = vcombine.high %v292_v51, %v296_v1 }
 0x369   :  { %10872 = vmatprep.subr.bf16.mxu1 %v12961_v13  ;;  %v12929_v9 = vcombine.high %v420_v2, %v424_v38  ;;  %v412_v13 = vld [vmem:[%s19723_s1 + $0xbd0] sm:$0xff] }
 0x36a   :  { %10832 = vmatpush1.bf16.msra.mxu0 %v12832_v7  ;;  %v416_v17 = vld [vmem:[%s19723_s1 + $0xbf0] sm:$0xff]  ;;  %v12928_v7 = vcombine.low %v420_v2, %v424_v38 }
 0x36b   :  { %10833 = vmatprep.subr.bf16.mxu0 %v12825_v0  ;;  %v540_v21 = vld [vmem:[%s19723_s1 + $0xfd0] sm:$0xff]  ;;  %v12920_v53 = vcombine.low %v412_v13, %v416_v17 }
 0x36c   :  { %10873 = vmatpush1.bf16.msra.mxu1 %v12960_v60  ;;  %v544_v54 = vld [vmem:[%s19723_s1 + $0xff0] sm:$0xff]  ;;  %v12921_v60 = vcombine.high %v412_v13, %v416_v17 }
 0x36d   :  { %10874 = vmatprep.subr.bf16.mxu1 %v12953_v16  ;;  %v13049_v0 = vcombine.high %v540_v21, %v544_v54  ;;  %v404_v16 = vld [vmem:[%s19723_s1 + $0xb90] sm:$0xff] }
 0x36e   :  { %10834 = vmatpush1.bf16.msra.mxu0 %v12824_v29  ;;  %v408_v35 = vld [vmem:[%s19723_s1 + $0xbb0] sm:$0xff]  ;;  %v13048_v29 = vcombine.low %v540_v21, %v544_v54 }
 0x36f   :  { %10835 = vmatprep.subr.bf16.mxu0 %v12817_v50  ;;  %v532_v34 = vld [vmem:[%s19723_s1 + $0xf90] sm:$0xff]  ;;  %v12912_v58 = vcombine.low %v404_v16, %v408_v35 }
 0x370   :  { %10875 = vmatpush1.bf16.msra.mxu1 %v12952_v3  ;;  %v536_v15 = vld [vmem:[%s19723_s1 + $0xfb0] sm:$0xff]  ;;  %v12913_v3 = vcombine.high %v404_v16, %v408_v35 }
 0x371   :  { %10876 = vmatprep.subr.bf16.mxu1 %v12945_v49  ;;  %v13041_v50 = vcombine.high %v532_v34, %v536_v15  ;;  %v396_v49 = vld [vmem:[%s19723_s1 + $0xb50] sm:$0xff] }
 0x372   :  { %10836 = vmatpush1.bf16.msra.mxu0 %v12816_v36  ;;  %v400_v43 = vld [vmem:[%s19723_s1 + $0xb70] sm:$0xff]  ;;  %v13040_v36 = vcombine.low %v532_v34, %v536_v15 }
 0x373   :  { %10837 = vmatprep.subr.bf16.mxu0 %v12809_v63  ;;  %v524_v55 = vld [vmem:[%s19723_s1 + $0xf50] sm:$0xff]  ;;  %v12904_v38 = vcombine.low %v396_v49, %v400_v43 }
 0x374   :  { %10877 = vmatpush1.bf16.msra.mxu1 %v12944_v47  ;;  %v528_v37 = vld [vmem:[%s19723_s1 + $0xf70] sm:$0xff]  ;;  %v12905_v47 = vcombine.high %v396_v49, %v400_v43 }
 0x375   :  { %10878 = vmatprep.subr.bf16.mxu1 %v12937_v39  ;;  %v13033_v63 = vcombine.high %v524_v55, %v528_v37  ;;  %v388_v39 = vld [vmem:[%s19723_s1 + $0xb10] sm:$0xff] }
 0x376   :  { %10838 = vmatpush1.bf16.msra.mxu0 %v12808_v61  ;;  %v392_v51 = vld [vmem:[%s19723_s1 + $0xb30] sm:$0xff]  ;;  %v13032_v61 = vcombine.low %v524_v55, %v528_v37 }
 0x377   :  { %10839 = vmatprep.subr.bf16.mxu0 %v12801_v52  ;;  %v516_v1 = vld [vmem:[%s19723_s1 + $0xf10] sm:$0xff]  ;;  %v12896_v54 = vcombine.low %v388_v39, %v392_v51 }
 0x378   :  { %10879 = vmatpush1.bf16.msra.mxu1 %v12936_v8  ;;  %v520_v2 = vld [vmem:[%s19723_s1 + $0xf30] sm:$0xff]  ;;  %v12897_v8 = vcombine.high %v388_v39, %v392_v51 }
 0x379   :  { %10880 = vmatprep.subr.bf16.mxu1 %v12929_v9  ;;  %v13025_v52 = vcombine.high %v516_v1, %v520_v2  ;;  %v380_v9 = vld [vmem:[%s19723_s1 + $0xad0] sm:$0xff] }
 0x37a   :  { %10840 = vmatpush1.bf16.msra.mxu0 %v12800_v26  ;;  %v384_v13 = vld [vmem:[%s19723_s1 + $0xaf0] sm:$0xff]  ;;  %v13024_v26 = vcombine.low %v516_v1, %v520_v2 }
 0x37b   :  { %10841 = vmatprep.subr.bf16.mxu0 %v12921_v60  ;;  %v508_v17 = vld [vmem:[%s19723_s1 + $0xed0] sm:$0xff]  ;;  %v12888_v15 = vcombine.low %v380_v9, %v384_v13 }
 0x37c   :  { %10881 = vmatpush1.bf16.msra.mxu1 %v12928_v7  ;;  %v512_v21 = vld [vmem:[%s19723_s1 + $0xef0] sm:$0xff]  ;;  %v12889_v7 = vcombine.high %v380_v9, %v384_v13 }
 0x37d   :  { %10882 = vmatprep.subr.bf16.mxu1 %v13049_v0  ;;  %v13017_v60 = vcombine.high %v508_v17, %v512_v21  ;;  %v372_v0 = vld [vmem:[%s19723_s1 + $0xa90] sm:$0xff] }
 0x37e   :  { %10842 = vmatpush2.bf16.msra.mxu0 %v12920_v53  ;;  %v376_v16 = vld [vmem:[%s19723_s1 + $0xab0] sm:$0xff]  ;;  %v13016_v53 = vcombine.low %v508_v17, %v512_v21 }
 0x37f   :  { %10843 = vmatprep.subr.bf16.mxu0 %v12913_v3  ;;  %v500_v35 = vld [vmem:[%s19723_s1 + $0xe90] sm:$0xff] }
 0x380   :  { %10883 = vmatpush2.bf16.msra.mxu1 %v13048_v29  ;;  %v504_v34 = vld [vmem:[%s19723_s1 + $0xeb0] sm:$0xff]  ;;  %v12881_v29 = vcombine.high %v372_v0, %v376_v16 }
 0x381   :  { %10884 = vmatprep.subr.bf16.mxu1 %v13041_v50  ;;  %v13009_v3 = vcombine.high %v500_v35, %v504_v34  ;;  %v364_v50 = vld [vmem:[%s19723_s1 + $0xa50] sm:$0xff] }
 0x382   :  { %10844 = vmatpush2.bf16.msra.mxu0 %v12912_v58  ;;  %v368_v49 = vld [vmem:[%s19723_s1 + $0xa70] sm:$0xff]  ;;  %v12880_v58 = vcombine.low %v372_v0, %v376_v16 }
 0x383   :  { %10845 = vmatprep.subr.bf16.mxu0 %v12905_v47  ;;  %v492_v43 = vld [vmem:[%s19723_s1 + $0xe50] sm:$0xff]  ;;  %v13008_v47 = vcombine.low %v500_v35, %v504_v34 }
 0x384   :  { %10885 = vmatpush2.bf16.msra.mxu1 %v13040_v36  ;;  %v496_v55 = vld [vmem:[%s19723_s1 + $0xe70] sm:$0xff] }
 0x385   :  { %10886 = vmatprep.subr.bf16.mxu1 %v13033_v63  ;;  %v12873_v63 = vcombine.high %v364_v50, %v368_v49  ;;  %v13001_v51 = vcombine.high %v492_v43, %v496_v55  ;;  %v356_v1 = vld [vmem:[%s19723_s1 + $0xa10] sm:$0xff]  ;;  %v13000_v9 = vcombine.low %v492_v43, %v496_v55 }
 0x386   :  { %10846 = vmatpush2.bf16.msra.mxu0 %v12904_v38  ;;  %v360_v2 = vld [vmem:[%s19723_s1 + $0xa30] sm:$0xff] }
 0x387   :  { %10847 = vmatprep.subr.bf16.mxu0 %v12897_v8  ;;  %v12865_v13 = vcombine.high %v356_v1, %v360_v2  ;;  %v596_v34 = vld [vmem:[%s19723_s1 + $0x1190] sm:$0xff] }
 0x388   :  { %10887 = vmatpush2.bf16.msra.mxu1 %v13032_v61  ;;  %v488_v61 = vld [vmem:[%s19723_s1 + $0xe30] sm:$0xff] }
 0x389   :  { %10888 = vmatprep.subr.bf16.mxu1 %v13025_v52  ;;  %v12872_v52 = vcombine.low %v364_v50, %v368_v49  ;;  %v588_v55 = vld [vmem:[%s19723_s1 + $0x1150] sm:$0xff] }
 0x38a   :  { %10848 = vmatpush2.bf16.msra.mxu0 %v12896_v54  ;;  %v608_v54 = vld [vmem:[%s19723_s1 + $0x11f0] sm:$0xff] }
 0x38b   :  { %10849 = vmatprep.subr.bf16.mxu0 %v12889_v7  ;;  %v736_v7 = vld [vmem:[%s19723_s1 + $0x15f0] sm:$0xff] }
 0x38c   :  { %10889 = vmatpush2.bf16.msra.mxu1 %v13024_v26  ;;  %v732_v26 = vld [vmem:[%s19723_s1 + $0x15d0] sm:$0xff] }
 0x38d   :  { %10890 = vmatprep.subr.bf16.mxu1 %v13017_v60  ;;  %v12864_v60 = vcombine.low %v356_v1, %v360_v2  ;;  %v13241_v35 = vcombine.high %v732_v26, %v736_v7  ;;  %v13240_v50 = vcombine.low %v732_v26, %v736_v7  ;;  %v572_v7 = vld [vmem:[%s19723_s1 + $0x10d0] sm:$0xff] }
 0x38e   :  { %10850 = vmatpush2.bf16.msra.mxu0 %v12888_v15  ;;  %v600_v15 = vld [vmem:[%s19723_s1 + $0x11b0] sm:$0xff] }
 0x38f   :  { %v10572_v37 = vpop.f32.mrf.mxu1  ;;  %10851 = vmatprep.subr.bf16.mxu0 %v12881_v29  ;;  %v728_v29 = vld [vmem:[%s19723_s1 + $0x15b0] sm:$0xff]  ;;  %v13105_v49 = vcombine.high %v596_v34, %v600_v15 }
 0x390   :  { %v10573_v36 = vadd.f32 %v10572_v37, %v17263_v20  ;;  %10891 = vmatpush2.bf16.msra.mxu1 %v13016_v53  ;;  %v484_v20 = vld [vmem:[%s19723_s1 + $0xe10] sm:$0xff] }
 0x391   :  { %v10574_v39 = vpop.f32.mrf.mxu1  ;;  %10892 = vmatprep.subr.bf16.mxu1 %v13009_v3  ;;  %v12993_v21 = vcombine.high %v484_v20, %v488_v61  ;;  %v12992_v0 = vcombine.low %v484_v20, %v488_v61  ;;  %v724_v53 = vld [vmem:[%s19723_s1 + $0x1590] sm:$0xff] }
 0x392   :  { %v10575_v38 = vadd.f32 %v10574_v39, %v17266_v62  ;;  %10852 = vmatpush2.bf16.msra.mxu0 %v12880_v58  ;;  %v604_v62 = vld [vmem:[%s19723_s1 + $0x11d0] sm:$0xff]  ;;  %v13233_v43 = vcombine.high %v724_v53, %v728_v29  ;;  %v13232_v2 = vcombine.low %v724_v53, %v728_v29 }
 0x393   :  { %v10576_v8 = vpop.f32.mrf.mxu1  ;;  %10853 = vmatprep.subr.bf16.mxu0 %v12873_v63  ;;  %v13113_v16 = vcombine.high %v604_v62, %v608_v54  ;;  %v13112_v3 = vcombine.low %v604_v62, %v608_v54  ;;  %v592_v37 = vld [vmem:[%s19723_s1 + $0x1170] sm:$0xff] }
 0x394   :  { %10893 = vmatpush2.bf16.msra.mxu1 %v13008_v47  ;;  %v716_v47 = vld [vmem:[%s19723_s1 + $0x1550] sm:$0xff]  ;;  %v13097_v20 = vcombine.high %v588_v55, %v592_v37 }
 0x395   :  { %v10577_v17 = vpop.f32.mrf.mxu1  ;;  %10894 = vmatprep.subr.bf16.mxu1 %v13001_v51  ;;  %v720_v63 = vld [vmem:[%s19723_s1 + $0x1570] sm:$0xff]  ;;  %v13104_v51 = vcombine.low %v596_v34, %v600_v15 }
 0x396   :  { %10854 = vmatpush2.bf16.msra.mxu0 %v12872_v52  ;;  %v13225_v8 = vcombine.high %v716_v47, %v720_v63  ;;  %v580_v52 = vld [vmem:[%s19723_s1 + $0x1110] sm:$0xff]  ;;  %v13096_v17 = vcombine.low %v588_v55, %v592_v37  ;;  %v13224_v62 = vcombine.low %v716_v47, %v720_v63 }
 0x397   :  { %10855 = vmatprep.subr.bf16.mxu0 %v12865_v13  ;;  %v708_v13 = vld [vmem:[%s19723_s1 + $0x1510] sm:$0xff] }
 0x398   :  { %10895 = vmatpush2.bf16.msra.mxu1 %v13000_v9  ;;  %v564_v29 = vld [vmem:[%s19723_s1 + $0x1090] sm:$0xff] }
 0x399   :  { %10896 = vmatprep.subr.bf16.mxu1 %v12993_v21  ;;  %v556_v47 = vld [vmem:[%s19723_s1 + $0x1050] sm:$0xff] }
 0x39a   :  { %10856 = vmatpush2.bf16.msra.mxu0 %v12864_v60  ;;  %v576_v60 = vld [vmem:[%s19723_s1 + $0x10f0] sm:$0xff] }
 0x39b   :  { %10907 = vmatprep.subr.bf16.mxu0 %v13113_v16  ;;  %v704_v16 = vld [vmem:[%s19723_s1 + $0x14f0] sm:$0xff]  ;;  %v13081_v15 = vcombine.high %v572_v7, %v576_v60 }
 0x39c   :  { %10897 = vmatpush2.bf16.msra.mxu1 %v12992_v0  ;;  %v700_v0 = vld [vmem:[%s19723_s1 + $0x14d0] sm:$0xff] }
 0x39d   :  { %10948 = vmatprep.subr.bf16.mxu1 %v13241_v35  ;;  %v10613_v58 = vpop.f32.mrf.mxu0  ;;  %10858 = vmatmul.mubr.bf16.vlgmr.msra.gmra.mxu0 %v14868_v48  ;;  %v13209_v53 = vcombine.high %v700_v0, %v704_v16  ;;  %v13208_v55 = vcombine.low %v700_v0, %v704_v16  ;;  %v560_v63 = vld [vmem:[%s19723_s1 + $0x1070] sm:$0xff] }
 0x39e   :  { %v17465_v39 = vadd.f32 %v10613_v58, %v10573_v36  ;;  %10908 = vmatpush1.bf16.msra.mxu0 %v13112_v3  ;;  %v584_v36 = vld [vmem:[%s19723_s1 + $0x1130] sm:$0xff]  ;;  %10939 = vmatprep.mubr.bf16.mxu0 %v14883_v56 }
 0x39f   :  { %10899 = vmatmul.mubr.bf16.vlgmr.msra.gmra.mxu1 %v14887_v57  ;;  %v10615_v1 = vpop.f32.mrf.mxu0  ;;  %10909 = vmatprep.subr.bf16.mxu0 %v13105_v49  ;;  %v13089_v54 = vcombine.high %v580_v52, %v584_v36  ;;  %v13088_v35 = vcombine.low %v580_v52, %v584_v36  ;;  %v568_v3 = vld [vmem:[%s19723_s1 + $0x10b0] sm:$0xff] }
 0x3a0   :  { %10949 = vmatpush1.bf16.msra.mxu1 %v13240_v50  ;;  %v17468_v61 = vadd.f32 %v10615_v1, %v10575_v38  ;;  %v712_v38 = vld [vmem:[%s19723_s1 + $0x1530] sm:$0xff]  ;;  %10980 = vmatprep.mubr.bf16.mxu1 %v14904_v4  ;;  %v13073_v37 = vcombine.high %v564_v29, %v568_v3 }
 0x3a1   :  { %10950 = vmatprep.subr.bf16.mxu1 %v13233_v43  ;;  %v10617_v9 = vpop.f32.mrf.mxu0  ;;  %v13217_v26 = vcombine.high %v708_v13, %v712_v38  ;;  %v13216_v34 = vcombine.low %v708_v13, %v712_v38  ;;  %v692_v50 = vld [vmem:[%s19723_s1 + $0x1490] sm:$0xff]  ;;  %v13080_v43 = vcombine.low %v572_v7, %v576_v60 }
 0x3a2   :  { %10910 = vmatpush1.bf16.msra.mxu0 %v13104_v51  ;;  %v696_v49 = vld [vmem:[%s19723_s1 + $0x14b0] sm:$0xff] }
 0x3a3   :  { %v10618_v21 = vpop.f32.mrf.mxu0  ;;  %10911 = vmatprep.subr.bf16.mxu0 %v13097_v20  ;;  %v13201_v58 = vcombine.high %v692_v50, %v696_v49  ;;  %v684_v51 = vld [vmem:[%s19723_s1 + $0x1450] sm:$0xff]  ;;  %v13200_v20 = vcombine.low %v692_v50, %v696_v49 }
 0x3a4   :  { %10951 = vmatpush1.bf16.msra.mxu1 %v13232_v2  ;;  %v688_v1 = vld [vmem:[%s19723_s1 + $0x1470] sm:$0xff]  ;;  %v13072_v2 = vcombine.low %v564_v29, %v568_v3 }
 0x3a5   :  { %10952 = vmatprep.subr.bf16.mxu1 %v13225_v8  ;;  %v13065_v8 = vcombine.high %v556_v47, %v560_v63  ;;  %v13193_v52 = vcombine.high %v684_v51, %v688_v1  ;;  %v548_v36 = vld [vmem:[%s19723_s1 + $0x1010] sm:$0xff]  ;;  %v13192_v21 = vcombine.low %v684_v51, %v688_v1 }
 0x3a6   :  { %10912 = vmatpush1.bf16.msra.mxu0 %v13096_v17  ;;  %v552_v9 = vld [vmem:[%s19723_s1 + $0x1030] sm:$0xff]  ;;  %v13064_v17 = vcombine.low %v556_v47, %v560_v63 }
 0x3a7   :  { %10913 = vmatprep.subr.bf16.mxu0 %v13089_v54  ;;  %v676_v13 = vld [vmem:[%s19723_s1 + $0x1410] sm:$0xff]  ;;  %v13056_v16 = vcombine.low %v548_v36, %v552_v9 }
 0x3a8   :  { %10953 = vmatpush1.bf16.msra.mxu1 %v13224_v62  ;;  %v680_v38 = vld [vmem:[%s19723_s1 + $0x1430] sm:$0xff]  ;;  %v13057_v62 = vcombine.high %v548_v36, %v552_v9 }
 0x3a9   :  { %10954 = vmatprep.subr.bf16.mxu1 %v13217_v26  ;;  %v13185_v54 = vcombine.high %v676_v13, %v680_v38  ;;  %v668_v26 = vld [vmem:[%s19723_s1 + $0x13d0] sm:$0xff] }
 0x3aa   :  { %10914 = vmatpush1.bf16.msra.mxu0 %v13088_v35  ;;  %v672_v7 = vld [vmem:[%s19723_s1 + $0x13f0] sm:$0xff]  ;;  %v13184_v35 = vcombine.low %v676_v13, %v680_v38 }
 0x3ab   :  { %10915 = vmatprep.subr.bf16.mxu0 %v13081_v15  ;;  %v796_v60 = vld [vmem:[%s19723_s1 + $0x17d0] sm:$0xff]  ;;  %v13176_v49 = vcombine.low %v668_v26, %v672_v7 }
 0x3ac   :  { %10955 = vmatpush1.bf16.msra.mxu1 %v13216_v34  ;;  %v800_v0 = vld [vmem:[%s19723_s1 + $0x17f0] sm:$0xff]  ;;  %v13177_v34 = vcombine.high %v668_v26, %v672_v7 }
 0x3ad   :  { %10956 = vmatprep.subr.bf16.mxu1 %v13209_v53  ;;  %v13305_v15 = vcombine.high %v796_v60, %v800_v0  ;;  %v660_v53 = vld [vmem:[%s19723_s1 + $0x1390] sm:$0xff] }
 0x3ae   :  { %10916 = vmatpush1.bf16.msra.mxu0 %v13080_v43  ;;  %v664_v29 = vld [vmem:[%s19723_s1 + $0x13b0] sm:$0xff]  ;;  %v13304_v43 = vcombine.low %v796_v60, %v800_v0 }
 0x3af   :  { %10917 = vmatprep.subr.bf16.mxu0 %v13073_v37  ;;  %v788_v3 = vld [vmem:[%s19723_s1 + $0x1790] sm:$0xff]  ;;  %v13168_v1 = vcombine.low %v660_v53, %v664_v29 }
 0x3b0   :  { %10957 = vmatpush1.bf16.msra.mxu1 %v13208_v55  ;;  %v792_v50 = vld [vmem:[%s19723_s1 + $0x17b0] sm:$0xff]  ;;  %v13169_v55 = vcombine.high %v660_v53, %v664_v29 }
 0x3b1   :  { %10958 = vmatprep.subr.bf16.mxu1 %v13201_v58  ;;  %v13297_v37 = vcombine.high %v788_v3, %v792_v50  ;;  %v652_v58 = vld [vmem:[%s19723_s1 + $0x1350] sm:$0xff] }
 0x3b2   :  { %10918 = vmatpush1.bf16.msra.mxu0 %v13072_v2  ;;  %v656_v47 = vld [vmem:[%s19723_s1 + $0x1370] sm:$0xff]  ;;  %v13296_v2 = vcombine.low %v788_v3, %v792_v50 }
 0x3b3   :  { %10919 = vmatprep.subr.bf16.mxu0 %v13065_v8  ;;  %v780_v63 = vld [vmem:[%s19723_s1 + $0x1750] sm:$0xff]  ;;  %v13160_v38 = vcombine.low %v652_v58, %v656_v47 }
 0x3b4   :  { %10959 = vmatpush1.bf16.msra.mxu1 %v13200_v20  ;;  %v784_v51 = vld [vmem:[%s19723_s1 + $0x1770] sm:$0xff]  ;;  %v13161_v20 = vcombine.high %v652_v58, %v656_v47 }
 0x3b5   :  { %10960 = vmatprep.subr.bf16.mxu1 %v13193_v52  ;;  %v13289_v8 = vcombine.high %v780_v63, %v784_v51  ;;  %v644_v52 = vld [vmem:[%s19723_s1 + $0x1310] sm:$0xff] }
 0x3b6   :  { %10920 = vmatpush1.bf16.msra.mxu0 %v13064_v17  ;;  %v648_v36 = vld [vmem:[%s19723_s1 + $0x1330] sm:$0xff]  ;;  %v13288_v17 = vcombine.low %v780_v63, %v784_v51 }
 0x3b7   :  { %10921 = vmatprep.subr.bf16.mxu0 %v13057_v62  ;;  %v772_v9 = vld [vmem:[%s19723_s1 + $0x1710] sm:$0xff]  ;;  %v13152_v0 = vcombine.low %v644_v52, %v648_v36 }
 0x3b8   :  { %10961 = vmatpush1.bf16.msra.mxu1 %v13192_v21  ;;  %v776_v13 = vld [vmem:[%s19723_s1 + $0x1730] sm:$0xff]  ;;  %v13153_v21 = vcombine.high %v644_v52, %v648_v36 }
 0x3b9   :  { %10962 = vmatprep.subr.bf16.mxu1 %v13185_v54  ;;  %v13281_v62 = vcombine.high %v772_v9, %v776_v13  ;;  %v636_v54 = vld [vmem:[%s19723_s1 + $0x12d0] sm:$0xff] }
 0x3ba   :  { %10922 = vmatpush1.bf16.msra.mxu0 %v13056_v16  ;;  %v640_v26 = vld [vmem:[%s19723_s1 + $0x12f0] sm:$0xff]  ;;  %v13280_v16 = vcombine.low %v772_v9, %v776_v13 }
 0x3bb   :  { %10923 = vmatprep.subr.bf16.mxu0 %v13177_v34  ;;  %v764_v7 = vld [vmem:[%s19723_s1 + $0x16d0] sm:$0xff]  ;;  %v13144_v50 = vcombine.low %v636_v54, %v640_v26 }
 0x3bc   :  { %10963 = vmatpush1.bf16.msra.mxu1 %v13184_v35  ;;  %v768_v60 = vld [vmem:[%s19723_s1 + $0x16f0] sm:$0xff]  ;;  %v13145_v35 = vcombine.high %v636_v54, %v640_v26 }
 0x3bd   :  { %10964 = vmatprep.subr.bf16.mxu1 %v13305_v15  ;;  %v13273_v34 = vcombine.high %v764_v7, %v768_v60  ;;  %v628_v15 = vld [vmem:[%s19723_s1 + $0x1290] sm:$0xff] }
 0x3be   :  { %10924 = vmatpush2.bf16.msra.mxu0 %v13176_v49  ;;  %v632_v53 = vld [vmem:[%s19723_s1 + $0x12b0] sm:$0xff]  ;;  %v13272_v49 = vcombine.low %v764_v7, %v768_v60 }
 0x3bf   :  { %10925 = vmatprep.subr.bf16.mxu0 %v13169_v55  ;;  %v756_v29 = vld [vmem:[%s19723_s1 + $0x1690] sm:$0xff] }
 0x3c0   :  { %10965 = vmatpush2.bf16.msra.mxu1 %v13304_v43  ;;  %v760_v3 = vld [vmem:[%s19723_s1 + $0x16b0] sm:$0xff]  ;;  %v13137_v43 = vcombine.high %v628_v15, %v632_v53 }
 0x3c1   :  { %10966 = vmatprep.subr.bf16.mxu1 %v13297_v37  ;;  %v13265_v55 = vcombine.high %v756_v29, %v760_v3  ;;  %v620_v37 = vld [vmem:[%s19723_s1 + $0x1250] sm:$0xff] }
 0x3c2   :  { %10926 = vmatpush2.bf16.msra.mxu0 %v13168_v1  ;;  %v624_v58 = vld [vmem:[%s19723_s1 + $0x1270] sm:$0xff]  ;;  %v13136_v1 = vcombine.low %v628_v15, %v632_v53 }
 0x3c3   :  { %10927 = vmatprep.subr.bf16.mxu0 %v13161_v20  ;;  %v748_v47 = vld [vmem:[%s19723_s1 + $0x1650] sm:$0xff]  ;;  %v13264_v20 = vcombine.low %v756_v29, %v760_v3 }
 0x3c4   :  { %10967 = vmatpush2.bf16.msra.mxu1 %v13296_v2  ;;  %v752_v63 = vld [vmem:[%s19723_s1 + $0x1670] sm:$0xff] }
 0x3c5   :  { %10968 = vmatprep.subr.bf16.mxu1 %v13289_v8  ;;  %v13129_v8 = vcombine.high %v620_v37, %v624_v58  ;;  %v13257_v36 = vcombine.high %v748_v47, %v752_v63  ;;  %v612_v9 = vld [vmem:[%s19723_s1 + $0x1210] sm:$0xff]  ;;  %v13256_v54 = vcombine.low %v748_v47, %v752_v63 }
 0x3c6   :  { %10928 = vmatpush2.bf16.msra.mxu0 %v13160_v38  ;;  %v616_v13 = vld [vmem:[%s19723_s1 + $0x1230] sm:$0xff] }
 0x3c7   :  { %10929 = vmatprep.subr.bf16.mxu0 %v13153_v21  ;;  %v13121_v26 = vcombine.high %v612_v9, %v616_v13  ;;  %v852_v3 = vld [vmem:[%s19723_s1 + $0x1990] sm:$0xff] }
 0x3c8   :  { %10969 = vmatpush2.bf16.msra.mxu1 %v13288_v17  ;;  %v744_v17 = vld [vmem:[%s19723_s1 + $0x1630] sm:$0xff] }
 0x3c9   :  { %10970 = vmatprep.subr.bf16.mxu1 %v13281_v62  ;;  %v13128_v62 = vcombine.low %v620_v37, %v624_v58  ;;  %v844_v63 = vld [vmem:[%s19723_s1 + $0x1950] sm:$0xff] }
 0x3ca   :  { %10930 = vmatpush2.bf16.msra.mxu0 %v13152_v0  ;;  %v864_v0 = vld [vmem:[%s19723_s1 + $0x19f0] sm:$0xff] }
 0x3cb   :  { %10931 = vmatprep.subr.bf16.mxu0 %v13145_v35  ;;  %v992_v35 = vld [vmem:[%s19723_s1 + $0x1df0] sm:$0xff] }
 0x3cc   :  { %10971 = vmatpush2.bf16.msra.mxu1 %v13280_v16  ;;  %v988_v16 = vld [vmem:[%s19723_s1 + $0x1dd0] sm:$0xff] }
 0x3cd   :  { %10972 = vmatprep.subr.bf16.mxu1 %v13273_v34  ;;  %v13120_v34 = vcombine.low %v612_v9, %v616_v13  ;;  %v13497_v29 = vcombine.high %v988_v16, %v992_v35  ;;  %v13496_v37 = vcombine.low %v988_v16, %v992_v35 }
 0x3ce   :  { %10932 = vmatpush2.bf16.msra.mxu0 %v13144_v50  ;;  %v856_v50 = vld [vmem:[%s19723_s1 + $0x19b0] sm:$0xff] }
 0x3cf   :  { %v10654_v51 = vpop.f32.mrf.mxu1  ;;  %10933 = vmatprep.subr.bf16.mxu0 %v13137_v43  ;;  %v984_v43 = vld [vmem:[%s19723_s1 + $0x1db0] sm:$0xff]  ;;  %v13361_v58 = vcombine.high %v852_v3, %v856_v50  ;;  %v13360_v9 = vcombine.low %v852_v3, %v856_v50 }
 0x3d0   :  { %v10655_v2 = vadd.f32 %v10654_v51, %v17465_v39  ;;  %10973 = vmatpush2.bf16.msra.mxu1 %v13272_v49  ;;  %v740_v39 = vld [vmem:[%s19723_s1 + $0x1610] sm:$0xff] }
 0x3d1   :  { %v10656_v52 = vpop.f32.mrf.mxu1  ;;  %10974 = vmatprep.subr.bf16.mxu1 %v13265_v55  ;;  %v13249_v60 = vcombine.high %v740_v39, %v744_v17  ;;  %v13248_v15 = vcombine.low %v740_v39, %v744_v17  ;;  %v980_v49 = vld [vmem:[%s19723_s1 + $0x1d90] sm:$0xff] }
 0x3d2   :  { %v10657_v38 = vadd.f32 %v10656_v52, %v17468_v61  ;;  %10934 = vmatpush2.bf16.msra.mxu0 %v13136_v1  ;;  %v860_v61 = vld [vmem:[%s19723_s1 + $0x19d0] sm:$0xff]  ;;  %v13489_v47 = vcombine.high %v980_v49, %v984_v43  ;;  %v13488_v39 = vcombine.low %v980_v49, %v984_v43 }
 0x3d3   :  { %v10658_v21 = vpop.f32.mrf.mxu1  ;;  %10935 = vmatprep.subr.bf16.mxu0 %v13129_v8  ;;  %v13369_v53 = vcombine.high %v860_v61, %v864_v0  ;;  %v13368_v55 = vcombine.low %v860_v61, %v864_v0  ;;  %v848_v51 = vld [vmem:[%s19723_s1 + $0x1970] sm:$0xff] }
 0x3d4   :  { %10975 = vmatpush2.bf16.msra.mxu1 %v13264_v20  ;;  %v972_v20 = vld [vmem:[%s19723_s1 + $0x1d50] sm:$0xff]  ;;  %v13353_v17 = vcombine.high %v844_v63, %v848_v51  ;;  %v13352_v35 = vcombine.low %v844_v63, %v848_v51 }
 0x3d5   :  { %v10659_v7 = vpop.f32.mrf.mxu1  ;;  %10976 = vmatprep.subr.bf16.mxu1 %v13257_v36  ;;  %v976_v8 = vld [vmem:[%s19723_s1 + $0x1d70] sm:$0xff] }
 0x3d6   :  { %10936 = vmatpush2.bf16.msra.mxu0 %v13128_v62  ;;  %v840_v7 = vld [vmem:[%s19723_s1 + $0x1930] sm:$0xff] }
 0x3d7   :  { %10937 = vmatprep.subr.bf16.mxu0 %v13121_v26  ;;  %v13481_v26 = vcombine.high %v972_v20, %v976_v8  ;;  %v964_v61 = vld [vmem:[%s19723_s1 + $0x1d10] sm:$0xff] }
 0x3d8   :  { %10977 = vmatpush2.bf16.msra.mxu1 %v13256_v54  ;;  %v828_v50 = vld [vmem:[%s19723_s1 + $0x18d0] sm:$0xff] }
 0x3d9   :  { %10978 = vmatprep.subr.bf16.mxu1 %v13249_v60  ;;  %v832_v49 = vld [vmem:[%s19723_s1 + $0x18f0] sm:$0xff] }
 0x3da   :  { %10938 = vmatpush2.bf16.msra.mxu0 %v13120_v34  ;;  %v956_v43 = vld [vmem:[%s19723_s1 + $0x1cd0] sm:$0xff] }
 0x3db   :  { %10989 = vmatprep.subr.bf16.mxu0 %v13369_v53  ;;  %v820_v51 = vld [vmem:[%s19723_s1 + $0x1890] sm:$0xff] }
 0x3dc   :  { %10979 = vmatpush2.bf16.msra.mxu1 %v13248_v15  ;;  %v13480_v15 = vcombine.low %v972_v20, %v976_v8  ;;  %v948_v20 = vld [vmem:[%s19723_s1 + $0x1c90] sm:$0xff] }
 0x3dd   :  { %11030 = vmatprep.subr.bf16.mxu1 %v13497_v29  ;;  %v10695_v1 = vpop.f32.mrf.mxu0  ;;  %10940 = vmatmul.mubr.bf16.vlgmr.msra.gmra.mxu0 %v15086_v22  ;;  %v952_v8 = vld [vmem:[%s19723_s1 + $0x1cb0] sm:$0xff] }
 0x3de   :  { %v10696_v52 = vadd.f32 %v10695_v1, %v10655_v2  ;;  %10990 = vmatpush1.bf16.msra.mxu0 %v13368_v55  ;;  %v836_v2 = vld [vmem:[%s19723_s1 + $0x1910] sm:$0xff]  ;;  %11021 = vmatprep.mubr.bf16.mxu0 %v15101_v32 }
 0x3df   :  { %v10736_v36 = vpop.f32.mrf.mxu1  ;;  %10981 = vmatmul.mubr.bf16.vlgmr.msra.gmra.mxu1 %v15105_v33  ;;  %v10697_v13 = vpop.f32.mrf.mxu0  ;;  %10991 = vmatprep.subr.bf16.mxu0 %v13361_v58  ;;  %v13345_v53 = vcombine.high %v836_v2, %v840_v7  ;;  %v960_v55 = vld [vmem:[%s19723_s1 + $0x1cf0] sm:$0xff] }
 0x3e0   :  { %11031 = vmatpush1.bf16.msra.mxu1 %v13496_v37  ;;  %v17668_v21 = vadd.f32 %v10736_v36, %v10696_v52  ;;  %v10698_v62 = vadd.f32 %v10697_v13, %v10657_v38  ;;  %v968_v38 = vld [vmem:[%s19723_s1 + $0x1d30] sm:$0xff]  ;;  %11062 = vmatprep.mubr.bf16.mxu1 %v15122_v45  ;;  %v13344_v37 = vcombine.low %v836_v2, %v840_v7 }
 0x3e1   :  { %v10738_v54 = vpop.f32.mrf.mxu1  ;;  %11032 = vmatprep.subr.bf16.mxu1 %v13489_v47  ;;  %v10699_v60 = vpop.f32.mrf.mxu0  ;;  %v13473_v3 = vcombine.high %v964_v61, %v968_v38  ;;  %v13472_v58 = vcombine.low %v964_v61, %v968_v38  ;;  %v13337_v47 = vcombine.high %v828_v50, %v832_v49  ;;  %v13465_v63 = vcombine.high %v956_v43, %v960_v55  ;;  %v824_v1 = vld [vmem:[%s19723_s1 + $0x18b0] sm:$0xff] }
 0x3e2   :  { %v17684_v0 = vadd.f32 %v10738_v54, %v10698_v62  ;;  %10992 = vmatpush1.bf16.msra.mxu0 %v13360_v9  ;;  %v13336_v52 = vcombine.low %v828_v50, %v832_v49  ;;  %v13464_v36 = vcombine.low %v956_v43, %v960_v55  ;;  %v13329_v9 = vcombine.high %v820_v51, %v824_v1  ;;  %v940_v62 = vld [vmem:[%s19723_s1 + $0x1c50] sm:$0xff] }
 0x3e3   :  { %v10740_v16 = vpop.f32.mrf.mxu1  ;;  %v10700_v34 = vpop.f32.mrf.mxu0  ;;  %10993 = vmatprep.subr.bf16.mxu0 %v13353_v17  ;;  %v13457_v13 = vcombine.high %v948_v20, %v952_v8  ;;  %v816_v17 = vld [vmem:[%s19723_s1 + $0x1870] sm:$0xff]  ;;  %v13456_v2 = vcombine.low %v948_v20, %v952_v8 }
 0x3e4   :  { %11033 = vmatpush1.bf16.msra.mxu1 %v13488_v39  ;;  %v812_v39 = vld [vmem:[%s19723_s1 + $0x1850] sm:$0xff] }
 0x3e5   :  { %v10741_v29 = vpop.f32.mrf.mxu1  ;;  %11034 = vmatprep.subr.bf16.mxu1 %v13481_v26  ;;  %v944_v54 = vld [vmem:[%s19723_s1 + $0x1c70] sm:$0xff]  ;;  %v13328_v26 = vcombine.low %v820_v51, %v824_v1  ;;  %v13321_v7 = vcombine.high %v812_v39, %v816_v17  ;;  %v13320_v34 = vcombine.low %v812_v39, %v816_v17 }
 0x3e6   :  { %10994 = vmatpush1.bf16.msra.mxu0 %v13352_v35  ;;  %v13449_v60 = vcombine.high %v940_v62, %v944_v54  ;;  %v804_v61 = vld [vmem:[%s19723_s1 + $0x1810] sm:$0xff] }
 0x3e7   :  { %10995 = vmatprep.subr.bf16.mxu0 %v13345_v53  ;;  %v808_v38 = vld [vmem:[%s19723_s1 + $0x1830] sm:$0xff] }
 0x3e8   :  { %11035 = vmatpush1.bf16.msra.mxu1 %v13480_v15  ;;  %v932_v16 = vld [vmem:[%s19723_s1 + $0x1c10] sm:$0xff]  ;;  %v13448_v15 = vcombine.low %v940_v62, %v944_v54  ;;  %v13313_v53 = vcombine.high %v804_v61, %v808_v38  ;;  %v13312_v55 = vcombine.low %v804_v61, %v808_v38 }
 0x3e9   :  { %11036 = vmatprep.subr.bf16.mxu1 %v13473_v3  ;;  %v936_v35 = vld [vmem:[%s19723_s1 + $0x1c30] sm:$0xff] }
 0x3ea   :  { %10996 = vmatpush1.bf16.msra.mxu0 %v13344_v37  ;;  %v13441_v29 = vcombine.high %v932_v16, %v936_v35  ;;  %v924_v3 = vld [vmem:[%s19723_s1 + $0x1bd0] sm:$0xff]  ;;  %v13440_v37 = vcombine.low %v932_v16, %v936_v35 }
 0x3eb   :  { %10997 = vmatprep.subr.bf16.mxu0 %v13337_v47  ;;  %v928_v50 = vld [vmem:[%s19723_s1 + $0x1bf0] sm:$0xff] }
 0x3ec   :  { %11037 = vmatpush1.bf16.msra.mxu1 %v13472_v58  ;;  %v1052_v49 = vld [vmem:[%s19723_s1 + $0x1fd0] sm:$0xff]  ;;  %v13433_v58 = vcombine.high %v924_v3, %v928_v50  ;;  %v13432_v8 = vcombine.low %v924_v3, %v928_v50 }
 0x3ed   :  { %11038 = vmatprep.subr.bf16.mxu1 %v13465_v63  ;;  %v1056_v43 = vld [vmem:[%s19723_s1 + $0x1ff0] sm:$0xff] }
 0x3ee   :  { %10998 = vmatpush1.bf16.msra.mxu0 %v13336_v52  ;;  %v13561_v47 = vcombine.high %v1052_v49, %v1056_v43  ;;  %v916_v63 = vld [vmem:[%s19723_s1 + $0x1b90] sm:$0xff]  ;;  %v13560_v52 = vcombine.low %v1052_v49, %v1056_v43 }
 0x3ef   :  { %10999 = vmatprep.subr.bf16.mxu0 %v13329_v9  ;;  %v920_v51 = vld [vmem:[%s19723_s1 + $0x1bb0] sm:$0xff] }
 0x3f0   :  { %11039 = vmatpush1.bf16.msra.mxu1 %v13464_v36  ;;  %v1044_v1 = vld [vmem:[%s19723_s1 + $0x1f90] sm:$0xff]  ;;  %v13425_v36 = vcombine.high %v916_v63, %v920_v51  ;;  %v13424_v54 = vcombine.low %v916_v63, %v920_v51 }
 0x3f1   :  { %11040 = vmatprep.subr.bf16.mxu1 %v13457_v13  ;;  %v1048_v20 = vld [vmem:[%s19723_s1 + $0x1fb0] sm:$0xff] }
 0x3f2   :  { %11000 = vmatpush1.bf16.msra.mxu0 %v13328_v26  ;;  %v13553_v9 = vcombine.high %v1044_v1, %v1048_v20  ;;  %v908_v13 = vld [vmem:[%s19723_s1 + $0x1b50] sm:$0xff]  ;;  %v13552_v26 = vcombine.low %v1044_v1, %v1048_v20 }
 0x3f3   :  { %11001 = vmatprep.subr.bf16.mxu0 %v13321_v7  ;;  %v912_v39 = vld [vmem:[%s19723_s1 + $0x1b70] sm:$0xff] }
 0x3f4   :  { %11041 = vmatpush1.bf16.msra.mxu1 %v13456_v2  ;;  %v1036_v17 = vld [vmem:[%s19723_s1 + $0x1f50] sm:$0xff]  ;;  %v13417_v2 = vcombine.high %v908_v13, %v912_v39  ;;  %v13416_v35 = vcombine.low %v908_v13, %v912_v39 }
 0x3f5   :  { %11042 = vmatprep.subr.bf16.mxu1 %v13449_v60  ;;  %v1040_v62 = vld [vmem:[%s19723_s1 + $0x1f70] sm:$0xff] }
 0x3f6   :  { %11002 = vmatpush1.bf16.msra.mxu0 %v13320_v34  ;;  %v13545_v7 = vcombine.high %v1036_v17, %v1040_v62  ;;  %v900_v60 = vld [vmem:[%s19723_s1 + $0x1b10] sm:$0xff]  ;;  %v13544_v34 = vcombine.low %v1036_v17, %v1040_v62 }
 0x3f7   :  { %11003 = vmatprep.subr.bf16.mxu0 %v13313_v53  ;;  %v904_v61 = vld [vmem:[%s19723_s1 + $0x1b30] sm:$0xff] }
 0x3f8   :  { %11043 = vmatpush1.bf16.msra.mxu1 %v13448_v15  ;;  %v1028_v38 = vld [vmem:[%s19723_s1 + $0x1f10] sm:$0xff]  ;;  %v13409_v15 = vcombine.high %v900_v60, %v904_v61  ;;  %v13408_v43 = vcombine.low %v900_v60, %v904_v61 }
 0x3f9   :  { %11044 = vmatprep.subr.bf16.mxu1 %v13441_v29  ;;  %v1032_v16 = vld [vmem:[%s19723_s1 + $0x1f30] sm:$0xff] }
 0x3fa   :  { %11004 = vmatpush1.bf16.msra.mxu0 %v13312_v55  ;;  %v13537_v53 = vcombine.high %v1028_v38, %v1032_v16  ;;  %v892_v29 = vld [vmem:[%s19723_s1 + $0x1ad0] sm:$0xff]  ;;  %v13536_v55 = vcombine.low %v1028_v38, %v1032_v16 }
 0x3fb   :  { %11005 = vmatprep.subr.bf16.mxu0 %v13433_v58  ;;  %v896_v3 = vld [vmem:[%s19723_s1 + $0x1af0] sm:$0xff] }
 0x3fc   :  { %11045 = vmatpush1.bf16.msra.mxu1 %v13440_v37  ;;  %v1020_v50 = vld [vmem:[%s19723_s1 + $0x1ed0] sm:$0xff]  ;;  %v13401_v37 = vcombine.high %v892_v29, %v896_v3  ;;  %v13400_v20 = vcombine.low %v892_v29, %v896_v3 }
 0x3fd   :  { %11046 = vmatprep.subr.bf16.mxu1 %v13561_v47  ;;  %v1024_v49 = vld [vmem:[%s19723_s1 + $0x1ef0] sm:$0xff] }
 0x3fe   :  { %11006 = vmatpush2.bf16.msra.mxu0 %v13432_v8  ;;  %v13529_v58 = vcombine.high %v1020_v50, %v1024_v49  ;;  %v884_v47 = vld [vmem:[%s19723_s1 + $0x1a90] sm:$0xff]  ;;  %v13528_v8 = vcombine.low %v1020_v50, %v1024_v49 }
 0x3ff   :  { %11007 = vmatprep.subr.bf16.mxu0 %v13425_v36  ;;  %v888_v63 = vld [vmem:[%s19723_s1 + $0x1ab0] sm:$0xff] }
 0x400   :  { %11047 = vmatpush2.bf16.msra.mxu1 %v13560_v52  ;;  %v1012_v51 = vld [vmem:[%s19723_s1 + $0x1e90] sm:$0xff]  ;;  %v13393_v52 = vcombine.high %v884_v47, %v888_v63  ;;  %v13392_v62 = vcombine.low %v884_v47, %v888_v63  ;;  %v1626_v47 = vsub.s32 5, %v14474_v44 }
 0x401   :  { %11048 = vmatprep.subr.bf16.mxu1 %v13553_v9  ;;  %v1016_v1 = vld [vmem:[%s19723_s1 + $0x1eb0] sm:$0xff] }
 0x402   :  { %11008 = vmatpush2.bf16.msra.mxu0 %v13424_v54  ;;  %v13521_v36 = vcombine.high %v1012_v51, %v1016_v1  ;;  %v876_v9 = vld [vmem:[%s19723_s1 + $0x1a50] sm:$0xff]  ;;  %v13520_v54 = vcombine.low %v1012_v51, %v1016_v1 }
 0x403   :  { %11009 = vmatprep.subr.bf16.mxu0 %v13417_v2  ;;  %v880_v13 = vld [vmem:[%s19723_s1 + $0x1a70] sm:$0xff] }
 0x404   :  { %11049 = vmatpush2.bf16.msra.mxu1 %v13552_v26  ;;  %v1004_v39 = vld [vmem:[%s19723_s1 + $0x1e50] sm:$0xff]  ;;  %v13385_v26 = vcombine.high %v876_v9, %v880_v13  ;;  %v13384_v16 = vcombine.low %v876_v9, %v880_v13 }
 0x405   :  { %11050 = vmatprep.subr.bf16.mxu1 %v13545_v7  ;;  %v1008_v17 = vld [vmem:[%s19723_s1 + $0x1e70] sm:$0xff] }
 0x406   :  { %11010 = vmatpush2.bf16.msra.mxu0 %v13416_v35  ;;  %v13513_v2 = vcombine.high %v1004_v39, %v1008_v17  ;;  %v868_v7 = vld [vmem:[%s19723_s1 + $0x1a10] sm:$0xff]  ;;  %v13512_v35 = vcombine.low %v1004_v39, %v1008_v17 }
 0x407   :  { %11011 = vmatprep.subr.bf16.mxu0 %v13409_v15  ;;  %v872_v60 = vld [vmem:[%s19723_s1 + $0x1a30] sm:$0xff] }
 0x408   :  { %11051 = vmatpush2.bf16.msra.mxu1 %v13544_v34  ;;  %v996_v61 = vld [vmem:[%s19723_s1 + $0x1e10] sm:$0xff]  ;;  %v13377_v34 = vcombine.high %v868_v7, %v872_v60  ;;  %v13376_v49 = vcombine.low %v868_v7, %v872_v60 }
 0x409   :  { %11052 = vmatprep.subr.bf16.mxu1 %v13537_v53  ;;  %v1000_v38 = vld [vmem:[%s19723_s1 + $0x1e30] sm:$0xff] }
 0x40a   :  { %11012 = vmatpush2.bf16.msra.mxu0 %v13408_v43  ;;  %v13505_v15 = vcombine.high %v996_v61, %v1000_v38  ;;  %v1116_v53 = vld [vmem:[%s19723_s1 + $0x21d0] sm:$0xff]  ;;  %v1622_v43 = vsub.s32 4, %v14474_v44 }
 0x40b   :  { %11013 = vmatprep.subr.bf16.mxu0 %v13401_v37  ;;  %v1120_v29 = vld [vmem:[%s19723_s1 + $0x21f0] sm:$0xff] }
 0x40c   :  { %11053 = vmatpush2.bf16.msra.mxu1 %v13536_v55  ;;  %v1244_v3 = vld [vmem:[%s19723_s1 + $0x25d0] sm:$0xff]  ;;  %v13504_v55 = vcombine.low %v996_v61, %v1000_v38  ;;  %v13625_v37 = vcombine.high %v1116_v53, %v1120_v29 }
 0x40d   :  { %11054 = vmatprep.subr.bf16.mxu1 %v13529_v58  ;;  %v1248_v50 = vld [vmem:[%s19723_s1 + $0x25f0] sm:$0xff] }
 0x40e   :  { %11014 = vmatpush2.bf16.msra.mxu0 %v13400_v20  ;;  %v13753_v58 = vcombine.high %v1244_v3, %v1248_v50  ;;  %v1108_v63 = vld [vmem:[%s19723_s1 + $0x2190] sm:$0xff]  ;;  %v13752_v9 = vcombine.low %v1244_v3, %v1248_v50 }
 0x40f   :  { %11015 = vmatprep.subr.bf16.mxu0 %v13393_v52  ;;  %v1112_v51 = vld [vmem:[%s19723_s1 + $0x21b0] sm:$0xff] }
 0x410   :  { %11055 = vmatpush2.bf16.msra.mxu1 %v13528_v8  ;;  %v1236_v1 = vld [vmem:[%s19723_s1 + $0x2590] sm:$0xff]  ;;  %v14338_v8 = vld [vmem:[%s19724_s2] sm:$0xff]  ;;  %v13617_v13 = vcombine.high %v1108_v63, %v1112_v51  ;;  %v13616_v38 = vcombine.low %v1108_v63, %v1112_v51 }
 0x411   :  { %11056 = vmatprep.subr.bf16.mxu1 %v13521_v36  ;;  %v1240_v20 = vld [vmem:[%s19723_s1 + $0x25b0] sm:$0xff]  ;;  %v1623_v52 = vrot.slane %v14338_v8, %v1622_v43  ;;  %v13624_v36 = vcombine.low %v1116_v53, %v1120_v29  ;;  %v1627_v39 = vrot.slane %v14338_v8, %v1626_v47 }
 0x412   :  { %11016 = vmatpush2.bf16.msra.mxu0 %v13392_v62  ;;  %v13745_v17 = vcombine.high %v1236_v1, %v1240_v20  ;;  %v1100_v62 = vld [vmem:[%s19723_s1 + $0x2150] sm:$0xff] }
 0x413   :  { %11017 = vmatprep.subr.bf16.mxu0 %v13385_v26  ;;  %v1232_v7 = vld [vmem:[%s19723_s1 + $0x2570] sm:$0xff] }
 0x414   :  { %11057 = vmatpush2.bf16.msra.mxu1 %v13520_v54  ;;  %v1104_v54 = vld [vmem:[%s19723_s1 + $0x2170] sm:$0xff] }
 0x415   :  { %11058 = vmatprep.subr.bf16.mxu1 %v13513_v2  ;;  %v1228_v2 = vld [vmem:[%s19723_s1 + $0x2550] sm:$0xff]  ;;  %v13608_v63 = vcombine.low %v1100_v62, %v1104_v54 }
 0x416   :  { %11018 = vmatpush2.bf16.msra.mxu0 %v13384_v16  ;;  %v13737_v3 = vcombine.high %v1228_v2, %v1232_v7  ;;  %v1092_v50 = vld [vmem:[%s19723_s1 + $0x2110] sm:$0xff] }
 0x417   :  { %11019 = vmatprep.subr.bf16.mxu0 %v13377_v34  ;;  %v13609_v34 = vcombine.high %v1100_v62, %v1104_v54 }
 0x418   :  { %11059 = vmatpush2.bf16.msra.mxu1 %v13512_v35  ;;  %v13744_v35 = vcombine.low %v1236_v1, %v1240_v20  ;;  %v13736_v1 = vcombine.low %v1228_v2, %v1232_v7  ;;  %v1076_v2 = vld [vmem:[%s19723_s1 + $0x2090] sm:$0xff] }
 0x419   :  { %11060 = vmatprep.subr.bf16.mxu1 %v13505_v15  ;;  %v1080_v7 = vld [vmem:[%s19723_s1 + $0x20b0] sm:$0xff] }
 0x41a   :  { %11020 = vmatpush2.bf16.msra.mxu0 %v13376_v49  ;;  %v1096_v49 = vld [vmem:[%s19723_s1 + $0x2130] sm:$0xff] }
 0x41b   :  { %11071 = vmatprep.subr.bf16.mxu0 %v13625_v37  ;;  %v1224_v37 = vld [vmem:[%s19723_s1 + $0x2530] sm:$0xff]  ;;  %v13601_v20 = vcombine.high %v1092_v50, %v1096_v49 }
 0x41c   :  { %11061 = vmatpush2.bf16.msra.mxu1 %v13504_v55  ;;  %v1220_v55 = vld [vmem:[%s19723_s1 + $0x2510] sm:$0xff] }
 0x41d   :  { %11112 = vmatprep.subr.bf16.mxu1 %v13753_v58  ;;  %v10777_v26 = vpop.f32.mrf.mxu0  ;;  %11022 = vmatmul.mubr.bf16.vlgmr.msra.gmra.mxu0 %v15309_v12  ;;  %v13728_v62 = vcombine.low %v1220_v55, %v1224_v37 }
 0x41e   :  { %v10778_v60 = vadd.f32 %v10777_v26, %v1623_v52  ;;  %11072 = vmatpush1.bf16.msra.mxu0 %v13624_v36  ;;  %11103 = vmatprep.mubr.bf16.mxu0 %v15328_v24  ;;  %v13729_v52 = vcombine.high %v1220_v55, %v1224_v37  ;;  %v1084_v36 = vld [vmem:[%s19723_s1 + $0x20d0] sm:$0xff] }
 0x41f   :  { %v10818_v61 = vpop.f32.mrf.mxu1  ;;  %11063 = vmatmul.mubr.bf16.vlgmr.msra.gmra.mxu1 %v15332_v27  ;;  %v10779_v16 = vpop.f32.mrf.mxu0  ;;  %11073 = vmatprep.subr.bf16.mxu0 %v13617_v13  ;;  %v1212_v13 = vld [vmem:[%s19723_s1 + $0x24d0] sm:$0xff] }
 0x420   :  { %11113 = vmatpush1.bf16.msra.mxu1 %v13752_v9  ;;  %v17873_v15 = vadd.f32 %v10818_v61, %v10778_v60  ;;  %v10780_v53 = vadd.f32 %v10779_v16, %v1627_v39  ;;  %11144 = vmatprep.mubr.bf16.mxu1 %v15349_v42  ;;  %v1088_v9 = vld [vmem:[%s19723_s1 + $0x20f0] sm:$0xff] }
 0x421   :  { %v10820_v29 = vpop.f32.mrf.mxu1  ;;  %11114 = vmatprep.subr.bf16.mxu1 %v13745_v17  ;;  %v10781_v43 = vpop.f32.mrf.mxu0  ;;  %v1216_v39 = vld [vmem:[%s19723_s1 + $0x24f0] sm:$0xff]  ;;  %v13600_v17 = vcombine.low %v1092_v50, %v1096_v49  ;;  %v13593_v54 = vcombine.high %v1084_v36, %v1088_v9  ;;  %v13584_v49 = vcombine.low %v1076_v2, %v1080_v7 }
 0x422   :  { %v17889_v58 = vadd.f32 %v10820_v29, %v10780_v53  ;;  %11074 = vmatpush1.bf16.msra.mxu0 %v13616_v38  ;;  %v13721_v26 = vcombine.high %v1212_v13, %v1216_v39  ;;  %v1204_v60 = vld [vmem:[%s19723_s1 + $0x2490] sm:$0xff]  ;;  %v13592_v38 = vcombine.low %v1084_v36, %v1088_v9  ;;  %v13720_v16 = vcombine.low %v1212_v13, %v1216_v39 }
 0x423   :  { %v10822_v47 = vpop.f32.mrf.mxu1  ;;  %v10782_v51 = vpop.f32.mrf.mxu0  ;;  %11075 = vmatprep.subr.bf16.mxu0 %v13609_v34  ;;  %v1208_v61 = vld [vmem:[%s19723_s1 + $0x24b0] sm:$0xff] }
 0x424   :  { %11115 = vmatpush1.bf16.msra.mxu1 %v13744_v35  ;;  %v13585_v35 = vcombine.high %v1076_v2, %v1080_v7  ;;  %v13713_v34 = vcombine.high %v1204_v60, %v1208_v61  ;;  %v1068_v53 = vld [vmem:[%s19723_s1 + $0x2050] sm:$0xff]  ;;  %v13712_v43 = vcombine.low %v1204_v60, %v1208_v61 }
 0x425   :  { %v10823_v8 = vpop.f32.mrf.mxu1  ;;  %11116 = vmatprep.subr.bf16.mxu1 %v13737_v3  ;;  %v1072_v29 = vld [vmem:[%s19723_s1 + $0x2070] sm:$0xff] }
 0x426   :  { %11076 = vmatpush1.bf16.msra.mxu0 %v13608_v63  ;;  %v1196_v3 = vld [vmem:[%s19723_s1 + $0x2450] sm:$0xff]  ;;  %v13577_v55 = vcombine.high %v1068_v53, %v1072_v29 }
 0x427   :  { %11077 = vmatprep.subr.bf16.mxu0 %v13601_v20  ;;  %v1200_v50 = vld [vmem:[%s19723_s1 + $0x2470] sm:$0xff]  ;;  %v13576_v20 = vcombine.low %v1068_v53, %v1072_v29 }
 0x428   :  { %11117 = vmatpush1.bf16.msra.mxu1 %v13736_v1  ;;  %v13705_v37 = vcombine.high %v1196_v3, %v1200_v50  ;;  %v1060_v47 = vld [vmem:[%s19723_s1 + $0x2010] sm:$0xff]  ;;  %v13704_v8 = vcombine.low %v1196_v3, %v1200_v50 }
 0x429   :  { %11118 = vmatprep.subr.bf16.mxu1 %v13729_v52  ;;  %v1064_v63 = vld [vmem:[%s19723_s1 + $0x2030] sm:$0xff] }
 0x42a   :  { %11078 = vmatpush1.bf16.msra.mxu0 %v13600_v17  ;;  %v1188_v51 = vld [vmem:[%s19723_s1 + $0x2410] sm:$0xff]  ;;  %v13569_v52 = vcombine.high %v1060_v47, %v1064_v63 }
 0x42b   :  { %11079 = vmatprep.subr.bf16.mxu0 %v13593_v54  ;;  %v1192_v1 = vld [vmem:[%s19723_s1 + $0x2430] sm:$0xff] }
 0x42c   :  { %11119 = vmatpush1.bf16.msra.mxu1 %v13728_v62  ;;  %v13697_v36 = vcombine.high %v1188_v51, %v1192_v1  ;;  %v1180_v9 = vld [vmem:[%s19723_s1 + $0x23d0] sm:$0xff]  ;;  %v13568_v62 = vcombine.low %v1060_v47, %v1064_v63  ;;  %v13696_v54 = vcombine.low %v1188_v51, %v1192_v1 }
 0x42d   :  { %11120 = vmatprep.subr.bf16.mxu1 %v13721_v26  ;;  %v1184_v13 = vld [vmem:[%s19723_s1 + $0x23f0] sm:$0xff] }
 0x42e   :  { %11080 = vmatpush1.bf16.msra.mxu0 %v13592_v38  ;;  %v1308_v39 = vld [vmem:[%s19723_s1 + $0x27d0] sm:$0xff]  ;;  %v13689_v26 = vcombine.high %v1180_v9, %v1184_v13 }
 0x42f   :  { %11081 = vmatprep.subr.bf16.mxu0 %v13585_v35  ;;  %v1312_v17 = vld [vmem:[%s19723_s1 + $0x27f0] sm:$0xff] }
 0x430   :  { %11121 = vmatpush1.bf16.msra.mxu1 %v13720_v16  ;;  %v13817_v2 = vcombine.high %v1308_v39, %v1312_v17  ;;  %v1172_v7 = vld [vmem:[%s19723_s1 + $0x2390] sm:$0xff]  ;;  %v13688_v16 = vcombine.low %v1180_v9, %v1184_v13  ;;  %v13816_v35 = vcombine.low %v1308_v39, %v1312_v17 }
 0x431   :  { %11122 = vmatprep.subr.bf16.mxu1 %v13713_v34  ;;  %v1176_v60 = vld [vmem:[%s19723_s1 + $0x23b0] sm:$0xff] }
 0x432   :  { %11082 = vmatpush1.bf16.msra.mxu0 %v13584_v49  ;;  %v1300_v61 = vld [vmem:[%s19723_s1 + $0x2790] sm:$0xff]  ;;  %v13681_v34 = vcombine.high %v1172_v7, %v1176_v60 }
 0x433   :  { %11083 = vmatprep.subr.bf16.mxu0 %v13577_v55  ;;  %v1304_v38 = vld [vmem:[%s19723_s1 + $0x27b0] sm:$0xff] }
 0x434   :  { %11123 = vmatpush1.bf16.msra.mxu1 %v13712_v43  ;;  %v13809_v53 = vcombine.high %v1300_v61, %v1304_v38  ;;  %v1164_v29 = vld [vmem:[%s19723_s1 + $0x2350] sm:$0xff]  ;;  %v13680_v43 = vcombine.low %v1172_v7, %v1176_v60  ;;  %v13808_v55 = vcombine.low %v1300_v61, %v1304_v38 }
 0x435   :  { %11124 = vmatprep.subr.bf16.mxu1 %v13705_v37  ;;  %v1168_v3 = vld [vmem:[%s19723_s1 + $0x2370] sm:$0xff] }
 0x436   :  { %11084 = vmatpush1.bf16.msra.mxu0 %v13576_v20  ;;  %v1292_v50 = vld [vmem:[%s19723_s1 + $0x2750] sm:$0xff]  ;;  %v13673_v37 = vcombine.high %v1164_v29, %v1168_v3 }
 0x437   :  { %11085 = vmatprep.subr.bf16.mxu0 %v13569_v52  ;;  %v1296_v49 = vld [vmem:[%s19723_s1 + $0x2770] sm:$0xff] }
 0x438   :  { %11125 = vmatpush1.bf16.msra.mxu1 %v13704_v8  ;;  %v13801_v47 = vcombine.high %v1292_v50, %v1296_v49  ;;  %v1156_v63 = vld [vmem:[%s19723_s1 + $0x2310] sm:$0xff]  ;;  %v13672_v8 = vcombine.low %v1164_v29, %v1168_v3  ;;  %v13800_v52 = vcombine.low %v1292_v50, %v1296_v49 }
 0x439   :  { %11126 = vmatprep.subr.bf16.mxu1 %v13697_v36  ;;  %v1160_v51 = vld [vmem:[%s19723_s1 + $0x2330] sm:$0xff] }
 0x43a   :  { %11086 = vmatpush1.bf16.msra.mxu0 %v13568_v62  ;;  %v1284_v1 = vld [vmem:[%s19723_s1 + $0x2710] sm:$0xff]  ;;  %v13665_v36 = vcombine.high %v1156_v63, %v1160_v51 }
 0x43b   :  { %11087 = vmatprep.subr.bf16.mxu0 %v13689_v26  ;;  %v1288_v20 = vld [vmem:[%s19723_s1 + $0x2730] sm:$0xff] }
 0x43c   :  { %11127 = vmatpush1.bf16.msra.mxu1 %v13696_v54  ;;  %v13793_v9 = vcombine.high %v1284_v1, %v1288_v20  ;;  %v1148_v13 = vld [vmem:[%s19723_s1 + $0x22d0] sm:$0xff]  ;;  %v13664_v54 = vcombine.low %v1156_v63, %v1160_v51  ;;  %v13792_v26 = vcombine.low %v1284_v1, %v1288_v20 }
 0x43d   :  { %11128 = vmatprep.subr.bf16.mxu1 %v13817_v2  ;;  %v1152_v39 = vld [vmem:[%s19723_s1 + $0x22f0] sm:$0xff] }
 0x43e   :  { %11088 = vmatpush2.bf16.msra.mxu0 %v13688_v16  ;;  %v1276_v17 = vld [vmem:[%s19723_s1 + $0x26d0] sm:$0xff]  ;;  %v13657_v2 = vcombine.high %v1148_v13, %v1152_v39 }
 0x43f   :  { %11089 = vmatprep.subr.bf16.mxu0 %v13681_v34  ;;  %v1280_v62 = vld [vmem:[%s19723_s1 + $0x26f0] sm:$0xff] }
 0x440   :  { %11129 = vmatpush2.bf16.msra.mxu1 %v13816_v35  ;;  %v13785_v7 = vcombine.high %v1276_v17, %v1280_v62  ;;  %v1140_v60 = vld [vmem:[%s19723_s1 + $0x2290] sm:$0xff]  ;;  %v13656_v35 = vcombine.low %v1148_v13, %v1152_v39  ;;  %v13784_v34 = vcombine.low %v1276_v17, %v1280_v62 }
 0x441   :  { %11130 = vmatprep.subr.bf16.mxu1 %v13809_v53  ;;  %v1144_v61 = vld [vmem:[%s19723_s1 + $0x22b0] sm:$0xff] }
 0x442   :  { %11090 = vmatpush2.bf16.msra.mxu0 %v13680_v43  ;;  %v1268_v38 = vld [vmem:[%s19723_s1 + $0x2690] sm:$0xff]  ;;  %v13649_v53 = vcombine.high %v1140_v60, %v1144_v61 }
 0x443   :  { %11091 = vmatprep.subr.bf16.mxu0 %v13673_v37  ;;  %v1272_v16 = vld [vmem:[%s19723_s1 + $0x26b0] sm:$0xff] }
 0x444   :  { %11131 = vmatpush2.bf16.msra.mxu1 %v13808_v55  ;;  %v13777_v29 = vcombine.high %v1268_v38, %v1272_v16  ;;  %v1132_v3 = vld [vmem:[%s19723_s1 + $0x2250] sm:$0xff]  ;;  %v13648_v55 = vcombine.low %v1140_v60, %v1144_v61  ;;  %v13776_v37 = vcombine.low %v1268_v38, %v1272_v16 }
 0x445   :  { %11132 = vmatprep.subr.bf16.mxu1 %v13801_v47  ;;  %v1136_v50 = vld [vmem:[%s19723_s1 + $0x2270] sm:$0xff] }
 0x446   :  { %11092 = vmatpush2.bf16.msra.mxu0 %v13672_v8  ;;  %v1260_v49 = vld [vmem:[%s19723_s1 + $0x2650] sm:$0xff]  ;;  %v13641_v47 = vcombine.high %v1132_v3, %v1136_v50 }
 0x447   :  { %11093 = vmatprep.subr.bf16.mxu0 %v13665_v36  ;;  %v1264_v43 = vld [vmem:[%s19723_s1 + $0x2670] sm:$0xff] }
 0x448   :  { %11133 = vmatpush2.bf16.msra.mxu1 %v13800_v52  ;;  %v13769_v63 = vcombine.high %v1260_v49, %v1264_v43  ;;  %v1124_v51 = vld [vmem:[%s19723_s1 + $0x2210] sm:$0xff]  ;;  %v13640_v52 = vcombine.low %v1132_v3, %v1136_v50  ;;  %v13768_v36 = vcombine.low %v1260_v49, %v1264_v43 }
 0x449   :  { %11134 = vmatprep.subr.bf16.mxu1 %v13793_v9  ;;  %v1128_v1 = vld [vmem:[%s19723_s1 + $0x2230] sm:$0xff] }
 0x44a   :  { %11094 = vmatpush2.bf16.msra.mxu0 %v13664_v54  ;;  %v1252_v20 = vld [vmem:[%s19723_s1 + $0x2610] sm:$0xff]  ;;  %v13633_v9 = vcombine.high %v1124_v51, %v1128_v1 }
 0x44b   :  { %11095 = vmatprep.subr.bf16.mxu0 %v13657_v2  ;;  %v1256_v8 = vld [vmem:[%s19723_s1 + $0x2630] sm:$0xff] }
 0x44c   :  { %11135 = vmatpush2.bf16.msra.mxu1 %v13792_v26  ;;  %v13761_v13 = vcombine.high %v1252_v20, %v1256_v8  ;;  %v1372_v39 = vld [vmem:[%s19723_s1 + $0x29d0] sm:$0xff]  ;;  %v13632_v26 = vcombine.low %v1124_v51, %v1128_v1  ;;  %v13760_v2 = vcombine.low %v1252_v20, %v1256_v8 }
 0x44d   :  { %11136 = vmatprep.subr.bf16.mxu1 %v13785_v7  ;;  %v1376_v17 = vld [vmem:[%s19723_s1 + $0x29f0] sm:$0xff] }
 0x44e   :  { %11096 = vmatpush2.bf16.msra.mxu0 %v13656_v35  ;;  %v1500_v62 = vld [vmem:[%s19723_s1 + $0x2dd0] sm:$0xff]  ;;  %v13881_v7 = vcombine.high %v1372_v39, %v1376_v17 }
 0x44f   :  { %11097 = vmatprep.subr.bf16.mxu0 %v13649_v53  ;;  %v1504_v54 = vld [vmem:[%s19723_s1 + $0x2df0] sm:$0xff] }
 0x450   :  { %11137 = vmatpush2.bf16.msra.mxu1 %v13784_v34  ;;  %v14009_v60 = vcombine.high %v1500_v62, %v1504_v54  ;;  %v1364_v61 = vld [vmem:[%s19723_s1 + $0x2990] sm:$0xff]  ;;  %v13880_v34 = vcombine.low %v1372_v39, %v1376_v17  ;;  %v14008_v53 = vcombine.low %v1500_v62, %v1504_v54 }
 0x451   :  { %11138 = vmatprep.subr.bf16.mxu1 %v13777_v29  ;;  %v1368_v38 = vld [vmem:[%s19723_s1 + $0x29b0] sm:$0xff] }
 0x452   :  { %11098 = vmatpush2.bf16.msra.mxu0 %v13648_v55  ;;  %v1492_v16 = vld [vmem:[%s19723_s1 + $0x2d90] sm:$0xff]  ;;  %v13873_v29 = vcombine.high %v1364_v61, %v1368_v38  ;;  %v13872_v51 = vcombine.low %v1364_v61, %v1368_v38 }
 0x453   :  { %11099 = vmatprep.subr.bf16.mxu0 %v13641_v47  ;;  %v1496_v35 = vld [vmem:[%s19723_s1 + $0x2db0] sm:$0xff] }
 0x454   :  { %11139 = vmatpush2.bf16.msra.mxu1 %v13776_v37  ;;  %v14001_v3 = vcombine.high %v1492_v16, %v1496_v35  ;;  %v1356_v50 = vld [vmem:[%s19723_s1 + $0x2950] sm:$0xff]  ;;  %v14000_v20 = vcombine.low %v1492_v16, %v1496_v35 }
 0x455   :  { %11140 = vmatprep.subr.bf16.mxu1 %v13769_v63  ;;  %v1360_v49 = vld [vmem:[%s19723_s1 + $0x2970] sm:$0xff] }
 0x456   :  { %11100 = vmatpush2.bf16.msra.mxu0 %v13640_v52  ;;  %v1484_v55 = vld [vmem:[%s19723_s1 + $0x2d50] sm:$0xff]  ;;  %v13865_v8 = vcombine.high %v1356_v50, %v1360_v49 }
 0x457   :  { %11101 = vmatprep.subr.bf16.mxu0 %v13633_v9  ;;  %v1488_v37 = vld [vmem:[%s19723_s1 + $0x2d70] sm:$0xff] }
 0x458   :  { %11141 = vmatpush2.bf16.msra.mxu1 %v13768_v36  ;;  %v1352_v39 = vld [vmem:[%s19723_s1 + $0x2930] sm:$0xff] }
 0x459   :  { %11142 = vmatprep.subr.bf16.mxu1 %v13761_v13  ;;  %v13993_v13 = vcombine.high %v1484_v55, %v1488_v37  ;;  %v1476_v62 = vld [vmem:[%s19723_s1 + $0x2d10] sm:$0xff] }
 0x45a   :  { %11102 = vmatpush2.bf16.msra.mxu0 %v13632_v26  ;;  %v1340_v35 = vld [vmem:[%s19723_s1 + $0x28d0] sm:$0xff] }
 0x45b   :  { %11153 = vmatprep.subr.bf16.mxu0 %v13881_v7 }
 0x45c   :  { %11143 = vmatpush2.bf16.msra.mxu1 %v13760_v2  ;;  %v13864_v2 = vcombine.low %v1356_v50, %v1360_v49 }
 0x45d   :  { %11194 = vmatprep.subr.bf16.mxu1 %v14009_v60  ;;  %v10859_v43 = vpop.f32.mrf.mxu0  ;;  %11104 = vmatmul.mubr.bf16.vlgmr.msra.gmra.mxu0 %v15536_v11  ;;  %v13992_v60 = vcombine.low %v1484_v55, %v1488_v37  ;;  %v1332_v55 = vld [vmem:[%s19723_s1 + $0x2890] sm:$0xff] }
 0x45e   :  { %v10860_v47 = vadd.f32 %v10859_v43, %v17873_v15  ;;  %11154 = vmatpush1.bf16.msra.mxu0 %v13880_v34  ;;  %v1348_v15 = vld [vmem:[%s19723_s1 + $0x2910] sm:$0xff]  ;;  %11185 = vmatprep.mubr.bf16.mxu0 %v15551_v5 }
 0x45f   :  { %v10900_v63 = vpop.f32.mrf.mxu1  ;;  %11145 = vmatmul.mubr.bf16.vlgmr.msra.gmra.mxu1 %v15555_v6  ;;  %v10861_v1 = vpop.f32.mrf.mxu0  ;;  %11155 = vmatprep.subr.bf16.mxu0 %v13873_v29  ;;  %v13857_v61 = vcombine.high %v1348_v15, %v1352_v39  ;;  %v1344_v34 = vld [vmem:[%s19723_s1 + $0x28f0] sm:$0xff] }
 0x460   :  { %11195 = vmatpush1.bf16.msra.mxu1 %v14008_v53  ;;  %v18074_v52 = vadd.f32 %v10900_v63, %v10860_v47  ;;  %v10862_v36 = vadd.f32 %v10861_v1, %v17889_v58  ;;  %v1480_v58 = vld [vmem:[%s19723_s1 + $0x2d30] sm:$0xff]  ;;  %11226 = vmatprep.mubr.bf16.mxu1 %v15572_v19  ;;  %v13849_v49 = vcombine.high %v1340_v35, %v1344_v34 }
 0x461   :  { %v10902_v9 = vpop.f32.mrf.mxu1  ;;  %11196 = vmatprep.subr.bf16.mxu1 %v14001_v3  ;;  %v10863_v17 = vpop.f32.mrf.mxu0  ;;  %v13985_v16 = vcombine.high %v1476_v62, %v1480_v58  ;;  %v1468_v53 = vld [vmem:[%s19723_s1 + $0x2cd0] sm:$0xff]  ;;  %v13856_v3 = vcombine.low %v1348_v15, %v1352_v39  ;;  %v13984_v50 = vcombine.low %v1476_v62, %v1480_v58 }
 0x462   :  { %v18091_v54 = vadd.f32 %v10902_v9, %v10862_v36  ;;  %11156 = vmatpush1.bf16.msra.mxu0 %v13872_v51  ;;  %v1472_v29 = vld [vmem:[%s19723_s1 + $0x2cf0] sm:$0xff]  ;;  %v13848_v51 = vcombine.low %v1340_v35, %v1344_v34 }
 0x463   :  { %v10904_v26 = vpop.f32.mrf.mxu1  ;;  %v10864_v7 = vpop.f32.mrf.mxu0  ;;  %11157 = vmatprep.subr.bf16.mxu0 %v13865_v8  ;;  %v13977_v43 = vcombine.high %v1468_v53, %v1472_v29  ;;  %v1336_v37 = vld [vmem:[%s19723_s1 + $0x28b0] sm:$0xff]  ;;  %v13976_v1 = vcombine.low %v1468_v53, %v1472_v29 }
 0x464   :  { %11197 = vmatpush1.bf16.msra.mxu1 %v14000_v20  ;;  %v1460_v47 = vld [vmem:[%s19723_s1 + $0x2c90] sm:$0xff]  ;;  %v13841_v20 = vcombine.high %v1332_v55, %v1336_v37  ;;  %v13840_v39 = vcombine.low %v1332_v55, %v1336_v37 }
 0x465   :  { %v10905_v38 = vpop.f32.mrf.mxu1  ;;  %11198 = vmatprep.subr.bf16.mxu1 %v13993_v13  ;;  %v1464_v63 = vld [vmem:[%s19723_s1 + $0x2cb0] sm:$0xff] }
 0x466   :  { %11158 = vmatpush1.bf16.msra.mxu0 %v13864_v2  ;;  %v13969_v8 = vcombine.high %v1460_v47, %v1464_v63  ;;  %v1324_v36 = vld [vmem:[%s19723_s1 + $0x2850] sm:$0xff]  ;;  %v13968_v17 = vcombine.low %v1460_v47, %v1464_v63 }
 0x467   :  { %11159 = vmatprep.subr.bf16.mxu0 %v13857_v61  ;;  %v1328_v9 = vld [vmem:[%s19723_s1 + $0x2870] sm:$0xff] }
 0x468   :  { %11199 = vmatpush1.bf16.msra.mxu1 %v13992_v60  ;;  %v1452_v13 = vld [vmem:[%s19723_s1 + $0x2c50] sm:$0xff]  ;;  %v13833_v62 = vcombine.high %v1324_v36, %v1328_v9  ;;  %v13832_v61 = vcombine.low %v1324_v36, %v1328_v9 }
 0x469   :  { %11200 = vmatprep.subr.bf16.mxu1 %v13985_v16  ;;  %v1456_v15 = vld [vmem:[%s19723_s1 + $0x2c70] sm:$0xff] }
 0x46a   :  { %11160 = vmatpush1.bf16.msra.mxu0 %v13856_v3  ;;  %v13961_v58 = vcombine.high %v1452_v13, %v1456_v15  ;;  %v1316_v26 = vld [vmem:[%s19723_s1 + $0x2810] sm:$0xff]  ;;  %v13960_v38 = vcombine.low %v1452_v13, %v1456_v15 }
 0x46b   :  { %11161 = vmatprep.subr.bf16.mxu0 %v13849_v49  ;;  %v1320_v2 = vld [vmem:[%s19723_s1 + $0x2830] sm:$0xff] }
 0x46c   :  { %11201 = vmatpush1.bf16.msra.mxu1 %v13984_v50  ;;  %v1444_v7 = vld [vmem:[%s19723_s1 + $0x2c10] sm:$0xff]  ;;  %v13825_v16 = vcombine.high %v1316_v26, %v1320_v2  ;;  %v13824_v50 = vcombine.low %v1316_v26, %v1320_v2 }
 0x46d   :  { %11202 = vmatprep.subr.bf16.mxu1 %v13977_v43  ;;  %v1448_v60 = vld [vmem:[%s19723_s1 + $0x2c30] sm:$0xff] }
 0x46e   :  { %11162 = vmatpush1.bf16.msra.mxu0 %v13848_v51  ;;  %v13953_v35 = vcombine.high %v1444_v7, %v1448_v60  ;;  %v1436_v34 = vld [vmem:[%s19723_s1 + $0x2bd0] sm:$0xff]  ;;  %v13952_v49 = vcombine.low %v1444_v7, %v1448_v60 }
 0x46f   :  { %11163 = vmatprep.subr.bf16.mxu0 %v13841_v20  ;;  %v1440_v53 = vld [vmem:[%s19723_s1 + $0x2bf0] sm:$0xff] }
 0x470   :  { %11203 = vmatpush1.bf16.msra.mxu1 %v13976_v1  ;;  %v1564_v29 = vld [vmem:[%s19723_s1 + $0x2fd0] sm:$0xff]  ;;  %v13945_v43 = vcombine.high %v1436_v34, %v1440_v53  ;;  %v13944_v1 = vcombine.low %v1436_v34, %v1440_v53 }
 0x471   :  { %11204 = vmatprep.subr.bf16.mxu1 %v13969_v8  ;;  %v1568_v3 = vld [vmem:[%s19723_s1 + $0x2ff0] sm:$0xff] }
 0x472   :  { %11164 = vmatpush1.bf16.msra.mxu0 %v13840_v39  ;;  %v14073_v55 = vcombine.high %v1564_v29, %v1568_v3  ;;  %v1428_v37 = vld [vmem:[%s19723_s1 + $0x2b90] sm:$0xff]  ;;  %v14072_v20 = vcombine.low %v1564_v29, %v1568_v3 }
 0x473   :  { %11165 = vmatprep.subr.bf16.mxu0 %v13833_v62  ;;  %v1432_v47 = vld [vmem:[%s19723_s1 + $0x2bb0] sm:$0xff] }
 0x474   :  { %11205 = vmatpush1.bf16.msra.mxu1 %v13968_v17  ;;  %v1556_v63 = vld [vmem:[%s19723_s1 + $0x2f90] sm:$0xff]  ;;  %v13937_v8 = vcombine.high %v1428_v37, %v1432_v47  ;;  %v13936_v17 = vcombine.low %v1428_v37, %v1432_v47 }
 0x475   :  { %11206 = vmatprep.subr.bf16.mxu1 %v13961_v58  ;;  %v1560_v51 = vld [vmem:[%s19723_s1 + $0x2fb0] sm:$0xff] }
 0x476   :  { %11166 = vmatpush1.bf16.msra.mxu0 %v13832_v61  ;;  %v14065_v36 = vcombine.high %v1556_v63, %v1560_v51  ;;  %v1420_v9 = vld [vmem:[%s19723_s1 + $0x2b50] sm:$0xff]  ;;  %v14064_v62 = vcombine.low %v1556_v63, %v1560_v51 }
 0x477   :  { %11167 = vmatprep.subr.bf16.mxu0 %v13825_v16  ;;  %v1424_v13 = vld [vmem:[%s19723_s1 + $0x2b70] sm:$0xff] }
 0x478   :  { %11207 = vmatpush1.bf16.msra.mxu1 %v13960_v38  ;;  %v1548_v15 = vld [vmem:[%s19723_s1 + $0x2f50] sm:$0xff]  ;;  %v13929_v58 = vcombine.high %v1420_v9, %v1424_v13  ;;  %v13928_v38 = vcombine.low %v1420_v9, %v1424_v13 }
 0x479   :  { %11208 = vmatprep.subr.bf16.mxu1 %v13953_v35  ;;  %v1552_v39 = vld [vmem:[%s19723_s1 + $0x2f70] sm:$0xff] }
 0x47a   :  { %11168 = vmatpush1.bf16.msra.mxu0 %v13824_v50  ;;  %v14057_v26 = vcombine.high %v1548_v15, %v1552_v39  ;;  %v1412_v2 = vld [vmem:[%s19723_s1 + $0x2b10] sm:$0xff]  ;;  %v14056_v16 = vcombine.low %v1548_v15, %v1552_v39 }
 0x47b   :  { %11169 = vmatprep.subr.bf16.mxu0 %v13945_v43  ;;  %v1416_v7 = vld [vmem:[%s19723_s1 + $0x2b30] sm:$0xff] }
 0x47c   :  { %11209 = vmatpush1.bf16.msra.mxu1 %v13952_v49  ;;  %v1540_v60 = vld [vmem:[%s19723_s1 + $0x2f10] sm:$0xff]  ;;  %v13921_v35 = vcombine.high %v1412_v2, %v1416_v7  ;;  %v13920_v49 = vcombine.low %v1412_v2, %v1416_v7 }
 0x47d   :  { %11210 = vmatprep.subr.bf16.mxu1 %v14073_v55  ;;  %v1544_v61 = vld [vmem:[%s19723_s1 + $0x2f30] sm:$0xff] }
 0x47e   :  { %11170 = vmatpush2.bf16.msra.mxu0 %v13944_v1  ;;  %v14049_v34 = vcombine.high %v1540_v60, %v1544_v61  ;;  %v1404_v53 = vld [vmem:[%s19723_s1 + $0x2ad0] sm:$0xff]  ;;  %v14048_v43 = vcombine.low %v1540_v60, %v1544_v61 }
 0x47f   :  { %11171 = vmatprep.subr.bf16.mxu0 %v13937_v8  ;;  %v1408_v29 = vld [vmem:[%s19723_s1 + $0x2af0] sm:$0xff] }
 0x480   :  { %11211 = vmatpush2.bf16.msra.mxu1 %v14072_v20  ;;  %v1532_v3 = vld [vmem:[%s19723_s1 + $0x2ed0] sm:$0xff]  ;;  %v13913_v55 = vcombine.high %v1404_v53, %v1408_v29  ;;  %v13912_v20 = vcombine.low %v1404_v53, %v1408_v29 }
 0x481   :  { %11212 = vmatprep.subr.bf16.mxu1 %v14065_v36  ;;  %v1536_v50 = vld [vmem:[%s19723_s1 + $0x2ef0] sm:$0xff] }
 0x482   :  { %11172 = vmatpush2.bf16.msra.mxu0 %v13936_v17  ;;  %v14041_v37 = vcombine.high %v1532_v3, %v1536_v50  ;;  %v1396_v47 = vld [vmem:[%s19723_s1 + $0x2a90] sm:$0xff]  ;;  %v14040_v8 = vcombine.low %v1532_v3, %v1536_v50  ;;  %v93_v50 = vld [vmem:[%s19723_s1 + $0x1d8] sm:$0xff] }
 0x483   :  { %11173 = vmatprep.subr.bf16.mxu0 %v13929_v58  ;;  %v1400_v63 = vld [vmem:[%s19723_s1 + $0x2ab0] sm:$0xff] }
 0x484   :  { %11213 = vmatpush2.bf16.msra.mxu1 %v14064_v62  ;;  %v1524_v51 = vld [vmem:[%s19723_s1 + $0x2e90] sm:$0xff]  ;;  %v13905_v36 = vcombine.high %v1396_v47, %v1400_v63  ;;  %v13904_v62 = vcombine.low %v1396_v47, %v1400_v63 }
 0x485   :  { %11214 = vmatprep.subr.bf16.mxu1 %v14057_v26  ;;  %v1528_v1 = vld [vmem:[%s19723_s1 + $0x2eb0] sm:$0xff] }
 0x486   :  { %11174 = vmatpush2.bf16.msra.mxu0 %v13928_v38  ;;  %v14033_v9 = vcombine.high %v1524_v51, %v1528_v1  ;;  %v1388_v13 = vld [vmem:[%s19723_s1 + $0x2a50] sm:$0xff]  ;;  %v14032_v58 = vcombine.low %v1524_v51, %v1528_v1  ;;  %v85_v1 = vld [vmem:[%s19723_s1 + $0x198] sm:$0xff] }
 0x487   :  { %11175 = vmatprep.subr.bf16.mxu0 %v13921_v35  ;;  %v1392_v15 = vld [vmem:[%s19723_s1 + $0x2a70] sm:$0xff] }
 0x488   :  { %11215 = vmatpush2.bf16.msra.mxu1 %v14056_v16  ;;  %v1516_v39 = vld [vmem:[%s19723_s1 + $0x2e50] sm:$0xff]  ;;  %v13897_v26 = vcombine.high %v1388_v13, %v1392_v15  ;;  %v13896_v16 = vcombine.low %v1388_v13, %v1392_v15 }
 0x489   :  { %11216 = vmatprep.subr.bf16.mxu1 %v14049_v34  ;;  %v1520_v17 = vld [vmem:[%s19723_s1 + $0x2e70] sm:$0xff] }
 0x48a   :  { %11176 = vmatpush2.bf16.msra.mxu0 %v13920_v49  ;;  %v14025_v2 = vcombine.high %v1516_v39, %v1520_v17  ;;  %v1380_v7 = vld [vmem:[%s19723_s1 + $0x2a10] sm:$0xff]  ;;  %v14024_v35 = vcombine.low %v1516_v39, %v1520_v17  ;;  %v97_v49 = vld [vmem:[%s19723_s1 + $0x1f8] sm:$0xff] }
 0x48b   :  { %11177 = vmatprep.subr.bf16.mxu0 %v13913_v55  ;;  %v1384_v60 = vld [vmem:[%s19723_s1 + $0x2a30] sm:$0xff]  ;;  %v12603_v47 = vcombine.high %v93_v50, %v97_v49 }
 0x48c   :  { %11217 = vmatpush2.bf16.msra.mxu1 %v14048_v43  ;;  %v1508_v61 = vld [vmem:[%s19723_s1 + $0x2e10] sm:$0xff]  ;;  %v13889_v34 = vcombine.high %v1380_v7, %v1384_v60  ;;  %v13888_v43 = vcombine.low %v1380_v7, %v1384_v60 }
 0x48d   :  { %11218 = vmatprep.subr.bf16.mxu1 %v14041_v37  ;;  %v1512_v38 = vld [vmem:[%s19723_s1 + $0x2e30] sm:$0xff] }
 0x48e   :  { %11178 = vmatpush2.bf16.msra.mxu0 %v13912_v20  ;;  %v14017_v53 = vcombine.high %v1508_v61, %v1512_v38  ;;  %v1596_v29 = vld [vmem:[%s19723_s1 + $0x30d0] sm:$0xff]  ;;  %v14016_v55 = vcombine.low %v1508_v61, %v1512_v38  ;;  %v89_v20 = vld [vmem:[%s19723_s1 + $0x1b8] sm:$0xff] }
 0x48f   :  { %11179 = vmatprep.subr.bf16.mxu0 %v13905_v36  ;;  %v1600_v3 = vld [vmem:[%s19723_s1 + $0x30f0] sm:$0xff]  ;;  %v12602_v36 = vcombine.low %v93_v50, %v97_v49  ;;  %v12595_v13 = vcombine.high %v85_v1, %v89_v20  ;;  %v12594_v61 = vcombine.low %v85_v1, %v89_v20  ;;  %v69_v50 = vld [vmem:[%s19723_s1 + $0x118] sm:$0xff] }
 0x490   :  { %11219 = vmatpush2.bf16.msra.mxu1 %v14040_v8  ;;  %v14105_v37 = vcombine.high %v1596_v29, %v1600_v3  ;;  %v1588_v63 = vld [vmem:[%s19723_s1 + $0x3090] sm:$0xff]  ;;  %v14104_v8 = vcombine.low %v1596_v29, %v1600_v3  ;;  %v221_v20 = vld [vmem:[%s19723_s1 + $0x5d8] sm:$0xff] }
 0x491   :  { %11220 = vmatprep.subr.bf16.mxu1 %v14033_v9  ;;  %v1592_v51 = vld [vmem:[%s19723_s1 + $0x30b0] sm:$0xff] }
 0x492   :  { %11180 = vmatpush2.bf16.msra.mxu0 %v13904_v62  ;;  %v14097_v9 = vcombine.high %v1588_v63, %v1592_v51  ;;  %v1580_v15 = vld [vmem:[%s19723_s1 + $0x3050] sm:$0xff]  ;;  %v77_v62 = vld [vmem:[%s19723_s1 + $0x158] sm:$0xff]  ;;  %v14096_v7 = vcombine.low %v1588_v63, %v1592_v51 }
 0x493   :  { %11181 = vmatprep.subr.bf16.mxu0 %v13897_v26  ;;  %v1584_v39 = vld [vmem:[%s19723_s1 + $0x3070] sm:$0xff] }
 0x494   :  { %11221 = vmatpush2.bf16.msra.mxu1 %v14032_v58  ;;  %v81_v58 = vld [vmem:[%s19723_s1 + $0x178] sm:$0xff]  ;;  %v14089_v38 = vcombine.high %v1580_v15, %v1584_v39  ;;  %v1576_v29 = vld [vmem:[%s19723_s1 + $0x3030] sm:$0xff] }
 0x495   :  { %11222 = vmatprep.subr.bf16.mxu1 %v14025_v2 }
 0x496   :  { %11182 = vmatpush2.bf16.msra.mxu0 %v13896_v16 }
 0x497   :  { %11183 = vmatprep.subr.bf16.mxu0 %v13889_v34 }
 0x498   :  { %11223 = vmatpush2.bf16.msra.mxu1 %v14024_v35 }
 0x499   :  { %11224 = vmatprep.subr.bf16.mxu1 %v14017_v53  ;;  %v12587_v53 = vcombine.high %v77_v62, %v81_v58 }
 0x49a   :  { %11184 = vmatpush2.bf16.msra.mxu0 %v13888_v43 }
 0x49b   :  { %11243 = vmatprep.subr.bf16.mxu0 %v14105_v37 }
 0x49c   :  { %11225 = vmatpush2.bf16.msra.mxu1 %v14016_v55  ;;  %v14088_v55 = vcombine.low %v1580_v15, %v1584_v39 }
 0x49d   :  { %11276 = vmatprep.subr.bf16.mxu1 %v12603_v47  ;;  %v10941_v17 = vpop.f32.mrf.mxu0  ;;  %11186 = vmatmul.mubr.bf16.vlgmr.msra.gmra.mxu0 %v15753_v46  ;;  %v12586_v47 = vcombine.low %v77_v62, %v81_v58  ;;  %v217_v62 = vld [vmem:[%s19723_s1 + $0x5b8] sm:$0xff] }
 0x49e   :  { %v10942_v26 = vadd.f32 %v10941_v17, %v18074_v52  ;;  %11244 = vmatpush1.bf16.msra.mxu0 %v14104_v8  ;;  %v1572_v52 = vld [vmem:[%s19723_s1 + $0x3010] sm:$0xff]  ;;  %11267 = vmatprep.mubr.bf16.mxu0 %v14363_v41  ;;  %v61_v8 = vld [vmem:[%s19723_s1 + $0xd8] sm:$0xff] }
 0x49f   :  { %v10982_v2 = vpop.f32.mrf.mxu1  ;;  %11227 = vmatmul.mubr.bf16.vlgmr.msra.gmra.mxu1 %v15769_v59  ;;  %v10943_v60 = vpop.f32.mrf.mxu0  ;;  %11245 = vmatprep.subr.bf16.mxu0 %v14097_v9  ;;  %v14081_v63 = vcombine.high %v1572_v52, %v1576_v29  ;;  %v14080_v9 = vcombine.low %v1572_v52, %v1576_v29  ;;  %v213_v17 = vld [vmem:[%s19723_s1 + $0x598] sm:$0xff] }
 0x4a0   :  { %11277 = vmatpush1.bf16.msra.mxu1 %v12602_v36  ;;  %v18276_v16 = vadd.f32 %v10982_v2, %v10942_v26  ;;  %v10944_v35 = vadd.f32 %v10943_v60, %v18091_v54  ;;  %v73_v54 = vld [vmem:[%s19723_s1 + $0x138] sm:$0xff]  ;;  %11308 = vmatprep.mubr.bf16.mxu1 %v14527_v10  ;;  %v12723_v60 = vcombine.high %v213_v17, %v217_v62 }
 0x4a1   :  { %v10984_v34 = vpop.f32.mrf.mxu1  ;;  %11278 = vmatprep.subr.bf16.mxu1 %v12595_v13  ;;  %v10945_v3 = vpop.f32.mrf.mxu0  ;;  %v12579_v1 = vcombine.high %v69_v50, %v73_v54  ;;  %v225_v10 = vld [vmem:[%s19723_s1 + $0x5f8] sm:$0xff]  ;;  %v12578_v13 = vcombine.low %v69_v50, %v73_v54  ;;  %v12722_v52 = vcombine.low %v213_v17, %v217_v62 }
 0x4a2   :  { %v18293_v49 = vadd.f32 %v10984_v34, %v10944_v35  ;;  %11246 = vmatpush1.bf16.msra.mxu0 %v14096_v7  ;;  %v65_v36 = vld [vmem:[%s19723_s1 + $0xf8] sm:$0xff]  ;;  %v12731_v15 = vcombine.high %v221_v20, %v225_v10  ;;  %v12730_v2 = vcombine.low %v221_v20, %v225_v10 }
 0x4a3   :  { %v10986_v43 = vpop.f32.mrf.mxu1  ;;  %v10946_v37 = vpop.f32.mrf.mxu0  ;;  %11247 = vmatprep.subr.bf16.mxu0 %v14089_v38  ;;  %v12571_v39 = vcombine.high %v61_v8, %v65_v36  ;;  %v53_v58 = vld [vmem:[%s19723_s1 + $0x98] sm:$0xff]  ;;  %v12570_v7 = vcombine.low %v61_v8, %v65_v36 }
 0x4a4   :  { %11279 = vmatpush1.bf16.msra.mxu1 %v12594_v61  ;;  %v57_v26 = vld [vmem:[%s19723_s1 + $0xb8] sm:$0xff] }
 0x4a5   :  { %v10987_v51 = vpop.f32.mrf.mxu1  ;;  %11280 = vmatprep.subr.bf16.mxu1 %v12587_v53  ;;  %v12563_v61 = vcombine.high %v53_v58, %v57_v26  ;;  %v205_v38 = vld [vmem:[%s19723_s1 + $0x558] sm:$0xff]  ;;  %v12562_v29 = vcombine.low %v53_v58, %v57_v26 }
 0x4a6   :  { %11248 = vmatpush1.bf16.msra.mxu0 %v14088_v55  ;;  %v209_v35 = vld [vmem:[%s19723_s1 + $0x578] sm:$0xff] }
 0x4a7   :  { %11249 = vmatprep.subr.bf16.mxu0 %v14081_v63  ;;  %v45_v34 = vld [vmem:[%s19723_s1 + $0x58] sm:$0xff]  ;;  %v12715_v3 = vcombine.high %v205_v38, %v209_v35  ;;  %v12714_v37 = vcombine.low %v205_v38, %v209_v35 }
 0x4a8   :  { %11281 = vmatpush1.bf16.msra.mxu1 %v12586_v47  ;;  %v49_v53 = vld [vmem:[%s19723_s1 + $0x78] sm:$0xff] }
 0x4a9   :  { %11282 = vmatprep.subr.bf16.mxu1 %v12579_v1  ;;  %v12555_v50 = vcombine.high %v45_v34, %v49_v53  ;;  %v197_v54 = vld [vmem:[%s19723_s1 + $0x518] sm:$0xff]  ;;  %v12554_v47 = vcombine.low %v45_v34, %v49_v53 }
 0x4aa   :  { %11250 = vmatpush1.bf16.msra.mxu0 %v14080_v9  ;;  %v201_v43 = vld [vmem:[%s19723_s1 + $0x538] sm:$0xff] }
 0x4ab   :  { %11317 = vmatprep.subr.bf16.mxu0 %v12731_v15  ;;  %v37_v55 = vld [vmem:[%s19723_s1 + $0x18] sm:$0xff]  ;;  %v12707_v63 = vcombine.high %v197_v54, %v201_v43  ;;  %v12706_v36 = vcombine.low %v197_v54, %v201_v43 }
 0x4ac   :  { %11283 = vmatpush1.bf16.msra.mxu1 %v12578_v13  ;;  %v189_v1 = vld [vmem:[%s19723_s1 + $0x4d8] sm:$0xff] }
 0x4ad   :  { %11284 = vmatprep.subr.bf16.mxu1 %v12571_v39  ;;  %14110 = vmatmul.mubr.msk.bf16.vlgmr.msra.gmra.mxu0 %vm9673_vm0, %v15827_v25  ;;  %v193_v20 = vld [vmem:[%s19723_s1 + $0x4f8] sm:$0xff] }
 0x4ae   :  { %11318 = vmatpush1.bf16.msra.mxu0 %v12730_v2  ;;  %11349 = vmatprep.mubr.bf16.mxu0 %v14538_v14  ;;  %v41_v14 = vld [vmem:[%s19723_s1 + $0x38] sm:$0xff]  ;;  %v12699_v13 = vcombine.high %v189_v1, %v193_v20  ;;  %v12698_v26 = vcombine.low %v189_v1, %v193_v20 }
 0x4af   :  { %11319 = vmatprep.subr.bf16.mxu0 %v12723_v60  ;;  %v12547_v51 = vcombine.high %v37_v55, %v41_v14  ;;  %v157_v10 = vld [vmem:[%s19723_s1 + $0x3d8] sm:$0xff]  ;;  %v12546_v9 = vcombine.low %v37_v55, %v41_v14 }
 0x4b0   :  { %11285 = vmatpush1.bf16.msra.mxu1 %v12570_v7  ;;  %v161_v8 = vld [vmem:[%s19723_s1 + $0x3f8] sm:$0xff] }
 0x4b1   :  { %11286 = vmatprep.subr.bf16.mxu1 %v12563_v61  ;;  %v12667_v15 = vcombine.high %v157_v10, %v161_v8  ;;  %v181_v39 = vld [vmem:[%s19723_s1 + $0x498] sm:$0xff]  ;;  %v12666_v2 = vcombine.low %v157_v10, %v161_v8 }
 0x4b2   :  { %11320 = vmatpush1.bf16.msra.mxu0 %v12722_v52  ;;  %v185_v17 = vld [vmem:[%s19723_s1 + $0x4b8] sm:$0xff] }
 0x4b3   :  { %11321 = vmatprep.subr.bf16.mxu0 %v12715_v3  ;;  %v149_v62 = vld [vmem:[%s19723_s1 + $0x398] sm:$0xff]  ;;  %v12691_v7 = vcombine.high %v181_v39, %v185_v17  ;;  %v12690_v53 = vcombine.low %v181_v39, %v185_v17 }
 0x4b4   :  { %11287 = vmatpush1.bf16.msra.mxu1 %v12562_v29  ;;  %v153_v58 = vld [vmem:[%s19723_s1 + $0x3b8] sm:$0xff] }
 0x4b5   :  { %11288 = vmatprep.subr.bf16.mxu1 %v12555_v50  ;;  %v12659_v60 = vcombine.high %v149_v62, %v153_v58  ;;  %v173_v61 = vld [vmem:[%s19723_s1 + $0x458] sm:$0xff]  ;;  %v12658_v52 = vcombine.low %v149_v62, %v153_v58 }
 0x4b6   :  { %11322 = vmatpush1.bf16.msra.mxu0 %v12714_v37  ;;  %v177_v38 = vld [vmem:[%s19723_s1 + $0x478] sm:$0xff] }
 0x4b7   :  { %11323 = vmatprep.subr.bf16.mxu0 %v12707_v63  ;;  %v141_v35 = vld [vmem:[%s19723_s1 + $0x358] sm:$0xff]  ;;  %v12683_v29 = vcombine.high %v173_v61, %v177_v38  ;;  %v12682_v14 = vcombine.low %v173_v61, %v177_v38 }
 0x4b8   :  { %11289 = vmatpush1.bf16.msra.mxu1 %v12554_v47  ;;  %v145_v34 = vld [vmem:[%s19723_s1 + $0x378] sm:$0xff] }
 0x4b9   :  { %11290 = vmatprep.subr.bf16.mxu1 %v12547_v51  ;;  %v12651_v3 = vcombine.high %v141_v35, %v145_v34  ;;  %v165_v50 = vld [vmem:[%s19723_s1 + $0x418] sm:$0xff]  ;;  %v12650_v37 = vcombine.low %v141_v35, %v145_v34 }
 0x4ba   :  { %11324 = vmatpush1.bf16.msra.mxu0 %v12706_v36  ;;  %v169_v54 = vld [vmem:[%s19723_s1 + $0x438] sm:$0xff] }
 0x4bb   :  { %11325 = vmatprep.subr.bf16.mxu0 %v12699_v13  ;;  %v133_v43 = vld [vmem:[%s19723_s1 + $0x318] sm:$0xff]  ;;  %v12675_v47 = vcombine.high %v165_v50, %v169_v54  ;;  %v12674_v8 = vcombine.low %v165_v50, %v169_v54 }
 0x4bc   :  { %11291 = vmatpush1.bf16.msra.mxu1 %v12546_v9  ;;  %v137_v55 = vld [vmem:[%s19723_s1 + $0x338] sm:$0xff] }
 0x4bd   :  { %11292 = vmatprep.subr.bf16.mxu1 %v12667_v15  ;;  %v12643_v63 = vcombine.high %v133_v43, %v137_v55  ;;  %v285_v51 = vld [vmem:[%s19723_s1 + $0x7d8] sm:$0xff]  ;;  %v12642_v36 = vcombine.low %v133_v43, %v137_v55 }
 0x4be   :  { %11326 = vmatpush1.bf16.msra.mxu0 %v12698_v26  ;;  %v289_v1 = vld [vmem:[%s19723_s1 + $0x7f8] sm:$0xff] }
 0x4bf   :  { %11327 = vmatprep.subr.bf16.mxu0 %v12691_v7  ;;  %v125_v20 = vld [vmem:[%s19723_s1 + $0x2d8] sm:$0xff]  ;;  %v12795_v9 = vcombine.high %v285_v51, %v289_v1  ;;  %v12794_v58 = vcombine.low %v285_v51, %v289_v1 }
 0x4c0   :  { %11293 = vmatpush2.bf16.msra.mxu1 %v12666_v2  ;;  %v129_v10 = vld [vmem:[%s19723_s1 + $0x2f8] sm:$0xff] }
 0x4c1   :  { %11294 = vmatprep.subr.bf16.mxu1 %v12659_v60  ;;  %v12635_v13 = vcombine.high %v125_v20, %v129_v10  ;;  %v277_v15 = vld [vmem:[%s19723_s1 + $0x798] sm:$0xff]  ;;  %v12634_v26 = vcombine.low %v125_v20, %v129_v10 }
 0x4c2   :  { %11328 = vmatpush1.bf16.msra.mxu0 %v12690_v53  ;;  %v281_v39 = vld [vmem:[%s19723_s1 + $0x7b8] sm:$0xff] }
 0x4c3   :  { %11329 = vmatprep.subr.bf16.mxu0 %v12683_v29  ;;  %v117_v17 = vld [vmem:[%s19723_s1 + $0x298] sm:$0xff]  ;;  %v12787_v2 = vcombine.high %v277_v15, %v281_v39  ;;  %v12786_v34 = vcombine.low %v277_v15, %v281_v39 }
 0x4c4   :  { %11295 = vmatpush2.bf16.msra.mxu1 %v12658_v52  ;;  %v121_v62 = vld [vmem:[%s19723_s1 + $0x2b8] sm:$0xff] }
 0x4c5   :  { %11296 = vmatprep.subr.bf16.mxu1 %v12651_v3  ;;  %v12627_v7 = vcombine.high %v117_v17, %v121_v62  ;;  %v269_v60 = vld [vmem:[%s19723_s1 + $0x758] sm:$0xff]  ;;  %v12626_v53 = vcombine.low %v117_v17, %v121_v62 }
 0x4c6   :  { %11330 = vmatpush1.bf16.msra.mxu0 %v12682_v14  ;;  %v273_v61 = vld [vmem:[%s19723_s1 + $0x778] sm:$0xff] }
 0x4c7   :  { %11331 = vmatprep.subr.bf16.mxu0 %v12675_v47  ;;  %v109_v38 = vld [vmem:[%s19723_s1 + $0x258] sm:$0xff]  ;;  %v12779_v52 = vcombine.high %v269_v60, %v273_v61  ;;  %v12778_v55 = vcombine.low %v269_v60, %v273_v61 }
 0x4c8   :  { %11297 = vmatpush2.bf16.msra.mxu1 %v12650_v37  ;;  %v113_v35 = vld [vmem:[%s19723_s1 + $0x278] sm:$0xff] }
 0x4c9   :  { %11298 = vmatprep.subr.bf16.mxu1 %v12643_v63  ;;  %v12619_v29 = vcombine.high %v109_v38, %v113_v35  ;;  %v261_v3 = vld [vmem:[%s19723_s1 + $0x718] sm:$0xff]  ;;  %v12618_v14 = vcombine.low %v109_v38, %v113_v35 }
 0x4ca   :  { %11332 = vmatpush1.bf16.msra.mxu0 %v12674_v8  ;;  %v265_v50 = vld [vmem:[%s19723_s1 + $0x738] sm:$0xff] }
 0x4cb   :  { %11333 = vmatprep.subr.bf16.mxu0 %v12795_v9  ;;  %v101_v54 = vld [vmem:[%s19723_s1 + $0x218] sm:$0xff]  ;;  %v12771_v37 = vcombine.high %v261_v3, %v265_v50  ;;  %v12770_v10 = vcombine.low %v261_v3, %v265_v50 }
 0x4cc   :  { %11299 = vmatpush2.bf16.msra.mxu1 %v12642_v36  ;;  %v105_v43 = vld [vmem:[%s19723_s1 + $0x238] sm:$0xff] }
 0x4cd   :  { %11300 = vmatprep.subr.bf16.mxu1 %v12635_v13  ;;  %v12611_v47 = vcombine.high %v101_v54, %v105_v43  ;;  %v253_v63 = vld [vmem:[%s19723_s1 + $0x6d8] sm:$0xff]  ;;  %v12610_v8 = vcombine.low %v101_v54, %v105_v43 }
 0x4ce   :  { %11334 = vmatpush2.bf16.msra.mxu0 %v12794_v58  ;;  %v257_v51 = vld [vmem:[%s19723_s1 + $0x6f8] sm:$0xff] }
 0x4cf   :  { %11335 = vmatprep.subr.bf16.mxu0 %v12787_v2  ;;  %v349_v1 = vld [vmem:[%s19723_s1 + $0x9d8] sm:$0xff]  ;;  %v12763_v36 = vcombine.high %v253_v63, %v257_v51  ;;  %v12762_v62 = vcombine.low %v253_v63, %v257_v51 }
 0x4d0   :  { %11301 = vmatpush2.bf16.msra.mxu1 %v12634_v26  ;;  %v353_v20 = vld [vmem:[%s19723_s1 + $0x9f8] sm:$0xff] }
 0x4d1   :  { %11302 = vmatprep.subr.bf16.mxu1 %v12627_v7  ;;  %v12859_v9 = vcombine.high %v349_v1, %v353_v20  ;;  %v245_v13 = vld [vmem:[%s19723_s1 + $0x698] sm:$0xff]  ;;  %v12858_v58 = vcombine.low %v349_v1, %v353_v20 }
 0x4d2   :  { %11336 = vmatpush2.bf16.msra.mxu0 %v12786_v34  ;;  %v249_v15 = vld [vmem:[%s19723_s1 + $0x6b8] sm:$0xff] }
 0x4d3   :  { %11337 = vmatprep.subr.bf16.mxu0 %v12779_v52  ;;  %v341_v39 = vld [vmem:[%s19723_s1 + $0x998] sm:$0xff]  ;;  %v12755_v26 = vcombine.high %v245_v13, %v249_v15  ;;  %v12754_v52 = vcombine.low %v245_v13, %v249_v15 }
 0x4d4   :  { %11303 = vmatpush2.bf16.msra.mxu1 %v12626_v53  ;;  %v345_v17 = vld [vmem:[%s19723_s1 + $0x9b8] sm:$0xff] }
 0x4d5   :  { %11304 = vmatprep.subr.bf16.mxu1 %v12619_v29  ;;  %v12851_v2 = vcombine.high %v341_v39, %v345_v17  ;;  %v237_v7 = vld [vmem:[%s19723_s1 + $0x658] sm:$0xff]  ;;  %v12850_v3 = vcombine.low %v341_v39, %v345_v17 }
 0x4d6   :  { %11338 = vmatpush2.bf16.msra.mxu0 %v12778_v55  ;;  %v241_v60 = vld [vmem:[%s19723_s1 + $0x678] sm:$0xff] }
 0x4d7   :  { %11339 = vmatprep.subr.bf16.mxu0 %v12771_v37  ;;  %v333_v38 = vld [vmem:[%s19723_s1 + $0x958] sm:$0xff]  ;;  %v12747_v50 = vcombine.high %v237_v7, %v241_v60  ;;  %v12746_v1 = vcombine.low %v237_v7, %v241_v60 }
 0x4d8   :  { %11305 = vmatpush2.bf16.msra.mxu1 %v12618_v14  ;;  %v337_v35 = vld [vmem:[%s19723_s1 + $0x978] sm:$0xff] }
 0x4d9   :  { %11306 = vmatprep.subr.bf16.mxu1 %v12611_v47  ;;  %v12843_v14 = vcombine.high %v333_v38, %v337_v35  ;;  %v325_v47 = vld [vmem:[%s19723_s1 + $0x918] sm:$0xff] }
 0x4da   :  { %11340 = vmatpush2.bf16.msra.mxu0 %v12770_v10  ;;  %v12842_v10 = vcombine.low %v333_v38, %v337_v35  ;;  %v481_v13 = vld [vmem:[%s19723_s1 + $0xdf8] sm:$0xff] }
 0x4db   :  { %11341 = vmatprep.subr.bf16.mxu0 %v12763_v36  ;;  %v317_v15 = vld [vmem:[%s19723_s1 + $0x8d8] sm:$0xff] }
 0x4dc   :  { %11307 = vmatpush2.bf16.msra.mxu1 %v12610_v8  ;;  %v321_v39 = vld [vmem:[%s19723_s1 + $0x8f8] sm:$0xff] }
 0x4dd   :  { %11358 = vmatprep.subr.bf16.mxu1 %v12859_v9  ;;  %v11023_v61 = vpop.f32.mrf.mxu0  ;;  %v477_v9 = vld [vmem:[%s19723_s1 + $0xdd8] sm:$0xff]  ;;  %v12826_v35 = vcombine.low %v317_v15, %v321_v39 }
 0x4de   :  { %v11024_v34 = vadd.f32 %v11023_v61, %v18276_v16  ;;  %11342 = vmatpush2.bf16.msra.mxu0 %v12762_v62  ;;  %v229_v16 = vld [vmem:[%s19723_s1 + $0x618] sm:$0xff]  ;;  %v12986_v38 = vcombine.low %v477_v9, %v481_v13 }
 0x4df   :  { %v11064_v53 = vpop.f32.mrf.mxu1  ;;  %11309 = vmatmul.mubr.bf16.vlgmr.msra.gmra.mxu1 %v14646_v23  ;;  %v11025_v29 = vpop.f32.mrf.mxu0  ;;  %11343 = vmatprep.subr.bf16.mxu0 %v12755_v26  ;;  %v233_v23 = vld [vmem:[%s19723_s1 + $0x638] sm:$0xff]  ;;  %v12827_v26 = vcombine.high %v317_v15, %v321_v39 }
 0x4e0   :  { %11359 = vmatpush1.bf16.msra.mxu1 %v12858_v58  ;;  %v18480_v54 = vadd.f32 %v11064_v53, %v11024_v34  ;;  %v11026_v43 = vadd.f32 %v11025_v29, %v18293_v49  ;;  %11390 = vmatprep.mubr.bf16.mxu1 %v14661_v30  ;;  %v329_v49 = vld [vmem:[%s19723_s1 + $0x938] sm:$0xff]  ;;  %v12739_v8 = vcombine.high %v229_v16, %v233_v23 }
 0x4e1   :  { %v11066_v55 = vpop.f32.mrf.mxu1  ;;  %11360 = vmatprep.subr.bf16.mxu1 %v12851_v2  ;;  %v11027_v37 = vpop.f32.mrf.mxu0  ;;  %v12835_v36 = vcombine.high %v325_v47, %v329_v49  ;;  %v12738_v17 = vcombine.low %v229_v16, %v233_v23  ;;  %v12834_v62 = vcombine.low %v325_v47, %v329_v49  ;;  %v12987_v58 = vcombine.high %v477_v9, %v481_v13  ;;  %v469_v2 = vld [vmem:[%s19723_s1 + $0xd98] sm:$0xff] }
 0x4e2   :  { %v18496_v63 = vadd.f32 %v11066_v55, %v11026_v43  ;;  %11344 = vmatpush2.bf16.msra.mxu0 %v12754_v52  ;;  %v473_v7 = vld [vmem:[%s19723_s1 + $0xdb8] sm:$0xff] }
 0x4e3   :  { %v11068_v51 = vpop.f32.mrf.mxu1  ;;  %v11028_v20 = vpop.f32.mrf.mxu0  ;;  %11345 = vmatprep.subr.bf16.mxu0 %v12747_v50  ;;  %v309_v60 = vld [vmem:[%s19723_s1 + $0x898] sm:$0xff]  ;;  %v12979_v34 = vcombine.high %v469_v2, %v473_v7  ;;  %v12978_v43 = vcombine.low %v469_v2, %v473_v7 }
 0x4e4   :  { %11361 = vmatpush1.bf16.msra.mxu1 %v12850_v3  ;;  %v313_v61 = vld [vmem:[%s19723_s1 + $0x8b8] sm:$0xff] }
 0x4e5   :  { %v11069_v30 = vpop.f32.mrf.mxu1  ;;  %11362 = vmatprep.subr.bf16.mxu1 %v12843_v14  ;;  %v12819_v53 = vcombine.high %v309_v60, %v313_v61  ;;  %v461_v52 = vld [vmem:[%s19723_s1 + $0xd58] sm:$0xff]  ;;  %v12818_v55 = vcombine.low %v309_v60, %v313_v61 }
 0x4e6   :  { %11346 = vmatpush2.bf16.msra.mxu0 %v12746_v1  ;;  %v465_v29 = vld [vmem:[%s19723_s1 + $0xd78] sm:$0xff] }
 0x4e7   :  { %11347 = vmatprep.subr.bf16.mxu0 %v12739_v8  ;;  %v301_v3 = vld [vmem:[%s19723_s1 + $0x858] sm:$0xff]  ;;  %v12971_v14 = vcombine.high %v461_v52, %v465_v29  ;;  %v12970_v47 = vcombine.low %v461_v52, %v465_v29 }
 0x4e8   :  { %11363 = vmatpush1.bf16.msra.mxu1 %v12842_v10  ;;  %v305_v50 = vld [vmem:[%s19723_s1 + $0x878] sm:$0xff] }
 0x4e9   :  { %11364 = vmatprep.subr.bf16.mxu1 %v12835_v36  ;;  %v12811_v16 = vcombine.high %v301_v3, %v305_v50  ;;  %v457_v23 = vld [vmem:[%s19723_s1 + $0xd38] sm:$0xff]  ;;  %v12810_v49 = vcombine.low %v301_v3, %v305_v50 }
 0x4ea   :  { %11348 = vmatpush2.bf16.msra.mxu0 %v12738_v17  ;;  %v293_v37 = vld [vmem:[%s19723_s1 + $0x818] sm:$0xff] }
 0x4eb   :  { %11399 = vmatprep.subr.bf16.mxu0 %v12987_v58  ;;  %v445_v20 = vld [vmem:[%s19723_s1 + $0xcd8] sm:$0xff] }
 0x4ec   :  { %11365 = vmatpush1.bf16.msra.mxu1 %v12834_v62  ;;  %v449_v10 = vld [vmem:[%s19723_s1 + $0xcf8] sm:$0xff] }
 0x4ed   :  { %11366 = vmatprep.subr.bf16.mxu1 %v12827_v26  ;;  %11350 = vmatmul.mubr.bf16.vlgmr.msra.gmra.mxu0 %v14665_v31  ;;  %v453_v31 = vld [vmem:[%s19723_s1 + $0xd18] sm:$0xff]  ;;  %v12955_v13 = vcombine.high %v445_v20, %v449_v10  ;;  %v12954_v26 = vcombine.low %v445_v20, %v449_v10 }
 0x4ee   :  { %11400 = vmatpush1.bf16.msra.mxu0 %v12986_v38  ;;  %11431 = vmatprep.mubr.bf16.mxu0 %v14682_v40  ;;  %v297_v40 = vld [vmem:[%s19723_s1 + $0x838] sm:$0xff]  ;;  %v12963_v51 = vcombine.high %v453_v31, %v457_v23  ;;  %v12962_v36 = vcombine.low %v453_v31, %v457_v23 }
 0x4ef   :  { %11401 = vmatprep.subr.bf16.mxu0 %v12979_v34  ;;  %v12803_v1 = vcombine.high %v293_v37, %v297_v40  ;;  %v413_v8 = vld [vmem:[%s19723_s1 + $0xbd8] sm:$0xff]  ;;  %v12802_v9 = vcombine.low %v293_v37, %v297_v40 }
 0x4f0   :  { %11367 = vmatpush1.bf16.msra.mxu1 %v12826_v35  ;;  %v417_v30 = vld [vmem:[%s19723_s1 + $0xbf8] sm:$0xff] }
 0x4f1   :  { %11368 = vmatprep.subr.bf16.mxu1 %v12819_v53  ;;  %v12923_v15 = vcombine.high %v413_v8, %v417_v30  ;;  %v437_v39 = vld [vmem:[%s19723_s1 + $0xc98] sm:$0xff]  ;;  %v12922_v2 = vcombine.low %v413_v8, %v417_v30 }
 0x4f2   :  { %11402 = vmatpush1.bf16.msra.mxu0 %v12978_v43  ;;  %v441_v17 = vld [vmem:[%s19723_s1 + $0xcb8] sm:$0xff] }
 0x4f3   :  { %11403 = vmatprep.subr.bf16.mxu0 %v12971_v14  ;;  %v405_v62 = vld [vmem:[%s19723_s1 + $0xb98] sm:$0xff]  ;;  %v12947_v7 = vcombine.high %v437_v39, %v441_v17  ;;  %v12946_v53 = vcombine.low %v437_v39, %v441_v17 }
 0x4f4   :  { %11369 = vmatpush1.bf16.msra.mxu1 %v12818_v55  ;;  %v409_v58 = vld [vmem:[%s19723_s1 + $0xbb8] sm:$0xff] }
 0x4f5   :  { %11370 = vmatprep.subr.bf16.mxu1 %v12811_v16  ;;  %v12915_v60 = vcombine.high %v405_v62, %v409_v58  ;;  %v429_v61 = vld [vmem:[%s19723_s1 + $0xc58] sm:$0xff]  ;;  %v12914_v52 = vcombine.low %v405_v62, %v409_v58 }
 0x4f6   :  { %11404 = vmatpush1.bf16.msra.mxu0 %v12970_v47  ;;  %v433_v38 = vld [vmem:[%s19723_s1 + $0xc78] sm:$0xff] }
 0x4f7   :  { %11405 = vmatprep.subr.bf16.mxu0 %v12963_v51  ;;  %v397_v35 = vld [vmem:[%s19723_s1 + $0xb58] sm:$0xff]  ;;  %v12939_v29 = vcombine.high %v429_v61, %v433_v38  ;;  %v12938_v16 = vcombine.low %v429_v61, %v433_v38 }
 0x4f8   :  { %11371 = vmatpush1.bf16.msra.mxu1 %v12810_v49  ;;  %v401_v34 = vld [vmem:[%s19723_s1 + $0xb78] sm:$0xff] }
 0x4f9   :  { %11372 = vmatprep.subr.bf16.mxu1 %v12803_v1  ;;  %v12907_v3 = vcombine.high %v397_v35, %v401_v34  ;;  %v421_v50 = vld [vmem:[%s19723_s1 + $0xc18] sm:$0xff]  ;;  %v12906_v31 = vcombine.low %v397_v35, %v401_v34 }
 0x4fa   :  { %11406 = vmatpush1.bf16.msra.mxu0 %v12962_v36  ;;  %v425_v43 = vld [vmem:[%s19723_s1 + $0xc38] sm:$0xff] }
 0x4fb   :  { %11407 = vmatprep.subr.bf16.mxu0 %v12955_v13  ;;  %v389_v55 = vld [vmem:[%s19723_s1 + $0xb18] sm:$0xff]  ;;  %v12931_v23 = vcombine.high %v421_v50, %v425_v43  ;;  %v12930_v1 = vcombine.low %v421_v50, %v425_v43 }
 0x4fc   :  { %11373 = vmatpush1.bf16.msra.mxu1 %v12802_v9  ;;  %v393_v14 = vld [vmem:[%s19723_s1 + $0xb38] sm:$0xff] }
 0x4fd   :  { %11374 = vmatprep.subr.bf16.mxu1 %v12923_v15  ;;  %v12899_v37 = vcombine.high %v389_v55, %v393_v14  ;;  %v541_v40 = vld [vmem:[%s19723_s1 + $0xfd8] sm:$0xff]  ;;  %v12898_v20 = vcombine.low %v389_v55, %v393_v14 }
 0x4fe   :  { %11408 = vmatpush1.bf16.msra.mxu0 %v12954_v26  ;;  %v545_v47 = vld [vmem:[%s19723_s1 + $0xff8] sm:$0xff] }
 0x4ff   :  { %11409 = vmatprep.subr.bf16.mxu0 %v12947_v7  ;;  %v381_v49 = vld [vmem:[%s19723_s1 + $0xad8] sm:$0xff]  ;;  %v13051_v10 = vcombine.high %v541_v40, %v545_v47  ;;  %v13050_v15 = vcombine.low %v541_v40, %v545_v47 }
 0x500   :  { %11375 = vmatpush2.bf16.msra.mxu1 %v12922_v2  ;;  %v385_v51 = vld [vmem:[%s19723_s1 + $0xaf8] sm:$0xff] }
 0x501   :  { %11376 = vmatprep.subr.bf16.mxu1 %v12915_v60  ;;  %v12891_v8 = vcombine.high %v381_v49, %v385_v51  ;;  %v533_v30 = vld [vmem:[%s19723_s1 + $0xf98] sm:$0xff]  ;;  %v12890_v39 = vcombine.low %v381_v49, %v385_v51 }
 0x502   :  { %11410 = vmatpush1.bf16.msra.mxu0 %v12946_v53  ;;  %v537_v36 = vld [vmem:[%s19723_s1 + $0xfb8] sm:$0xff] }
 0x503   :  { %11411 = vmatprep.subr.bf16.mxu0 %v12939_v29  ;;  %v373_v9 = vld [vmem:[%s19723_s1 + $0xa98] sm:$0xff]  ;;  %v13043_v17 = vcombine.high %v533_v30, %v537_v36  ;;  %v13042_v60 = vcombine.low %v533_v30, %v537_v36 }
 0x504   :  { %11377 = vmatpush2.bf16.msra.mxu1 %v12914_v52  ;;  %v377_v13 = vld [vmem:[%s19723_s1 + $0xab8] sm:$0xff] }
 0x505   :  { %11378 = vmatprep.subr.bf16.mxu1 %v12907_v3  ;;  %v12883_v62 = vcombine.high %v373_v9, %v377_v13  ;;  %v525_v58 = vld [vmem:[%s19723_s1 + $0xf58] sm:$0xff]  ;;  %v12882_v61 = vcombine.low %v373_v9, %v377_v13 }
 0x506   :  { %11412 = vmatpush1.bf16.msra.mxu0 %v12938_v16  ;;  %v529_v26 = vld [vmem:[%s19723_s1 + $0xf78] sm:$0xff] }
 0x507   :  { %11413 = vmatprep.subr.bf16.mxu0 %v12931_v23  ;;  %v365_v2 = vld [vmem:[%s19723_s1 + $0xa58] sm:$0xff]  ;;  %v13035_v38 = vcombine.high %v525_v58, %v529_v26  ;;  %v13034_v3 = vcombine.low %v525_v58, %v529_v26 }
 0x508   :  { %11379 = vmatpush2.bf16.msra.mxu1 %v12906_v31  ;;  %v369_v7 = vld [vmem:[%s19723_s1 + $0xa78] sm:$0xff] }
 0x509   :  { %11380 = vmatprep.subr.bf16.mxu1 %v12899_v37  ;;  %v12875_v35 = vcombine.high %v365_v2, %v369_v7  ;;  %v517_v34 = vld [vmem:[%s19723_s1 + $0xf18] sm:$0xff]  ;;  %v12874_v50 = vcombine.low %v365_v2, %v369_v7 }
 0x50a   :  { %11414 = vmatpush1.bf16.msra.mxu0 %v12930_v1  ;;  %v521_v53 = vld [vmem:[%s19723_s1 + $0xf38] sm:$0xff] }
 0x50b   :  { %11415 = vmatprep.subr.bf16.mxu0 %v13051_v10  ;;  %v357_v52 = vld [vmem:[%s19723_s1 + $0xa18] sm:$0xff]  ;;  %v13027_v43 = vcombine.high %v517_v34, %v521_v53  ;;  %v13026_v37 = vcombine.low %v517_v34, %v521_v53 }
 0x50c   :  { %11381 = vmatpush2.bf16.msra.mxu1 %v12898_v20  ;;  %v361_v29 = vld [vmem:[%s19723_s1 + $0xa38] sm:$0xff] }
 0x50d   :  { %11382 = vmatprep.subr.bf16.mxu1 %v12891_v8  ;;  %v12867_v55 = vcombine.high %v357_v52, %v361_v29  ;;  %v509_v14 = vld [vmem:[%s19723_s1 + $0xed8] sm:$0xff]  ;;  %v12866_v40 = vcombine.low %v357_v52, %v361_v29 }
 0x50e   :  { %11416 = vmatpush2.bf16.msra.mxu0 %v13050_v15  ;;  %v513_v16 = vld [vmem:[%s19723_s1 + $0xef8] sm:$0xff] }
 0x50f   :  { %11417 = vmatprep.subr.bf16.mxu0 %v13043_v17  ;;  %v605_v31 = vld [vmem:[%s19723_s1 + $0x11d8] sm:$0xff]  ;;  %v13019_v47 = vcombine.high %v509_v14, %v513_v16  ;;  %v13018_v8 = vcombine.low %v509_v14, %v513_v16 }
 0x510   :  { %11383 = vmatpush2.bf16.msra.mxu1 %v12890_v39  ;;  %v609_v23 = vld [vmem:[%s19723_s1 + $0x11f8] sm:$0xff] }
 0x511   :  { %11384 = vmatprep.subr.bf16.mxu1 %v12883_v62  ;;  %v13115_v49 = vcombine.high %v605_v31, %v609_v23  ;;  %v501_v51 = vld [vmem:[%s19723_s1 + $0xe98] sm:$0xff]  ;;  %v13114_v30 = vcombine.low %v605_v31, %v609_v23 }
 0x512   :  { %11418 = vmatpush2.bf16.msra.mxu0 %v13042_v60  ;;  %v505_v1 = vld [vmem:[%s19723_s1 + $0xeb8] sm:$0xff] }
 0x513   :  { %11419 = vmatprep.subr.bf16.mxu0 %v13035_v38  ;;  %v597_v20 = vld [vmem:[%s19723_s1 + $0x1198] sm:$0xff]  ;;  %v13011_v36 = vcombine.high %v501_v51, %v505_v1  ;;  %v13010_v2 = vcombine.low %v501_v51, %v505_v1 }
 0x514   :  { %11385 = vmatpush2.bf16.msra.mxu1 %v12882_v61  ;;  %v601_v10 = vld [vmem:[%s19723_s1 + $0x11b8] sm:$0xff] }
 0x515   :  { %11386 = vmatprep.subr.bf16.mxu1 %v12875_v35  ;;  %v13107_v9 = vcombine.high %v597_v20, %v601_v10  ;;  %v493_v13 = vld [vmem:[%s19723_s1 + $0xe58] sm:$0xff]  ;;  %v13106_v60 = vcombine.low %v597_v20, %v601_v10 }
 0x516   :  { %11420 = vmatpush2.bf16.msra.mxu0 %v13034_v3  ;;  %v497_v15 = vld [vmem:[%s19723_s1 + $0xe78] sm:$0xff] }
 0x517   :  { %11421 = vmatprep.subr.bf16.mxu0 %v13027_v43  ;;  %v589_v17 = vld [vmem:[%s19723_s1 + $0x1158] sm:$0xff]  ;;  %v13003_v61 = vcombine.high %v493_v13, %v497_v15  ;;  %v13002_v43 = vcombine.low %v493_v13, %v497_v15 }
 0x518   :  { %11387 = vmatpush2.bf16.msra.mxu1 %v12874_v50  ;;  %v593_v62 = vld [vmem:[%s19723_s1 + $0x1178] sm:$0xff] }
 0x519   :  { %11388 = vmatprep.subr.bf16.mxu1 %v12867_v55  ;;  %v13099_v53 = vcombine.high %v589_v17, %v593_v62  ;;  %v581_v29 = vld [vmem:[%s19723_s1 + $0x1118] sm:$0xff]  ;;  %v13098_v14 = vcombine.low %v589_v17, %v593_v62 }
 0x51a   :  { %11422 = vmatpush2.bf16.msra.mxu0 %v13026_v37  ;;  %v733_v23 = vld [vmem:[%s19723_s1 + $0x15d8] sm:$0xff] }
 0x51b   :  { %11423 = vmatprep.subr.bf16.mxu0 %v13019_v47  ;;  %v737_v37 = vld [vmem:[%s19723_s1 + $0x15f8] sm:$0xff] }
 0x51c   :  { %11389 = vmatpush2.bf16.msra.mxu1 %v12866_v40  ;;  %v573_v40 = vld [vmem:[%s19723_s1 + $0x10d8] sm:$0xff]  ;;  %v13243_v1 = vcombine.high %v733_v23, %v737_v37 }
 0x51d   :  { %11440 = vmatprep.subr.bf16.mxu1 %v13115_v49  ;;  %v11105_v39 = vpop.f32.mrf.mxu0  ;;  %v577_v47 = vld [vmem:[%s19723_s1 + $0x10f8] sm:$0xff] }
 0x51e   :  { %v11106_v58 = vadd.f32 %v11105_v39, %v18480_v54  ;;  %11424 = vmatpush2.bf16.msra.mxu0 %v13018_v8  ;;  %v485_v54 = vld [vmem:[%s19723_s1 + $0xe18] sm:$0xff]  ;;  %v13083_v20 = vcombine.high %v573_v40, %v577_v47  ;;  %v13082_v13 = vcombine.low %v573_v40, %v577_v47 }
 0x51f   :  { %v11146_v26 = vpop.f32.mrf.mxu1  ;;  %11391 = vmatmul.mubr.bf16.vlgmr.msra.gmra.mxu1 %v14868_v48  ;;  %v11107_v7 = vpop.f32.mrf.mxu0  ;;  %11425 = vmatprep.subr.bf16.mxu0 %v13011_v36  ;;  %v489_v48 = vld [vmem:[%s19723_s1 + $0xe38] sm:$0xff] }
 0x520   :  { %11441 = vmatpush1.bf16.msra.mxu1 %v13114_v30  ;;  %v18682_v38 = vadd.f32 %v11146_v26, %v11106_v58  ;;  %v11108_v35 = vadd.f32 %v11107_v7, %v18496_v63  ;;  %11472 = vmatprep.mubr.bf16.mxu1 %v14883_v56  ;;  %v585_v63 = vld [vmem:[%s19723_s1 + $0x1138] sm:$0xff]  ;;  %v12995_v16 = vcombine.high %v485_v54, %v489_v48 }
 0x521   :  { %v11148_v34 = vpop.f32.mrf.mxu1  ;;  %11442 = vmatprep.subr.bf16.mxu1 %v13107_v9  ;;  %v11109_v52 = vpop.f32.mrf.mxu0  ;;  %v13091_v31 = vcombine.high %v581_v29, %v585_v63  ;;  %v12994_v49 = vcombine.low %v485_v54, %v489_v48  ;;  %v13090_v51 = vcombine.low %v581_v29, %v585_v63  ;;  %v725_v10 = vld [vmem:[%s19723_s1 + $0x1598] sm:$0xff]  ;;  %v13242_v9 = vcombine.low %v733_v23, %v737_v37 }
 0x522   :  { %v18698_v3 = vadd.f32 %v11148_v34, %v11108_v35  ;;  %11426 = vmatpush2.bf16.msra.mxu0 %v13010_v2  ;;  %v729_v8 = vld [vmem:[%s19723_s1 + $0x15b8] sm:$0xff] }
 0x523   :  { %v11150_v50 = vpop.f32.mrf.mxu1  ;;  %v11110_v55 = vpop.f32.mrf.mxu0  ;;  %11427 = vmatprep.subr.bf16.mxu0 %v13003_v61  ;;  %v565_v30 = vld [vmem:[%s19723_s1 + $0x1098] sm:$0xff]  ;;  %v13235_v15 = vcombine.high %v725_v10, %v729_v8  ;;  %v13234_v2 = vcombine.low %v725_v10, %v729_v8 }
 0x524   :  { %11443 = vmatpush1.bf16.msra.mxu1 %v13106_v60  ;;  %v569_v36 = vld [vmem:[%s19723_s1 + $0x10b8] sm:$0xff] }
 0x525   :  { %v11151_v56 = vpop.f32.mrf.mxu1  ;;  %11444 = vmatprep.subr.bf16.mxu1 %v13099_v53  ;;  %v13075_v39 = vcombine.high %v565_v30, %v569_v36  ;;  %v717_v17 = vld [vmem:[%s19723_s1 + $0x1558] sm:$0xff]  ;;  %v13074_v7 = vcombine.low %v565_v30, %v569_v36 }
 0x526   :  { %11428 = vmatpush2.bf16.msra.mxu0 %v13002_v43  ;;  %v721_v62 = vld [vmem:[%s19723_s1 + $0x1578] sm:$0xff] }
 0x527   :  { %11429 = vmatprep.subr.bf16.mxu0 %v12995_v16  ;;  %v557_v58 = vld [vmem:[%s19723_s1 + $0x1058] sm:$0xff]  ;;  %v13227_v60 = vcombine.high %v717_v17, %v721_v62  ;;  %v13226_v53 = vcombine.low %v717_v17, %v721_v62 }
 0x528   :  { %11445 = vmatpush1.bf16.msra.mxu1 %v13098_v14  ;;  %v561_v26 = vld [vmem:[%s19723_s1 + $0x1078] sm:$0xff] }
 0x529   :  { %11446 = vmatprep.subr.bf16.mxu1 %v13091_v31  ;;  %v13067_v61 = vcombine.high %v557_v58, %v561_v26  ;;  %v713_v35 = vld [vmem:[%s19723_s1 + $0x1538] sm:$0xff]  ;;  %v13066_v54 = vcombine.low %v557_v58, %v561_v26 }
 0x52a   :  { %11430 = vmatpush2.bf16.msra.mxu0 %v12994_v49  ;;  %v549_v34 = vld [vmem:[%s19723_s1 + $0x1018] sm:$0xff] }
 0x52b   :  { %11481 = vmatprep.subr.bf16.mxu0 %v13243_v1  ;;  %v701_v29 = vld [vmem:[%s19723_s1 + $0x14d8] sm:$0xff] }
 0x52c   :  { %11447 = vmatpush1.bf16.msra.mxu1 %v13090_v51  ;;  %v705_v63 = vld [vmem:[%s19723_s1 + $0x14f8] sm:$0xff] }
 0x52d   :  { %11448 = vmatprep.subr.bf16.mxu1 %v13083_v20  ;;  %11432 = vmatmul.mubr.bf16.vlgmr.msra.gmra.mxu0 %v14887_v57  ;;  %v709_v57 = vld [vmem:[%s19723_s1 + $0x1518] sm:$0xff]  ;;  %v13211_v16 = vcombine.high %v701_v29, %v705_v63  ;;  %v13210_v47 = vcombine.low %v701_v29, %v705_v63 }
 0x52e   :  { %11482 = vmatpush1.bf16.msra.mxu0 %v13242_v9  ;;  %11513 = vmatprep.mubr.bf16.mxu0 %v14904_v4  ;;  %v553_v4 = vld [vmem:[%s19723_s1 + $0x1038] sm:$0xff]  ;;  %v13219_v48 = vcombine.high %v709_v57, %v713_v35  ;;  %v13218_v55 = vcombine.low %v709_v57, %v713_v35 }
 0x52f   :  { %11483 = vmatprep.subr.bf16.mxu0 %v13235_v15  ;;  %v13059_v52 = vcombine.high %v549_v34, %v553_v4  ;;  %v669_v50 = vld [vmem:[%s19723_s1 + $0x13d8] sm:$0xff]  ;;  %v13058_v14 = vcombine.low %v549_v34, %v553_v4 }
 0x530   :  { %11449 = vmatpush1.bf16.msra.mxu1 %v13082_v13  ;;  %v673_v43 = vld [vmem:[%s19723_s1 + $0x13f8] sm:$0xff] }
 0x531   :  { %11450 = vmatprep.subr.bf16.mxu1 %v13075_v39  ;;  %v13179_v56 = vcombine.high %v669_v50, %v673_v43  ;;  %v693_v31 = vld [vmem:[%s19723_s1 + $0x1498] sm:$0xff]  ;;  %v13178_v49 = vcombine.low %v669_v50, %v673_v43 }
 0x532   :  { %11484 = vmatpush1.bf16.msra.mxu0 %v13234_v2  ;;  %v697_v23 = vld [vmem:[%s19723_s1 + $0x14b8] sm:$0xff] }
 0x533   :  { %11485 = vmatprep.subr.bf16.mxu0 %v13227_v60  ;;  %v661_v37 = vld [vmem:[%s19723_s1 + $0x1398] sm:$0xff]  ;;  %v13203_v51 = vcombine.high %v693_v31, %v697_v23  ;;  %v13202_v36 = vcombine.low %v693_v31, %v697_v23 }
 0x534   :  { %11451 = vmatpush1.bf16.msra.mxu1 %v13074_v7  ;;  %v665_v40 = vld [vmem:[%s19723_s1 + $0x13b8] sm:$0xff] }
 0x535   :  { %11452 = vmatprep.subr.bf16.mxu1 %v13067_v61  ;;  %v13171_v1 = vcombine.high %v661_v37, %v665_v40  ;;  %v685_v20 = vld [vmem:[%s19723_s1 + $0x1458] sm:$0xff]  ;;  %v13170_v9 = vcombine.low %v661_v37, %v665_v40 }
 0x536   :  { %11486 = vmatpush1.bf16.msra.mxu0 %v13226_v53  ;;  %v689_v10 = vld [vmem:[%s19723_s1 + $0x1478] sm:$0xff] }
 0x537   :  { %11487 = vmatprep.subr.bf16.mxu0 %v13219_v48  ;;  %v653_v8 = vld [vmem:[%s19723_s1 + $0x1358] sm:$0xff]  ;;  %v13195_v13 = vcombine.high %v685_v20, %v689_v10  ;;  %v13194_v26 = vcombine.low %v685_v20, %v689_v10 }
 0x538   :  { %11453 = vmatpush1.bf16.msra.mxu1 %v13066_v54  ;;  %v657_v30 = vld [vmem:[%s19723_s1 + $0x1378] sm:$0xff] }
 0x539   :  { %11454 = vmatprep.subr.bf16.mxu1 %v13059_v52  ;;  %v13163_v15 = vcombine.high %v653_v8, %v657_v30  ;;  %v677_v39 = vld [vmem:[%s19723_s1 + $0x1418] sm:$0xff]  ;;  %v13162_v2 = vcombine.low %v653_v8, %v657_v30 }
 0x53a   :  { %11488 = vmatpush1.bf16.msra.mxu0 %v13218_v55  ;;  %v681_v17 = vld [vmem:[%s19723_s1 + $0x1438] sm:$0xff] }
 0x53b   :  { %11489 = vmatprep.subr.bf16.mxu0 %v13211_v16  ;;  %v645_v62 = vld [vmem:[%s19723_s1 + $0x1318] sm:$0xff]  ;;  %v13187_v7 = vcombine.high %v677_v39, %v681_v17  ;;  %v13186_v4 = vcombine.low %v677_v39, %v681_v17 }
 0x53c   :  { %11455 = vmatpush1.bf16.msra.mxu1 %v13058_v14  ;;  %v649_v58 = vld [vmem:[%s19723_s1 + $0x1338] sm:$0xff] }
 0x53d   :  { %11456 = vmatprep.subr.bf16.mxu1 %v13179_v56  ;;  %v13155_v60 = vcombine.high %v645_v62, %v649_v58  ;;  %v797_v61 = vld [vmem:[%s19723_s1 + $0x17d8] sm:$0xff]  ;;  %v13154_v53 = vcombine.low %v645_v62, %v649_v58 }
 0x53e   :  { %11490 = vmatpush1.bf16.msra.mxu0 %v13210_v47  ;;  %v801_v57 = vld [vmem:[%s19723_s1 + $0x17f8] sm:$0xff] }
 0x53f   :  { %11491 = vmatprep.subr.bf16.mxu0 %v13203_v51  ;;  %v637_v35 = vld [vmem:[%s19723_s1 + $0x12d8] sm:$0xff]  ;;  %v13307_v54 = vcombine.high %v797_v61, %v801_v57  ;;  %v13306_v43 = vcombine.low %v797_v61, %v801_v57 }
 0x540   :  { %11457 = vmatpush2.bf16.msra.mxu1 %v13178_v49  ;;  %v641_v34 = vld [vmem:[%s19723_s1 + $0x12f8] sm:$0xff] }
 0x541   :  { %11458 = vmatprep.subr.bf16.mxu1 %v13171_v1  ;;  %v13147_v48 = vcombine.high %v637_v35, %v641_v34  ;;  %v789_v52 = vld [vmem:[%s19723_s1 + $0x1798] sm:$0xff]  ;;  %v13146_v55 = vcombine.low %v637_v35, %v641_v34 }
 0x542   :  { %11492 = vmatpush1.bf16.msra.mxu0 %v13202_v36  ;;  %v793_v29 = vld [vmem:[%s19723_s1 + $0x17b8] sm:$0xff] }
 0x543   :  { %11493 = vmatprep.subr.bf16.mxu0 %v13195_v13  ;;  %v629_v63 = vld [vmem:[%s19723_s1 + $0x1298] sm:$0xff]  ;;  %v13299_v14 = vcombine.high %v789_v52, %v793_v29  ;;  %v13298_v40 = vcombine.low %v789_v52, %v793_v29 }
 0x544   :  { %11459 = vmatpush2.bf16.msra.mxu1 %v13170_v9  ;;  %v633_v50 = vld [vmem:[%s19723_s1 + $0x12b8] sm:$0xff] }
 0x545   :  { %11460 = vmatprep.subr.bf16.mxu1 %v13163_v15  ;;  %v13139_v16 = vcombine.high %v629_v63, %v633_v50  ;;  %v781_v56 = vld [vmem:[%s19723_s1 + $0x1758] sm:$0xff]  ;;  %v13138_v47 = vcombine.low %v629_v63, %v633_v50 }
 0x546   :  { %11494 = vmatpush1.bf16.msra.mxu0 %v13194_v26  ;;  %v785_v31 = vld [vmem:[%s19723_s1 + $0x1778] sm:$0xff] }
 0x547   :  { %11495 = vmatprep.subr.bf16.mxu0 %v13187_v7  ;;  %v621_v23 = vld [vmem:[%s19723_s1 + $0x1258] sm:$0xff]  ;;  %v13291_v49 = vcombine.high %v781_v56, %v785_v31  ;;  %v13290_v30 = vcombine.low %v781_v56, %v785_v31 }
 0x548   :  { %11461 = vmatpush2.bf16.msra.mxu1 %v13162_v2  ;;  %v625_v37 = vld [vmem:[%s19723_s1 + $0x1278] sm:$0xff] }
 0x549   :  { %11462 = vmatprep.subr.bf16.mxu1 %v13155_v60  ;;  %v13131_v51 = vcombine.high %v621_v23, %v625_v37  ;;  %v773_v1 = vld [vmem:[%s19723_s1 + $0x1718] sm:$0xff]  ;;  %v13130_v36 = vcombine.low %v621_v23, %v625_v37 }
 0x54a   :  { %11496 = vmatpush1.bf16.msra.mxu0 %v13186_v4  ;;  %v777_v20 = vld [vmem:[%s19723_s1 + $0x1738] sm:$0xff] }
 0x54b   :  { %11497 = vmatprep.subr.bf16.mxu0 %v13307_v54  ;;  %v613_v10 = vld [vmem:[%s19723_s1 + $0x1218] sm:$0xff]  ;;  %v13283_v9 = vcombine.high %v773_v1, %v777_v20  ;;  %v13282_v58 = vcombine.low %v773_v1, %v777_v20 }
 0x54c   :  { %11463 = vmatpush2.bf16.msra.mxu1 %v13154_v53  ;;  %v617_v8 = vld [vmem:[%s19723_s1 + $0x1238] sm:$0xff] }
 0x54d   :  { %11464 = vmatprep.subr.bf16.mxu1 %v13147_v48  ;;  %v13123_v13 = vcombine.high %v613_v10, %v617_v8  ;;  %v765_v15 = vld [vmem:[%s19723_s1 + $0x16d8] sm:$0xff]  ;;  %v13122_v26 = vcombine.low %v613_v10, %v617_v8 }
 0x54e   :  { %11498 = vmatpush2.bf16.msra.mxu0 %v13306_v43  ;;  %v769_v39 = vld [vmem:[%s19723_s1 + $0x16f8] sm:$0xff] }
 0x54f   :  { %11499 = vmatprep.subr.bf16.mxu0 %v13299_v14  ;;  %v861_v17 = vld [vmem:[%s19723_s1 + $0x19d8] sm:$0xff]  ;;  %v13275_v2 = vcombine.high %v765_v15, %v769_v39  ;;  %v13274_v34 = vcombine.low %v765_v15, %v769_v39 }
 0x550   :  { %11465 = vmatpush2.bf16.msra.mxu1 %v13146_v55  ;;  %v865_v62 = vld [vmem:[%s19723_s1 + $0x19f8] sm:$0xff] }
 0x551   :  { %11466 = vmatprep.subr.bf16.mxu1 %v13139_v16  ;;  %v13371_v7 = vcombine.high %v861_v17, %v865_v62  ;;  %v757_v60 = vld [vmem:[%s19723_s1 + $0x1698] sm:$0xff]  ;;  %v13370_v4 = vcombine.low %v861_v17, %v865_v62 }
 0x552   :  { %11500 = vmatpush2.bf16.msra.mxu0 %v13298_v40  ;;  %v761_v61 = vld [vmem:[%s19723_s1 + $0x16b8] sm:$0xff] }
 0x553   :  { %11501 = vmatprep.subr.bf16.mxu0 %v13291_v49  ;;  %v853_v57 = vld [vmem:[%s19723_s1 + $0x1998] sm:$0xff]  ;;  %v13267_v53 = vcombine.high %v757_v60, %v761_v61  ;;  %v13266_v14 = vcombine.low %v757_v60, %v761_v61 }
 0x554   :  { %11467 = vmatpush2.bf16.msra.mxu1 %v13138_v47  ;;  %v857_v35 = vld [vmem:[%s19723_s1 + $0x19b8] sm:$0xff] }
 0x555   :  { %11468 = vmatprep.subr.bf16.mxu1 %v13131_v51  ;;  %v13363_v54 = vcombine.high %v853_v57, %v857_v35  ;;  %v749_v48 = vld [vmem:[%s19723_s1 + $0x1658] sm:$0xff]  ;;  %v13362_v56 = vcombine.low %v853_v57, %v857_v35 }
 0x556   :  { %11502 = vmatpush2.bf16.msra.mxu0 %v13290_v30  ;;  %v753_v52 = vld [vmem:[%s19723_s1 + $0x1678] sm:$0xff] }
 0x557   :  { %11503 = vmatprep.subr.bf16.mxu0 %v13283_v9  ;;  %v845_v63 = vld [vmem:[%s19723_s1 + $0x1958] sm:$0xff]  ;;  %v13259_v31 = vcombine.high %v749_v48, %v753_v52  ;;  %v13258_v10 = vcombine.low %v749_v48, %v753_v52 }
 0x558   :  { %11469 = vmatpush2.bf16.msra.mxu1 %v13130_v36  ;;  %v849_v50 = vld [vmem:[%s19723_s1 + $0x1978] sm:$0xff] }
 0x559   :  { %11470 = vmatprep.subr.bf16.mxu1 %v13123_v13  ;;  %v13355_v47 = vcombine.high %v845_v63, %v849_v50  ;;  %v837_v51 = vld [vmem:[%s19723_s1 + $0x1918] sm:$0xff]  ;;  %v13354_v30 = vcombine.low %v845_v63, %v849_v50 }
 0x55a   :  { %11504 = vmatpush2.bf16.msra.mxu0 %v13282_v58  ;;  %v989_v13 = vld [vmem:[%s19723_s1 + $0x1dd8] sm:$0xff] }
 0x55b   :  { %11505 = vmatprep.subr.bf16.mxu0 %v13275_v2  ;;  %v993_v15 = vld [vmem:[%s19723_s1 + $0x1df8] sm:$0xff] }
 0x55c   :  { %11471 = vmatpush2.bf16.msra.mxu1 %v13122_v26  ;;  %v829_v39 = vld [vmem:[%s19723_s1 + $0x18d8] sm:$0xff]  ;;  %v13499_v26 = vcombine.high %v989_v13, %v993_v15  ;;  %v13498_v35 = vcombine.low %v989_v13, %v993_v15 }
 0x55d   :  { %11522 = vmatprep.subr.bf16.mxu1 %v13371_v7  ;;  %v11187_v29 = vpop.f32.mrf.mxu0  ;;  %v833_v17 = vld [vmem:[%s19723_s1 + $0x18f8] sm:$0xff] }
 0x55e   :  { %v11188_v43 = vadd.f32 %v11187_v29, %v18682_v38  ;;  %11506 = vmatpush2.bf16.msra.mxu0 %v13274_v34  ;;  %v741_v38 = vld [vmem:[%s19723_s1 + $0x1618] sm:$0xff]  ;;  %v13339_v2 = vcombine.high %v829_v39, %v833_v17  ;;  %v13338_v34 = vcombine.low %v829_v39, %v833_v17 }
 0x55f   :  { %v11228_v55 = vpop.f32.mrf.mxu1  ;;  %11473 = vmatmul.mubr.bf16.vlgmr.msra.gmra.mxu1 %v15086_v22  ;;  %v11189_v16 = vpop.f32.mrf.mxu0  ;;  %11507 = vmatprep.subr.bf16.mxu0 %v13267_v53  ;;  %v745_v22 = vld [vmem:[%s19723_s1 + $0x1638] sm:$0xff] }
 0x560   :  { %11523 = vmatpush1.bf16.msra.mxu1 %v13370_v4  ;;  %v11229_v23 = vadd.f32 %v11228_v55, %v11188_v43  ;;  %v11190_v37 = vadd.f32 %v11189_v16, %v18698_v3  ;;  %11554 = vmatprep.mubr.bf16.mxu1 %v15101_v32  ;;  %v841_v3 = vld [vmem:[%s19723_s1 + $0x1938] sm:$0xff]  ;;  %v13251_v36 = vcombine.high %v741_v38, %v745_v22 }
 0x561   :  { %v11230_v40 = vpop.f32.mrf.mxu1  ;;  %11524 = vmatprep.subr.bf16.mxu1 %v13363_v54  ;;  %v11191_v49 = vpop.f32.mrf.mxu0  ;;  %v13347_v32 = vcombine.high %v837_v51, %v841_v3  ;;  %v13250_v62 = vcombine.low %v741_v38, %v745_v22  ;;  %v13346_v58 = vcombine.low %v837_v51, %v841_v3  ;;  %v981_v7 = vld [vmem:[%s19723_s1 + $0x1d98] sm:$0xff] }
 0x562   :  { %v11231_v1 = vadd.f32 %v11230_v40, %v11190_v37  ;;  %11508 = vmatpush2.bf16.msra.mxu0 %v13266_v14  ;;  %v985_v60 = vld [vmem:[%s19723_s1 + $0x1db8] sm:$0xff] }
 0x563   :  { %v11232_v20 = vpop.f32.mrf.mxu1  ;;  %v11192_v8 = vpop.f32.mrf.mxu0  ;;  %11509 = vmatprep.subr.bf16.mxu0 %v13259_v31  ;;  %v821_v61 = vld [vmem:[%s19723_s1 + $0x1898] sm:$0xff]  ;;  %v13491_v4 = vcombine.high %v981_v7, %v985_v60  ;;  %v13490_v43 = vcombine.low %v981_v7, %v985_v60 }
 0x564   :  { %11525 = vmatpush1.bf16.msra.mxu1 %v13362_v56  ;;  %v825_v57 = vld [vmem:[%s19723_s1 + $0x18b8] sm:$0xff] }
 0x565   :  { %v11233_v9 = vpop.f32.mrf.mxu1  ;;  %11526 = vmatprep.subr.bf16.mxu1 %v13355_v47  ;;  %v13331_v53 = vcombine.high %v821_v61, %v825_v57  ;;  %v973_v54 = vld [vmem:[%s19723_s1 + $0x1d58] sm:$0xff]  ;;  %v13330_v14 = vcombine.low %v821_v61, %v825_v57 }
 0x566   :  { %11510 = vmatpush2.bf16.msra.mxu0 %v13258_v10  ;;  %v977_v48 = vld [vmem:[%s19723_s1 + $0x1d78] sm:$0xff] }
 0x567   :  { %11511 = vmatprep.subr.bf16.mxu0 %v13251_v36  ;;  %v813_v29 = vld [vmem:[%s19723_s1 + $0x1858] sm:$0xff]  ;;  %v13483_v16 = vcombine.high %v973_v54, %v977_v48  ;;  %v13482_v47 = vcombine.low %v973_v54, %v977_v48 }
 0x568   :  { %11527 = vmatpush1.bf16.msra.mxu1 %v13354_v30  ;;  %v817_v63 = vld [vmem:[%s19723_s1 + $0x1878] sm:$0xff] }
 0x569   :  { %11528 = vmatprep.subr.bf16.mxu1 %v13347_v32  ;;  %v13323_v56 = vcombine.high %v813_v29, %v817_v63  ;;  %v965_v31 = vld [vmem:[%s19723_s1 + $0x1d18] sm:$0xff]  ;;  %v13322_v22 = vcombine.low %v813_v29, %v817_v63 }
 0x56a   :  { %11512 = vmatpush2.bf16.msra.mxu0 %v13250_v62  ;;  %v809_v40 = vld [vmem:[%s19723_s1 + $0x1838] sm:$0xff] }
 0x56b   :  { %11563 = vmatprep.subr.bf16.mxu0 %v13499_v26  ;;  %v957_v3 = vld [vmem:[%s19723_s1 + $0x1cd8] sm:$0xff] }
 0x56c   :  { %11529 = vmatpush1.bf16.msra.mxu1 %v13346_v58  ;;  %v925_v20 = vld [vmem:[%s19723_s1 + $0x1bd8] sm:$0xff] }
 0x56d   :  { %11530 = vmatprep.subr.bf16.mxu1 %v13339_v2  ;;  %v11269_v52 = vpop.f32.mrf.mxu0  ;;  %11514 = vmatmul.mubr.bf16.vlgmr.msra.gmra.mxu0 %v15105_v33  ;;  %v929_v10 = vld [vmem:[%s19723_s1 + $0x1bf8] sm:$0xff] }
 0x56e   :  { %v18935_v50 = vadd.f32 %v11269_v52, %v11229_v23  ;;  %11564 = vmatpush1.bf16.msra.mxu0 %v13498_v35  ;;  %11595 = vmatprep.mubr.bf16.mxu0 %v15122_v45  ;;  %v969_v23 = vld [vmem:[%s19723_s1 + $0x1d38] sm:$0xff]  ;;  %v13435_v9 = vcombine.high %v925_v20, %v929_v10  ;;  %v13434_v62 = vcombine.low %v925_v20, %v929_v10 }
 0x56f   :  { %v11271_v55 = vpop.f32.mrf.mxu0  ;;  %11565 = vmatprep.subr.bf16.mxu0 %v13491_v4  ;;  %v805_v45 = vld [vmem:[%s19723_s1 + $0x1818] sm:$0xff]  ;;  %v13475_v49 = vcombine.high %v965_v31, %v969_v23  ;;  %v13474_v8 = vcombine.low %v965_v31, %v969_v23 }
 0x570   :  { %11531 = vmatpush1.bf16.msra.mxu1 %v13338_v34  ;;  %v18938_v33 = vadd.f32 %v11271_v55, %v11231_v1  ;;  %v13315_v51 = vcombine.high %v805_v45, %v809_v40  ;;  %v961_v1 = vld [vmem:[%s19723_s1 + $0x1cf8] sm:$0xff]  ;;  %v13314_v30 = vcombine.low %v805_v45, %v809_v40 }
 0x571   :  { %11532 = vmatprep.subr.bf16.mxu1 %v13331_v53  ;;  %v11273_v37 = vpop.f32.mrf.mxu0  ;;  %v13467_v36 = vcombine.high %v957_v3, %v961_v1  ;;  %v949_v32 = vld [vmem:[%s19723_s1 + $0x1c98] sm:$0xff]  ;;  %v13466_v17 = vcombine.low %v957_v3, %v961_v1 }
 0x572   :  { %11566 = vmatpush1.bf16.msra.mxu0 %v13490_v43  ;;  %v953_v13 = vld [vmem:[%s19723_s1 + $0x1cb8] sm:$0xff] }
 0x573   :  { %v11274_v38 = vpop.f32.mrf.mxu0  ;;  %11567 = vmatprep.subr.bf16.mxu0 %v13483_v16  ;;  %v917_v15 = vld [vmem:[%s19723_s1 + $0x1b98] sm:$0xff]  ;;  %v13459_v58 = vcombine.high %v949_v32, %v953_v13  ;;  %v13458_v57 = vcombine.low %v949_v32, %v953_v13 }
 0x574   :  { %11533 = vmatpush1.bf16.msra.mxu1 %v13330_v14  ;;  %v921_v39 = vld [vmem:[%s19723_s1 + $0x1bb8] sm:$0xff] }
 0x575   :  { %11534 = vmatprep.subr.bf16.mxu1 %v13323_v56  ;;  %v13427_v26 = vcombine.high %v917_v15, %v921_v39  ;;  %v941_v2 = vld [vmem:[%s19723_s1 + $0x1c58] sm:$0xff]  ;;  %v13426_v35 = vcombine.low %v917_v15, %v921_v39 }
 0x576   :  { %11568 = vmatpush1.bf16.msra.mxu0 %v13482_v47  ;;  %v945_v7 = vld [vmem:[%s19723_s1 + $0x1c78] sm:$0xff] }
 0x577   :  { %11569 = vmatprep.subr.bf16.mxu0 %v13475_v49  ;;  %v909_v60 = vld [vmem:[%s19723_s1 + $0x1b58] sm:$0xff]  ;;  %v13451_v34 = vcombine.high %v941_v2, %v945_v7  ;;  %v13450_v29 = vcombine.low %v941_v2, %v945_v7 }
 0x578   :  { %11535 = vmatpush1.bf16.msra.mxu1 %v13322_v22  ;;  %v913_v61 = vld [vmem:[%s19723_s1 + $0x1b78] sm:$0xff] }
 0x579   :  { %11536 = vmatprep.subr.bf16.mxu1 %v13315_v51  ;;  %v13419_v4 = vcombine.high %v909_v60, %v913_v61  ;;  %v933_v53 = vld [vmem:[%s19723_s1 + $0x1c18] sm:$0xff]  ;;  %v13418_v63 = vcombine.low %v909_v60, %v913_v61 }
 0x57a   :  { %11570 = vmatpush1.bf16.msra.mxu0 %v13474_v8  ;;  %v937_v54 = vld [vmem:[%s19723_s1 + $0x1c38] sm:$0xff] }
 0x57b   :  { %11571 = vmatprep.subr.bf16.mxu0 %v13467_v36  ;;  %v901_v48 = vld [vmem:[%s19723_s1 + $0x1b18] sm:$0xff]  ;;  %v13443_v43 = vcombine.high %v933_v53, %v937_v54  ;;  %v13442_v23 = vcombine.low %v933_v53, %v937_v54 }
 0x57c   :  { %11537 = vmatpush1.bf16.msra.mxu1 %v13314_v30  ;;  %v905_v52 = vld [vmem:[%s19723_s1 + $0x1b38] sm:$0xff] }
 0x57d   :  { %11538 = vmatprep.subr.bf16.mxu1 %v13435_v9  ;;  %v13411_v55 = vcombine.high %v901_v48, %v905_v52  ;;  %v1053_v14 = vld [vmem:[%s19723_s1 + $0x1fd8] sm:$0xff]  ;;  %v13410_v37 = vcombine.low %v901_v48, %v905_v52 }
 0x57e   :  { %11572 = vmatpush1.bf16.msra.mxu0 %v13466_v17  ;;  %v1057_v16 = vld [vmem:[%s19723_s1 + $0x1ff8] sm:$0xff] }
 0x57f   :  { %11573 = vmatprep.subr.bf16.mxu0 %v13459_v58  ;;  %v893_v56 = vld [vmem:[%s19723_s1 + $0x1ad8] sm:$0xff]  ;;  %v13563_v45 = vcombine.high %v1053_v14, %v1057_v16  ;;  %v13562_v51 = vcombine.low %v1053_v14, %v1057_v16 }
 0x580   :  { %11539 = vmatpush2.bf16.msra.mxu1 %v13434_v62  ;;  %v897_v31 = vld [vmem:[%s19723_s1 + $0x1af8] sm:$0xff] }
 0x581   :  { %11540 = vmatprep.subr.bf16.mxu1 %v13427_v26  ;;  %v13403_v40 = vcombine.high %v893_v56, %v897_v31  ;;  %v1045_v47 = vld [vmem:[%s19723_s1 + $0x1f98] sm:$0xff]  ;;  %v13402_v3 = vcombine.low %v893_v56, %v897_v31 }
 0x582   :  { %11574 = vmatpush1.bf16.msra.mxu0 %v13458_v57  ;;  %v1049_v38 = vld [vmem:[%s19723_s1 + $0x1fb8] sm:$0xff] }
 0x583   :  { %11575 = vmatprep.subr.bf16.mxu0 %v13451_v34  ;;  %v885_v22 = vld [vmem:[%s19723_s1 + $0x1a98] sm:$0xff]  ;;  %v13555_v1 = vcombine.high %v1045_v47, %v1049_v38  ;;  %v13554_v9 = vcombine.low %v1045_v47, %v1049_v38 }
 0x584   :  { %11541 = vmatpush2.bf16.msra.mxu1 %v13426_v35  ;;  %v889_v49 = vld [vmem:[%s19723_s1 + $0x1ab8] sm:$0xff] }
 0x585   :  { %11542 = vmatprep.subr.bf16.mxu1 %v13419_v4  ;;  %v13395_v20 = vcombine.high %v885_v22, %v889_v49  ;;  %v1037_v10 = vld [vmem:[%s19723_s1 + $0x1f58] sm:$0xff]  ;;  %v13394_v32 = vcombine.low %v885_v22, %v889_v49 }
 0x586   :  { %11576 = vmatpush1.bf16.msra.mxu0 %v13450_v29  ;;  %v1041_v8 = vld [vmem:[%s19723_s1 + $0x1f78] sm:$0xff] }
 0x587   :  { %11577 = vmatprep.subr.bf16.mxu0 %v13443_v43  ;;  %v877_v30 = vld [vmem:[%s19723_s1 + $0x1a58] sm:$0xff]  ;;  %v13547_v13 = vcombine.high %v1037_v10, %v1041_v8  ;;  %v13546_v26 = vcombine.low %v1037_v10, %v1041_v8 }
 0x588   :  { %11543 = vmatpush2.bf16.msra.mxu1 %v13418_v63  ;;  %v881_v36 = vld [vmem:[%s19723_s1 + $0x1a78] sm:$0xff] }
 0x589   :  { %11544 = vmatprep.subr.bf16.mxu1 %v13411_v55  ;;  %v13387_v15 = vcombine.high %v877_v30, %v881_v36  ;;  %v1029_v39 = vld [vmem:[%s19723_s1 + $0x1f18] sm:$0xff]  ;;  %v13386_v2 = vcombine.low %v877_v30, %v881_v36 }
 0x58a   :  { %11578 = vmatpush1.bf16.msra.mxu0 %v13442_v23  ;;  %v1033_v17 = vld [vmem:[%s19723_s1 + $0x1f38] sm:$0xff] }
 0x58b   :  { %11579 = vmatprep.subr.bf16.mxu0 %v13563_v45  ;;  %v869_v62 = vld [vmem:[%s19723_s1 + $0x1a18] sm:$0xff]  ;;  %v13539_v7 = vcombine.high %v1029_v39, %v1033_v17  ;;  %v13538_v4 = vcombine.low %v1029_v39, %v1033_v17 }
 0x58c   :  { %11545 = vmatpush2.bf16.msra.mxu1 %v13410_v37  ;;  %v873_v58 = vld [vmem:[%s19723_s1 + $0x1a38] sm:$0xff] }
 0x58d   :  { %11546 = vmatprep.subr.bf16.mxu1 %v13403_v40  ;;  %v13379_v60 = vcombine.high %v869_v62, %v873_v58  ;;  %v1021_v61 = vld [vmem:[%s19723_s1 + $0x1ed8] sm:$0xff]  ;;  %v13378_v53 = vcombine.low %v869_v62, %v873_v58  ;;  %v1634_v62 = vsub.s32 7, %v14474_v44 }
 0x58e   :  { %11580 = vmatpush2.bf16.msra.mxu0 %v13562_v51  ;;  %v1025_v57 = vld [vmem:[%s19723_s1 + $0x1ef8] sm:$0xff] }
 0x58f   :  { %11581 = vmatprep.subr.bf16.mxu0 %v13555_v1  ;;  %v1117_v35 = vld [vmem:[%s19723_s1 + $0x21d8] sm:$0xff]  ;;  %v13531_v54 = vcombine.high %v1021_v61, %v1025_v57  ;;  %v13530_v55 = vcombine.low %v1021_v61, %v1025_v57 }
 0x590   :  { %11547 = vmatpush2.bf16.msra.mxu1 %v13402_v3  ;;  %v1121_v34 = vld [vmem:[%s19723_s1 + $0x21f8] sm:$0xff] }
 0x591   :  { %11548 = vmatprep.subr.bf16.mxu1 %v13395_v20  ;;  %v13627_v48 = vcombine.high %v1117_v35, %v1121_v34  ;;  %v1013_v52 = vld [vmem:[%s19723_s1 + $0x1e98] sm:$0xff]  ;;  %v13626_v14 = vcombine.low %v1117_v35, %v1121_v34 }
 0x592   :  { %11582 = vmatpush2.bf16.msra.mxu0 %v13554_v9  ;;  %v1017_v29 = vld [vmem:[%s19723_s1 + $0x1eb8] sm:$0xff]  ;;  %v1630_v9 = vsub.s32 6, %v14474_v44 }
 0x593   :  { %11583 = vmatprep.subr.bf16.mxu0 %v13547_v13  ;;  %v1109_v63 = vld [vmem:[%s19723_s1 + $0x2198] sm:$0xff]  ;;  %v13523_v16 = vcombine.high %v1013_v52, %v1017_v29  ;;  %v13522_v47 = vcombine.low %v1013_v52, %v1017_v29 }
 0x594   :  { %11549 = vmatpush2.bf16.msra.mxu1 %v13394_v32  ;;  %v1113_v43 = vld [vmem:[%s19723_s1 + $0x21b8] sm:$0xff] }
 0x595   :  { %11550 = vmatprep.subr.bf16.mxu1 %v13387_v15  ;;  %v13619_v56 = vcombine.high %v1109_v63, %v1113_v43  ;;  %v1005_v31 = vld [vmem:[%s19723_s1 + $0x1e58] sm:$0xff]  ;;  %v13618_v38 = vcombine.low %v1109_v63, %v1113_v43 }
 0x596   :  { %11584 = vmatpush2.bf16.msra.mxu0 %v13546_v26  ;;  %v1009_v23 = vld [vmem:[%s19723_s1 + $0x1e78] sm:$0xff] }
 0x597   :  { %11585 = vmatprep.subr.bf16.mxu0 %v13539_v7  ;;  %v1101_v37 = vld [vmem:[%s19723_s1 + $0x2158] sm:$0xff]  ;;  %v13515_v22 = vcombine.high %v1005_v31, %v1009_v23  ;;  %v13514_v8 = vcombine.low %v1005_v31, %v1009_v23  ;;  %v14339_v7 = vld [vmem:[%s19724_s2] sm:$0xff] }
 0x598   :  { %11551 = vmatpush2.bf16.msra.mxu1 %v13386_v2  ;;  %v1105_v45 = vld [vmem:[%s19723_s1 + $0x2178] sm:$0xff] }
 0x599   :  { %11552 = vmatprep.subr.bf16.mxu1 %v13379_v60  ;;  %v13611_v51 = vcombine.high %v1101_v37, %v1105_v45  ;;  %v997_v3 = vld [vmem:[%s19723_s1 + $0x1e18] sm:$0xff]  ;;  %v13610_v30 = vcombine.low %v1101_v37, %v1105_v45  ;;  %v1631_v60 = vrot.slane %v14339_v7, %v1630_v9 }
 0x59a   :  { %11586 = vmatpush2.bf16.msra.mxu0 %v13538_v4  ;;  %v1001_v1 = vld [vmem:[%s19723_s1 + $0x1e38] sm:$0xff]  ;;  %v1635_v4 = vrot.slane %v14339_v7, %v1634_v62 }
 0x59b   :  { %11587 = vmatprep.subr.bf16.mxu0 %v13531_v54  ;;  %v1097_v20 = vld [vmem:[%s19723_s1 + $0x2138] sm:$0xff]  ;;  %v13507_v36 = vcombine.high %v997_v3, %v1001_v1  ;;  %v13506_v58 = vcombine.low %v997_v3, %v1001_v1 }
 0x59c   :  { %11553 = vmatpush2.bf16.msra.mxu1 %v13378_v53  ;;  %v1245_v13 = vld [vmem:[%s19723_s1 + $0x25d8] sm:$0xff] }
 0x59d   :  { %11604 = vmatprep.subr.bf16.mxu1 %v13627_v48  ;;  %v1249_v15 = vld [vmem:[%s19723_s1 + $0x25f8] sm:$0xff] }
 0x59e   :  { %11588 = vmatpush2.bf16.msra.mxu0 %v13530_v55  ;;  %v1085_v39 = vld [vmem:[%s19723_s1 + $0x20d8] sm:$0xff]  ;;  %v13755_v2 = vcombine.high %v1245_v13, %v1249_v15  ;;  %v13754_v53 = vcombine.low %v1245_v13, %v1249_v15 }
 0x59f   :  { %v11310_v40 = vpop.f32.mrf.mxu1  ;;  %11555 = vmatmul.mubr.bf16.vlgmr.msra.gmra.mxu1 %v15309_v12  ;;  %11589 = vmatprep.subr.bf16.mxu0 %v13523_v16  ;;  %v1093_v12 = vld [vmem:[%s19723_s1 + $0x2118] sm:$0xff] }
 0x5a0   :  { %11605 = vmatpush1.bf16.msra.mxu1 %v13626_v14  ;;  %11636 = vmatprep.mubr.bf16.mxu1 %v15328_v24  ;;  %v13603_v24 = vcombine.high %v1093_v12, %v1097_v20  ;;  %v1089_v17 = vld [vmem:[%s19723_s1 + $0x20f8] sm:$0xff]  ;;  %v13602_v26 = vcombine.low %v1093_v12, %v1097_v20  ;;  %v11311_v52 = vadd.f32 %v11310_v40, %v1631_v60 }
 0x5a1   :  { %v11312_v49 = vpop.f32.mrf.mxu1  ;;  %11606 = vmatprep.subr.bf16.mxu1 %v13619_v56  ;;  %v13595_v61 = vcombine.high %v1085_v39, %v1089_v17  ;;  %v1237_v57 = vld [vmem:[%s19723_s1 + $0x2598] sm:$0xff]  ;;  %v13594_v54 = vcombine.low %v1085_v39, %v1089_v17 }
 0x5a2   :  { %11590 = vmatpush2.bf16.msra.mxu0 %v13522_v47  ;;  %v1241_v44 = vld [vmem:[%s19723_s1 + $0x25b8] sm:$0xff]  ;;  %v11313_v56 = vadd.f32 %v11312_v49, %v1635_v4 }
 0x5a3   :  { %v11314_v10 = vpop.f32.mrf.mxu1  ;;  %11591 = vmatprep.subr.bf16.mxu0 %v13515_v22  ;;  %v1077_v35 = vld [vmem:[%s19723_s1 + $0x2098] sm:$0xff]  ;;  %v13747_v48 = vcombine.high %v1237_v57, %v1241_v44  ;;  %v13746_v23 = vcombine.low %v1237_v57, %v1241_v44 }
 0x5a4   :  { %11607 = vmatpush1.bf16.msra.mxu1 %v13618_v38  ;;  %v1081_v34 = vld [vmem:[%s19723_s1 + $0x20b8] sm:$0xff] }
 0x5a5   :  { %v11315_v32 = vpop.f32.mrf.mxu1  ;;  %11608 = vmatprep.subr.bf16.mxu1 %v13611_v51  ;;  %v13587_v29 = vcombine.high %v1077_v35, %v1081_v34  ;;  %v1229_v63 = vld [vmem:[%s19723_s1 + $0x2558] sm:$0xff]  ;;  %v13586_v45 = vcombine.low %v1077_v35, %v1081_v34 }
 0x5a6   :  { %11592 = vmatpush2.bf16.msra.mxu0 %v13514_v8  ;;  %v1233_v43 = vld [vmem:[%s19723_s1 + $0x2578] sm:$0xff] }
 0x5a7   :  { %11593 = vmatprep.subr.bf16.mxu0 %v13507_v36  ;;  %v1069_v14 = vld [vmem:[%s19723_s1 + $0x2058] sm:$0xff]  ;;  %v13738_v3 = vcombine.low %v1229_v63, %v1233_v43 }
 0x5a8   :  { %11609 = vmatpush1.bf16.msra.mxu1 %v13610_v30  ;;  %v1073_v16 = vld [vmem:[%s19723_s1 + $0x2078] sm:$0xff] }
 0x5a9   :  { %11610 = vmatprep.subr.bf16.mxu1 %v13603_v24  ;;  %v13579_v47 = vcombine.high %v1069_v14, %v1073_v16  ;;  %v1221_v38 = vld [vmem:[%s19723_s1 + $0x2518] sm:$0xff]  ;;  %v13578_v12 = vcombine.low %v1069_v14, %v1073_v16 }
 0x5aa   :  { %11594 = vmatpush2.bf16.msra.mxu0 %v13506_v58  ;;  %v1225_v22 = vld [vmem:[%s19723_s1 + $0x2538] sm:$0xff] }
 0x5ab   :  { %11645 = vmatprep.subr.bf16.mxu0 %v13755_v2  ;;  %v1065_v51 = vld [vmem:[%s19723_s1 + $0x2038] sm:$0xff]  ;;  %v13731_v20 = vcombine.high %v1221_v38, %v1225_v22  ;;  %v13730_v32 = vcombine.low %v1221_v38, %v1225_v22 }
 0x5ac   :  { %11611 = vmatpush1.bf16.msra.mxu1 %v13602_v26  ;;  %v1213_v8 = vld [vmem:[%s19723_s1 + $0x24d8] sm:$0xff] }
 0x5ad   :  { %11612 = vmatprep.subr.bf16.mxu1 %v13595_v61  ;;  %v11351_v55 = vpop.f32.mrf.mxu0  ;;  %11596 = vmatmul.mubr.bf16.vlgmr.msra.gmra.mxu0 %v15332_v27  ;;  %v13739_v27 = vcombine.high %v1229_v63, %v1233_v43  ;;  %v1217_v30 = vld [vmem:[%s19723_s1 + $0x24f8] sm:$0xff] }
 0x5ae   :  { %v19140_v31 = vadd.f32 %v11351_v55, %v11311_v52  ;;  %11646 = vmatpush1.bf16.msra.mxu0 %v13754_v53  ;;  %11677 = vmatprep.mubr.bf16.mxu0 %v15349_v42  ;;  %v1061_v42 = vld [vmem:[%s19723_s1 + $0x2018] sm:$0xff]  ;;  %v13723_v13 = vcombine.high %v1213_v8, %v1217_v30  ;;  %v13722_v26 = vcombine.low %v1213_v8, %v1217_v30 }
 0x5af   :  { %v11353_v37 = vpop.f32.mrf.mxu0  ;;  %11647 = vmatprep.subr.bf16.mxu0 %v13747_v48  ;;  %v13571_v10 = vcombine.high %v1061_v42, %v1065_v51  ;;  %v1181_v36 = vld [vmem:[%s19723_s1 + $0x23d8] sm:$0xff]  ;;  %v13570_v24 = vcombine.low %v1061_v42, %v1065_v51 }
 0x5b0   :  { %11613 = vmatpush1.bf16.msra.mxu1 %v13594_v54  ;;  %v19143_v40 = vadd.f32 %v11353_v37, %v11313_v56  ;;  %v1185_v9 = vld [vmem:[%s19723_s1 + $0x23f8] sm:$0xff] }
 0x5b1   :  { %11614 = vmatprep.subr.bf16.mxu1 %v13587_v29  ;;  %v11355_v49 = vpop.f32.mrf.mxu0  ;;  %v13691_v15 = vcombine.high %v1181_v36, %v1185_v9  ;;  %v1205_v39 = vld [vmem:[%s19723_s1 + $0x2498] sm:$0xff]  ;;  %v13690_v2 = vcombine.low %v1181_v36, %v1185_v9 }
 0x5b2   :  { %11648 = vmatpush1.bf16.msra.mxu0 %v13746_v23  ;;  %v1209_v17 = vld [vmem:[%s19723_s1 + $0x24b8] sm:$0xff] }
 0x5b3   :  { %v11356_v1 = vpop.f32.mrf.mxu0  ;;  %11649 = vmatprep.subr.bf16.mxu0 %v13739_v27  ;;  %v1173_v62 = vld [vmem:[%s19723_s1 + $0x2398] sm:$0xff]  ;;  %v13715_v7 = vcombine.high %v1205_v39, %v1209_v17  ;;  %v13714_v34 = vcombine.low %v1205_v39, %v1209_v17 }
 0x5b4   :  { %11615 = vmatpush1.bf16.msra.mxu1 %v13586_v45  ;;  %v1177_v58 = vld [vmem:[%s19723_s1 + $0x23b8] sm:$0xff] }
 0x5b5   :  { %11616 = vmatprep.subr.bf16.mxu1 %v13579_v47  ;;  %v13683_v60 = vcombine.high %v1173_v62, %v1177_v58  ;;  %v1197_v61 = vld [vmem:[%s19723_s1 + $0x2458] sm:$0xff]  ;;  %v13682_v4 = vcombine.low %v1173_v62, %v1177_v58 }
 0x5b6   :  { %11650 = vmatpush1.bf16.msra.mxu0 %v13738_v3  ;;  %v1201_v57 = vld [vmem:[%s19723_s1 + $0x2478] sm:$0xff] }
 0x5b7   :  { %11651 = vmatprep.subr.bf16.mxu0 %v13731_v20  ;;  %v1165_v44 = vld [vmem:[%s19723_s1 + $0x2358] sm:$0xff]  ;;  %v13707_v53 = vcombine.high %v1197_v61, %v1201_v57  ;;  %v13706_v43 = vcombine.low %v1197_v61, %v1201_v57 }
 0x5b8   :  { %11617 = vmatpush1.bf16.msra.mxu1 %v13578_v12  ;;  %v1169_v35 = vld [vmem:[%s19723_s1 + $0x2378] sm:$0xff] }
 0x5b9   :  { %11618 = vmatprep.subr.bf16.mxu1 %v13571_v10  ;;  %v13675_v54 = vcombine.high %v1165_v44, %v1169_v35  ;;  %v1189_v48 = vld [vmem:[%s19723_s1 + $0x2418] sm:$0xff]  ;;  %v13674_v55 = vcombine.low %v1165_v44, %v1169_v35 }
 0x5ba   :  { %11652 = vmatpush1.bf16.msra.mxu0 %v13730_v32  ;;  %v1193_v52 = vld [vmem:[%s19723_s1 + $0x2438] sm:$0xff] }
 0x5bb   :  { %11653 = vmatprep.subr.bf16.mxu0 %v13723_v13  ;;  %v1157_v29 = vld [vmem:[%s19723_s1 + $0x2318] sm:$0xff]  ;;  %v13699_v14 = vcombine.high %v1189_v48, %v1193_v52  ;;  %v13698_v27 = vcombine.low %v1189_v48, %v1193_v52 }
 0x5bc   :  { %11619 = vmatpush1.bf16.msra.mxu1 %v13570_v24  ;;  %v1161_v63 = vld [vmem:[%s19723_s1 + $0x2338] sm:$0xff] }
 0x5bd   :  { %11620 = vmatprep.subr.bf16.mxu1 %v13691_v15  ;;  %v13667_v16 = vcombine.high %v1157_v29, %v1161_v63  ;;  %v1309_v56 = vld [vmem:[%s19723_s1 + $0x27d8] sm:$0xff]  ;;  %v13666_v47 = vcombine.low %v1157_v29, %v1161_v63 }
 0x5be   :  { %11654 = vmatpush1.bf16.msra.mxu0 %v13722_v26  ;;  %v1313_v23 = vld [vmem:[%s19723_s1 + $0x27f8] sm:$0xff] }
 0x5bf   :  { %11655 = vmatprep.subr.bf16.mxu0 %v13715_v7  ;;  %v1149_v37 = vld [vmem:[%s19723_s1 + $0x22d8] sm:$0xff]  ;;  %v13819_v38 = vcombine.high %v1309_v56, %v1313_v23  ;;  %v13818_v1 = vcombine.low %v1309_v56, %v1313_v23 }
 0x5c0   :  { %11621 = vmatpush2.bf16.msra.mxu1 %v13690_v2  ;;  %v1153_v45 = vld [vmem:[%s19723_s1 + $0x22f8] sm:$0xff] }
 0x5c1   :  { %11622 = vmatprep.subr.bf16.mxu1 %v13683_v60  ;;  %v13659_v22 = vcombine.high %v1149_v37, %v1153_v45  ;;  %v1301_v49 = vld [vmem:[%s19723_s1 + $0x2798] sm:$0xff]  ;;  %v13658_v12 = vcombine.low %v1149_v37, %v1153_v45 }
 0x5c2   :  { %11656 = vmatpush1.bf16.msra.mxu0 %v13714_v34  ;;  %v1305_v42 = vld [vmem:[%s19723_s1 + $0x27b8] sm:$0xff] }
 0x5c3   :  { %11657 = vmatprep.subr.bf16.mxu0 %v13707_v53  ;;  %v1141_v51 = vld [vmem:[%s19723_s1 + $0x2298] sm:$0xff]  ;;  %v13811_v20 = vcombine.high %v1301_v49, %v1305_v42  ;;  %v13810_v32 = vcombine.low %v1301_v49, %v1305_v42 }
 0x5c4   :  { %11623 = vmatpush2.bf16.msra.mxu1 %v13682_v4  ;;  %v1145_v3 = vld [vmem:[%s19723_s1 + $0x22b8] sm:$0xff] }
 0x5c5   :  { %11624 = vmatprep.subr.bf16.mxu1 %v13675_v54  ;;  %v13651_v10 = vcombine.high %v1141_v51, %v1145_v3  ;;  %v1293_v8 = vld [vmem:[%s19723_s1 + $0x2758] sm:$0xff]  ;;  %v13650_v24 = vcombine.low %v1141_v51, %v1145_v3 }
 0x5c6   :  { %11658 = vmatpush1.bf16.msra.mxu0 %v13706_v43  ;;  %v1297_v30 = vld [vmem:[%s19723_s1 + $0x2778] sm:$0xff] }
 0x5c7   :  { %11659 = vmatprep.subr.bf16.mxu0 %v13699_v14  ;;  %v1133_v36 = vld [vmem:[%s19723_s1 + $0x2258] sm:$0xff]  ;;  %v13803_v13 = vcombine.high %v1293_v8, %v1297_v30  ;;  %v13802_v26 = vcombine.low %v1293_v8, %v1297_v30 }
 0x5c8   :  { %11625 = vmatpush2.bf16.msra.mxu1 %v13674_v55  ;;  %v1137_v9 = vld [vmem:[%s19723_s1 + $0x2278] sm:$0xff] }
 0x5c9   :  { %11626 = vmatprep.subr.bf16.mxu1 %v13667_v16  ;;  %v13643_v15 = vcombine.high %v1133_v36, %v1137_v9  ;;  %v1285_v39 = vld [vmem:[%s19723_s1 + $0x2718] sm:$0xff]  ;;  %v13642_v2 = vcombine.low %v1133_v36, %v1137_v9 }
 0x5ca   :  { %11660 = vmatpush1.bf16.msra.mxu0 %v13698_v27  ;;  %v1289_v17 = vld [vmem:[%s19723_s1 + $0x2738] sm:$0xff] }
 0x5cb   :  { %11661 = vmatprep.subr.bf16.mxu0 %v13819_v38  ;;  %v1125_v62 = vld [vmem:[%s19723_s1 + $0x2218] sm:$0xff]  ;;  %v13795_v7 = vcombine.high %v1285_v39, %v1289_v17  ;;  %v13794_v34 = vcombine.low %v1285_v39, %v1289_v17 }
 0x5cc   :  { %11627 = vmatpush2.bf16.msra.mxu1 %v13666_v47  ;;  %v1129_v58 = vld [vmem:[%s19723_s1 + $0x2238] sm:$0xff] }
 0x5cd   :  { %11628 = vmatprep.subr.bf16.mxu1 %v13659_v22  ;;  %v13635_v60 = vcombine.high %v1125_v62, %v1129_v58  ;;  %v1277_v61 = vld [vmem:[%s19723_s1 + $0x26d8] sm:$0xff]  ;;  %v13634_v4 = vcombine.low %v1125_v62, %v1129_v58 }
 0x5ce   :  { %11662 = vmatpush2.bf16.msra.mxu0 %v13818_v1  ;;  %v1281_v57 = vld [vmem:[%s19723_s1 + $0x26f8] sm:$0xff] }
 0x5cf   :  { %11663 = vmatprep.subr.bf16.mxu0 %v13811_v20  ;;  %v1373_v44 = vld [vmem:[%s19723_s1 + $0x29d8] sm:$0xff]  ;;  %v13787_v53 = vcombine.high %v1277_v61, %v1281_v57  ;;  %v13786_v43 = vcombine.low %v1277_v61, %v1281_v57 }
 0x5d0   :  { %11629 = vmatpush2.bf16.msra.mxu1 %v13658_v12  ;;  %v1377_v35 = vld [vmem:[%s19723_s1 + $0x29f8] sm:$0xff] }
 0x5d1   :  { %11630 = vmatprep.subr.bf16.mxu1 %v13651_v10  ;;  %v13883_v54 = vcombine.high %v1373_v44, %v1377_v35  ;;  %v1269_v48 = vld [vmem:[%s19723_s1 + $0x2698] sm:$0xff]  ;;  %v13882_v55 = vcombine.low %v1373_v44, %v1377_v35 }
 0x5d2   :  { %11664 = vmatpush2.bf16.msra.mxu0 %v13810_v32  ;;  %v1273_v52 = vld [vmem:[%s19723_s1 + $0x26b8] sm:$0xff] }
 0x5d3   :  { %11665 = vmatprep.subr.bf16.mxu0 %v13803_v13  ;;  %v1365_v29 = vld [vmem:[%s19723_s1 + $0x2998] sm:$0xff]  ;;  %v13779_v14 = vcombine.high %v1269_v48, %v1273_v52  ;;  %v13778_v47 = vcombine.low %v1269_v48, %v1273_v52 }
 0x5d4   :  { %11631 = vmatpush2.bf16.msra.mxu1 %v13650_v24  ;;  %v1369_v63 = vld [vmem:[%s19723_s1 + $0x29b8] sm:$0xff] }
 0x5d5   :  { %11632 = vmatprep.subr.bf16.mxu1 %v13643_v15  ;;  %v13875_v16 = vcombine.high %v1365_v29, %v1369_v63  ;;  %v1261_v56 = vld [vmem:[%s19723_s1 + $0x2658] sm:$0xff]  ;;  %v13874_v22 = vcombine.low %v1365_v29, %v1369_v63 }
 0x5d6   :  { %11666 = vmatpush2.bf16.msra.mxu0 %v13802_v26  ;;  %v1265_v23 = vld [vmem:[%s19723_s1 + $0x2678] sm:$0xff] }
 0x5d7   :  { %11667 = vmatprep.subr.bf16.mxu0 %v13795_v7  ;;  %v1357_v37 = vld [vmem:[%s19723_s1 + $0x2958] sm:$0xff]  ;;  %v13771_v49 = vcombine.high %v1261_v56, %v1265_v23  ;;  %v13770_v10 = vcombine.low %v1261_v56, %v1265_v23 }
 0x5d8   :  { %11633 = vmatpush2.bf16.msra.mxu1 %v13642_v2  ;;  %v1361_v45 = vld [vmem:[%s19723_s1 + $0x2978] sm:$0xff] }
 0x5d9   :  { %11634 = vmatprep.subr.bf16.mxu1 %v13635_v60  ;;  %v13867_v51 = vcombine.high %v1357_v37, %v1361_v45  ;;  %v1253_v3 = vld [vmem:[%s19723_s1 + $0x2618] sm:$0xff]  ;;  %v13866_v8 = vcombine.low %v1357_v37, %v1361_v45 }
 0x5da   :  { %11668 = vmatpush2.bf16.msra.mxu0 %v13794_v34  ;;  %v1257_v1 = vld [vmem:[%s19723_s1 + $0x2638] sm:$0xff] }
 0x5db   :  { %11669 = vmatprep.subr.bf16.mxu0 %v13787_v53  ;;  %v1353_v12 = vld [vmem:[%s19723_s1 + $0x2938] sm:$0xff]  ;;  %v13763_v30 = vcombine.high %v1253_v3, %v1257_v1  ;;  %v13762_v13 = vcombine.low %v1253_v3, %v1257_v1 }
 0x5dc   :  { %11635 = vmatpush2.bf16.msra.mxu1 %v13634_v4  ;;  %v1505_v9 = vld [vmem:[%s19723_s1 + $0x2df8] sm:$0xff] }
 0x5dd   :  { %11686 = vmatprep.subr.bf16.mxu1 %v13883_v54  ;;  %v1341_v32 = vld [vmem:[%s19723_s1 + $0x28d8] sm:$0xff] }
 0x5de   :  { %11670 = vmatpush2.bf16.msra.mxu0 %v13786_v43  ;;  %v1345_v24 = vld [vmem:[%s19723_s1 + $0x28f8] sm:$0xff] }
 0x5df   :  { %v11392_v27 = vpop.f32.mrf.mxu1  ;;  %11637 = vmatmul.mubr.bf16.vlgmr.msra.gmra.mxu1 %v15536_v11  ;;  %11671 = vmatprep.subr.bf16.mxu0 %v13779_v14  ;;  %v13851_v17 = vcombine.high %v1341_v32, %v1345_v24  ;;  %v1493_v62 = vld [vmem:[%s19723_s1 + $0x2d98] sm:$0xff]  ;;  %v13850_v60 = vcombine.low %v1341_v32, %v1345_v24 }
 0x5e0   :  { %v11393_v38 = vadd.f32 %v11392_v27, %v19140_v31  ;;  %11687 = vmatpush1.bf16.msra.mxu1 %v13882_v55  ;;  %11718 = vmatprep.mubr.bf16.mxu1 %v15551_v5  ;;  %v1349_v31 = vld [vmem:[%s19723_s1 + $0x2918] sm:$0xff] }
 0x5e1   :  { %v11394_v42 = vpop.f32.mrf.mxu1  ;;  %11688 = vmatprep.subr.bf16.mxu1 %v13875_v16  ;;  %v13859_v5 = vcombine.high %v1349_v31, %v1353_v12  ;;  %v13858_v15 = vcombine.low %v1349_v31, %v1353_v12  ;;  %v1497_v58 = vld [vmem:[%s19723_s1 + $0x2db8] sm:$0xff] }
 0x5e2   :  { %v11395_v11 = vadd.f32 %v11394_v42, %v19143_v40  ;;  %11672 = vmatpush2.bf16.msra.mxu0 %v13778_v47  ;;  %v1501_v40 = vld [vmem:[%s19723_s1 + $0x2dd8] sm:$0xff]  ;;  %v14003_v61 = vcombine.high %v1493_v62, %v1497_v58  ;;  %v14002_v48 = vcombine.low %v1493_v62, %v1497_v58 }
 0x5e3   :  { %v11396_v20 = vpop.f32.mrf.mxu1  ;;  %11673 = vmatprep.subr.bf16.mxu0 %v13771_v49  ;;  %v14011_v39 = vcombine.high %v1501_v40, %v1505_v9  ;;  %v1333_v26 = vld [vmem:[%s19723_s1 + $0x2898] sm:$0xff]  ;;  %v14010_v7 = vcombine.low %v1501_v40, %v1505_v9 }
 0x5e4   :  { %11689 = vmatpush1.bf16.msra.mxu1 %v13874_v22  ;;  %v1337_v2 = vld [vmem:[%s19723_s1 + $0x28b8] sm:$0xff] }
 0x5e5   :  { %v11397_v36 = vpop.f32.mrf.mxu1  ;;  %11690 = vmatprep.subr.bf16.mxu1 %v13867_v51  ;;  %v13843_v57 = vcombine.high %v1333_v26, %v1337_v2  ;;  %v1485_v44 = vld [vmem:[%s19723_s1 + $0x2d58] sm:$0xff]  ;;  %v13842_v29 = vcombine.low %v1333_v26, %v1337_v2 }
 0x5e6   :  { %11674 = vmatpush2.bf16.msra.mxu0 %v13770_v10  ;;  %v1489_v35 = vld [vmem:[%s19723_s1 + $0x2d78] sm:$0xff] }
 0x5e7   :  { %11675 = vmatprep.subr.bf16.mxu0 %v13763_v30  ;;  %v1325_v4 = vld [vmem:[%s19723_s1 + $0x2858] sm:$0xff]  ;;  %v13995_v63 = vcombine.high %v1485_v44, %v1489_v35  ;;  %v13994_v23 = vcombine.low %v1485_v44, %v1489_v35 }
 0x5e8   :  { %11691 = vmatpush1.bf16.msra.mxu1 %v13866_v8  ;;  %v1329_v53 = vld [vmem:[%s19723_s1 + $0x2878] sm:$0xff] }
 0x5e9   :  { %11692 = vmatprep.subr.bf16.mxu1 %v13859_v5  ;;  %v13835_v43 = vcombine.high %v1325_v4, %v1329_v53  ;;  %v1477_v55 = vld [vmem:[%s19723_s1 + $0x2d18] sm:$0xff]  ;;  %v13834_v45 = vcombine.low %v1325_v4, %v1329_v53 }
 0x5ea   :  { %11676 = vmatpush2.bf16.msra.mxu0 %v13762_v13  ;;  %v1481_v14 = vld [vmem:[%s19723_s1 + $0x2d38] sm:$0xff] }
 0x5eb   :  { %11727 = vmatprep.subr.bf16.mxu0 %v14011_v39  ;;  %v1321_v56 = vld [vmem:[%s19723_s1 + $0x2838] sm:$0xff]  ;;  %v13987_v27 = vcombine.high %v1477_v55, %v1481_v14  ;;  %v13986_v51 = vcombine.low %v1477_v55, %v1481_v14 }
 0x5ec   :  { %11693 = vmatpush1.bf16.msra.mxu1 %v13858_v15  ;;  %v1473_v22 = vld [vmem:[%s19723_s1 + $0x2cf8] sm:$0xff] }
 0x5ed   :  { %11694 = vmatprep.subr.bf16.mxu1 %v13851_v17  ;;  %v11433_v34 = vpop.f32.mrf.mxu0  ;;  %11678 = vmatmul.mubr.bf16.vlgmr.msra.gmra.mxu0 %v15555_v6  ;;  %v1437_v49 = vld [vmem:[%s19723_s1 + $0x2bd8] sm:$0xff] }
 0x5ee   :  { %v19342_v54 = vadd.f32 %v11433_v34, %v11393_v38  ;;  %11728 = vmatpush1.bf16.msra.mxu0 %v14010_v7  ;;  %11759 = vmatprep.mubr.bf16.mxu0 %v15572_v19  ;;  %v1317_v19 = vld [vmem:[%s19723_s1 + $0x2818] sm:$0xff] }
 0x5ef   :  { %v11435_v52 = vpop.f32.mrf.mxu0  ;;  %11729 = vmatprep.subr.bf16.mxu0 %v14003_v61  ;;  %v13827_v47 = vcombine.high %v1317_v19, %v1321_v56  ;;  %v1469_v38 = vld [vmem:[%s19723_s1 + $0x2cd8] sm:$0xff]  ;;  %v13826_v3 = vcombine.low %v1317_v19, %v1321_v56 }
 0x5f0   :  { %11695 = vmatpush1.bf16.msra.mxu1 %v13850_v60  ;;  %v19345_v6 = vadd.f32 %v11435_v52, %v11395_v11  ;;  %v1441_v42 = vld [vmem:[%s19723_s1 + $0x2bf8] sm:$0xff]  ;;  %v13979_v1 = vcombine.high %v1469_v38, %v1473_v22  ;;  %v13978_v8 = vcombine.low %v1469_v38, %v1473_v22 }
 0x5f1   :  { %11696 = vmatprep.subr.bf16.mxu1 %v13843_v57  ;;  %v11437_v16 = vpop.f32.mrf.mxu0  ;;  %v13947_v11 = vcombine.high %v1437_v49, %v1441_v42  ;;  %v1461_v31 = vld [vmem:[%s19723_s1 + $0x2c98] sm:$0xff]  ;;  %v13946_v30 = vcombine.low %v1437_v49, %v1441_v42 }
 0x5f2   :  { %11730 = vmatpush1.bf16.msra.mxu0 %v14002_v48  ;;  %v1465_v12 = vld [vmem:[%s19723_s1 + $0x2cb8] sm:$0xff] }
 0x5f3   :  { %v11438_v37 = vpop.f32.mrf.mxu0  ;;  %11731 = vmatprep.subr.bf16.mxu0 %v13995_v63  ;;  %v1429_v20 = vld [vmem:[%s19723_s1 + $0x2b98] sm:$0xff]  ;;  %v13971_v36 = vcombine.high %v1461_v31, %v1465_v12  ;;  %v13970_v13 = vcombine.low %v1461_v31, %v1465_v12 }
 0x5f4   :  { %11697 = vmatpush1.bf16.msra.mxu1 %v13842_v29  ;;  %v1433_v10 = vld [vmem:[%s19723_s1 + $0x2bb8] sm:$0xff] }
 0x5f5   :  { %11698 = vmatprep.subr.bf16.mxu1 %v13835_v43  ;;  %v13939_v5 = vcombine.high %v1429_v20, %v1433_v10  ;;  %v1453_v40 = vld [vmem:[%s19723_s1 + $0x2c58] sm:$0xff]  ;;  %v13938_v15 = vcombine.low %v1429_v20, %v1433_v10 }
 0x5f6   :  { %11732 = vmatpush1.bf16.msra.mxu0 %v13994_v23  ;;  %v1457_v9 = vld [vmem:[%s19723_s1 + $0x2c78] sm:$0xff] }
 0x5f7   :  { %11733 = vmatprep.subr.bf16.mxu0 %v13987_v27  ;;  %v1421_v32 = vld [vmem:[%s19723_s1 + $0x2b58] sm:$0xff]  ;;  %v13963_v39 = vcombine.high %v1453_v40, %v1457_v9  ;;  %v13962_v7 = vcombine.low %v1453_v40, %v1457_v9 }
 0x5f8   :  { %11699 = vmatpush1.bf16.msra.mxu1 %v13834_v45  ;;  %v1425_v24 = vld [vmem:[%s19723_s1 + $0x2b78] sm:$0xff] }
 0x5f9   :  { %11700 = vmatprep.subr.bf16.mxu1 %v13827_v47  ;;  %v13931_v17 = vcombine.high %v1421_v32, %v1425_v24  ;;  %v1445_v62 = vld [vmem:[%s19723_s1 + $0x2c18] sm:$0xff]  ;;  %v13930_v60 = vcombine.low %v1421_v32, %v1425_v24 }
 0x5fa   :  { %11734 = vmatpush1.bf16.msra.mxu0 %v13986_v51  ;;  %v1449_v58 = vld [vmem:[%s19723_s1 + $0x2c38] sm:$0xff] }
 0x5fb   :  { %11735 = vmatprep.subr.bf16.mxu0 %v13979_v1  ;;  %v1413_v26 = vld [vmem:[%s19723_s1 + $0x2b18] sm:$0xff]  ;;  %v13955_v61 = vcombine.high %v1445_v62, %v1449_v58  ;;  %v13954_v53 = vcombine.low %v1445_v62, %v1449_v58 }
 0x5fc   :  { %11701 = vmatpush1.bf16.msra.mxu1 %v13826_v3  ;;  %v1417_v2 = vld [vmem:[%s19723_s1 + $0x2b38] sm:$0xff] }
 0x5fd   :  { %11702 = vmatprep.subr.bf16.mxu1 %v13947_v11  ;;  %v13923_v57 = vcombine.high %v1413_v26, %v1417_v2  ;;  %v1565_v44 = vld [vmem:[%s19723_s1 + $0x2fd8] sm:$0xff]  ;;  %v13922_v48 = vcombine.low %v1413_v26, %v1417_v2 }
 0x5fe   :  { %11736 = vmatpush1.bf16.msra.mxu0 %v13978_v8  ;;  %v1569_v35 = vld [vmem:[%s19723_s1 + $0x2ff8] sm:$0xff] }
 0x5ff   :  { %11737 = vmatprep.subr.bf16.mxu0 %v13971_v36  ;;  %v1405_v34 = vld [vmem:[%s19723_s1 + $0x2ad8] sm:$0xff]  ;;  %v14075_v52 = vcombine.high %v1565_v44, %v1569_v35  ;;  %v14074_v16 = vcombine.low %v1565_v44, %v1569_v35 }
 0x600   :  { %11703 = vmatpush2.bf16.msra.mxu1 %v13946_v30  ;;  %v1409_v4 = vld [vmem:[%s19723_s1 + $0x2af8] sm:$0xff] }
 0x601   :  { %11704 = vmatprep.subr.bf16.mxu1 %v13939_v5  ;;  %v13915_v29 = vcombine.high %v1405_v34, %v1409_v4  ;;  %v1557_v63 = vld [vmem:[%s19723_s1 + $0x2f98] sm:$0xff]  ;;  %v13914_v19 = vcombine.low %v1405_v34, %v1409_v4 }
 0x602   :  { %11738 = vmatpush1.bf16.msra.mxu0 %v13970_v13  ;;  %v1561_v43 = vld [vmem:[%s19723_s1 + $0x2fb8] sm:$0xff] }
 0x603   :  { %11739 = vmatprep.subr.bf16.mxu0 %v13963_v39  ;;  %v1397_v55 = vld [vmem:[%s19723_s1 + $0x2a98] sm:$0xff]  ;;  %v14067_v56 = vcombine.high %v1557_v63, %v1561_v43  ;;  %v14066_v38 = vcombine.low %v1557_v63, %v1561_v43 }
 0x604   :  { %11705 = vmatpush2.bf16.msra.mxu1 %v13938_v15  ;;  %v1401_v14 = vld [vmem:[%s19723_s1 + $0x2ab8] sm:$0xff] }
 0x605   :  { %11706 = vmatprep.subr.bf16.mxu1 %v13931_v17  ;;  %v13907_v23 = vcombine.high %v1397_v55, %v1401_v14  ;;  %v1549_v37 = vld [vmem:[%s19723_s1 + $0x2f58] sm:$0xff]  ;;  %v13906_v22 = vcombine.low %v1397_v55, %v1401_v14 }
 0x606   :  { %11740 = vmatpush1.bf16.msra.mxu0 %v13962_v7  ;;  %v1553_v45 = vld [vmem:[%s19723_s1 + $0x2f78] sm:$0xff] }
 0x607   :  { %11741 = vmatprep.subr.bf16.mxu0 %v13955_v61  ;;  %v1389_v27 = vld [vmem:[%s19723_s1 + $0x2a58] sm:$0xff]  ;;  %v14059_v49 = vcombine.high %v1549_v37, %v1553_v45  ;;  %v14058_v31 = vcombine.low %v1549_v37, %v1553_v45 }
 0x608   :  { %11707 = vmatpush2.bf16.msra.mxu1 %v13930_v60  ;;  %v1393_v47 = vld [vmem:[%s19723_s1 + $0x2a78] sm:$0xff] }
 0x609   :  { %11708 = vmatprep.subr.bf16.mxu1 %v13923_v57  ;;  %v13899_v42 = vcombine.high %v1389_v27, %v1393_v47  ;;  %v1541_v51 = vld [vmem:[%s19723_s1 + $0x2f18] sm:$0xff]  ;;  %v13898_v12 = vcombine.low %v1389_v27, %v1393_v47  ;;  %v11810_v27 = vmax.f32 %v16454_v28, 0.0  ;;  %v11812_v47 = vmax.f32 %v17684_v0, 0.0  ;;  %v14278_v0 = vld [vmem:[%s19725_s3 + $0xf0] sm:$0xff]  }
 0x60a   :  { %11742 = vmatpush1.bf16.msra.mxu0 %v13954_v53  ;;  %v1545_v3 = vld [vmem:[%s19723_s1 + $0x2f38] sm:$0xff] }
 0x60b   :  { %11743 = vmatprep.subr.bf16.mxu0 %v14075_v52  ;;  %v1381_v1 = vld [vmem:[%s19723_s1 + $0x2a18] sm:$0xff]  ;;  %v14051_v20 = vcombine.high %v1541_v51, %v1545_v3  ;;  %v14050_v40 = vcombine.low %v1541_v51, %v1545_v3  ;;  %v11820_v51 = vpack.c.bf16 %v11812_v47, %v11812_v47  ;;  %v14317_v47 = vld [vmem:[%s19727_s5 + $0x48] sm:$0xff]  }
 0x60c   :  { %11709 = vmatpush2.bf16.msra.mxu1 %v13922_v48  ;;  %v1385_v11 = vld [vmem:[%s19723_s1 + $0x2a38] sm:$0xff] }
 0x60d   :  { %11710 = vmatprep.subr.bf16.mxu1 %v13915_v29  ;;  %v13891_v10 = vcombine.high %v1381_v1, %v1385_v11  ;;  %v1533_v8 = vld [vmem:[%s19723_s1 + $0x2ed8] sm:$0xff]  ;;  %v13890_v9 = vcombine.low %v1381_v1, %v1385_v11  ;;  %v14279_v1 = vld [vmem:[%s19725_s3 + $0x30] sm:$0xff]  }
 0x60e   :  { %11744 = vmatpush2.bf16.msra.mxu0 %v14074_v16  ;;  %v1537_v30 = vld [vmem:[%s19723_s1 + $0x2ef8] sm:$0xff] }
 0x60f   :  { %11745 = vmatprep.subr.bf16.mxu0 %v14067_v56  ;;  %v1597_v36 = vld [vmem:[%s19723_s1 + $0x30d8] sm:$0xff]  ;;  %v14043_v32 = vcombine.high %v1533_v8, %v1537_v30  ;;  %v14042_v62 = vcombine.low %v1533_v8, %v1537_v30  ;;  %v14284_v30 = vld [vmem:[%s19725_s3 + $0xa8] sm:$0xff]  }
 0x610   :  { %11711 = vmatpush2.bf16.msra.mxu1 %v13914_v19  ;;  %v1601_v5 = vld [vmem:[%s19723_s1 + $0x30f8] sm:$0xff] }
 0x611   :  { %11712 = vmatprep.subr.bf16.mxu1 %v13907_v23  ;;  %v14107_v24 = vcombine.high %v1597_v36, %v1601_v5  ;;  %v1525_v13 = vld [vmem:[%s19723_s1 + $0x2e98] sm:$0xff]  ;;  %v14106_v58 = vcombine.low %v1597_v36, %v1601_v5  ;;  %v14285_v36 = vld [vmem:[%s19725_s3 + $0x60] sm:$0xff]  }
 0x612   :  { %11746 = vmatpush2.bf16.msra.mxu0 %v14066_v38  ;;  %v1529_v15 = vld [vmem:[%s19723_s1 + $0x2eb8] sm:$0xff]  ;;  %v14286_v5 = vld [vmem:[%s19725_s3 + $0xe0] sm:$0xff]  }
 0x613   :  { %11747 = vmatprep.subr.bf16.mxu0 %v14059_v49  ;;  %v1589_v39 = vld [vmem:[%s19723_s1 + $0x3098] sm:$0xff]  ;;  %v14035_v26 = vcombine.high %v1525_v13, %v1529_v15  ;;  %v14034_v35 = vcombine.low %v1525_v13, %v1529_v15  ;;  %v14277_v49 = vld [vmem:[%s19725_s3 + $0x70] sm:$0xff]  }
 0x614   :  { %11713 = vmatpush2.bf16.msra.mxu1 %v13906_v22  ;;  %v1593_v17 = vld [vmem:[%s19723_s1 + $0x30b8] sm:$0xff] }
 0x615   :  { %11714 = vmatprep.subr.bf16.mxu1 %v13899_v42  ;;  %v14099_v2 = vcombine.high %v1589_v39, %v1593_v17  ;;  %v1517_v7 = vld [vmem:[%s19723_s1 + $0x2e58] sm:$0xff]  ;;  %v14098_v4 = vcombine.low %v1589_v39, %v1593_v17  ;;  %v11818_v42 = vpack.c.bf16 %v11810_v27, %v11810_v27  ;;  %v14293_v39 = vld [vmem:[%s19725_s3 + $0x50] sm:$0xff]  }
 0x616   :  { %11748 = vmatpush2.bf16.msra.mxu0 %v14058_v31  ;;  %v1521_v60 = vld [vmem:[%s19723_s1 + $0x2e78] sm:$0xff]  ;;  %v14281_v31 = vld [vmem:[%s19725_s3 + $0x68] sm:$0xff]   ;;  %v14294_v17 = vld [vmem:[%s19725_s3 + $0xd0] sm:$0xff]  }
 0x617   :  { %11749 = vmatprep.subr.bf16.mxu0 %v14051_v20  ;;  %v1581_v61 = vld [vmem:[%s19723_s1 + $0x3058] sm:$0xff]  ;;  %v14027_v53 = vcombine.high %v1517_v7, %v1521_v60  ;;  %v14026_v14 = vcombine.low %v1517_v7, %v1521_v60  ;;  %v14299_v7 = vld [vmem:[%s19725_s3 + $0x8] sm:$0xff]  }
 0x618   :  { %11715 = vmatpush2.bf16.msra.mxu1 %v13898_v12  ;;  %v1585_v57 = vld [vmem:[%s19723_s1 + $0x3078] sm:$0xff]  ;;  %v14300_v60 = vld [vmem:[%s19725_s3 + $0x88] sm:$0xff]  }
 0x619   :  { %11716 = vmatprep.subr.bf16.mxu1 %v13891_v10  ;;  %v14091_v52 = vcombine.high %v1581_v61, %v1585_v57  ;;  %v1509_v29 = vld [vmem:[%s19723_s1 + $0x2e18] sm:$0xff]  ;;  %v14090_v16 = vcombine.low %v1581_v61, %v1585_v57  ;;  %v14283_v10 = vld [vmem:[%s19725_s3 + $0x28] sm:$0xff]   ;;  %v14301_v61 = vld [vmem:[%s19725_s3 + $0x40] sm:$0xff]  }
 0x61a   :  { %11750 = vmatpush2.bf16.msra.mxu0 %v14050_v40  ;;  %v1513_v63 = vld [vmem:[%s19723_s1 + $0x2e38] sm:$0xff]  ;;  %v14287_v40 = vld [vmem:[%s19725_s3 + $0x20] sm:$0xff]  }
 0x61b   :  { %11751 = vmatprep.subr.bf16.mxu0 %v14043_v32  ;;  %v1577_v43 = vld [vmem:[%s19723_s1 + $0x3038] sm:$0xff]  ;;  %v14019_v19 = vcombine.high %v1509_v29, %v1513_v63  ;;  %v14302_v57 = vld [vmem:[%s19725_s3 + $0xc0] sm:$0xff]  }
 0x61c   :  { %11717 = vmatpush2.bf16.msra.mxu1 %v13890_v9  ;;  %v14273_v37 = vld [vmem:[%s19725_s3 + $0x78] sm:$0xff]   ;;  %v14288_v9 = vld [vmem:[%s19725_s3 + $0xa0] sm:$0xff]  }
 0x61d   :  { %11776 = vmatprep.subr.bf16.mxu1 %v14107_v24  ;;  %v14274_v45 = vld [vmem:[%s19725_s3 + $0xf8] sm:$0xff]  }
 0x61e   :  { %11752 = vmatpush2.bf16.msra.mxu0 %v14042_v62  ;;  %v14275_v38 = vld [vmem:[%s19725_s3 + $0x38] sm:$0xff]   ;;  %v14295_v62 = vld [vmem:[%s19725_s3 + $0x10] sm:$0xff]  }
 0x61f   :  { %v11474_v44 = vpop.f32.mrf.mxu1  ;;  %11719 = vmatmul.mubr.bf16.vlgmr.msra.gmra.mxu1 %v15753_v46  ;;  %11753 = vmatprep.subr.bf16.mxu0 %v14035_v26  ;;  %v14276_v22 = vld [vmem:[%s19725_s3 + $0xb8] sm:$0xff]   ;;  %v14297_v26 = vld [vmem:[%s19725_s3 + $0x48] sm:$0xff]  }
 0x620   :  { %v11475_v34 = vadd.f32 %v11474_v44, %v19342_v54  ;;  %11777 = vmatpush1.bf16.msra.mxu1 %v14106_v58  ;;  %11800 = vmatprep.mubr.bf16.mxu1 %v14363_v41  ;;  %v1573_v54 = vld [vmem:[%s19723_s1 + $0x3018] sm:$0xff]  ;;  %v14296_v58 = vld [vmem:[%s19725_s3 + $0x90] sm:$0xff]   ;;  %v14303_v44 = vld [vmem:[%s19725_s3] sm:$0xff]  }
 0x621   :  { %v11476_v48 = vpop.f32.mrf.mxu1  ;;  %11778 = vmatprep.subr.bf16.mxu1 %v14099_v2  ;;  %v14083_v41 = vcombine.high %v1573_v54, %v1577_v43  ;;  %v14082_v23 = vcombine.low %v1573_v54, %v1577_v43  ;;  %v14289_v32 = vld [vmem:[%s19725_s3 + $0x58] sm:$0xff]   ;;  %v14298_v2 = vld [vmem:[%s19725_s3 + $0xc8] sm:$0xff]  }
 0x622   :  { %v11477_v46 = vadd.f32 %v11476_v48, %v19345_v6  ;;  %11754 = vmatpush2.bf16.msra.mxu0 %v14034_v35  ;;  %v14018_v6 = vcombine.low %v1509_v29, %v1513_v63  ;;  %v14290_v24 = vld [vmem:[%s19725_s3 + $0xd8] sm:$0xff]   ;;  %v11809_v35 = vmax.f32 %v16451_v18, 0.0  ;;  %v14307_v63 = vld [vmem:[%s19727_s5 + $0x70] sm:$0xff]   ;;  %v14309_v43 = vld [vmem:[%s19727_s5 + $0x68] sm:$0xff]  }
 0x623   :  { %v11478_v55 = vpop.f32.mrf.mxu1  ;;  %11755 = vmatprep.subr.bf16.mxu0 %v14027_v53  ;;  %v14291_v13 = vld [vmem:[%s19725_s3 + $0x18] sm:$0xff]   ;;  %v11811_v53 = vmax.f32 %v17668_v21, 0.0 }
 0x624   :  { %11779 = vmatpush1.bf16.msra.mxu1 %v14098_v4  ;;  %v14292_v15 = vld [vmem:[%s19725_s3 + $0x98] sm:$0xff]   ;;  %v11817_v29 = vpack.c.bf16 %v11809_v35, %v11809_v35  ;;  %v14310_v55 = vld [vmem:[%s19727_s5 + $0x28] sm:$0xff]  }
 0x625   :  { %v11479_v56 = vpop.f32.mrf.mxu1  ;;  %11780 = vmatprep.subr.bf16.mxu1 %v14091_v52  ;;  %v14305_v4 = vld [vmem:[%s19727_s5 + $0x78] sm:$0xff]   ;;  %v11814_v52 = vmax.f32 %v18938_v33, 0.0  ;;  %v11819_v21 = vpack.c.bf16 %v11811_v53, %v11811_v53  ;;  %v14308_v33 = vld [vmem:[%s19727_s5 + $0x30] sm:$0xff]  }
 0x626   :  { %11756 = vmatpush2.bf16.msra.mxu0 %v14026_v14  ;;  %v14321_v48 = vld [vmem:[%s19727_s5 + $0xf8] sm:$0xff]   ;;  %v14311_v14 = vld [vmem:[%s19727_s5 + $0x60] sm:$0xff]  }
 0x627   :  { %11757 = vmatprep.subr.bf16.mxu0 %v14019_v19  ;;  %v14306_v18 = vld [vmem:[%s19727_s5 + $0x38] sm:$0xff]   ;;  %v11822_v54 = vpack.c.bf16 %v11814_v52, %v11814_v52 }
 0x628   :  { %11781 = vmatpush1.bf16.msra.mxu1 %v14090_v16  ;;  %v14312_v16 = vld [vmem:[%s19727_s5 + $0x20] sm:$0xff]   ;;  %v14313_v19 = vld [vmem:[%s19727_s5 + $0x58] sm:$0xff]  }
 0x629   :  { %11782 = vmatprep.subr.bf16.mxu1 %v14083_v41  ;;  %v14314_v56 = vld [vmem:[%s19727_s5 + $0x18] sm:$0xff]   ;;  %v14315_v41 = vld [vmem:[%s19727_s5 + $0x50] sm:$0xff]  }
 0x62a   :  { %11758 = vmatpush2.bf16.msra.mxu0 %v14018_v6  ;;  %v14323_v6 = vld [vmem:[%s19727_s5 + $0xf0] sm:$0xff]  }
 0x62b   :  { %14178 = vmatprep.subr.bf16.mxu0 %v14273_v37  ;;  %v14316_v37 = vld [vmem:[%s19727_s5 + $0x10] sm:$0xff]  }
 0x62c   :  { %11783 = vmatpush1.bf16.msra.mxu1 %v14082_v23 }
 0x62d   :  { %14200 = vmatprep.subr.bf16.mxu1 %v14274_v45  ;;  %v11515_v28 = vpop.f32.mrf.mxu0  ;;  %11760 = vmatmul.mubr.bf16.vlgmr.msra.gmra.mxu0 %v15769_v59  ;;  %v14280_v59 = vld [vmem:[%s19725_s3 + $0xb0] sm:$0xff]  }
 0x62e   :  { %v19528_v3 = vadd.f32 %v11515_v28, %v11475_v34  ;;  %14179 = vmatpush3.bf16.msra.mxu0 %v14275_v38  ;;  %12120 = vmatprep.mubr.bf16.mxu0 %v11818_v42  ;;  %v14304_v34 = vld [vmem:[%s19725_s3 + $0x80] sm:$0xff]   ;;  %v14324_v45 = vld [vmem:[%s19727_s5 + $0xb0] sm:$0xff]   ;;  %v14318_v28 = vld [vmem:[%s19727_s5 + $0x8] sm:$0xff]  }
 0x62f   :  { %14111 = vmatmul.mubr.msk.bf16.vlgmr.msra.gmra.mxu1 %vm9673_vm0, %v15827_v25  ;;  %v11517_v11 = vpop.f32.mrf.mxu0  ;;  %14180 = vmatprep.subr.bf16.mxu0 %v14277_v49  ;;  %v14282_v25 = vld [vmem:[%s19725_s3 + $0xe8] sm:$0xff]  }
 0x630   :  { %14201 = vmatpush3.bf16.msra.mxu1 %v14276_v22  ;;  %12160 = vmatprep.mubr.bf16.mxu1 %v11820_v51  ;;  %v19541_v12 = vadd.f32 %v11517_v11, %v11477_v46  ;;  %v14322_v46 = vld [vmem:[%s19727_s5 + $0xb8] sm:$0xff]   ;;  %v14325_v49 = vld [vmem:[%s19727_s5 + $0xe8] sm:$0xff]   ;;  %v14319_v51 = vld [vmem:[%s19727_s5 + $0x40] sm:$0xff]  }
 0x631   :  { %v11519_v20 = vpop.f32.mrf.mxu0  ;;  %14202 = vmatprep.subr.bf16.mxu1 %v14278_v0  ;;  %v14326_v0 = vld [vmem:[%s19727_s5 + $0xa8] sm:$0xff]   ;;  %v14328_v11 = vld [vmem:[%s19727_s5 + $0xa0] sm:$0xff]  }
 0x632   :  { %14181 = vmatpush3.bf16.msra.mxu0 %v14279_v1  ;;  %v14327_v1 = vld [vmem:[%s19727_s5 + $0xe0] sm:$0xff]  }
 0x633   :  { %v11520_v8 = vpop.f32.mrf.mxu0  ;;  %14182 = vmatprep.subr.bf16.mxu0 %v14281_v31  ;;  %v14320_v31 = vld [vmem:[%s19727_s5] sm:$0xff]  }
 0x634   :  { %14203 = vmatpush3.bf16.msra.mxu1 %v14280_v59  ;;  %v14329_v59 = vld [vmem:[%s19727_s5 + $0xd8] sm:$0xff]   ;;  %v14331_v8 = vld [vmem:[%s19727_s5 + $0xd0] sm:$0xff]  }
 0x635   :  { %14204 = vmatprep.subr.bf16.mxu1 %v14282_v25  ;;  %v14330_v25 = vld [vmem:[%s19727_s5 + $0x98] sm:$0xff]  }
 0x636   :  { %14183 = vmatpush3.bf16.msra.mxu0 %v14283_v10 }
 0x637   :  { %14184 = vmatprep.subr.bf16.mxu0 %v14285_v36 }
 0x638   :  { %14205 = vmatpush3.bf16.msra.mxu1 %v14284_v30 }
 0x639   :  { %14206 = vmatprep.subr.bf16.mxu1 %v14286_v5 }
 0x63a   :  { %14185 = vmatpush3.bf16.msra.mxu0 %v14287_v40 }
 0x63b   :  { %14186 = vmatprep.subr.bf16.mxu0 %v14289_v32  ;;  %v14334_v32 = vld [vmem:[%s19727_s5 + $0x88] sm:$0xff]  }
 0x63c   :  { %14207 = vmatpush3.bf16.msra.mxu1 %v14288_v9  ;;  %v14333_v9 = vld [vmem:[%s19727_s5 + $0xc8] sm:$0xff]  }
 0x63d   :  { %14208 = vmatprep.subr.bf16.mxu1 %v14290_v24 }
 0x63e   :  { %14187 = vmatpush3.bf16.msra.mxu0 %v14291_v13  ;;  %v14335_v13 = vld [vmem:[%s19727_s5 + $0xc0] sm:$0xff]  }
 0x63f   :  { %14188 = vmatprep.subr.bf16.mxu0 %v14293_v39 }
 0x640   :  { %14209 = vmatpush3.bf16.msra.mxu1 %v14292_v15  ;;  %v14336_v15 = vld [vmem:[%s19727_s5 + $0x80] sm:$0xff]  }
 0x641   :  { %14210 = vmatprep.subr.bf16.mxu1 %v14294_v17 }
 0x642   :  { %14189 = vmatpush3.bf16.msra.mxu0 %v14295_v62 }
 0x643   :  { %14190 = vmatprep.subr.bf16.mxu0 %v14297_v26 }
 0x644   :  { %14211 = vmatpush3.bf16.msra.mxu1 %v14296_v58 }
 0x645   :  { %14212 = vmatprep.subr.bf16.mxu1 %v14298_v2 }
 0x646   :  { %14191 = vmatpush3.bf16.msra.mxu0 %v14299_v7 }
 0x647   :  { %14192 = vmatprep.subr.bf16.mxu0 %v14301_v61 }
 0x648   :  { %14213 = vmatpush3.bf16.msra.mxu1 %v14300_v60 }
 0x649   :  { %14214 = vmatprep.subr.bf16.mxu1 %v14302_v57 }
 0x64a   :  { %14193 = vmatpush3.bf16.msra.mxu0 %v14303_v44 }
 0x64b   :  { %14222 = vmatprep.subr.bf16.mxu0 %v14305_v4 }
 0x64c   :  { %14215 = vmatpush3.bf16.msra.mxu1 %v14304_v34 }
 0x64d   :  { %14244 = vmatprep.subr.bf16.mxu1 %v14321_v48  ;;  %12121 = vmatmul.mubr.bf16.vlgmr.msra.gmra.mxu0 %v11817_v29 }
 0x64e   :  { %14223 = vmatpush3.bf16.msra.mxu0 %v14306_v18  ;;  %12463 = vmatprep.mubr.bf16.mxu0 %v11822_v54 }
 0x64f   :  { %12161 = vmatmul.mubr.bf16.vlgmr.msra.gmra.mxu1 %v11819_v21  ;;  %14224 = vmatprep.subr.bf16.mxu0 %v14307_v63 }
 0x650   :  { %14245 = vmatpush3.bf16.msra.mxu1 %v14322_v46 }
 0x651   :  { %14246 = vmatprep.subr.bf16.mxu1 %v14323_v6 }
 0x652   :  { %14225 = vmatpush3.bf16.msra.mxu0 %v14308_v33 }
 0x653   :  { %14226 = vmatprep.subr.bf16.mxu0 %v14309_v43 }
 0x654   :  { %14247 = vmatpush3.bf16.msra.mxu1 %v14324_v45 }
 0x655   :  { %14248 = vmatprep.subr.bf16.mxu1 %v14325_v49 }
 0x656   :  { %14227 = vmatpush3.bf16.msra.mxu0 %v14310_v55 }
 0x657   :  { %14228 = vmatprep.subr.bf16.mxu0 %v14311_v14 }
 0x658   :  { %14249 = vmatpush3.bf16.msra.mxu1 %v14326_v0 }
 0x659   :  { %14250 = vmatprep.subr.bf16.mxu1 %v14327_v1 }
 0x65a   :  { %14229 = vmatpush3.bf16.msra.mxu0 %v14312_v16 }
 0x65b   :  { %14230 = vmatprep.subr.bf16.mxu0 %v14313_v19 }
 0x65c   :  { %14251 = vmatpush3.bf16.msra.mxu1 %v14328_v11 }
 0x65d   :  { %14252 = vmatprep.subr.bf16.mxu1 %v14329_v59 }
 0x65e   :  { %14231 = vmatpush3.bf16.msra.mxu0 %v14314_v56 }
 0x65f   :  { %v11556_v23 = vpop.f32.mrf.mxu1  ;;  %14232 = vmatprep.subr.bf16.mxu0 %v14315_v41 }
 0x660   :  { %v11557_v27 = vadd.f32 %v11556_v23, %v19528_v3  ;;  %14253 = vmatpush3.bf16.msra.mxu1 %v14330_v25 }
 0x661   :  { %v11558_v38 = vpop.f32.mrf.mxu1  ;;  %14254 = vmatprep.subr.bf16.mxu1 %v14331_v8  ;;  %v14145_v8 = vld [vmem:[#allocation2] ss:$0 sm:$0xff] }
 0x662   :  { %v11559_v22 = vadd.f32 %v11558_v38, %v19541_v12  ;;  %14233 = vmatpush3.bf16.msra.mxu0 %v14316_v37  ;;  %v11813_v12 = vmax.f32 %v18935_v50, 0.0  ;;  %v14332_v50 = vld [vmem:[%s19727_s5 + $0x90] sm:$0xff]  }
 0x663   :  { %v11560_v42 = vpop.f32.mrf.mxu1  ;;  %14234 = vmatprep.subr.bf16.mxu0 %v14317_v47  ;;  %v14112_v47 = vld [vmem:[%s19726_s4] ss:$0 sm:$0xff]  ;;  %s14364_s4 = smov [#allocation3]  }
 0x664   :  { %v11821_v20 = vpack.c.bf16 %v11813_v12, %v11813_v12  ;;  %14255 = vmatpush3.bf16.msra.mxu1 %v14332_v50  ;;  %s12531_s19 = sshll.u32 %s14364_s4, 4  ;;  %s12532_s19 = int_to_ptr.vmem [resolvable:$true] %s12531_s19 }
 0x665   :  { %v11561_v3 = vpop.f32.mrf.mxu1  ;;  %14256 = vmatprep.subr.bf16.mxu1 %v14333_v9  ;;  %s14340_s20 = scalar_lea.vmem %s12532_s19, 32  ;;  %p14345_p1 = scmp.lt.s32.totalorder %s12532_s19, %s12532_s19 }
 0x666   :  { %14235 = vmatpush3.bf16.msra.mxu0 %v14318_v28  ;;  %p14341_p0 = scmp.ne.s32.totalorder %s12532_s19, %s14340_s20  ;;  %p14346_p2 = scmp.lt.s32.totalorder %s14340_s20, %s14340_s20 }
 0x667   :  { %14236 = vmatprep.subr.bf16.mxu0 %v14319_v51 }
 0x668   :  { %14257 = vmatpush3.bf16.msra.mxu1 %v14334_v32  ;;  %p14347_p3 = por %p14346_p2, %p14345_p1 }
 0x669   :  { %14258 = vmatprep.subr.bf16.mxu1 %v14335_v13 }
 0x66a   :  { %14237 = vmatpush3.bf16.msra.mxu0 %v14320_v31  ;;  %p14348_p4 = pnand %p14347_p3, %p14341_p0 }
 0x66c   :  { %14259 = vmatpush3.bf16.msra.mxu1 %v14336_v15 }
 0x66d   :  { %v11597_v10 = vpop.f32.mrf.mxu0  ;;  %12464 = vmatmul.mubr.bf16.vlgmr.msra.gmra.mxu0 %v11821_v20 }
 0x66e   :  { %v11598_v30 = vadd.f32 %v11597_v10, %v11557_v27 }
 0x66f   :  { %v11599_v36 = vpop.f32.mrf.mxu0 }
 0x670   :  { %v11600_v5 = vadd.f32 %v11599_v36, %v11559_v22 }
 0x671   :  { %v11601_v40 = vpop.f32.mrf.mxu0 }
 0x673   :  { %v11602_v24 = vpop.f32.mrf.mxu0 }
 0x69f   :  { %v11638_v39 = vpop.f32.mrf.mxu1 }
 0x6a0   :  { %v11639_v17 = vadd.f32 %v11638_v39, %v11598_v30 }
 0x6a1   :  { %v11640_v62 = vpop.f32.mrf.mxu1 }
 0x6a2   :  { %v11641_v58 = vadd.f32 %v11640_v62, %v11600_v5 }
 0x6a3   :  { %v11642_v26 = vpop.f32.mrf.mxu1 }
 0x6a5   :  { %v11643_v2 = vpop.f32.mrf.mxu1 }
 0x6ad   :  { %v11679_v7 = vpop.f32.mrf.mxu0 }
 0x6ae   :  { %v11680_v53 = vadd.f32 %v11679_v7, %v11639_v17 }
 0x6af   :  { %v11681_v60 = vpop.f32.mrf.mxu0 }
 0x6b0   :  { %v11682_v48 = vadd.f32 %v11681_v60, %v11641_v58 }
 0x6b1   :  { %v11683_v61 = vpop.f32.mrf.mxu0 }
 0x6b3   :  { %v11684_v57 = vpop.f32.mrf.mxu0 }
 0x6df   :  { %v11720_v44 = vpop.f32.mrf.mxu1 }
 0x6e0   :  { %v11721_v52 = vadd.f32 %v11720_v44, %v11680_v53 }
 0x6e1   :  { %v11722_v35 = vpop.f32.mrf.mxu1 }
 0x6e2   :  { %v11723_v29 = vadd.f32 %v11722_v35, %v11682_v48 }
 0x6e3   :  { %v11724_v34 = vpop.f32.mrf.mxu1 }
 0x6e5   :  { %v11725_v4 = vpop.f32.mrf.mxu1 }
 0x6ed   :  { %v11761_v18 = vpop.f32.mrf.mxu0 }
 0x6ee   :  { %v11762_v63 = vadd.f32 %v11761_v18, %v11721_v52 }
 0x6ef   :  { %v11802_v21 = vpop.f32.mrf.mxu1  ;;  %v11763_v46 = vpop.f32.mrf.mxu0 }
 0x6f0   :  { %v11803_v54 = vadd.f32 %v11802_v21, %v11762_v63  ;;  %v11764_v33 = vadd.f32 %v11763_v46, %v11723_v29 }
 0x6f1   :  { %v11804_v43 = vpop.f32.mrf.mxu1  ;;  %v11765_v55 = vpop.f32.mrf.mxu0 }
 0x6f2   :  { %v11805_v14 = vadd.f32 %v11804_v43, %v11764_v33  ;;  %v11815_v19 = vmax.f32 %v11803_v54, 0.0 }
 0x6f3   :  { %v11806_v16 = vpop.f32.mrf.mxu1  ;;  %v11766_v56 = vpop.f32.mrf.mxu0 }
 0x6f4   :  { %v11816_v41 = vmax.f32 %v11805_v14, 0.0  ;;  %v11823_v37 = vpack.c.bf16 %v11815_v19, %v11815_v19 }
 0x6f5   :  { %v11807_v6 = vpop.f32.mrf.mxu1 }
 0x6f6   :  { %v11824_v23 = vpack.c.bf16 %v11816_v41, %v11816_v41 }
 0x6f8   :  { %12503 = vmatprep.mubr.bf16.mxu1 %v11824_v23 }
 0x6f9   :  { %12504 = vmatmul.mubr.bf16.vlgmr.msra.gmra.mxu1 %v11823_v37 }
 0x70d   :  { %v14194_v45 = vpop.f32.mrf.mxu0 }
 0x70f   :  { %v14216_v27 = vpop.f32.mrf.mxu1  ;;  %v14195_v38 = vpop.f32.mrf.mxu0 }
 0x710   :  { %v14196_v22 = vadd.f32 %v14195_v38, %v14194_v45 }
 0x711   :  { %v14217_v49 = vpop.f32.mrf.mxu1  ;;  %v14197_v42 = vpop.f32.mrf.mxu0 }
 0x712   :  { %v12123_v28 = vadd.f32 %v14196_v22, %v14112_v47  ;;  %v14218_v0 = vadd.f32 %v14217_v49, %v14216_v27 }
 0x713   :  { %v14219_v51 = vpop.f32.mrf.mxu1  ;;  %v14198_v3 = vpop.f32.mrf.mxu0 }
 0x714   :  { %v12163_v11 = vadd.f32 %v14218_v0, %v12123_v28 }
 0x715   :  { %v14220_v1 = vpop.f32.mrf.mxu1 }
 0x716   :  { %v12518_v59 = vsel %vm12517_vm1, %v12163_v11, 0.0 }
 0x717   :  { %12519 = vadd.xlane.f32.xlu0 %v12518_v59 }
 0x72d   :  { %v14238_v31 = vpop.f32.mrf.mxu0 }
 0x72f   :  { %v14239_v12 = vpop.f32.mrf.mxu0 }
 0x730   :  { %v14240_v25 = vadd.f32 %v14239_v12, %v14238_v31 }
 0x731   :  { %v14241_v20 = vpop.f32.mrf.mxu0 }
 0x732   :  { %v12466_v36 = vadd.f32 %v14240_v25, %v14145_v8 }
 0x733   :  { %v14242_v10 = vpop.f32.mrf.mxu0 }
 0x7a0   :  { %v12520_v24 = vpop.xlane.xlu0 %12519 }
 0x7a1   :  { %v12522_v15 = vmul.f32 0.11111111, %v12520_v24 }
 0x7b9   :  { %v14260_v30 = vpop.f32.mrf.mxu1 }
 0x7bb   :  { %v14261_v50 = vpop.f32.mrf.mxu1 }
 0x7bc   :  { %v14262_v5 = vadd.f32 %v14261_v50, %v14260_v30 }
 0x7bd   :  { %v14263_v40 = vpop.f32.mrf.mxu1 }
 0x7be   :  { %v12506_v9 = vadd.f32 %v14262_v5, %v12466_v36 }
 0x7bf   :  { %v14264_v32 = vpop.f32.mrf.mxu1 }
 0x7c0   :  { %12513 = vperm.xlu0 %14269, %v12506_v9  }
 0x83b   :  { %v12514_v13 = vpop.permute.xlu0 %12513 }
 0x83c   :  { %v12516_v39 = vadd.f32 %v12514_v13, %v12163_v11 }
 0x83e   :  { %v12523_v17 = vsub.f32 %v12516_v39, %v12522_v15 }
 0x840   :  { %12524 = vst.msk [vmem:[#allocation3] sm:$0x3] %vm12517_vm1, %v12523_v17 }
 0x841   :  { %14351 = shalt.err (!%p14348_p4)
}
 0x842   :  { %12534 = dma.vmem_to_hbm [thread:$0]  %s12532_s19, 32, %s19729_s7, [#allocation4]  }
 0x843   :  { %14360 = dma.done.wait [#allocation4], 32  }
 0x844   :  { %14361 = vsyncadd [#allocation4], 4294967264 }
 0x845   :  { %12538 = vsyncpa [#allocation4], 1 }

</bundles_post_ra>
